<compile_context>
chip_gen: v6e
topology: v6e:2x2x1
jax: 0.10.0
libtpu: 0.0.40
codegen_flags: <defaults>
</compile_context>

<pallas_src>
import functools

import jax
import jax.numpy as jnp
from jax.experimental import pallas as pl
from jax.experimental.pallas import tpu as pltpu


# ----------------------------------------------------------------------------- helpers
def _round_up(x, m):
    return ((x + m - 1) // m) * m


# ----------------------------------------------------------------------------- fused Pallas kernel
def _fused_conv_bn_kernel(*refs, m_true, eps, relu, has_residual, has_head):
    """Fused: conv-as-matmul -> BatchNorm (batch stats in-kernel) -> (+residual) -> (ReLU)
    -> (avgpool + FC head).

    Ref order:
      a (Mp, Kp) bf16, w (Kp, C) bf16, gamma (1, C) f32, beta (1, C) f32,
      [residual (Mp, C) f32],
      [pool (N, Mp) f32, fc_w (C, ncls) f32, fc_b (1, ncls) f32],
      out  ((Mp, C) f32  or  (N, ncls) f32 when has_head)
    """
    idx = 0
    a_ref = refs[idx]; idx += 1
    w_ref = refs[idx]; idx += 1
    g_ref = refs[idx]; idx += 1
    b_ref = refs[idx]; idx += 1
    r_ref = None
    if has_residual:
        r_ref = refs[idx]; idx += 1
    if has_head:
        p_ref = refs[idx]; idx += 1
        fcw_ref = refs[idx]; idx += 1
        fcb_ref = refs[idx]; idx += 1
    o_ref = refs[idx]

    # Conv as a single MXU matmul: bf16 operands, f32 accumulation.
    acc = jnp.dot(a_ref[...], w_ref[...], preferred_element_type=jnp.float32)  # (Mp, C)
    mp = acc.shape[0]

    # Training-mode BatchNorm2d statistics (biased variance) over the true M = N*Ho*Wo rows.
    # Padded rows (if any) are masked out so they never pollute the batch mean/var.
    if mp == m_true:
        row_valid = None
        acc_v = acc
    else:
        rows = jax.lax.broadcasted_iota(jnp.int32, acc.shape, 0)
        row_valid = rows < m_true
        acc_v = jnp.where(row_valid, acc, 0.0)
    inv_m = jnp.float32(1.0 / m_true)
    mean = jnp.sum(acc_v, axis=0, keepdims=True) * inv_m                      # (1, C)
    cent = acc - mean
    if row_valid is not None:
        cent = jnp.where(row_valid, cent, 0.0)
    var = jnp.sum(cent * cent, axis=0, keepdims=True) * inv_m                 # (1, C), biased
    scale = g_ref[...] * jax.lax.rsqrt(var + eps)
    bias = b_ref[...] - mean * scale

    y = acc * scale + bias
    if has_residual:
        y = y + r_ref[...]
    if relu:
        y = jnp.maximum(y, 0.0)

    if has_head:
        # Adaptive avg-pool to (1,1) expressed as a small pooling matmul (avoids an in-kernel
        # reshape), followed by the FC layer — fused into this last conv's epilogue.
        pooled = jnp.dot(p_ref[...], y, preferred_element_type=jnp.float32)   # (N, C)
        logits = jnp.dot(pooled, fcw_ref[...], preferred_element_type=jnp.float32)
        o_ref[...] = logits + fcb_ref[...]
    else:
        o_ref[...] = y


def fused_conv_bn(patches, wmat, gamma, beta, *, residual=None, relu=True, head=None, eps=1e-5):
    """patches: (M, K), wmat: (K, C).  Returns (M, C) activation, or (N, ncls) logits if head.

    head = (pool_mat (N, M), fc_w (C, ncls), fc_b (ncls,)) fuses avgpool + FC into the epilogue.
    """
    M, K = patches.shape
    C = wmat.shape[1]
    Mp = _round_up(M, 16)      # bf16 sublane packing
    Kp = _round_up(K, 16)

    a = jnp.pad(patches.astype(jnp.bfloat16), ((0, Mp - M), (0, Kp - K)))
    w = jnp.pad(wmat.astype(jnp.bfloat16), ((0, Kp - K), (0, 0)))
    g = gamma.reshape(1, C).astype(jnp.float32)
    b = beta.reshape(1, C).astype(jnp.float32)

    args = [a, w, g, b]
    in_specs = [
        pl.BlockSpec((Mp, Kp), lambda i: (0, 0)),
        pl.BlockSpec((Kp, C), lambda i: (0, 0)),
        pl.BlockSpec((1, C), lambda i: (0, 0)),
        pl.BlockSpec((1, C), lambda i: (0, 0)),
    ]
    if residual is not None:
        r = jnp.pad(residual.astype(jnp.float32), ((0, Mp - M), (0, 0)))
        args.append(r)
        in_specs.append(pl.BlockSpec((Mp, C), lambda i: (0, 0)))
    if head is not None:
        pool_mat, fcw, fcb = head
        N, ncls = pool_mat.shape[0], fcw.shape[1]
        pool_p = jnp.pad(pool_mat.astype(jnp.float32), ((0, 0), (0, Mp - M)))
        args += [pool_p, fcw.astype(jnp.float32), fcb.reshape(1, ncls).astype(jnp.float32)]
        in_specs += [
            pl.BlockSpec((N, Mp), lambda i: (0, 0)),
            pl.BlockSpec((C, ncls), lambda i: (0, 0)),
            pl.BlockSpec((1, ncls), lambda i: (0, 0)),
        ]
        out_shape = jax.ShapeDtypeStruct((N, ncls), jnp.float32)
        out_spec = pl.BlockSpec((N, ncls), lambda i: (0, 0))
    else:
        out_shape = jax.ShapeDtypeStruct((Mp, C), jnp.float32)
        out_spec = pl.BlockSpec((Mp, C), lambda i: (0, 0))

    kernel = functools.partial(
        _fused_conv_bn_kernel, m_true=M, eps=eps, relu=relu,
        has_residual=residual is not None, has_head=head is not None)

    out = pl.pallas_call(
        kernel,
        out_shape=out_shape,
        grid=(1,),
        in_specs=in_specs,
        out_specs=out_spec,
        compiler_params=pltpu.CompilerParams(dimension_semantics=("arbitrary",)),
    )(*args)

    if head is None and Mp != M:
        out = out[:M]
    return out


# ----------------------------------------------------------------------------- conv glue (XLA side)
def _im2col(x, kh, kw, stride, pad):
    """x: (N, H, W, C) -> patches (N*Ho*Wo, kh*kw*C), plus (Ho, Wo)."""
    N, H, W, C = x.shape
    xp = jnp.pad(x, ((0, 0), (pad, pad), (pad, pad), (0, 0)))
    Ho = (H + 2 * pad - kh) // stride + 1
    Wo = (W + 2 * pad - kw) // stride + 1
    cols = []
    for i in range(kh):
        for j in range(kw):
            cols.append(xp[:, i:i + Ho * stride:stride, j:j + Wo * stride:stride, :])
    patches = jnp.stack(cols, axis=3)                     # (N, Ho, Wo, kh*kw, C)
    return patches.reshape(N * Ho * Wo, kh * kw * C), Ho, Wo


def conv_im2col(x_nhwc, w_oihw, stride, pad):
    """Prepare (patches, weight-matrix) for a PyTorch-semantics Conv2d (no bias)."""
    Cout, Cin, KH, KW = w_oihw.shape
    patches, Ho, Wo = _im2col(x_nhwc, KH, KW, stride, pad)
    wmat = jnp.transpose(w_oihw, (2, 3, 1, 0)).reshape(KH * KW * Cin, Cout)
    return patches, wmat, Ho, Wo


# ----------------------------------------------------------------------------- ResNet (BasicBlock, expansion=1)
def basic_block_forward(x_nhwc, blk, stride, fc=None):
    N, H, W, Cin = x_nhwc.shape

    # conv1 -> bn1 -> relu  (one fused kernel)
    p1, w1, Ho, Wo = conv_im2col(x_nhwc, blk["conv1_w"], stride, 1)
    out1 = fused_conv_bn(p1, w1, blk["bn1_g"], blk["bn1_b"], relu=True)
    out1_nhwc = out1.reshape(N, Ho, Wo, -1)

    # identity / downsample branch
    if "down_w" in blk:
        pd, wd, _, _ = conv_im2col(x_nhwc, blk["down_w"], stride, 0)
        residual = fused_conv_bn(pd, wd, blk["down_bn_g"], blk["down_bn_b"], relu=False)
    else:
        residual = x_nhwc.reshape(N * H * W, Cin)

    # conv2 -> bn2 -> +residual -> relu (-> avgpool -> fc)  (one fused kernel)
    p2, w2, Ho2, Wo2 = conv_im2col(out1_nhwc, blk["conv2_w"], 1, 1)

    head = None
    if fc is not None:
        fc_w, fc_b = fc
        hw = Ho2 * Wo2
        M2 = N * hw
        sample_id = jnp.arange(M2) // hw
        pool_mat = (sample_id[None, :] == jnp.arange(N)[:, None]).astype(jnp.float32) / hw
        head = (pool_mat, fc_w.T, fc_b)

    out2 = fused_conv_bn(p2, w2, blk["bn2_g"], blk["bn2_b"],
                         residual=residual, relu=True, head=head)
    if head is not None:
        return out2                                  # (N, num_classes) logits
    return out2.reshape(N, Ho2, Wo2, -1)


def resnet_forward(params, x_nchw, cfg):
    x = jnp.transpose(x_nchw.astype(jnp.float32), (0, 2, 3, 1))   # NCHW -> NHWC
    N = x.shape[0]

    # stem: conv1 (3x3 s1 p1) -> bn1 -> relu  (one fused kernel)
    p, w, Ho, Wo = conv_im2col(x, params["conv1_w"], 1, 1)
    x = fused_conv_bn(p, w, params["bn1_g"], params["bn1_b"], relu=True).reshape(N, Ho, Wo, -1)

    blocks = []
    for stage in ("layer1", "layer2", "layer3"):
        for blk, s in zip(params[stage], cfg[stage]):
            blocks.append((blk, s))

    for i, (blk, s) in enumerate(blocks):
        fc = (params["fc_w"], params["fc_b"]) if i == len(blocks) - 1 else None
        x = basic_block_forward(x, blk, s, fc=fc)
    return x                                                       # logits (avgpool+fc fused in)


# ----------------------------------------------------------------------------- parameter init
def init_params(key, num_classes=10, layers=(1, 1, 1)):
    keys = iter(jax.random.split(key, 64))

    def conv_init(cout, cin, kh, kw):
        std = (2.0 / (cout * kh * kw)) ** 0.5                      # kaiming_normal, fan_out, relu
        return jax.random.normal(next(keys), (cout, cin, kh, kw), jnp.float32) * std

    params = {
        "conv1_w": conv_init(16, 3, 3, 3),
        "bn1_g": jnp.ones((16,), jnp.float32),
        "bn1_b": jnp.zeros((16,), jnp.float32),
    }
    cfg = {}                                                       # static per-block strides

    in_ch = 16
    stage_cfg = [("layer1", 16, layers[0], 1),
                 ("layer2", 32, layers[1], 2),
                 ("layer3", 64, layers[2], 2)]
    for name, out_ch, n_blocks, stride in stage_cfg:
        blocks, strides = [], []
        for bi in range(n_blocks):
            s = stride if bi == 0 else 1
            blk = {
                "conv1_w": conv_init(out_ch, in_ch, 3, 3),
                "bn1_g": jnp.ones((out_ch,), jnp.float32),
                "bn1_b": jnp.zeros((out_ch,), jnp.float32),
                "conv2_w": conv_init(out_ch, out_ch, 3, 3),
                "bn2_g": jnp.ones((out_ch,), jnp.float32),
                "bn2_b": jnp.zeros((out_ch,), jnp.float32),
            }
            if s != 1 or in_ch != out_ch:
                blk["down_w"] = conv_init(out_ch, in_ch, 1, 1)
                blk["down_bn_g"] = jnp.ones((out_ch,), jnp.float32)
                blk["down_bn_b"] = jnp.zeros((out_ch,), jnp.float32)
            blocks.append(blk)
            strides.append(s)
            in_ch = out_ch
        params[name] = blocks
        cfg[name] = tuple(strides)

    bound = 1.0 / (64 ** 0.5)                                      # PyTorch default Linear init
    params["fc_w"] = jax.random.uniform(next(keys), (num_classes, 64), jnp.float32,
                                        minval=-bound, maxval=bound)
    params["fc_b"] = jax.random.uniform(next(keys), (num_classes,), jnp.float32,
                                        minval=-bound, maxval=bound)
    return params, cfg


# ----------------------------------------------------------------------------- main
if __name__ == "__main__":
    root = jax.random.PRNGKey(0)
    k_params, k_x = jax.random.split(root)

    params, cfg = init_params(k_params)
    x = jax.random.normal(k_x, (2, 3, 16, 16), jnp.float32)        # NCHW, CIFAR-like small input

    fwd = jax.jit(functools.partial(resnet_forward, cfg=cfg))
    logits = fwd(params, x)
    logits = jax.block_until_ready(logits)

    assert logits.shape == (2, 10), logits.shape
    assert bool(jnp.all(jnp.isfinite(logits)))
    print("KERNEL_OK")
</pallas_src>

<mosaic_0001>
module attributes {stable_mosaic.version = 11 : i64} {
  func.func @_fused_conv_bn_kernel(%arg0: i32, %arg1: memref<512x32xbf16, #tpu.memory_space<vmem>>, %arg2: memref<32x16xbf16, #tpu.memory_space<vmem>>, %arg3: memref<1x16xf32, #tpu.memory_space<vmem>>, %arg4: memref<1x16xf32, #tpu.memory_space<vmem>>, %arg5: memref<512x16xf32, #tpu.memory_space<vmem>>) attributes {dimension_semantics = [#tpu.dimension_semantics<arbitrary>], iteration_bounds = array<i64: 1>, scalar_prefetch = 0 : i64, scratch_operands = 0 : i64, tpu.core_type = #tpu.core_type<tc>, window_params = [{pipeline_mode = #tpu.pipeline_mode<synchronous>, transform_indices = @transform_0, window_bounds = array<i64: 512, 32>}, {pipeline_mode = #tpu.pipeline_mode<synchronous>, transform_indices = @transform_1, window_bounds = array<i64: 32, 16>}, {pipeline_mode = #tpu.pipeline_mode<synchronous>, transform_indices = @transform_2, window_bounds = array<i64: 1, 16>}, {pipeline_mode = #tpu.pipeline_mode<synchronous>, transform_indices = @transform_3, window_bounds = array<i64: 1, 16>}, {pipeline_mode = #tpu.pipeline_mode<synchronous>, transform_indices = @transform_4, window_bounds = array<i64: 512, 16>}]} {
    %c0 = arith.constant 0 : index
    %c0_0 = arith.constant 0 : index
    %0 = vector.load %arg1[%c0, %c0_0] : memref<512x32xbf16, #tpu.memory_space<vmem>>, vector<512x32xbf16>
    %c0_1 = arith.constant 0 : index
    %c0_2 = arith.constant 0 : index
    %1 = vector.load %arg2[%c0_1, %c0_2] : memref<32x16xbf16, #tpu.memory_space<vmem>>, vector<32x16xbf16>
    %cst = arith.constant dense<0.000000e+00> : vector<512x16xf32>
    %2 = tpu.matmul %0, %1, %cst {dimension_numbers = #tpu.dot_dimension_numbers<[1], [0], [0], [1], [0, 0, 1, 1], [], []>} : vector<512x32xbf16>, vector<32x16xbf16>, vector<512x16xf32> -> vector<512x16xf32>
    %cst_3 = arith.constant dense<0.000000e+00> : vector<16xf32>
    %3 = vector.multi_reduction <add>, %2, %cst_3 [0] : vector<512x16xf32> to vector<16xf32>
    %4 = vector.shape_cast %3 : vector<16xf32> to vector<1x16xf32>
    %cst_4 = arith.constant 0.001953125 : f32
    %5 = vector.broadcast %cst_4 : f32 to vector<1x16xf32>
    %6 = arith.mulf %4, %5 : vector<1x16xf32>
    %7 = vector.broadcast %6 : vector<1x16xf32> to vector<512x16xf32>
    %8 = arith.subf %2, %7 : vector<512x16xf32>
    %9 = arith.mulf %8, %8 : vector<512x16xf32>
    %cst_5 = arith.constant dense<0.000000e+00> : vector<16xf32>
    %10 = vector.multi_reduction <add>, %9, %cst_5 [0] : vector<512x16xf32> to vector<16xf32>
    %11 = vector.shape_cast %10 : vector<16xf32> to vector<1x16xf32>
    %cst_6 = arith.constant 0.001953125 : f32
    %12 = vector.broadcast %cst_6 : f32 to vector<1x16xf32>
    %13 = arith.mulf %11, %12 : vector<1x16xf32>
    %c0_7 = arith.constant 0 : index
    %c0_8 = arith.constant 0 : index
    %14 = vector.load %arg3[%c0_7, %c0_8] : memref<1x16xf32, #tpu.memory_space<vmem>>, vector<1x16xf32>
    %cst_9 = arith.constant 9.99999974E-6 : f32
    %15 = vector.broadcast %cst_9 : f32 to vector<1x16xf32>
    %16 = arith.addf %13, %15 : vector<1x16xf32>
    %17 = math.rsqrt %16 : vector<1x16xf32>
    %18 = arith.mulf %14, %17 : vector<1x16xf32>
    %c0_10 = arith.constant 0 : index
    %c0_11 = arith.constant 0 : index
    %19 = vector.load %arg4[%c0_10, %c0_11] : memref<1x16xf32, #tpu.memory_space<vmem>>, vector<1x16xf32>
    %20 = arith.mulf %6, %18 : vector<1x16xf32>
    %21 = arith.subf %19, %20 : vector<1x16xf32>
    %22 = vector.broadcast %18 : vector<1x16xf32> to vector<512x16xf32>
    %23 = arith.mulf %2, %22 : vector<512x16xf32>
    %24 = vector.broadcast %21 : vector<1x16xf32> to vector<512x16xf32>
    %25 = arith.addf %23, %24 : vector<512x16xf32>
    %cst_12 = arith.constant 0.000000e+00 : f32
    %26 = vector.broadcast %cst_12 : f32 to vector<512x16xf32>
    %27 = arith.maximumf %25, %26 : vector<512x16xf32>
    %c0_13 = arith.constant 0 : index
    %c0_14 = arith.constant 0 : index
    %28 = vector.load %arg5[%c0_13, %c0_14] : memref<512x16xf32, #tpu.memory_space<vmem>>, vector<512x16xf32>
    tpu.vector_store %arg5[%c0_13, %c0_14], %27 {strides = array<i32>} : memref<512x16xf32, #tpu.memory_space<vmem>>, vector<512x16xf32>,
    return
  }
  func.func @transform_0(%arg0: i32) -> (i32, i32) {
    %c0_i32 = arith.constant 0 : i32
    %c0_i32_0 = arith.constant 0 : i32
    %c0_i32_1 = arith.constant 0 : i32
    return %c0_i32, %c0_i32_0 : i32, i32
  }
  func.func @transform_1(%arg0: i32) -> (i32, i32) {
    %c0_i32 = arith.constant 0 : i32
    %c0_i32_0 = arith.constant 0 : i32
    %c0_i32_1 = arith.constant 0 : i32
    return %c0_i32, %c0_i32_0 : i32, i32
  }
  func.func @transform_2(%arg0: i32) -> (i32, i32) {
    %c0_i32 = arith.constant 0 : i32
    %c0_i32_0 = arith.constant 0 : i32
    %c0_i32_1 = arith.constant 0 : i32
    return %c0_i32, %c0_i32_0 : i32, i32
  }
  func.func @transform_3(%arg0: i32) -> (i32, i32) {
    %c0_i32 = arith.constant 0 : i32
    %c0_i32_0 = arith.constant 0 : i32
    %c0_i32_1 = arith.constant 0 : i32
    return %c0_i32, %c0_i32_0 : i32, i32
  }
  func.func @transform_4(%arg0: i32) -> (i32, i32) {
    %c0_i32 = arith.constant 0 : i32
    %c0_i32_0 = arith.constant 0 : i32
    %c0_i32_1 = arith.constant 0 : i32
    return %c0_i32, %c0_i32_0 : i32, i32
  }
}

module attributes {stable_mosaic.version = 11 : i64} {
  func.func @_fused_conv_bn_kernel(%arg0: i32, %arg1: memref<512x144xbf16, #tpu.memory_space<vmem>>, %arg2: memref<144x16xbf16, #tpu.memory_space<vmem>>, %arg3: memref<1x16xf32, #tpu.memory_space<vmem>>, %arg4: memref<1x16xf32, #tpu.memory_space<vmem>>, %arg5: memref<512x16xf32, #tpu.memory_space<vmem>>) attributes {dimension_semantics = [#tpu.dimension_semantics<arbitrary>], iteration_bounds = array<i64: 1>, scalar_prefetch = 0 : i64, scratch_operands = 0 : i64, tpu.core_type = #tpu.core_type<tc>, window_params = [{pipeline_mode = #tpu.pipeline_mode<synchronous>, transform_indices = @transform_0, window_bounds = array<i64: 512, 144>}, {pipeline_mode = #tpu.pipeline_mode<synchronous>, transform_indices = @transform_1, window_bounds = array<i64: 144, 16>}, {pipeline_mode = #tpu.pipeline_mode<synchronous>, transform_indices = @transform_2, window_bounds = array<i64: 1, 16>}, {pipeline_mode = #tpu.pipeline_mode<synchronous>, transform_indices = @transform_3, window_bounds = array<i64: 1, 16>}, {pipeline_mode = #tpu.pipeline_mode<synchronous>, transform_indices = @transform_4, window_bounds = array<i64: 512, 16>}]} {
    %c0 = arith.constant 0 : index
    %c0_0 = arith.constant 0 : index
    %0 = vector.load %arg1[%c0, %c0_0] : memref<512x144xbf16, #tpu.memory_space<vmem>>, vector<512x144xbf16>
    %c0_1 = arith.constant 0 : index
    %c0_2 = arith.constant 0 : index
    %1 = vector.load %arg2[%c0_1, %c0_2] : memref<144x16xbf16, #tpu.memory_space<vmem>>, vector<144x16xbf16>
    %cst = arith.constant dense<0.000000e+00> : vector<512x16xf32>
    %2 = tpu.matmul %0, %1, %cst {dimension_numbers = #tpu.dot_dimension_numbers<[1], [0], [0], [1], [0, 0, 1, 1], [], []>} : vector<512x144xbf16>, vector<144x16xbf16>, vector<512x16xf32> -> vector<512x16xf32>
    %cst_3 = arith.constant dense<0.000000e+00> : vector<16xf32>
    %3 = vector.multi_reduction <add>, %2, %cst_3 [0] : vector<512x16xf32> to vector<16xf32>
    %4 = vector.shape_cast %3 : vector<16xf32> to vector<1x16xf32>
    %cst_4 = arith.constant 0.001953125 : f32
    %5 = vector.broadcast %cst_4 : f32 to vector<1x16xf32>
    %6 = arith.mulf %4, %5 : vector<1x16xf32>
    %7 = vector.broadcast %6 : vector<1x16xf32> to vector<512x16xf32>
    %8 = arith.subf %2, %7 : vector<512x16xf32>
    %9 = arith.mulf %8, %8 : vector<512x16xf32>
    %cst_5 = arith.constant dense<0.000000e+00> : vector<16xf32>
    %10 = vector.multi_reduction <add>, %9, %cst_5 [0] : vector<512x16xf32> to vector<16xf32>
    %11 = vector.shape_cast %10 : vector<16xf32> to vector<1x16xf32>
    %cst_6 = arith.constant 0.001953125 : f32
    %12 = vector.broadcast %cst_6 : f32 to vector<1x16xf32>
    %13 = arith.mulf %11, %12 : vector<1x16xf32>
    %c0_7 = arith.constant 0 : index
    %c0_8 = arith.constant 0 : index
    %14 = vector.load %arg3[%c0_7, %c0_8] : memref<1x16xf32, #tpu.memory_space<vmem>>, vector<1x16xf32>
    %cst_9 = arith.constant 9.99999974E-6 : f32
    %15 = vector.broadcast %cst_9 : f32 to vector<1x16xf32>
    %16 = arith.addf %13, %15 : vector<1x16xf32>
    %17 = math.rsqrt %16 : vector<1x16xf32>
    %18 = arith.mulf %14, %17 : vector<1x16xf32>
    %c0_10 = arith.constant 0 : index
    %c0_11 = arith.constant 0 : index
    %19 = vector.load %arg4[%c0_10, %c0_11] : memref<1x16xf32, #tpu.memory_space<vmem>>, vector<1x16xf32>
    %20 = arith.mulf %6, %18 : vector<1x16xf32>
    %21 = arith.subf %19, %20 : vector<1x16xf32>
    %22 = vector.broadcast %18 : vector<1x16xf32> to vector<512x16xf32>
    %23 = arith.mulf %2, %22 : vector<512x16xf32>
    %24 = vector.broadcast %21 : vector<1x16xf32> to vector<512x16xf32>
    %25 = arith.addf %23, %24 : vector<512x16xf32>
    %cst_12 = arith.constant 0.000000e+00 : f32
    %26 = vector.broadcast %cst_12 : f32 to vector<512x16xf32>
    %27 = arith.maximumf %25, %26 : vector<512x16xf32>
    %c0_13 = arith.constant 0 : index
    %c0_14 = arith.constant 0 : index
    %28 = vector.load %arg5[%c0_13, %c0_14] : memref<512x16xf32, #tpu.memory_space<vmem>>, vector<512x16xf32>
    tpu.vector_store %arg5[%c0_13, %c0_14], %27 {strides = array<i32>} : memref<512x16xf32, #tpu.memory_space<vmem>>, vector<512x16xf32>,
    return
  }
  func.func @transform_0(%arg0: i32) -> (i32, i32) {
    %c0_i32 = arith.constant 0 : i32
    %c0_i32_0 = arith.constant 0 : i32
    %c0_i32_1 = arith.constant 0 : i32
    return %c0_i32, %c0_i32_0 : i32, i32
  }
  func.func @transform_1(%arg0: i32) -> (i32, i32) {
    %c0_i32 = arith.constant 0 : i32
    %c0_i32_0 = arith.constant 0 : i32
    %c0_i32_1 = arith.constant 0 : i32
    return %c0_i32, %c0_i32_0 : i32, i32
  }
  func.func @transform_2(%arg0: i32) -> (i32, i32) {
    %c0_i32 = arith.constant 0 : i32
    %c0_i32_0 = arith.constant 0 : i32
    %c0_i32_1 = arith.constant 0 : i32
    return %c0_i32, %c0_i32_0 : i32, i32
  }
  func.func @transform_3(%arg0: i32) -> (i32, i32) {
    %c0_i32 = arith.constant 0 : i32
    %c0_i32_0 = arith.constant 0 : i32
    %c0_i32_1 = arith.constant 0 : i32
    return %c0_i32, %c0_i32_0 : i32, i32
  }
  func.func @transform_4(%arg0: i32) -> (i32, i32) {
    %c0_i32 = arith.constant 0 : i32
    %c0_i32_0 = arith.constant 0 : i32
    %c0_i32_1 = arith.constant 0 : i32
    return %c0_i32, %c0_i32_0 : i32, i32
  }
}

module attributes {stable_mosaic.version = 11 : i64} {
  func.func @_fused_conv_bn_kernel(%arg0: i32, %arg1: memref<512x144xbf16, #tpu.memory_space<vmem>>, %arg2: memref<144x16xbf16, #tpu.memory_space<vmem>>, %arg3: memref<1x16xf32, #tpu.memory_space<vmem>>, %arg4: memref<1x16xf32, #tpu.memory_space<vmem>>, %arg5: memref<512x16xf32, #tpu.memory_space<vmem>>, %arg6: memref<512x16xf32, #tpu.memory_space<vmem>>) attributes {dimension_semantics = [#tpu.dimension_semantics<arbitrary>], iteration_bounds = array<i64: 1>, scalar_prefetch = 0 : i64, scratch_operands = 0 : i64, tpu.core_type = #tpu.core_type<tc>, window_params = [{pipeline_mode = #tpu.pipeline_mode<synchronous>, transform_indices = @transform_0, window_bounds = array<i64: 512, 144>}, {pipeline_mode = #tpu.pipeline_mode<synchronous>, transform_indices = @transform_1, window_bounds = array<i64: 144, 16>}, {pipeline_mode = #tpu.pipeline_mode<synchronous>, transform_indices = @transform_2, window_bounds = array<i64: 1, 16>}, {pipeline_mode = #tpu.pipeline_mode<synchronous>, transform_indices = @transform_3, window_bounds = array<i64: 1, 16>}, {pipeline_mode = #tpu.pipeline_mode<synchronous>, transform_indices = @transform_4, window_bounds = array<i64: 512, 16>}, {pipeline_mode = #tpu.pipeline_mode<synchronous>, transform_indices = @transform_5, window_bounds = array<i64: 512, 16>}]} {
    %c0 = arith.constant 0 : index
    %c0_0 = arith.constant 0 : index
    %0 = vector.load %arg1[%c0, %c0_0] : memref<512x144xbf16, #tpu.memory_space<vmem>>, vector<512x144xbf16>
    %c0_1 = arith.constant 0 : index
    %c0_2 = arith.constant 0 : index
    %1 = vector.load %arg2[%c0_1, %c0_2] : memref<144x16xbf16, #tpu.memory_space<vmem>>, vector<144x16xbf16>
    %cst = arith.constant dense<0.000000e+00> : vector<512x16xf32>
    %2 = tpu.matmul %0, %1, %cst {dimension_numbers = #tpu.dot_dimension_numbers<[1], [0], [0], [1], [0, 0, 1, 1], [], []>} : vector<512x144xbf16>, vector<144x16xbf16>, vector<512x16xf32> -> vector<512x16xf32>
    %cst_3 = arith.constant dense<0.000000e+00> : vector<16xf32>
    %3 = vector.multi_reduction <add>, %2, %cst_3 [0] : vector<512x16xf32> to vector<16xf32>
    %4 = vector.shape_cast %3 : vector<16xf32> to vector<1x16xf32>
    %cst_4 = arith.constant 0.001953125 : f32
    %5 = vector.broadcast %cst_4 : f32 to vector<1x16xf32>
    %6 = arith.mulf %4, %5 : vector<1x16xf32>
    %7 = vector.broadcast %6 : vector<1x16xf32> to vector<512x16xf32>
    %8 = arith.subf %2, %7 : vector<512x16xf32>
    %9 = arith.mulf %8, %8 : vector<512x16xf32>
    %cst_5 = arith.constant dense<0.000000e+00> : vector<16xf32>
    %10 = vector.multi_reduction <add>, %9, %cst_5 [0] : vector<512x16xf32> to vector<16xf32>
    %11 = vector.shape_cast %10 : vector<16xf32> to vector<1x16xf32>
    %cst_6 = arith.constant 0.001953125 : f32
    %12 = vector.broadcast %cst_6 : f32 to vector<1x16xf32>
    %13 = arith.mulf %11, %12 : vector<1x16xf32>
    %c0_7 = arith.constant 0 : index
    %c0_8 = arith.constant 0 : index
    %14 = vector.load %arg3[%c0_7, %c0_8] : memref<1x16xf32, #tpu.memory_space<vmem>>, vector<1x16xf32>
    %cst_9 = arith.constant 9.99999974E-6 : f32
    %15 = vector.broadcast %cst_9 : f32 to vector<1x16xf32>
    %16 = arith.addf %13, %15 : vector<1x16xf32>
    %17 = math.rsqrt %16 : vector<1x16xf32>
    %18 = arith.mulf %14, %17 : vector<1x16xf32>
    %c0_10 = arith.constant 0 : index
    %c0_11 = arith.constant 0 : index
    %19 = vector.load %arg4[%c0_10, %c0_11] : memref<1x16xf32, #tpu.memory_space<vmem>>, vector<1x16xf32>
    %20 = arith.mulf %6, %18 : vector<1x16xf32>
    %21 = arith.subf %19, %20 : vector<1x16xf32>
    %22 = vector.broadcast %18 : vector<1x16xf32> to vector<512x16xf32>
    %23 = arith.mulf %2, %22 : vector<512x16xf32>
    %24 = vector.broadcast %21 : vector<1x16xf32> to vector<512x16xf32>
    %25 = arith.addf %23, %24 : vector<512x16xf32>
    %c0_12 = arith.constant 0 : index
    %c0_13 = arith.constant 0 : index
    %26 = vector.load %arg5[%c0_12, %c0_13] : memref<512x16xf32, #tpu.memory_space<vmem>>, vector<512x16xf32>
    %27 = arith.addf %25, %26 : vector<512x16xf32>
    %cst_14 = arith.constant 0.000000e+00 : f32
    %28 = vector.broadcast %cst_14 : f32 to vector<512x16xf32>
    %29 = arith.maximumf %27, %28 : vector<512x16xf32>
    %c0_15 = arith.constant 0 : index
    %c0_16 = arith.constant 0 : index
    %30 = vector.load %arg6[%c0_15, %c0_16] : memref<512x16xf32, #tpu.memory_space<vmem>>, vector<512x16xf32>
    tpu.vector_store %arg6[%c0_15, %c0_16], %29 {strides = array<i32>} : memref<512x16xf32, #tpu.memory_space<vmem>>, vector<512x16xf32>,
    return
  }
  func.func @transform_0(%arg0: i32) -> (i32, i32) {
    %c0_i32 = arith.constant 0 : i32
    %c0_i32_0 = arith.constant 0 : i32
    %c0_i32_1 = arith.constant 0 : i32
    return %c0_i32, %c0_i32_0 : i32, i32
  }
  func.func @transform_1(%arg0: i32) -> (i32, i32) {
    %c0_i32 = arith.constant 0 : i32
    %c0_i32_0 = arith.constant 0 : i32
    %c0_i32_1 = arith.constant 0 : i32
    return %c0_i32, %c0_i32_0 : i32, i32
  }
  func.func @transform_2(%arg0: i32) -> (i32, i32) {
    %c0_i32 = arith.constant 0 : i32
    %c0_i32_0 = arith.constant 0 : i32
    %c0_i32_1 = arith.constant 0 : i32
    return %c0_i32, %c0_i32_0 : i32, i32
  }
  func.func @transform_3(%arg0: i32) -> (i32, i32) {
    %c0_i32 = arith.constant 0 : i32
    %c0_i32_0 = arith.constant 0 : i32
    %c0_i32_1 = arith.constant 0 : i32
    return %c0_i32, %c0_i32_0 : i32, i32
  }
  func.func @transform_4(%arg0: i32) -> (i32, i32) {
    %c0_i32 = arith.constant 0 : i32
    %c0_i32_0 = arith.constant 0 : i32
    %c0_i32_1 = arith.constant 0 : i32
    return %c0_i32, %c0_i32_0 : i32, i32
  }
  func.func @transform_5(%arg0: i32) -> (i32, i32) {
    %c0_i32 = arith.constant 0 : i32
    %c0_i32_0 = arith.constant 0 : i32
    %c0_i32_1 = arith.constant 0 : i32
    return %c0_i32, %c0_i32_0 : i32, i32
  }
}

module attributes {stable_mosaic.version = 11 : i64} {
  func.func @_fused_conv_bn_kernel(%arg0: i32, %arg1: memref<128x144xbf16, #tpu.memory_space<vmem>>, %arg2: memref<144x32xbf16, #tpu.memory_space<vmem>>, %arg3: memref<1x32xf32, #tpu.memory_space<vmem>>, %arg4: memref<1x32xf32, #tpu.memory_space<vmem>>, %arg5: memref<128x32xf32, #tpu.memory_space<vmem>>) attributes {dimension_semantics = [#tpu.dimension_semantics<arbitrary>], iteration_bounds = array<i64: 1>, scalar_prefetch = 0 : i64, scratch_operands = 0 : i64, tpu.core_type = #tpu.core_type<tc>, window_params = [{pipeline_mode = #tpu.pipeline_mode<synchronous>, transform_indices = @transform_0, window_bounds = array<i64: 128, 144>}, {pipeline_mode = #tpu.pipeline_mode<synchronous>, transform_indices = @transform_1, window_bounds = array<i64: 144, 32>}, {pipeline_mode = #tpu.pipeline_mode<synchronous>, transform_indices = @transform_2, window_bounds = array<i64: 1, 32>}, {pipeline_mode = #tpu.pipeline_mode<synchronous>, transform_indices = @transform_3, window_bounds = array<i64: 1, 32>}, {pipeline_mode = #tpu.pipeline_mode<synchronous>, transform_indices = @transform_4, window_bounds = array<i64: 128, 32>}]} {
    %c0 = arith.constant 0 : index
    %c0_0 = arith.constant 0 : index
    %0 = vector.load %arg1[%c0, %c0_0] : memref<128x144xbf16, #tpu.memory_space<vmem>>, vector<128x144xbf16>
    %c0_1 = arith.constant 0 : index
    %c0_2 = arith.constant 0 : index
    %1 = vector.load %arg2[%c0_1, %c0_2] : memref<144x32xbf16, #tpu.memory_space<vmem>>, vector<144x32xbf16>
    %cst = arith.constant dense<0.000000e+00> : vector<128x32xf32>
    %2 = tpu.matmul %0, %1, %cst {dimension_numbers = #tpu.dot_dimension_numbers<[1], [0], [0], [1], [0, 0, 1, 1], [], []>} : vector<128x144xbf16>, vector<144x32xbf16>, vector<128x32xf32> -> vector<128x32xf32>
    %cst_3 = arith.constant dense<0.000000e+00> : vector<32xf32>
    %3 = vector.multi_reduction <add>, %2, %cst_3 [0] : vector<128x32xf32> to vector<32xf32>
    %4 = vector.shape_cast %3 : vector<32xf32> to vector<1x32xf32>
    %cst_4 = arith.constant 7.812500e-03 : f32
    %5 = vector.broadcast %cst_4 : f32 to vector<1x32xf32>
    %6 = arith.mulf %4, %5 : vector<1x32xf32>
    %7 = vector.broadcast %6 : vector<1x32xf32> to vector<128x32xf32>
    %8 = arith.subf %2, %7 : vector<128x32xf32>
    %9 = arith.mulf %8, %8 : vector<128x32xf32>
    %cst_5 = arith.constant dense<0.000000e+00> : vector<32xf32>
    %10 = vector.multi_reduction <add>, %9, %cst_5 [0] : vector<128x32xf32> to vector<32xf32>
    %11 = vector.shape_cast %10 : vector<32xf32> to vector<1x32xf32>
    %cst_6 = arith.constant 7.812500e-03 : f32
    %12 = vector.broadcast %cst_6 : f32 to vector<1x32xf32>
    %13 = arith.mulf %11, %12 : vector<1x32xf32>
    %c0_7 = arith.constant 0 : index
    %c0_8 = arith.constant 0 : index
    %14 = vector.load %arg3[%c0_7, %c0_8] : memref<1x32xf32, #tpu.memory_space<vmem>>, vector<1x32xf32>
    %cst_9 = arith.constant 9.99999974E-6 : f32
    %15 = vector.broadcast %cst_9 : f32 to vector<1x32xf32>
    %16 = arith.addf %13, %15 : vector<1x32xf32>
    %17 = math.rsqrt %16 : vector<1x32xf32>
    %18 = arith.mulf %14, %17 : vector<1x32xf32>
    %c0_10 = arith.constant 0 : index
    %c0_11 = arith.constant 0 : index
    %19 = vector.load %arg4[%c0_10, %c0_11] : memref<1x32xf32, #tpu.memory_space<vmem>>, vector<1x32xf32>
    %20 = arith.mulf %6, %18 : vector<1x32xf32>
    %21 = arith.subf %19, %20 : vector<1x32xf32>
    %22 = vector.broadcast %18 : vector<1x32xf32> to vector<128x32xf32>
    %23 = arith.mulf %2, %22 : vector<128x32xf32>
    %24 = vector.broadcast %21 : vector<1x32xf32> to vector<128x32xf32>
    %25 = arith.addf %23, %24 : vector<128x32xf32>
    %cst_12 = arith.constant 0.000000e+00 : f32
    %26 = vector.broadcast %cst_12 : f32 to vector<128x32xf32>
    %27 = arith.maximumf %25, %26 : vector<128x32xf32>
    %c0_13 = arith.constant 0 : index
    %c0_14 = arith.constant 0 : index
    %28 = vector.load %arg5[%c0_13, %c0_14] : memref<128x32xf32, #tpu.memory_space<vmem>>, vector<128x32xf32>
    tpu.vector_store %arg5[%c0_13, %c0_14], %27 {strides = array<i32>} : memref<128x32xf32, #tpu.memory_space<vmem>>, vector<128x32xf32>,
    return
  }
  func.func @transform_0(%arg0: i32) -> (i32, i32) {
    %c0_i32 = arith.constant 0 : i32
    %c0_i32_0 = arith.constant 0 : i32
    %c0_i32_1 = arith.constant 0 : i32
    return %c0_i32, %c0_i32_0 : i32, i32
  }
  func.func @transform_1(%arg0: i32) -> (i32, i32) {
    %c0_i32 = arith.constant 0 : i32
    %c0_i32_0 = arith.constant 0 : i32
    %c0_i32_1 = arith.constant 0 : i32
    return %c0_i32, %c0_i32_0 : i32, i32
  }
  func.func @transform_2(%arg0: i32) -> (i32, i32) {
    %c0_i32 = arith.constant 0 : i32
    %c0_i32_0 = arith.constant 0 : i32
    %c0_i32_1 = arith.constant 0 : i32
    return %c0_i32, %c0_i32_0 : i32, i32
  }
  func.func @transform_3(%arg0: i32) -> (i32, i32) {
    %c0_i32 = arith.constant 0 : i32
    %c0_i32_0 = arith.constant 0 : i32
    %c0_i32_1 = arith.constant 0 : i32
    return %c0_i32, %c0_i32_0 : i32, i32
  }
  func.func @transform_4(%arg0: i32) -> (i32, i32) {
    %c0_i32 = arith.constant 0 : i32
    %c0_i32_0 = arith.constant 0 : i32
    %c0_i32_1 = arith.constant 0 : i32
    return %c0_i32, %c0_i32_0 : i32, i32
  }
}

module attributes {stable_mosaic.version = 11 : i64} {
  func.func @_fused_conv_bn_kernel(%arg0: i32, %arg1: memref<128x16xbf16, #tpu.memory_space<vmem>>, %arg2: memref<16x32xbf16, #tpu.memory_space<vmem>>, %arg3: memref<1x32xf32, #tpu.memory_space<vmem>>, %arg4: memref<1x32xf32, #tpu.memory_space<vmem>>, %arg5: memref<128x32xf32, #tpu.memory_space<vmem>>) attributes {dimension_semantics = [#tpu.dimension_semantics<arbitrary>], iteration_bounds = array<i64: 1>, scalar_prefetch = 0 : i64, scratch_operands = 0 : i64, tpu.core_type = #tpu.core_type<tc>, window_params = [{pipeline_mode = #tpu.pipeline_mode<synchronous>, transform_indices = @transform_0, window_bounds = array<i64: 128, 16>}, {pipeline_mode = #tpu.pipeline_mode<synchronous>, transform_indices = @transform_1, window_bounds = array<i64: 16, 32>}, {pipeline_mode = #tpu.pipeline_mode<synchronous>, transform_indices = @transform_2, window_bounds = array<i64: 1, 32>}, {pipeline_mode = #tpu.pipeline_mode<synchronous>, transform_indices = @transform_3, window_bounds = array<i64: 1, 32>}, {pipeline_mode = #tpu.pipeline_mode<synchronous>, transform_indices = @transform_4, window_bounds = array<i64: 128, 32>}]} {
    %c0 = arith.constant 0 : index
    %c0_0 = arith.constant 0 : index
    %0 = vector.load %arg1[%c0, %c0_0] : memref<128x16xbf16, #tpu.memory_space<vmem>>, vector<128x16xbf16>
    %c0_1 = arith.constant 0 : index
    %c0_2 = arith.constant 0 : index
    %1 = vector.load %arg2[%c0_1, %c0_2] : memref<16x32xbf16, #tpu.memory_space<vmem>>, vector<16x32xbf16>
    %cst = arith.constant dense<0.000000e+00> : vector<128x32xf32>
    %2 = tpu.matmul %0, %1, %cst {dimension_numbers = #tpu.dot_dimension_numbers<[1], [0], [0], [1], [0, 0, 1, 1], [], []>} : vector<128x16xbf16>, vector<16x32xbf16>, vector<128x32xf32> -> vector<128x32xf32>
    %cst_3 = arith.constant dense<0.000000e+00> : vector<32xf32>
    %3 = vector.multi_reduction <add>, %2, %cst_3 [0] : vector<128x32xf32> to vector<32xf32>
    %4 = vector.shape_cast %3 : vector<32xf32> to vector<1x32xf32>
    %cst_4 = arith.constant 7.812500e-03 : f32
    %5 = vector.broadcast %cst_4 : f32 to vector<1x32xf32>
    %6 = arith.mulf %4, %5 : vector<1x32xf32>
    %7 = vector.broadcast %6 : vector<1x32xf32> to vector<128x32xf32>
    %8 = arith.subf %2, %7 : vector<128x32xf32>
    %9 = arith.mulf %8, %8 : vector<128x32xf32>
    %cst_5 = arith.constant dense<0.000000e+00> : vector<32xf32>
    %10 = vector.multi_reduction <add>, %9, %cst_5 [0] : vector<128x32xf32> to vector<32xf32>
    %11 = vector.shape_cast %10 : vector<32xf32> to vector<1x32xf32>
    %cst_6 = arith.constant 7.812500e-03 : f32
    %12 = vector.broadcast %cst_6 : f32 to vector<1x32xf32>
    %13 = arith.mulf %11, %12 : vector<1x32xf32>
    %c0_7 = arith.constant 0 : index
    %c0_8 = arith.constant 0 : index
    %14 = vector.load %arg3[%c0_7, %c0_8] : memref<1x32xf32, #tpu.memory_space<vmem>>, vector<1x32xf32>
    %cst_9 = arith.constant 9.99999974E-6 : f32
    %15 = vector.broadcast %cst_9 : f32 to vector<1x32xf32>
    %16 = arith.addf %13, %15 : vector<1x32xf32>
    %17 = math.rsqrt %16 : vector<1x32xf32>
    %18 = arith.mulf %14, %17 : vector<1x32xf32>
    %c0_10 = arith.constant 0 : index
    %c0_11 = arith.constant 0 : index
    %19 = vector.load %arg4[%c0_10, %c0_11] : memref<1x32xf32, #tpu.memory_space<vmem>>, vector<1x32xf32>
    %20 = arith.mulf %6, %18 : vector<1x32xf32>
    %21 = arith.subf %19, %20 : vector<1x32xf32>
    %22 = vector.broadcast %18 : vector<1x32xf32> to vector<128x32xf32>
    %23 = arith.mulf %2, %22 : vector<128x32xf32>
    %24 = vector.broadcast %21 : vector<1x32xf32> to vector<128x32xf32>
    %25 = arith.addf %23, %24 : vector<128x32xf32>
    %c0_12 = arith.constant 0 : index
    %c0_13 = arith.constant 0 : index
    %26 = vector.load %arg5[%c0_12, %c0_13] : memref<128x32xf32, #tpu.memory_space<vmem>>, vector<128x32xf32>
    tpu.vector_store %arg5[%c0_12, %c0_13], %25 {strides = array<i32>} : memref<128x32xf32, #tpu.memory_space<vmem>>, vector<128x32xf32>,
    return
  }
  func.func @transform_0(%arg0: i32) -> (i32, i32) {
    %c0_i32 = arith.constant 0 : i32
    %c0_i32_0 = arith.constant 0 : i32
    %c0_i32_1 = arith.constant 0 : i32
    return %c0_i32, %c0_i32_0 : i32, i32
  }
  func.func @transform_1(%arg0: i32) -> (i32, i32) {
    %c0_i32 = arith.constant 0 : i32
    %c0_i32_0 = arith.constant 0 : i32
    %c0_i32_1 = arith.constant 0 : i32
    return %c0_i32, %c0_i32_0 : i32, i32
  }
  func.func @transform_2(%arg0: i32) -> (i32, i32) {
    %c0_i32 = arith.constant 0 : i32
    %c0_i32_0 = arith.constant 0 : i32
    %c0_i32_1 = arith.constant 0 : i32
    return %c0_i32, %c0_i32_0 : i32, i32
  }
  func.func @transform_3(%arg0: i32) -> (i32, i32) {
    %c0_i32 = arith.constant 0 : i32
    %c0_i32_0 = arith.constant 0 : i32
    %c0_i32_1 = arith.constant 0 : i32
    return %c0_i32, %c0_i32_0 : i32, i32
  }
  func.func @transform_4(%arg0: i32) -> (i32, i32) {
    %c0_i32 = arith.constant 0 : i32
    %c0_i32_0 = arith.constant 0 : i32
    %c0_i32_1 = arith.constant 0 : i32
    return %c0_i32, %c0_i32_0 : i32, i32
  }
}

module attributes {stable_mosaic.version = 11 : i64} {
  func.func @_fused_conv_bn_kernel(%arg0: i32, %arg1: memref<128x288xbf16, #tpu.memory_space<vmem>>, %arg2: memref<288x32xbf16, #tpu.memory_space<vmem>>, %arg3: memref<1x32xf32, #tpu.memory_space<vmem>>, %arg4: memref<1x32xf32, #tpu.memory_space<vmem>>, %arg5: memref<128x32xf32, #tpu.memory_space<vmem>>, %arg6: memref<128x32xf32, #tpu.memory_space<vmem>>) attributes {dimension_semantics = [#tpu.dimension_semantics<arbitrary>], iteration_bounds = array<i64: 1>, scalar_prefetch = 0 : i64, scratch_operands = 0 : i64, tpu.core_type = #tpu.core_type<tc>, window_params = [{pipeline_mode = #tpu.pipeline_mode<synchronous>, transform_indices = @transform_0, window_bounds = array<i64: 128, 288>}, {pipeline_mode = #tpu.pipeline_mode<synchronous>, transform_indices = @transform_1, window_bounds = array<i64: 288, 32>}, {pipeline_mode = #tpu.pipeline_mode<synchronous>, transform_indices = @transform_2, window_bounds = array<i64: 1, 32>}, {pipeline_mode = #tpu.pipeline_mode<synchronous>, transform_indices = @transform_3, window_bounds = array<i64: 1, 32>}, {pipeline_mode = #tpu.pipeline_mode<synchronous>, transform_indices = @transform_4, window_bounds = array<i64: 128, 32>}, {pipeline_mode = #tpu.pipeline_mode<synchronous>, transform_indices = @transform_5, window_bounds = array<i64: 128, 32>}]} {
    %c0 = arith.constant 0 : index
    %c0_0 = arith.constant 0 : index
    %0 = vector.load %arg1[%c0, %c0_0] : memref<128x288xbf16, #tpu.memory_space<vmem>>, vector<128x288xbf16>
    %c0_1 = arith.constant 0 : index
    %c0_2 = arith.constant 0 : index
    %1 = vector.load %arg2[%c0_1, %c0_2] : memref<288x32xbf16, #tpu.memory_space<vmem>>, vector<288x32xbf16>
    %cst = arith.constant dense<0.000000e+00> : vector<128x32xf32>
    %2 = tpu.matmul %0, %1, %cst {dimension_numbers = #tpu.dot_dimension_numbers<[1], [0], [0], [1], [0, 0, 1, 1], [], []>} : vector<128x288xbf16>, vector<288x32xbf16>, vector<128x32xf32> -> vector<128x32xf32>
    %cst_3 = arith.constant dense<0.000000e+00> : vector<32xf32>
    %3 = vector.multi_reduction <add>, %2, %cst_3 [0] : vector<128x32xf32> to vector<32xf32>
    %4 = vector.shape_cast %3 : vector<32xf32> to vector<1x32xf32>
    %cst_4 = arith.constant 7.812500e-03 : f32
    %5 = vector.broadcast %cst_4 : f32 to vector<1x32xf32>
    %6 = arith.mulf %4, %5 : vector<1x32xf32>
    %7 = vector.broadcast %6 : vector<1x32xf32> to vector<128x32xf32>
    %8 = arith.subf %2, %7 : vector<128x32xf32>
    %9 = arith.mulf %8, %8 : vector<128x32xf32>
    %cst_5 = arith.constant dense<0.000000e+00> : vector<32xf32>
    %10 = vector.multi_reduction <add>, %9, %cst_5 [0] : vector<128x32xf32> to vector<32xf32>
    %11 = vector.shape_cast %10 : vector<32xf32> to vector<1x32xf32>
    %cst_6 = arith.constant 7.812500e-03 : f32
    %12 = vector.broadcast %cst_6 : f32 to vector<1x32xf32>
    %13 = arith.mulf %11, %12 : vector<1x32xf32>
    %c0_7 = arith.constant 0 : index
    %c0_8 = arith.constant 0 : index
    %14 = vector.load %arg3[%c0_7, %c0_8] : memref<1x32xf32, #tpu.memory_space<vmem>>, vector<1x32xf32>
    %cst_9 = arith.constant 9.99999974E-6 : f32
    %15 = vector.broadcast %cst_9 : f32 to vector<1x32xf32>
    %16 = arith.addf %13, %15 : vector<1x32xf32>
    %17 = math.rsqrt %16 : vector<1x32xf32>
    %18 = arith.mulf %14, %17 : vector<1x32xf32>
    %c0_10 = arith.constant 0 : index
    %c0_11 = arith.constant 0 : index
    %19 = vector.load %arg4[%c0_10, %c0_11] : memref<1x32xf32, #tpu.memory_space<vmem>>, vector<1x32xf32>
    %20 = arith.mulf %6, %18 : vector<1x32xf32>
    %21 = arith.subf %19, %20 : vector<1x32xf32>
    %22 = vector.broadcast %18 : vector<1x32xf32> to vector<128x32xf32>
    %23 = arith.mulf %2, %22 : vector<128x32xf32>
    %24 = vector.broadcast %21 : vector<1x32xf32> to vector<128x32xf32>
    %25 = arith.addf %23, %24 : vector<128x32xf32>
    %c0_12 = arith.constant 0 : index
    %c0_13 = arith.constant 0 : index
    %26 = vector.load %arg5[%c0_12, %c0_13] : memref<128x32xf32, #tpu.memory_space<vmem>>, vector<128x32xf32>
    %27 = arith.addf %25, %26 : vector<128x32xf32>
    %cst_14 = arith.constant 0.000000e+00 : f32
    %28 = vector.broadcast %cst_14 : f32 to vector<128x32xf32>
    %29 = arith.maximumf %27, %28 : vector<128x32xf32>
    %c0_15 = arith.constant 0 : index
    %c0_16 = arith.constant 0 : index
    %30 = vector.load %arg6[%c0_15, %c0_16] : memref<128x32xf32, #tpu.memory_space<vmem>>, vector<128x32xf32>
    tpu.vector_store %arg6[%c0_15, %c0_16], %29 {strides = array<i32>} : memref<128x32xf32, #tpu.memory_space<vmem>>, vector<128x32xf32>,
    return
  }
  func.func @transform_0(%arg0: i32) -> (i32, i32) {
    %c0_i32 = arith.constant 0 : i32
    %c0_i32_0 = arith.constant 0 : i32
    %c0_i32_1 = arith.constant 0 : i32
    return %c0_i32, %c0_i32_0 : i32, i32
  }
  func.func @transform_1(%arg0: i32) -> (i32, i32) {
    %c0_i32 = arith.constant 0 : i32
    %c0_i32_0 = arith.constant 0 : i32
    %c0_i32_1 = arith.constant 0 : i32
    return %c0_i32, %c0_i32_0 : i32, i32
  }
  func.func @transform_2(%arg0: i32) -> (i32, i32) {
    %c0_i32 = arith.constant 0 : i32
    %c0_i32_0 = arith.constant 0 : i32
    %c0_i32_1 = arith.constant 0 : i32
    return %c0_i32, %c0_i32_0 : i32, i32
  }
  func.func @transform_3(%arg0: i32) -> (i32, i32) {
    %c0_i32 = arith.constant 0 : i32
    %c0_i32_0 = arith.constant 0 : i32
    %c0_i32_1 = arith.constant 0 : i32
    return %c0_i32, %c0_i32_0 : i32, i32
  }
  func.func @transform_4(%arg0: i32) -> (i32, i32) {
    %c0_i32 = arith.constant 0 : i32
    %c0_i32_0 = arith.constant 0 : i32
    %c0_i32_1 = arith.constant 0 : i32
    return %c0_i32, %c0_i32_0 : i32, i32
  }
  func.func @transform_5(%arg0: i32) -> (i32, i32) {
    %c0_i32 = arith.constant 0 : i32
    %c0_i32_0 = arith.constant 0 : i32
    %c0_i32_1 = arith.constant 0 : i32
    return %c0_i32, %c0_i32_0 : i32, i32
  }
}

module attributes {stable_mosaic.version = 11 : i64} {
  func.func @_fused_conv_bn_kernel(%arg0: i32, %arg1: memref<32x288xbf16, #tpu.memory_space<vmem>>, %arg2: memref<288x64xbf16, #tpu.memory_space<vmem>>, %arg3: memref<1x64xf32, #tpu.memory_space<vmem>>, %arg4: memref<1x64xf32, #tpu.memory_space<vmem>>, %arg5: memref<32x64xf32, #tpu.memory_space<vmem>>) attributes {dimension_semantics = [#tpu.dimension_semantics<arbitrary>], iteration_bounds = array<i64: 1>, scalar_prefetch = 0 : i64, scratch_operands = 0 : i64, tpu.core_type = #tpu.core_type<tc>, window_params = [{pipeline_mode = #tpu.pipeline_mode<synchronous>, transform_indices = @transform_0, window_bounds = array<i64: 32, 288>}, {pipeline_mode = #tpu.pipeline_mode<synchronous>, transform_indices = @transform_1, window_bounds = array<i64: 288, 64>}, {pipeline_mode = #tpu.pipeline_mode<synchronous>, transform_indices = @transform_2, window_bounds = array<i64: 1, 64>}, {pipeline_mode = #tpu.pipeline_mode<synchronous>, transform_indices = @transform_3, window_bounds = array<i64: 1, 64>}, {pipeline_mode = #tpu.pipeline_mode<synchronous>, transform_indices = @transform_4, window_bounds = array<i64: 32, 64>}]} {
    %c0 = arith.constant 0 : index
    %c0_0 = arith.constant 0 : index
    %0 = vector.load %arg1[%c0, %c0_0] : memref<32x288xbf16, #tpu.memory_space<vmem>>, vector<32x288xbf16>
    %c0_1 = arith.constant 0 : index
    %c0_2 = arith.constant 0 : index
    %1 = vector.load %arg2[%c0_1, %c0_2] : memref<288x64xbf16, #tpu.memory_space<vmem>>, vector<288x64xbf16>
    %cst = arith.constant dense<0.000000e+00> : vector<32x64xf32>
    %2 = tpu.matmul %0, %1, %cst {dimension_numbers = #tpu.dot_dimension_numbers<[1], [0], [0], [1], [0, 0, 1, 1], [], []>} : vector<32x288xbf16>, vector<288x64xbf16>, vector<32x64xf32> -> vector<32x64xf32>
    %cst_3 = arith.constant dense<0.000000e+00> : vector<64xf32>
    %3 = vector.multi_reduction <add>, %2, %cst_3 [0] : vector<32x64xf32> to vector<64xf32>
    %4 = vector.shape_cast %3 : vector<64xf32> to vector<1x64xf32>
    %cst_4 = arith.constant 3.125000e-02 : f32
    %5 = vector.broadcast %cst_4 : f32 to vector<1x64xf32>
    %6 = arith.mulf %4, %5 : vector<1x64xf32>
    %7 = vector.broadcast %6 : vector<1x64xf32> to vector<32x64xf32>
    %8 = arith.subf %2, %7 : vector<32x64xf32>
    %9 = arith.mulf %8, %8 : vector<32x64xf32>
    %cst_5 = arith.constant dense<0.000000e+00> : vector<64xf32>
    %10 = vector.multi_reduction <add>, %9, %cst_5 [0] : vector<32x64xf32> to vector<64xf32>
    %11 = vector.shape_cast %10 : vector<64xf32> to vector<1x64xf32>
    %cst_6 = arith.constant 3.125000e-02 : f32
    %12 = vector.broadcast %cst_6 : f32 to vector<1x64xf32>
    %13 = arith.mulf %11, %12 : vector<1x64xf32>
    %c0_7 = arith.constant 0 : index
    %c0_8 = arith.constant 0 : index
    %14 = vector.load %arg3[%c0_7, %c0_8] : memref<1x64xf32, #tpu.memory_space<vmem>>, vector<1x64xf32>
    %cst_9 = arith.constant 9.99999974E-6 : f32
    %15 = vector.broadcast %cst_9 : f32 to vector<1x64xf32>
    %16 = arith.addf %13, %15 : vector<1x64xf32>
    %17 = math.rsqrt %16 : vector<1x64xf32>
    %18 = arith.mulf %14, %17 : vector<1x64xf32>
    %c0_10 = arith.constant 0 : index
    %c0_11 = arith.constant 0 : index
    %19 = vector.load %arg4[%c0_10, %c0_11] : memref<1x64xf32, #tpu.memory_space<vmem>>, vector<1x64xf32>
    %20 = arith.mulf %6, %18 : vector<1x64xf32>
    %21 = arith.subf %19, %20 : vector<1x64xf32>
    %22 = vector.broadcast %18 : vector<1x64xf32> to vector<32x64xf32>
    %23 = arith.mulf %2, %22 : vector<32x64xf32>
    %24 = vector.broadcast %21 : vector<1x64xf32> to vector<32x64xf32>
    %25 = arith.addf %23, %24 : vector<32x64xf32>
    %cst_12 = arith.constant 0.000000e+00 : f32
    %26 = vector.broadcast %cst_12 : f32 to vector<32x64xf32>
    %27 = arith.maximumf %25, %26 : vector<32x64xf32>
    %c0_13 = arith.constant 0 : index
    %c0_14 = arith.constant 0 : index
    %28 = vector.load %arg5[%c0_13, %c0_14] : memref<32x64xf32, #tpu.memory_space<vmem>>, vector<32x64xf32>
    tpu.vector_store %arg5[%c0_13, %c0_14], %27 {strides = array<i32>} : memref<32x64xf32, #tpu.memory_space<vmem>>, vector<32x64xf32>,
    return
  }
  func.func @transform_0(%arg0: i32) -> (i32, i32) {
    %c0_i32 = arith.constant 0 : i32
    %c0_i32_0 = arith.constant 0 : i32
    %c0_i32_1 = arith.constant 0 : i32
    return %c0_i32, %c0_i32_0 : i32, i32
  }
  func.func @transform_1(%arg0: i32) -> (i32, i32) {
    %c0_i32 = arith.constant 0 : i32
    %c0_i32_0 = arith.constant 0 : i32
    %c0_i32_1 = arith.constant 0 : i32
    return %c0_i32, %c0_i32_0 : i32, i32
  }
  func.func @transform_2(%arg0: i32) -> (i32, i32) {
    %c0_i32 = arith.constant 0 : i32
    %c0_i32_0 = arith.constant 0 : i32
    %c0_i32_1 = arith.constant 0 : i32
    return %c0_i32, %c0_i32_0 : i32, i32
  }
  func.func @transform_3(%arg0: i32) -> (i32, i32) {
    %c0_i32 = arith.constant 0 : i32
    %c0_i32_0 = arith.constant 0 : i32
    %c0_i32_1 = arith.constant 0 : i32
    return %c0_i32, %c0_i32_0 : i32, i32
  }
  func.func @transform_4(%arg0: i32) -> (i32, i32) {
    %c0_i32 = arith.constant 0 : i32
    %c0_i32_0 = arith.constant 0 : i32
    %c0_i32_1 = arith.constant 0 : i32
    return %c0_i32, %c0_i32_0 : i32, i32
  }
}

module attributes {stable_mosaic.version = 11 : i64} {
  func.func @_fused_conv_bn_kernel(%arg0: i32, %arg1: memref<32x32xbf16, #tpu.memory_space<vmem>>, %arg2: memref<32x64xbf16, #tpu.memory_space<vmem>>, %arg3: memref<1x64xf32, #tpu.memory_space<vmem>>, %arg4: memref<1x64xf32, #tpu.memory_space<vmem>>, %arg5: memref<32x64xf32, #tpu.memory_space<vmem>>) attributes {dimension_semantics = [#tpu.dimension_semantics<arbitrary>], iteration_bounds = array<i64: 1>, scalar_prefetch = 0 : i64, scratch_operands = 0 : i64, tpu.core_type = #tpu.core_type<tc>, window_params = [{pipeline_mode = #tpu.pipeline_mode<synchronous>, transform_indices = @transform_0, window_bounds = array<i64: 32, 32>}, {pipeline_mode = #tpu.pipeline_mode<synchronous>, transform_indices = @transform_1, window_bounds = array<i64: 32, 64>}, {pipeline_mode = #tpu.pipeline_mode<synchronous>, transform_indices = @transform_2, window_bounds = array<i64: 1, 64>}, {pipeline_mode = #tpu.pipeline_mode<synchronous>, transform_indices = @transform_3, window_bounds = array<i64: 1, 64>}, {pipeline_mode = #tpu.pipeline_mode<synchronous>, transform_indices = @transform_4, window_bounds = array<i64: 32, 64>}]} {
    %c0 = arith.constant 0 : index
    %c0_0 = arith.constant 0 : index
    %0 = vector.load %arg1[%c0, %c0_0] : memref<32x32xbf16, #tpu.memory_space<vmem>>, vector<32x32xbf16>
    %c0_1 = arith.constant 0 : index
    %c0_2 = arith.constant 0 : index
    %1 = vector.load %arg2[%c0_1, %c0_2] : memref<32x64xbf16, #tpu.memory_space<vmem>>, vector<32x64xbf16>
    %cst = arith.constant dense<0.000000e+00> : vector<32x64xf32>
    %2 = tpu.matmul %0, %1, %cst {dimension_numbers = #tpu.dot_dimension_numbers<[1], [0], [0], [1], [0, 0, 1, 1], [], []>} : vector<32x32xbf16>, vector<32x64xbf16>, vector<32x64xf32> -> vector<32x64xf32>
    %cst_3 = arith.constant dense<0.000000e+00> : vector<64xf32>
    %3 = vector.multi_reduction <add>, %2, %cst_3 [0] : vector<32x64xf32> to vector<64xf32>
    %4 = vector.shape_cast %3 : vector<64xf32> to vector<1x64xf32>
    %cst_4 = arith.constant 3.125000e-02 : f32
    %5 = vector.broadcast %cst_4 : f32 to vector<1x64xf32>
    %6 = arith.mulf %4, %5 : vector<1x64xf32>
    %7 = vector.broadcast %6 : vector<1x64xf32> to vector<32x64xf32>
    %8 = arith.subf %2, %7 : vector<32x64xf32>
    %9 = arith.mulf %8, %8 : vector<32x64xf32>
    %cst_5 = arith.constant dense<0.000000e+00> : vector<64xf32>
    %10 = vector.multi_reduction <add>, %9, %cst_5 [0] : vector<32x64xf32> to vector<64xf32>
    %11 = vector.shape_cast %10 : vector<64xf32> to vector<1x64xf32>
    %cst_6 = arith.constant 3.125000e-02 : f32
    %12 = vector.broadcast %cst_6 : f32 to vector<1x64xf32>
    %13 = arith.mulf %11, %12 : vector<1x64xf32>
    %c0_7 = arith.constant 0 : index
    %c0_8 = arith.constant 0 : index
    %14 = vector.load %arg3[%c0_7, %c0_8] : memref<1x64xf32, #tpu.memory_space<vmem>>, vector<1x64xf32>
    %cst_9 = arith.constant 9.99999974E-6 : f32
    %15 = vector.broadcast %cst_9 : f32 to vector<1x64xf32>
    %16 = arith.addf %13, %15 : vector<1x64xf32>
    %17 = math.rsqrt %16 : vector<1x64xf32>
    %18 = arith.mulf %14, %17 : vector<1x64xf32>
    %c0_10 = arith.constant 0 : index
    %c0_11 = arith.constant 0 : index
    %19 = vector.load %arg4[%c0_10, %c0_11] : memref<1x64xf32, #tpu.memory_space<vmem>>, vector<1x64xf32>
    %20 = arith.mulf %6, %18 : vector<1x64xf32>
    %21 = arith.subf %19, %20 : vector<1x64xf32>
    %22 = vector.broadcast %18 : vector<1x64xf32> to vector<32x64xf32>
    %23 = arith.mulf %2, %22 : vector<32x64xf32>
    %24 = vector.broadcast %21 : vector<1x64xf32> to vector<32x64xf32>
    %25 = arith.addf %23, %24 : vector<32x64xf32>
    %c0_12 = arith.constant 0 : index
    %c0_13 = arith.constant 0 : index
    %26 = vector.load %arg5[%c0_12, %c0_13] : memref<32x64xf32, #tpu.memory_space<vmem>>, vector<32x64xf32>
    tpu.vector_store %arg5[%c0_12, %c0_13], %25 {strides = array<i32>} : memref<32x64xf32, #tpu.memory_space<vmem>>, vector<32x64xf32>,
    return
  }
  func.func @transform_0(%arg0: i32) -> (i32, i32) {
    %c0_i32 = arith.constant 0 : i32
    %c0_i32_0 = arith.constant 0 : i32
    %c0_i32_1 = arith.constant 0 : i32
    return %c0_i32, %c0_i32_0 : i32, i32
  }
  func.func @transform_1(%arg0: i32) -> (i32, i32) {
    %c0_i32 = arith.constant 0 : i32
    %c0_i32_0 = arith.constant 0 : i32
    %c0_i32_1 = arith.constant 0 : i32
    return %c0_i32, %c0_i32_0 : i32, i32
  }
  func.func @transform_2(%arg0: i32) -> (i32, i32) {
    %c0_i32 = arith.constant 0 : i32
    %c0_i32_0 = arith.constant 0 : i32
    %c0_i32_1 = arith.constant 0 : i32
    return %c0_i32, %c0_i32_0 : i32, i32
  }
  func.func @transform_3(%arg0: i32) -> (i32, i32) {
    %c0_i32 = arith.constant 0 : i32
    %c0_i32_0 = arith.constant 0 : i32
    %c0_i32_1 = arith.constant 0 : i32
    return %c0_i32, %c0_i32_0 : i32, i32
  }
  func.func @transform_4(%arg0: i32) -> (i32, i32) {
    %c0_i32 = arith.constant 0 : i32
    %c0_i32_0 = arith.constant 0 : i32
    %c0_i32_1 = arith.constant 0 : i32
    return %c0_i32, %c0_i32_0 : i32, i32
  }
}

module attributes {stable_mosaic.version = 11 : i64} {
  func.func @_fused_conv_bn_kernel(%arg0: i32, %arg1: memref<32x576xbf16, #tpu.memory_space<vmem>>, %arg2: memref<576x64xbf16, #tpu.memory_space<vmem>>, %arg3: memref<1x64xf32, #tpu.memory_space<vmem>>, %arg4: memref<1x64xf32, #tpu.memory_space<vmem>>, %arg5: memref<32x64xf32, #tpu.memory_space<vmem>>, %arg6: memref<2x32xf32, #tpu.memory_space<vmem>>, %arg7: memref<64x10xf32, #tpu.memory_space<vmem>>, %arg8: memref<1x10xf32, #tpu.memory_space<vmem>>, %arg9: memref<2x10xf32, #tpu.memory_space<vmem>>) attributes {dimension_semantics = [#tpu.dimension_semantics<arbitrary>], iteration_bounds = array<i64: 1>, scalar_prefetch = 0 : i64, scratch_operands = 0 : i64, tpu.core_type = #tpu.core_type<tc>, window_params = [{pipeline_mode = #tpu.pipeline_mode<synchronous>, transform_indices = @transform_0, window_bounds = array<i64: 32, 576>}, {pipeline_mode = #tpu.pipeline_mode<synchronous>, transform_indices = @transform_1, window_bounds = array<i64: 576, 64>}, {pipeline_mode = #tpu.pipeline_mode<synchronous>, transform_indices = @transform_2, window_bounds = array<i64: 1, 64>}, {pipeline_mode = #tpu.pipeline_mode<synchronous>, transform_indices = @transform_3, window_bounds = array<i64: 1, 64>}, {pipeline_mode = #tpu.pipeline_mode<synchronous>, transform_indices = @transform_4, window_bounds = array<i64: 32, 64>}, {pipeline_mode = #tpu.pipeline_mode<synchronous>, transform_indices = @transform_5, window_bounds = array<i64: 2, 32>}, {pipeline_mode = #tpu.pipeline_mode<synchronous>, transform_indices = @transform_6, window_bounds = array<i64: 64, 10>}, {pipeline_mode = #tpu.pipeline_mode<synchronous>, transform_indices = @transform_7, window_bounds = array<i64: 1, 10>}, {pipeline_mode = #tpu.pipeline_mode<synchronous>, transform_indices = @transform_8, window_bounds = array<i64: 2, 10>}]} {
    %c0 = arith.constant 0 : index
    %c0_0 = arith.constant 0 : index
    %0 = vector.load %arg1[%c0, %c0_0] : memref<32x576xbf16, #tpu.memory_space<vmem>>, vector<32x576xbf16>
    %c0_1 = arith.constant 0 : index
    %c0_2 = arith.constant 0 : index
    %1 = vector.load %arg2[%c0_1, %c0_2] : memref<576x64xbf16, #tpu.memory_space<vmem>>, vector<576x64xbf16>
    %cst = arith.constant dense<0.000000e+00> : vector<32x64xf32>
    %2 = tpu.matmul %0, %1, %cst {dimension_numbers = #tpu.dot_dimension_numbers<[1], [0], [0], [1], [0, 0, 1, 1], [], []>} : vector<32x576xbf16>, vector<576x64xbf16>, vector<32x64xf32> -> vector<32x64xf32>
    %cst_3 = arith.constant dense<0.000000e+00> : vector<64xf32>
    %3 = vector.multi_reduction <add>, %2, %cst_3 [0] : vector<32x64xf32> to vector<64xf32>
    %4 = vector.shape_cast %3 : vector<64xf32> to vector<1x64xf32>
    %cst_4 = arith.constant 3.125000e-02 : f32
    %5 = vector.broadcast %cst_4 : f32 to vector<1x64xf32>
    %6 = arith.mulf %4, %5 : vector<1x64xf32>
    %7 = vector.broadcast %6 : vector<1x64xf32> to vector<32x64xf32>
    %8 = arith.subf %2, %7 : vector<32x64xf32>
    %9 = arith.mulf %8, %8 : vector<32x64xf32>
    %cst_5 = arith.constant dense<0.000000e+00> : vector<64xf32>
    %10 = vector.multi_reduction <add>, %9, %cst_5 [0] : vector<32x64xf32> to vector<64xf32>
    %11 = vector.shape_cast %10 : vector<64xf32> to vector<1x64xf32>
    %cst_6 = arith.constant 3.125000e-02 : f32
    %12 = vector.broadcast %cst_6 : f32 to vector<1x64xf32>
    %13 = arith.mulf %11, %12 : vector<1x64xf32>
    %c0_7 = arith.constant 0 : index
    %c0_8 = arith.constant 0 : index
    %14 = vector.load %arg3[%c0_7, %c0_8] : memref<1x64xf32, #tpu.memory_space<vmem>>, vector<1x64xf32>
    %cst_9 = arith.constant 9.99999974E-6 : f32
    %15 = vector.broadcast %cst_9 : f32 to vector<1x64xf32>
    %16 = arith.addf %13, %15 : vector<1x64xf32>
    %17 = math.rsqrt %16 : vector<1x64xf32>
    %18 = arith.mulf %14, %17 : vector<1x64xf32>
    %c0_10 = arith.constant 0 : index
    %c0_11 = arith.constant 0 : index
    %19 = vector.load %arg4[%c0_10, %c0_11] : memref<1x64xf32, #tpu.memory_space<vmem>>, vector<1x64xf32>
    %20 = arith.mulf %6, %18 : vector<1x64xf32>
    %21 = arith.subf %19, %20 : vector<1x64xf32>
    %22 = vector.broadcast %18 : vector<1x64xf32> to vector<32x64xf32>
    %23 = arith.mulf %2, %22 : vector<32x64xf32>
    %24 = vector.broadcast %21 : vector<1x64xf32> to vector<32x64xf32>
    %25 = arith.addf %23, %24 : vector<32x64xf32>
    %c0_12 = arith.constant 0 : index
    %c0_13 = arith.constant 0 : index
    %26 = vector.load %arg5[%c0_12, %c0_13] : memref<32x64xf32, #tpu.memory_space<vmem>>, vector<32x64xf32>
    %27 = arith.addf %25, %26 : vector<32x64xf32>
    %cst_14 = arith.constant 0.000000e+00 : f32
    %28 = vector.broadcast %cst_14 : f32 to vector<32x64xf32>
    %29 = arith.maximumf %27, %28 : vector<32x64xf32>
    %c0_15 = arith.constant 0 : index
    %c0_16 = arith.constant 0 : index
    %30 = vector.load %arg6[%c0_15, %c0_16] : memref<2x32xf32, #tpu.memory_space<vmem>>, vector<2x32xf32>
    %cst_17 = arith.constant dense<0.000000e+00> : vector<2x64xf32>
    %31 = tpu.matmul %30, %29, %cst_17 {dimension_numbers = #tpu.dot_dimension_numbers<[1], [0], [0], [1], [0, 0, 1, 1], [], []>} : vector<2x32xf32>, vector<32x64xf32>, vector<2x64xf32> -> vector<2x64xf32>
    %c0_18 = arith.constant 0 : index
    %c0_19 = arith.constant 0 : index
    %32 = vector.load %arg7[%c0_18, %c0_19] : memref<64x10xf32, #tpu.memory_space<vmem>>, vector<64x10xf32>
    %cst_20 = arith.constant dense<0.000000e+00> : vector<2x10xf32>
    %33 = tpu.matmul %31, %32, %cst_20 {dimension_numbers = #tpu.dot_dimension_numbers<[1], [0], [0], [1], [0, 0, 1, 1], [], []>} : vector<2x64xf32>, vector<64x10xf32>, vector<2x10xf32> -> vector<2x10xf32>
    %c0_21 = arith.constant 0 : index
    %c0_22 = arith.constant 0 : index
    %34 = vector.load %arg8[%c0_21, %c0_22] : memref<1x10xf32, #tpu.memory_space<vmem>>, vector<1x10xf32>
    %35 = vector.broadcast %34 : vector<1x10xf32> to vector<2x10xf32>
    %36 = arith.addf %33, %35 : vector<2x10xf32>
    %c0_23 = arith.constant 0 : index
    %c0_24 = arith.constant 0 : index
    %37 = vector.load %arg9[%c0_23, %c0_24] : memref<2x10xf32, #tpu.memory_space<vmem>>, vector<2x10xf32>
    tpu.vector_store %arg9[%c0_23, %c0_24], %36 {strides = array<i32>} : memref<2x10xf32, #tpu.memory_space<vmem>>, vector<2x10xf32>,
    return
  }
  func.func @transform_0(%arg0: i32) -> (i32, i32) {
    %c0_i32 = arith.constant 0 : i32
    %c0_i32_0 = arith.constant 0 : i32
    %c0_i32_1 = arith.constant 0 : i32
    return %c0_i32, %c0_i32_0 : i32, i32
  }
  func.func @transform_1(%arg0: i32) -> (i32, i32) {
    %c0_i32 = arith.constant 0 : i32
    %c0_i32_0 = arith.constant 0 : i32
    %c0_i32_1 = arith.constant 0 : i32
    return %c0_i32, %c0_i32_0 : i32, i32
  }
  func.func @transform_2(%arg0: i32) -> (i32, i32) {
    %c0_i32 = arith.constant 0 : i32
    %c0_i32_0 = arith.constant 0 : i32
    %c0_i32_1 = arith.constant 0 : i32
    return %c0_i32, %c0_i32_0 : i32, i32
  }
  func.func @transform_3(%arg0: i32) -> (i32, i32) {
    %c0_i32 = arith.constant 0 : i32
    %c0_i32_0 = arith.constant 0 : i32
    %c0_i32_1 = arith.constant 0 : i32
    return %c0_i32, %c0_i32_0 : i32, i32
  }
  func.func @transform_4(%arg0: i32) -> (i32, i32) {
    %c0_i32 = arith.constant 0 : i32
    %c0_i32_0 = arith.constant 0 : i32
    %c0_i32_1 = arith.constant 0 : i32
    return %c0_i32, %c0_i32_0 : i32, i32
  }
  func.func @transform_5(%arg0: i32) -> (i32, i32) {
    %c0_i32 = arith.constant 0 : i32
    %c0_i32_0 = arith.constant 0 : i32
    %c0_i32_1 = arith.constant 0 : i32
    return %c0_i32, %c0_i32_0 : i32, i32
  }
  func.func @transform_6(%arg0: i32) -> (i32, i32) {
    %c0_i32 = arith.constant 0 : i32
    %c0_i32_0 = arith.constant 0 : i32
    %c0_i32_1 = arith.constant 0 : i32
    return %c0_i32, %c0_i32_0 : i32, i32
  }
  func.func @transform_7(%arg0: i32) -> (i32, i32) {
    %c0_i32 = arith.constant 0 : i32
    %c0_i32_0 = arith.constant 0 : i32
    %c0_i32_1 = arith.constant 0 : i32
    return %c0_i32, %c0_i32_0 : i32, i32
  }
  func.func @transform_8(%arg0: i32) -> (i32, i32) {
    %c0_i32 = arith.constant 0 : i32
    %c0_i32_0 = arith.constant 0 : i32
    %c0_i32_1 = arith.constant 0 : i32
    return %c0_i32, %c0_i32_0 : i32, i32
  }
}

</mosaic_0001>

<bundles_post_ra>
// kernel: resnet_forward.9
= control target key start
LH: loop header
LB: loop body
LE: loop exit
PB: predicated region body
PF: predicated region fallthrough
CT: control target
= control target key end

     0   :  { %vm258_vm0 = vcmask 261120   ;;  %vm644_vm1 = vcmask 130048   ;;  %s2993_s1 = inlined_call_operand.vmem [shape: bf16[32,16], index: 1, kind: input, shape index: {}]   ;;  %s2994_s0 = inlined_call_operand.vmem [shape: bf16[512,32], index: 0, kind: input, shape index: {}]   ;;  %s2995_s2 = inlined_call_operand.vmem [shape: f32[1,16], index: 2, kind: input, shape index: {}]   ;;  %s2996_s3 = inlined_call_operand.vmem [shape: f32[1,16], index: 3, kind: input, shape index: {}]   ;;  %s2997_s4 = inlined_call_operand.vmem [shape: f32[512,16], index: 4, kind: output, shape index: {}]  }
   0x1   :  { %v1492_v0 = vld [vmem:[%s2993_s1 + $0x8] sm:$0xff]   ;;  %v1493_v1 = vld [vmem:[%s2993_s1] sm:$0xff]   ;;  %v1496_v4 = vld [vmem:[%s2994_s0 + $0x10] sm:$0xff]  }
   0x2   :  { %1420 = vmatprep.subr.bf16.mxu0 %v1492_v0  ;;  %v1494_v2 = vld [vmem:[%s2994_s0] sm:$0xff]   ;;  %1488 = vmatprep.subr.bf16.mxu1 %v1492_v0  ;;  %v1495_v3 = vld [vmem:[%s2994_s0 + $0x8] sm:$0xff]   ;;  %v1497_v5 = vld [vmem:[%s2994_s0 + $0x18] sm:$0xff]  }
   0x3   :  { %1421 = vmatpush3.bf16.msra.mxu0 %v1492_v0  ;;  %1490 = vmatpush3.bf16.msra.mxu1 %v1492_v0  ;;  %v1498_v6 = vld [vmem:[%s2994_s0 + $0x20] sm:$0xff]   ;;  %v1511_v8 = vld [vmem:[%s2994_s0 + $0x88] sm:$0xff]   ;;  %v1512_v9 = vld [vmem:[%s2994_s0 + $0x90] sm:$0xff]  }
   0x4   :  { %1422 = vmatprep.subr.bf16.mxu0 %v1493_v1  ;;  %1424 = vmatprep.mubr.msk.bf16.mxu0 %vm258_vm0, %v1494_v2  ;;  %v1510_v7 = vld [vmem:[%s2994_s0 + $0x80] sm:$0xff]   ;;  %v1499_v10 = vld [vmem:[%s2994_s0 + $0x28] sm:$0xff]   ;;  %v1500_v11 = vld [vmem:[%s2994_s0 + $0x30] sm:$0xff]  }
   0x5   :  { %1489 = vmatprep.subr.bf16.mxu1 %v1493_v1  ;;  %1456 = vmatprep.mubr.msk.bf16.mxu1 %vm258_vm0, %v1510_v7  ;;  %v1513_v12 = vld [vmem:[%s2994_s0 + $0x98] sm:$0xff]   ;;  %v1514_v13 = vld [vmem:[%s2994_s0 + $0xa0] sm:$0xff]   ;;  %v1515_v16 = vld [vmem:[%s2994_s0 + $0xa8] sm:$0xff]  }
   0x6   :  { %v1501_v14 = vld [vmem:[%s2994_s0 + $0x38] sm:$0xff]   ;;  %v1502_v15 = vld [vmem:[%s2994_s0 + $0x40] sm:$0xff]   ;;  %v1516_v17 = vld [vmem:[%s2994_s0 + $0xb0] sm:$0xff]  }
   0x7   :  { %1423 = vmatpush3.bf16.msra.mxu0 %v1493_v1  ;;  %1491 = vmatpush3.bf16.msra.mxu1 %v1493_v1  ;;  %v1503_v18 = vld [vmem:[%s2994_s0 + $0x48] sm:$0xff]   ;;  %v1504_v19 = vld [vmem:[%s2994_s0 + $0x50] sm:$0xff]   ;;  %v1517_v20 = vld [vmem:[%s2994_s0 + $0xb8] sm:$0xff]  }
   0x8   :  { %v1518_v21 = vld [vmem:[%s2994_s0 + $0xc0] sm:$0xff]   ;;  %v1505_v22 = vld [vmem:[%s2994_s0 + $0x58] sm:$0xff]   ;;  %v1519_v24 = vld [vmem:[%s2994_s0 + $0xc8] sm:$0xff]  }
   0x9   :  { %v1506_v23 = vld [vmem:[%s2994_s0 + $0x60] sm:$0xff]   ;;  %v1520_v25 = vld [vmem:[%s2994_s0 + $0xd0] sm:$0xff]   ;;  %v1507_v26 = vld [vmem:[%s2994_s0 + $0x68] sm:$0xff]  }
   0xa   :  { %1425 = vmatmul.mubr.msk.bf16.vlgmr.msra.gmra.mxu0 %vm258_vm0, %v1495_v3  ;;  %1457 = vmatmul.mubr.msk.bf16.vlgmr.msra.gmra.mxu1 %vm258_vm0, %v1511_v8  ;;  %v1508_v27 = vld [vmem:[%s2994_s0 + $0x70] sm:$0xff]   ;;  %v1521_v28 = vld [vmem:[%s2994_s0 + $0xd8] sm:$0xff]   ;;  %v1522_v29 = vld [vmem:[%s2994_s0 + $0xe0] sm:$0xff]  }
   0xb   :  { %1428 = vmatprep.mubr.msk.bf16.mxu0 %vm258_vm0, %v1496_v4  ;;  %1460 = vmatprep.mubr.msk.bf16.mxu1 %vm258_vm0, %v1512_v9  ;;  %v1509_v30 = vld [vmem:[%s2994_s0 + $0x78] sm:$0xff]   ;;  %v1523_v31 = vld [vmem:[%s2994_s0 + $0xe8] sm:$0xff]   ;;  %v1524_v32 = vld [vmem:[%s2994_s0 + $0xf0] sm:$0xff]  }
   0xc   :  { %v1525_v33 = vld [vmem:[%s2994_s0 + $0xf8] sm:$0xff]  }
  0x12   :  { %1429 = vmatmul.mubr.msk.bf16.gmra.mxu0 %vm258_vm0, %v1497_v5  ;;  %1461 = vmatmul.mubr.msk.bf16.gmra.mxu1 %vm258_vm0, %v1513_v12 }
  0x13   :  { %1432 = vmatprep.mubr.msk.bf16.mxu0 %vm258_vm0, %v1498_v6  ;;  %1464 = vmatprep.mubr.msk.bf16.mxu1 %vm258_vm0, %v1514_v13 }
  0x1a   :  { %1433 = vmatmul.mubr.msk.bf16.gmra.mxu0 %vm258_vm0, %v1499_v10  ;;  %1465 = vmatmul.mubr.msk.bf16.gmra.mxu1 %vm258_vm0, %v1515_v16 }
  0x1b   :  { %1436 = vmatprep.mubr.msk.bf16.mxu0 %vm258_vm0, %v1500_v11  ;;  %1468 = vmatprep.mubr.msk.bf16.mxu1 %vm258_vm0, %v1516_v17 }
  0x22   :  { %1437 = vmatmul.mubr.msk.bf16.gmra.mxu0 %vm258_vm0, %v1501_v14  ;;  %1469 = vmatmul.mubr.msk.bf16.gmra.mxu1 %vm258_vm0, %v1517_v20 }
  0x23   :  { %1440 = vmatprep.mubr.msk.bf16.mxu0 %vm258_vm0, %v1502_v15  ;;  %1472 = vmatprep.mubr.msk.bf16.mxu1 %vm258_vm0, %v1518_v21 }
  0x2a   :  { %1441 = vmatmul.mubr.msk.bf16.gmra.mxu0 %vm258_vm0, %v1503_v18  ;;  %1473 = vmatmul.mubr.msk.bf16.gmra.mxu1 %vm258_vm0, %v1519_v24 }
  0x2b   :  { %1444 = vmatprep.mubr.msk.bf16.mxu0 %vm258_vm0, %v1504_v19  ;;  %1476 = vmatprep.mubr.msk.bf16.mxu1 %vm258_vm0, %v1520_v25 }
  0x32   :  { %1445 = vmatmul.mubr.msk.bf16.gmra.mxu0 %vm258_vm0, %v1505_v22  ;;  %1477 = vmatmul.mubr.msk.bf16.gmra.mxu1 %vm258_vm0, %v1521_v28 }
  0x33   :  { %1448 = vmatprep.mubr.msk.bf16.mxu0 %vm258_vm0, %v1506_v23  ;;  %1480 = vmatprep.mubr.msk.bf16.mxu1 %vm258_vm0, %v1522_v29 }
  0x3a   :  { %1449 = vmatmul.mubr.msk.bf16.gmra.mxu0 %vm258_vm0, %v1507_v26  ;;  %1481 = vmatmul.mubr.msk.bf16.gmra.mxu1 %vm258_vm0, %v1523_v31 }
  0x3b   :  { %1452 = vmatprep.mubr.msk.bf16.mxu0 %vm258_vm0, %v1508_v27  ;;  %1484 = vmatprep.mubr.msk.bf16.mxu1 %vm258_vm0, %v1524_v32 }
  0x42   :  { %1453 = vmatmul.mubr.msk.bf16.gmra.mxu0 %vm258_vm0, %v1509_v30  ;;  %1485 = vmatmul.mubr.msk.bf16.gmra.mxu1 %vm258_vm0, %v1525_v33 }
  0xca   :  { %v1687_v34 = vpop.f32.mrf.mxu0  ;;  %v1707_v46 = vpop.f32.mrf.mxu1 }
  0xcb   :  { %3044 = vst [vmem:[#allocation2_spill] sm:$0xff] %v1687_v34  ;;  %v648_v42 = vsel %vm644_vm1, %v1687_v34, 0.0 }
  0xcc   :  { %v1689_v35 = vpop.f32.mrf.mxu0  ;;  %v1713_v50 = vpop.f32.mrf.mxu1 }
  0xcd   :  { %v645_v38 = vsel %vm644_vm1, %v1689_v35, 0.0 }
  0xce   :  { %v1691_v36 = vpop.f32.mrf.mxu0  ;;  %v1719_v54 = vpop.f32.mrf.mxu1 }
  0xcf   :  { %3045 = vst [vmem:[#allocation3_spill] sm:$0xff] %v1691_v36  ;;  %v650_v45 = vsel %vm644_vm1, %v1691_v36, 0.0 }
  0xd0   :  { %v1693_v37 = vpop.f32.mrf.mxu0  ;;  %v1725_v58 = vpop.f32.mrf.mxu1 }
  0xd1   :  { %v646_v39 = vsel %vm644_vm1, %v1693_v37, 0.0 }
  0xd2   :  { %v647_v40 = vadd.f32 %v646_v39, %v645_v38  ;;  %v1699_v41 = vpop.f32.mrf.mxu0  ;;  %v1733_v0 = vpop.f32.mrf.mxu1 }
  0xd3   :  { %v656_v57 = vsel %vm644_vm1, %v1699_v41, 0.0 }
  0xd4   :  { %v649_v43 = vadd.f32 %v648_v42, %v647_v40  ;;  %v1703_v44 = vpop.f32.mrf.mxu0  ;;  %v1743_v7 = vpop.f32.mrf.mxu1 }
  0xd5   :  { %3046 = vst [vmem:[#allocation4_spill] sm:$0xff] %v1703_v44  ;;  %v652_v49 = vsel %vm644_vm1, %v1703_v44, 0.0 }
  0xd6   :  { %v651_v47 = vadd.f32 %v650_v45, %v649_v43  ;;  %v1709_v48 = vpop.f32.mrf.mxu0  ;;  %v1753_v14 = vpop.f32.mrf.mxu1 }
  0xd7   :  { %v658_v61 = vsel %vm644_vm1, %v1709_v48, 0.0  ;;  %3048 = vst [vmem:[#allocation6_spill] sm:$0xff] %v1753_v14 }
  0xd8   :  { %v653_v51 = vadd.f32 %v652_v49, %v651_v47  ;;  %v1715_v52 = vpop.f32.mrf.mxu0  ;;  %v1763_v21 = vpop.f32.mrf.mxu1 }
  0xd9   :  { %3047 = vst [vmem:[#allocation5_spill] sm:$0xff] %v1715_v52  ;;  %v654_v53 = vsel %vm644_vm1, %v1715_v52, 0.0  ;;  %3049 = vst [vmem:[#allocation7_spill] sm:$0xff] %v1763_v21 }
  0xda   :  { %v655_v55 = vadd.f32 %v654_v53, %v653_v51  ;;  %v1721_v56 = vpop.f32.mrf.mxu0  ;;  %v1773_v28 = vpop.f32.mrf.mxu1 }
  0xdb   :  { %v664_v8 = vsel %vm644_vm1, %v1721_v56, 0.0  ;;  %3050 = vst [vmem:[#allocation8_spill] sm:$0xff] %v1773_v28 }
  0xdc   :  { %v657_v59 = vadd.f32 %v656_v57, %v655_v55  ;;  %v1727_v60 = vpop.f32.mrf.mxu0  ;;  %v1783_v39 = vpop.f32.mrf.mxu1 }
  0xdd   :  { %v660_v1 = vsel %vm644_vm1, %v1727_v60, 0.0  ;;  %3051 = vst [vmem:[#allocation9_spill] sm:$0xff] %v1783_v39 }
  0xde   :  { %v659_v62 = vadd.f32 %v658_v61, %v657_v59  ;;  %v1731_v63 = vpop.f32.mrf.mxu0  ;;  %v1793_v51 = vpop.f32.mrf.mxu1 }
  0xdf   :  { %v666_v11 = vsel %vm644_vm1, %v1731_v63, 0.0  ;;  %3052 = vst [vmem:[#allocation10_spill] sm:$0xff] %v1793_v51 }
  0xe0   :  { %v661_v2 = vadd.f32 %v660_v1, %v659_v62  ;;  %v1737_v3 = vpop.f32.mrf.mxu0  ;;  %v1803_v1 = vpop.f32.mrf.mxu1 }
  0xe1   :  { %v662_v4 = vsel %vm644_vm1, %v1737_v3, 0.0  ;;  %3053 = vst [vmem:[#allocation11_spill] sm:$0xff] %v1803_v1 }
  0xe2   :  { %v663_v5 = vadd.f32 %v662_v4, %v661_v2  ;;  %v1741_v6 = vpop.f32.mrf.mxu0 }
  0xe3   :  { %v672_v22 = vsel %vm644_vm1, %v1741_v6, 0.0 }
  0xe4   :  { %v665_v9 = vadd.f32 %v664_v8, %v663_v5  ;;  %v1747_v10 = vpop.f32.mrf.mxu0 }
  0xe5   :  { %v668_v15 = vsel %vm644_vm1, %v1747_v10, 0.0 }
  0xe6   :  { %v667_v12 = vadd.f32 %v666_v11, %v665_v9  ;;  %v1751_v13 = vpop.f32.mrf.mxu0 }
  0xe7   :  { %v674_v25 = vsel %vm644_vm1, %v1751_v13, 0.0 }
  0xe8   :  { %v669_v16 = vadd.f32 %v668_v15, %v667_v12  ;;  %v1757_v17 = vpop.f32.mrf.mxu0  ;;  %v1813_v12 = vpop.f32.mrf.mxu1 }
  0xe9   :  { %v670_v18 = vsel %vm644_vm1, %v1757_v17, 0.0  ;;  %3054 = vst [vmem:[#allocation12_spill] sm:$0xff] %v1813_v12 }
  0xea   :  { %v671_v19 = vadd.f32 %v670_v18, %v669_v16  ;;  %v1761_v20 = vpop.f32.mrf.mxu0 }
  0xeb   :  { %v680_v40 = vsel %vm644_vm1, %v1761_v20, 0.0 }
  0xec   :  { %v673_v23 = vadd.f32 %v672_v22, %v671_v19  ;;  %v1767_v24 = vpop.f32.mrf.mxu0 }
  0xed   :  { %v676_v29 = vsel %vm644_vm1, %v1767_v24, 0.0 }
  0xee   :  { %v675_v26 = vadd.f32 %v674_v25, %v673_v23  ;;  %v1771_v27 = vpop.f32.mrf.mxu0  ;;  %v1823_v25 = vpop.f32.mrf.mxu1 }
  0xef   :  { %v682_v45 = vsel %vm644_vm1, %v1771_v27, 0.0  ;;  %3055 = vst [vmem:[#allocation13_spill] sm:$0xff] %v1823_v25 }
  0xf0   :  { %v677_v30 = vadd.f32 %v676_v29, %v675_v26  ;;  %v1777_v31 = vpop.f32.mrf.mxu0 }
  0xf1   :  { %v678_v32 = vsel %vm644_vm1, %v1777_v31, 0.0 }
  0xf2   :  { %v679_v33 = vadd.f32 %v678_v32, %v677_v30  ;;  %v1781_v38 = vpop.f32.mrf.mxu0 }
  0xf3   :  { %v688_v2 = vsel %vm644_vm1, %v1781_v38, 0.0 }
  0xf4   :  { %v681_v42 = vadd.f32 %v680_v40, %v679_v33  ;;  %v1787_v43 = vpop.f32.mrf.mxu0 }
  0xf5   :  { %v684_v53 = vsel %vm644_vm1, %v1787_v43, 0.0 }
  0xf6   :  { %v683_v47 = vadd.f32 %v682_v45, %v681_v42  ;;  %v1791_v49 = vpop.f32.mrf.mxu0  ;;  %v1833_v42 = vpop.f32.mrf.mxu1 }
  0xf7   :  { %v690_v8 = vsel %vm644_vm1, %v1791_v49, 0.0  ;;  %3056 = vst [vmem:[#allocation14_spill] sm:$0xff] %v1833_v42 }
  0xf8   :  { %v685_v55 = vadd.f32 %v684_v53, %v683_v47  ;;  %v1797_v57 = vpop.f32.mrf.mxu0 }
  0xf9   :  { %v686_v59 = vsel %vm644_vm1, %v1797_v57, 0.0 }
  0xfa   :  { %v687_v61 = vadd.f32 %v686_v59, %v685_v55  ;;  %v1801_v62 = vpop.f32.mrf.mxu0 }
  0xfb   :  { %v696_v26 = vsel %vm644_vm1, %v1801_v62, 0.0 }
  0xfc   :  { %v689_v4 = vadd.f32 %v688_v2, %v687_v61  ;;  %v1807_v5 = vpop.f32.mrf.mxu0  ;;  %v1841_v61 = vpop.f32.mrf.mxu1 }
  0xfd   :  { %v692_v15 = vsel %vm644_vm1, %v1807_v5, 0.0  ;;  %3057 = vst [vmem:[#allocation15_spill] sm:$0xff] %v1841_v61 }
  0xfe   :  { %v691_v9 = vadd.f32 %v690_v8, %v689_v4  ;;  %v1811_v11 = vpop.f32.mrf.mxu0 }
  0xff   :  { %v698_v32 = vsel %vm644_vm1, %v1811_v11, 0.0 }
 0x100   :  { %v693_v16 = vadd.f32 %v692_v15, %v691_v9  ;;  %v1817_v18 = vpop.f32.mrf.mxu0  ;;  %v1847_v15 = vpop.f32.mrf.mxu1 }
 0x101   :  { %v694_v19 = vsel %vm644_vm1, %v1817_v18, 0.0  ;;  %3058 = vst [vmem:[#allocation16_spill] sm:$0xff] %v1847_v15 }
 0x102   :  { %v695_v22 = vadd.f32 %v694_v19, %v693_v16  ;;  %v1821_v23 = vpop.f32.mrf.mxu0  ;;  %v708_v16 = vsel %vm644_vm1, %v1713_v50, 0.0 }
 0x103   :  { %v704_v2 = vsel %vm644_vm1, %v1821_v23, 0.0 }
 0x104   :  { %v697_v29 = vadd.f32 %v696_v26, %v695_v22  ;;  %v1827_v30 = vpop.f32.mrf.mxu0  ;;  %v710_v22 = vsel %vm644_vm1, %v1725_v58, 0.0 }
 0x105   :  { %v700_v45 = vsel %vm644_vm1, %v1827_v30, 0.0 }
 0x106   :  { %v699_v33 = vadd.f32 %v698_v32, %v697_v29  ;;  %v1831_v40 = vpop.f32.mrf.mxu0  ;;  %v1853_v29 = vpop.f32.mrf.mxu1  ;;  %v712_v32 = vsel %vm644_vm1, %v1707_v46, 0.0 }
 0x107   :  { %v706_v8 = vsel %vm644_vm1, %v1831_v40, 0.0  ;;  %3059 = vst [vmem:[#allocation17_spill] sm:$0xff] %v1853_v29 }
 0x108   :  { %v701_v47 = vadd.f32 %v700_v45, %v699_v33  ;;  %v1837_v53 = vpop.f32.mrf.mxu0  ;;  %v714_v45 = vsel %vm644_vm1, %v1719_v54, 0.0 }
 0x109   :  { %v702_v55 = vsel %vm644_vm1, %v1837_v53, 0.0 }
 0x10a   :  { %v703_v59 = vadd.f32 %v702_v55, %v701_v47  ;;  %v1859_v55 = vpop.f32.mrf.mxu1 }
 0x10b   :  { %3060 = vst [vmem:[#allocation18_spill] sm:$0xff] %v1859_v55 }
 0x10c   :  { %v705_v4 = vadd.f32 %v704_v2, %v703_v59  ;;  %v716_v59 = vsel %vm644_vm1, %v1743_v7, 0.0 }
 0x10e   :  { %v707_v9 = vadd.f32 %v706_v8, %v705_v4  ;;  %v718_v4 = vsel %vm644_vm1, %v1763_v21, 0.0 }
 0x110   :  { %v709_v19 = vadd.f32 %v708_v16, %v707_v9  ;;  %v1865_v9 = vpop.f32.mrf.mxu1  ;;  %v720_v16 = vsel %vm644_vm1, %v1733_v0, 0.0 }
 0x111   :  { %3061 = vst [vmem:[#allocation19_spill] sm:$0xff] %v1865_v9 }
 0x112   :  { %v711_v26 = vadd.f32 %v710_v22, %v709_v19  ;;  %v722_v22 = vsel %vm644_vm1, %v1753_v14, 0.0 }
 0x114   :  { %v713_v33 = vadd.f32 %v712_v32, %v711_v26  ;;  %v1871_v32 = vpop.f32.mrf.mxu1 }
 0x115   :  { %3062 = vst [vmem:[#allocation20_spill] sm:$0xff] %v1871_v32 }
 0x116   :  { %v715_v47 = vadd.f32 %v714_v45, %v713_v33  ;;  %v724_v33 = vsel %vm644_vm1, %v1783_v39, 0.0  ;;  %v732_v39 = vsel %vm644_vm1, %v1823_v25, 0.0  ;;  %v740_v25 = vsel %vm644_vm1, %v1853_v29, 0.0 }
 0x118   :  { %v717_v2 = vadd.f32 %v716_v59, %v715_v47  ;;  %v726_v47 = vsel %vm644_vm1, %v1803_v1, 0.0 }
 0x11a   :  { %v719_v8 = vadd.f32 %v718_v4, %v717_v2  ;;  %v1877_v2 = vpop.f32.mrf.mxu1  ;;  %v728_v4 = vsel %vm644_vm1, %v1773_v28, 0.0  ;;  %v736_v28 = vsel %vm644_vm1, %v1813_v12, 0.0  ;;  %v744_v12 = vsel %vm644_vm1, %v1847_v15, 0.0 }
 0x11b   :  { %3063 = vst [vmem:[#allocation21_spill] sm:$0xff] %v1877_v2  ;;  %v748_v29 = vsel %vm644_vm1, %v1877_v2, 0.0  ;;  %v752_v15 = vsel %vm644_vm1, %v1871_v32, 0.0 }
 0x11c   :  { %v721_v19 = vadd.f32 %v720_v16, %v719_v8  ;;  %v730_v16 = vsel %vm644_vm1, %v1793_v51, 0.0 }
 0x11e   :  { %v723_v26 = vadd.f32 %v722_v22, %v721_v19  ;;  %v1883_v22 = vpop.f32.mrf.mxu1 }
 0x11f   :  { %3064 = vst [vmem:[#allocation22_spill] sm:$0xff] %v1883_v22 }
 0x120   :  { %v725_v45 = vadd.f32 %v724_v33, %v723_v26  ;;  %v734_v33 = vsel %vm644_vm1, %v1841_v61, 0.0 }
 0x122   :  { %v727_v59 = vadd.f32 %v726_v47, %v725_v45  ;;  %v1889_v47 = vpop.f32.mrf.mxu1 }
 0x123   :  { %3065 = vst [vmem:[#allocation23_spill] sm:$0xff] %v1889_v47 }
 0x124   :  { %v729_v8 = vadd.f32 %v728_v4, %v727_v59  ;;  %v738_v4 = vsel %vm644_vm1, %v1833_v42, 0.0 }
 0x126   :  { %v731_v19 = vadd.f32 %v730_v16, %v729_v8  ;;  %v1895_v16 = vpop.f32.mrf.mxu1 }
 0x127   :  { %3066 = vst [vmem:[#allocation24_spill] sm:$0xff] %v1895_v16  ;;  %v760_v32 = vsel %vm644_vm1, %v1895_v16, 0.0 }
 0x128   :  { %v733_v26 = vadd.f32 %v732_v39, %v731_v19  ;;  %v742_v19 = vsel %vm644_vm1, %v1865_v9, 0.0 }
 0x12a   :  { %v735_v45 = vadd.f32 %v734_v33, %v733_v26  ;;  %v1901_v33 = vpop.f32.mrf.mxu1 }
 0x12b   :  { %3067 = vst [vmem:[#allocation25_spill] sm:$0xff] %v1901_v33  ;;  %v756_v2 = vsel %vm644_vm1, %v1901_v33, 0.0 }
 0x12c   :  { %v737_v59 = vadd.f32 %v736_v28, %v735_v45  ;;  %v746_v45 = vsel %vm644_vm1, %v1859_v55, 0.0 }
 0x12e   :  { %v739_v8 = vadd.f32 %v738_v4, %v737_v59  ;;  %v1907_v4 = vpop.f32.mrf.mxu1 }
 0x12f   :  { %3068 = vst [vmem:[#allocation26_spill] sm:$0xff] %v1907_v4 }
 0x130   :  { %v741_v39 = vadd.f32 %v740_v25, %v739_v8  ;;  %v750_v8 = vsel %vm644_vm1, %v1889_v47, 0.0 }
 0x132   :  { %v743_v26 = vadd.f32 %v742_v19, %v741_v39  ;;  %v1913_v19 = vpop.f32.mrf.mxu1 }
 0x133   :  { %3069 = vst [vmem:[#allocation27_spill] sm:$0xff] %v1913_v19 }
 0x134   :  { %v745_v28 = vadd.f32 %v744_v12, %v743_v26  ;;  %v754_v26 = vsel %vm644_vm1, %v1883_v22, 0.0 }
 0x136   :  { %v747_v59 = vadd.f32 %v746_v45, %v745_v28  ;;  %v1919_v45 = vpop.f32.mrf.mxu1 }
 0x137   :  { %3070 = vst [vmem:[#allocation28_spill] sm:$0xff] %v1919_v45  ;;  %v768_v16 = vsel %vm644_vm1, %v1919_v45, 0.0 }
 0x138   :  { %v749_v25 = vadd.f32 %v748_v29, %v747_v59  ;;  %v758_v59 = vsel %vm644_vm1, %v1913_v19, 0.0 }
 0x13a   :  { %v751_v39 = vadd.f32 %v750_v8, %v749_v25  ;;  %v1925_v8 = vpop.f32.mrf.mxu1 }
 0x13b   :  { %3071 = vst [vmem:[#allocation29_spill] sm:$0xff] %v1925_v8  ;;  %v764_v33 = vsel %vm644_vm1, %v1925_v8, 0.0 }
 0x13c   :  { %v753_v12 = vadd.f32 %v752_v15, %v751_v39  ;;  %v762_v39 = vsel %vm644_vm1, %v1907_v4, 0.0 }
 0x13e   :  { %v755_v28 = vadd.f32 %v754_v26, %v753_v12  ;;  %v1931_v26 = vpop.f32.mrf.mxu1 }
 0x13f   :  { %3072 = vst [vmem:[#allocation30_spill] sm:$0xff] %v1931_v26 }
 0x140   :  { %v757_v29 = vadd.f32 %v756_v2, %v755_v28  ;;  %v1935_v28 = vpop.f32.mrf.mxu1 }
 0x141   :  { %3073 = vst [vmem:[#allocation31_spill] sm:$0xff] %v1935_v28 }
 0x142   :  { %v759_v25 = vadd.f32 %v758_v59, %v757_v29  ;;  %v766_v29 = vsel %vm644_vm1, %v1935_v28, 0.0 }
 0x144   :  { %v761_v15 = vadd.f32 %v760_v32, %v759_v25  ;;  %v770_v25 = vsel %vm644_vm1, %v1931_v26, 0.0 }
 0x146   :  { %v763_v12 = vadd.f32 %v762_v39, %v761_v15 }
 0x148   :  { %v765_v2 = vadd.f32 %v764_v33, %v763_v12 }
 0x14a   :  { %v767_v59 = vadd.f32 %v766_v29, %v765_v2 }
 0x14c   :  { %v769_v32 = vadd.f32 %v768_v16, %v767_v59 }
 0x14e   :  { %v771_v15 = vadd.f32 %v770_v25, %v769_v32 }
 0x150   :  { %v772_v39 = vrot.slane %v771_v15, 4 }
 0x152   :  { %v773_v4 = vadd.f32 %v772_v39, %v771_v15 }
 0x154   :  { %v774_v19 = vrot.slane %v773_v4, 2 }
 0x156   :  { %v775_v22 = vadd.f32 %v774_v19, %v773_v4 }
 0x158   :  { %v776_v8 = vrot.slane %v775_v22, 1 }
 0x15a   :  { %v777_v33 = vadd.f32 %v776_v8, %v775_v22 }
 0x15c   :  { %v1943_v12 = vmul.f32 0.001953125, %v777_v33 }
 0x15e   :  { %v779_v28 = vsub.f32 %v1689_v35, %v1943_v12  ;;  %v780_v2 = vsub.f32 %v1693_v37, %v1943_v12  ;;  %v781_v16 = vsub.f32 %v1687_v34, %v1943_v12  ;;  %v782_v29 = vsub.f32 %v1691_v36, %v1943_v12 }
 0x15f   :  { %v783_v4 = vsub.f32 %v1703_v44, %v1943_v12  ;;  %v784_v19 = vsub.f32 %v1715_v52, %v1943_v12  ;;  %v785_v33 = vsub.f32 %v1699_v41, %v1943_v12  ;;  %v786_v44 = vsub.f32 %v1709_v48, %v1943_v12 }
 0x160   :  { %v843_v59 = vmul.f32 %v779_v28, %v779_v28  ;;  %v844_v32 = vmul.f32 %v780_v2, %v780_v2  ;;  %v845_v22 = vmul.f32 %v781_v16, %v781_v16  ;;  %v846_v8 = vmul.f32 %v782_v29, %v782_v29 }
 0x161   :  { %v847_v34 = vmul.f32 %v783_v4, %v783_v4  ;;  %v848_v16 = vmul.f32 %v784_v19, %v784_v19  ;;  %v787_v29 = vsub.f32 %v1727_v60, %v1943_v12  ;;  %v788_v4 = vsub.f32 %v1737_v3, %v1943_v12 }
 0x162   :  { %v907_v25 = vsel %vm644_vm1, %v843_v59, 0.0  ;;  %v908_v15 = vsel %vm644_vm1, %v844_v32, 0.0  ;;  %v910_v28 = vsel %vm644_vm1, %v845_v22, 0.0  ;;  %v912_v36 = vsel %vm644_vm1, %v846_v8, 0.0 }
 0x163   :  { %v909_v39 = vadd.f32 %v908_v15, %v907_v25  ;;  %v849_v59 = vmul.f32 %v785_v33, %v785_v33  ;;  %v914_v32 = vsel %vm644_vm1, %v847_v34, 0.0  ;;  %v850_v15 = vmul.f32 %v786_v44, %v786_v44 }
 0x164   :  { %v916_v22 = vsel %vm644_vm1, %v848_v16, 0.0  ;;  %v789_v19 = vsub.f32 %v1721_v56, %v1943_v12  ;;  %v790_v33 = vsub.f32 %v1731_v63, %v1943_v12  ;;  %v791_v44 = vsub.f32 %v1747_v10, %v1943_v12 }
 0x165   :  { %v911_v2 = vadd.f32 %v910_v28, %v909_v39  ;;  %v851_v28 = vmul.f32 %v787_v29, %v787_v29  ;;  %v920_v34 = vsel %vm644_vm1, %v850_v15, 0.0  ;;  %v792_v29 = vsub.f32 %v1757_v17, %v1943_v12 }
 0x167   :  { %v913_v52 = vadd.f32 %v912_v36, %v911_v2  ;;  %v918_v36 = vsel %vm644_vm1, %v849_v59, 0.0  ;;  %v852_v2 = vmul.f32 %v788_v4, %v788_v4  ;;  %v922_v16 = vsel %vm644_vm1, %v851_v28, 0.0 }
 0x168   :  { %v793_v4 = vsub.f32 %v1741_v6, %v1943_v12 }
 0x169   :  { %v915_v25 = vadd.f32 %v914_v32, %v913_v52  ;;  %v853_v32 = vmul.f32 %v789_v19, %v789_v19  ;;  %v924_v59 = vsel %vm644_vm1, %v852_v2, 0.0  ;;  %v794_v19 = vsub.f32 %v1751_v13, %v1943_v12 }
 0x16b   :  { %v917_v39 = vadd.f32 %v916_v22, %v915_v25  ;;  %v854_v22 = vmul.f32 %v790_v33, %v790_v33  ;;  %v926_v15 = vsel %vm644_vm1, %v853_v32, 0.0  ;;  %v795_v33 = vsub.f32 %v1767_v24, %v1943_v12 }
 0x16d   :  { %v919_v8 = vadd.f32 %v918_v36, %v917_v39  ;;  %v855_v36 = vmul.f32 %v791_v44, %v791_v44  ;;  %v928_v28 = vsel %vm644_vm1, %v854_v22, 0.0  ;;  %v796_v44 = vsub.f32 %v1777_v31, %v1943_v12 }
 0x16f   :  { %v921_v52 = vadd.f32 %v920_v34, %v919_v8  ;;  %v856_v34 = vmul.f32 %v792_v29, %v792_v29  ;;  %v930_v2 = vsel %vm644_vm1, %v855_v36, 0.0  ;;  %v797_v29 = vsub.f32 %v1761_v20, %v1943_v12 }
 0x171   :  { %v923_v25 = vadd.f32 %v922_v16, %v921_v52  ;;  %v857_v16 = vmul.f32 %v793_v4, %v793_v4  ;;  %v932_v32 = vsel %vm644_vm1, %v856_v34, 0.0  ;;  %v798_v4 = vsub.f32 %v1771_v27, %v1943_v12 }
 0x173   :  { %v925_v39 = vadd.f32 %v924_v59, %v923_v25  ;;  %v858_v59 = vmul.f32 %v794_v19, %v794_v19  ;;  %v934_v22 = vsel %vm644_vm1, %v857_v16, 0.0  ;;  %v799_v19 = vsub.f32 %v1787_v43, %v1943_v12 }
 0x175   :  { %v927_v8 = vadd.f32 %v926_v15, %v925_v39  ;;  %v859_v15 = vmul.f32 %v795_v33, %v795_v33  ;;  %v936_v36 = vsel %vm644_vm1, %v858_v59, 0.0  ;;  %v800_v33 = vsub.f32 %v1797_v57, %v1943_v12 }
 0x177   :  { %v929_v52 = vadd.f32 %v928_v28, %v927_v8  ;;  %v860_v28 = vmul.f32 %v796_v44, %v796_v44  ;;  %v938_v34 = vsel %vm644_vm1, %v859_v15, 0.0  ;;  %v801_v44 = vsub.f32 %v1781_v38, %v1943_v12 }
 0x179   :  { %v931_v25 = vadd.f32 %v930_v2, %v929_v52  ;;  %v861_v2 = vmul.f32 %v797_v29, %v797_v29  ;;  %v940_v16 = vsel %vm644_vm1, %v860_v28, 0.0  ;;  %v802_v29 = vsub.f32 %v1791_v49, %v1943_v12 }
 0x17b   :  { %v933_v39 = vadd.f32 %v932_v32, %v931_v25  ;;  %v862_v32 = vmul.f32 %v798_v4, %v798_v4  ;;  %v942_v59 = vsel %vm644_vm1, %v861_v2, 0.0  ;;  %v803_v4 = vsub.f32 %v1807_v5, %v1943_v12 }
 0x17d   :  { %v935_v8 = vadd.f32 %v934_v22, %v933_v39  ;;  %v863_v22 = vmul.f32 %v799_v19, %v799_v19  ;;  %v944_v15 = vsel %vm644_vm1, %v862_v32, 0.0  ;;  %v804_v19 = vsub.f32 %v1817_v18, %v1943_v12 }
 0x17f   :  { %v937_v52 = vadd.f32 %v936_v36, %v935_v8  ;;  %v864_v36 = vmul.f32 %v800_v33, %v800_v33  ;;  %v946_v28 = vsel %vm644_vm1, %v863_v22, 0.0  ;;  %v805_v33 = vsub.f32 %v1801_v62, %v1943_v12 }
 0x181   :  { %v939_v25 = vadd.f32 %v938_v34, %v937_v52  ;;  %v865_v34 = vmul.f32 %v801_v44, %v801_v44  ;;  %v948_v2 = vsel %vm644_vm1, %v864_v36, 0.0  ;;  %v806_v44 = vsub.f32 %v1811_v11, %v1943_v12 }
 0x183   :  { %v941_v39 = vadd.f32 %v940_v16, %v939_v25  ;;  %v866_v16 = vmul.f32 %v802_v29, %v802_v29  ;;  %v950_v32 = vsel %vm644_vm1, %v865_v34, 0.0  ;;  %v807_v29 = vsub.f32 %v1827_v30, %v1943_v12 }
 0x185   :  { %v943_v8 = vadd.f32 %v942_v59, %v941_v39  ;;  %v867_v59 = vmul.f32 %v803_v4, %v803_v4  ;;  %v952_v22 = vsel %vm644_vm1, %v866_v16, 0.0  ;;  %v808_v4 = vsub.f32 %v1837_v53, %v1943_v12 }
 0x187   :  { %v945_v52 = vadd.f32 %v944_v15, %v943_v8  ;;  %v868_v15 = vmul.f32 %v804_v19, %v804_v19  ;;  %v954_v36 = vsel %vm644_vm1, %v867_v59, 0.0  ;;  %v809_v19 = vsub.f32 %v1821_v23, %v1943_v12 }
 0x189   :  { %v947_v25 = vadd.f32 %v946_v28, %v945_v52  ;;  %v869_v28 = vmul.f32 %v805_v33, %v805_v33  ;;  %v956_v34 = vsel %vm644_vm1, %v868_v15, 0.0  ;;  %v810_v33 = vsub.f32 %v1831_v40, %v1943_v12 }
 0x18b   :  { %v949_v39 = vadd.f32 %v948_v2, %v947_v25  ;;  %v870_v2 = vmul.f32 %v806_v44, %v806_v44  ;;  %v958_v16 = vsel %vm644_vm1, %v869_v28, 0.0  ;;  %v811_v44 = vsub.f32 %v1713_v50, %v1943_v12 }
 0x18d   :  { %v951_v8 = vadd.f32 %v950_v32, %v949_v39  ;;  %v871_v32 = vmul.f32 %v807_v29, %v807_v29  ;;  %v960_v59 = vsel %vm644_vm1, %v870_v2, 0.0  ;;  %v812_v29 = vsub.f32 %v1725_v58, %v1943_v12 }
 0x18f   :  { %v953_v52 = vadd.f32 %v952_v22, %v951_v8  ;;  %v872_v22 = vmul.f32 %v808_v4, %v808_v4  ;;  %v962_v15 = vsel %vm644_vm1, %v871_v32, 0.0  ;;  %v813_v4 = vsub.f32 %v1707_v46, %v1943_v12 }
 0x191   :  { %v955_v25 = vadd.f32 %v954_v36, %v953_v52  ;;  %v873_v36 = vmul.f32 %v809_v19, %v809_v19  ;;  %v964_v28 = vsel %vm644_vm1, %v872_v22, 0.0  ;;  %v814_v19 = vsub.f32 %v1719_v54, %v1943_v12 }
 0x193   :  { %v957_v39 = vadd.f32 %v956_v34, %v955_v25  ;;  %v874_v34 = vmul.f32 %v810_v33, %v810_v33  ;;  %v966_v2 = vsel %vm644_vm1, %v873_v36, 0.0  ;;  %v815_v33 = vsub.f32 %v1743_v7, %v1943_v12 }
 0x195   :  { %v959_v8 = vadd.f32 %v958_v16, %v957_v39  ;;  %v875_v16 = vmul.f32 %v811_v44, %v811_v44  ;;  %v968_v32 = vsel %vm644_vm1, %v874_v34, 0.0  ;;  %v816_v44 = vsub.f32 %v1763_v21, %v1943_v12 }
 0x197   :  { %v961_v52 = vadd.f32 %v960_v59, %v959_v8  ;;  %v876_v59 = vmul.f32 %v812_v29, %v812_v29  ;;  %v970_v22 = vsel %vm644_vm1, %v875_v16, 0.0  ;;  %v817_v29 = vsub.f32 %v1733_v0, %v1943_v12 }
 0x199   :  { %v963_v25 = vadd.f32 %v962_v15, %v961_v52  ;;  %v877_v15 = vmul.f32 %v813_v4, %v813_v4  ;;  %v972_v36 = vsel %vm644_vm1, %v876_v59, 0.0  ;;  %v818_v4 = vsub.f32 %v1753_v14, %v1943_v12 }
 0x19a   :  { %v881_v21 = vmul.f32 %v817_v29, %v817_v29  ;;  %v822_v29 = vsub.f32 %v1793_v51, %v1943_v12 }
 0x19b   :  { %v965_v39 = vadd.f32 %v964_v28, %v963_v25  ;;  %v878_v28 = vmul.f32 %v814_v19, %v814_v19  ;;  %v974_v34 = vsel %vm644_vm1, %v877_v15, 0.0 }
 0x19d   :  { %v967_v8 = vadd.f32 %v966_v2, %v965_v39  ;;  %v879_v2 = vmul.f32 %v815_v33, %v815_v33  ;;  %v976_v16 = vsel %vm644_vm1, %v878_v28, 0.0  ;;  %v820_v33 = vsub.f32 %v1803_v1, %v1943_v12 }
 0x19e   :  { %v982_v28 = vsel %vm644_vm1, %v881_v21, 0.0 }
 0x19f   :  { %v969_v52 = vadd.f32 %v968_v32, %v967_v8  ;;  %v880_v32 = vmul.f32 %v816_v44, %v816_v44  ;;  %v978_v59 = vsel %vm644_vm1, %v879_v2, 0.0 }
 0x1a1   :  { %v971_v25 = vadd.f32 %v970_v22, %v969_v52  ;;  %v3074_v22 = vld [vmem:[#allocation9_spill] sm:$0xff]  ;;  %v980_v15 = vsel %vm644_vm1, %v880_v32, 0.0 }
 0x1a2   :  { %v819_v19 = vsub.f32 %v3074_v22, %v1943_v12 }
 0x1a3   :  { %v973_v39 = vadd.f32 %v972_v36, %v971_v25  ;;  %v882_v36 = vmul.f32 %v818_v4, %v818_v4 }
 0x1a4   :  { %v883_v14 = vmul.f32 %v819_v19, %v819_v19  ;;  %v824_v19 = vsub.f32 %v1841_v61, %v1943_v12 }
 0x1a5   :  { %v975_v8 = vadd.f32 %v974_v34, %v973_v39  ;;  %v3075_v34 = vld [vmem:[#allocation8_spill] sm:$0xff]  ;;  %v984_v2 = vsel %vm644_vm1, %v882_v36, 0.0 }
 0x1a6   :  { %v821_v44 = vsub.f32 %v3075_v34, %v1943_v12  ;;  %v986_v32 = vsel %vm644_vm1, %v883_v14, 0.0 }
 0x1a7   :  { %v977_v52 = vadd.f32 %v976_v16, %v975_v8  ;;  %v884_v16 = vmul.f32 %v820_v33, %v820_v33 }
 0x1a8   :  { %v885_v1 = vmul.f32 %v821_v44, %v821_v44  ;;  %v826_v44 = vsub.f32 %v1833_v42, %v1943_v12 }
 0x1a9   :  { %v979_v25 = vadd.f32 %v978_v59, %v977_v52  ;;  %v3076_v59 = vld [vmem:[#allocation13_spill] sm:$0xff]  ;;  %v988_v21 = vsel %vm644_vm1, %v884_v16, 0.0 }
 0x1aa   :  { %v823_v4 = vsub.f32 %v3076_v59, %v1943_v12  ;;  %v990_v36 = vsel %vm644_vm1, %v885_v1, 0.0 }
 0x1ab   :  { %v981_v39 = vadd.f32 %v980_v15, %v979_v25  ;;  %v886_v15 = vmul.f32 %v822_v29, %v822_v29 }
 0x1ac   :  { %v887_v51 = vmul.f32 %v823_v4, %v823_v4  ;;  %v828_v4 = vsub.f32 %v1865_v9, %v1943_v12 }
 0x1ad   :  { %v983_v8 = vadd.f32 %v982_v28, %v981_v39  ;;  %v3077_v28 = vld [vmem:[#allocation12_spill] sm:$0xff]  ;;  %v992_v14 = vsel %vm644_vm1, %v886_v15, 0.0 }
 0x1ae   :  { %v825_v33 = vsub.f32 %v3077_v28, %v1943_v12  ;;  %v994_v16 = vsel %vm644_vm1, %v887_v51, 0.0 }
 0x1af   :  { %v985_v52 = vadd.f32 %v984_v2, %v983_v8  ;;  %v888_v2 = vmul.f32 %v824_v19, %v824_v19 }
 0x1b0   :  { %v889_v61 = vmul.f32 %v825_v33, %v825_v33  ;;  %v830_v33 = vsub.f32 %v1859_v55, %v1943_v12 }
 0x1b1   :  { %v987_v25 = vadd.f32 %v986_v32, %v985_v52  ;;  %v3078_v32 = vld [vmem:[#allocation17_spill] sm:$0xff]  ;;  %v996_v1 = vsel %vm644_vm1, %v888_v2, 0.0 }
 0x1b2   :  { %v827_v29 = vsub.f32 %v3078_v32, %v1943_v12  ;;  %v998_v15 = vsel %vm644_vm1, %v889_v61, 0.0 }
 0x1b3   :  { %v989_v39 = vadd.f32 %v988_v21, %v987_v25  ;;  %v890_v21 = vmul.f32 %v826_v44, %v826_v44 }
 0x1b4   :  { %v891_v42 = vmul.f32 %v827_v29, %v827_v29  ;;  %v832_v29 = vsub.f32 %v1889_v47, %v1943_v12 }
 0x1b5   :  { %v991_v8 = vadd.f32 %v990_v36, %v989_v39  ;;  %v3079_v36 = vld [vmem:[#allocation16_spill] sm:$0xff]  ;;  %v1000_v51 = vsel %vm644_vm1, %v890_v21, 0.0 }
 0x1b6   :  { %v829_v19 = vsub.f32 %v3079_v36, %v1943_v12  ;;  %v1002_v2 = vsel %vm644_vm1, %v891_v42, 0.0 }
 0x1b7   :  { %v993_v52 = vadd.f32 %v992_v14, %v991_v8  ;;  %v892_v14 = vmul.f32 %v828_v4, %v828_v4 }
 0x1b8   :  { %v893_v9 = vmul.f32 %v829_v19, %v829_v19 }
 0x1b9   :  { %v995_v25 = vadd.f32 %v994_v16, %v993_v52  ;;  %v3080_v16 = vld [vmem:[#allocation21_spill] sm:$0xff]  ;;  %v1004_v61 = vsel %vm644_vm1, %v892_v14, 0.0 }
 0x1ba   :  { %v831_v44 = vsub.f32 %v3080_v16, %v1943_v12  ;;  %v1006_v21 = vsel %vm644_vm1, %v893_v9, 0.0  ;;  %v896_v16 = vmul.f32 %v832_v29, %v832_v29 }
 0x1bb   :  { %v997_v39 = vadd.f32 %v996_v1, %v995_v25  ;;  %v894_v1 = vmul.f32 %v830_v33, %v830_v33 }
 0x1bc   :  { %v895_v55 = vmul.f32 %v831_v44, %v831_v44  ;;  %v1012_v9 = vsel %vm644_vm1, %v896_v16, 0.0 }
 0x1bd   :  { %v999_v8 = vadd.f32 %v998_v15, %v997_v39  ;;  %v3081_v15 = vld [vmem:[#allocation20_spill] sm:$0xff]  ;;  %v1008_v42 = vsel %vm644_vm1, %v894_v1, 0.0 }
 0x1be   :  { %v833_v4 = vsub.f32 %v3081_v15, %v1943_v12  ;;  %v1010_v14 = vsel %vm644_vm1, %v895_v55, 0.0 }
 0x1bf   :  { %v1001_v52 = vadd.f32 %v1000_v51, %v999_v8  ;;  %v3082_v51 = vld [vmem:[#allocation22_spill] sm:$0xff] }
 0x1c0   :  { %v834_v19 = vsub.f32 %v3082_v51, %v1943_v12  ;;  %v897_v47 = vmul.f32 %v833_v4, %v833_v4 }
 0x1c1   :  { %v1003_v25 = vadd.f32 %v1002_v2, %v1001_v52  ;;  %v3083_v2 = vld [vmem:[#allocation25_spill] sm:$0xff] }
 0x1c2   :  { %v835_v33 = vsub.f32 %v3083_v2, %v1943_v12  ;;  %v898_v15 = vmul.f32 %v834_v19, %v834_v19  ;;  %v1014_v1 = vsel %vm644_vm1, %v897_v47, 0.0 }
 0x1c3   :  { %v1005_v39 = vadd.f32 %v1004_v61, %v1003_v25  ;;  %v3084_v61 = vld [vmem:[#allocation27_spill] sm:$0xff] }
 0x1c4   :  { %v836_v44 = vsub.f32 %v3084_v61, %v1943_v12  ;;  %v899_v51 = vmul.f32 %v835_v33, %v835_v33  ;;  %v1016_v55 = vsel %vm644_vm1, %v898_v15, 0.0 }
 0x1c5   :  { %v1007_v8 = vadd.f32 %v1006_v21, %v1005_v39  ;;  %v3085_v21 = vld [vmem:[#allocation24_spill] sm:$0xff] }
 0x1c6   :  { %v837_v29 = vsub.f32 %v3085_v21, %v1943_v12  ;;  %v900_v2 = vmul.f32 %v836_v44, %v836_v44  ;;  %v1018_v16 = vsel %vm644_vm1, %v899_v51, 0.0  ;;  %v841_v44 = vsub.f32 %v1919_v45, %v1943_v12 }
 0x1c7   :  { %v1009_v52 = vadd.f32 %v1008_v42, %v1007_v8  ;;  %v3086_v42 = vld [vmem:[#allocation26_spill] sm:$0xff] }
 0x1c8   :  { %v838_v4 = vsub.f32 %v3086_v42, %v1943_v12  ;;  %v901_v61 = vmul.f32 %v837_v29, %v837_v29  ;;  %v1020_v47 = vsel %vm644_vm1, %v900_v2, 0.0  ;;  %v842_v29 = vsub.f32 %v1931_v26, %v1943_v12 }
 0x1c9   :  { %v1011_v25 = vadd.f32 %v1010_v14, %v1009_v52  ;;  %v3087_v14 = vld [vmem:[#allocation29_spill] sm:$0xff] }
 0x1ca   :  { %v839_v19 = vsub.f32 %v3087_v14, %v1943_v12  ;;  %v902_v21 = vmul.f32 %v838_v4, %v838_v4  ;;  %v1022_v15 = vsel %vm644_vm1, %v901_v61, 0.0  ;;  %v906_v2 = vmul.f32 %v842_v29, %v842_v29 }
 0x1cb   :  { %v1013_v39 = vadd.f32 %v1012_v9, %v1011_v25  ;;  %v3088_v9 = vld [vmem:[#allocation31_spill] sm:$0xff] }
 0x1cc   :  { %v840_v33 = vsub.f32 %v3088_v9, %v1943_v12  ;;  %v1024_v51 = vsel %vm644_vm1, %v902_v21, 0.0  ;;  %v1032_v61 = vsel %vm644_vm1, %v906_v2, 0.0 }
 0x1cd   :  { %v1015_v8 = vadd.f32 %v1014_v1, %v1013_v39  ;;  %v903_v1 = vmul.f32 %v839_v19, %v839_v19 }
 0x1cf   :  { %v1017_v52 = vadd.f32 %v1016_v55, %v1015_v8  ;;  %v904_v55 = vmul.f32 %v840_v33, %v840_v33  ;;  %v1026_v4 = vsel %vm644_vm1, %v903_v1, 0.0  ;;  %v1049_v1 = vlaneseq }
 0x1d1   :  { %v1019_v25 = vadd.f32 %v1018_v16, %v1017_v52  ;;  %v905_v16 = vmul.f32 %v841_v44, %v841_v44  ;;  %v2137_v29 = vshrl.u32 %v1049_v1, 7  ;;  %v3093_v1 = vld [vmem:[#allocation7_spill] sm:$0xff] }
 0x1d3   :  { %v1021_v39 = vadd.f32 %v1020_v47, %v1019_v25  ;;  %v1028_v25 = vsel %vm644_vm1, %v904_v55, 0.0  ;;  %v1030_v19 = vsel %vm644_vm1, %v905_v16, 0.0  ;;  %v3043_v55 = vsub.s32 0, %v2137_v29 }
 0x1d5   :  { %v1023_v8 = vadd.f32 %v1022_v15, %v1021_v39 }
 0x1d7   :  { %v1025_v52 = vadd.f32 %v1024_v51, %v1023_v8 }
 0x1d9   :  { %v1027_v9 = vadd.f32 %v1026_v4, %v1025_v52 }
 0x1db   :  { %v1029_v47 = vadd.f32 %v1028_v25, %v1027_v9  ;;  %v1041_v9 = vld [vmem:[%s2995_s2] sm:$0x1] }
 0x1dd   :  { %v1031_v45 = vadd.f32 %v1030_v19, %v1029_v47  ;;  %v3089_v47 = vld [vmem:[#allocation2_spill] sm:$0xff] }
 0x1df   :  { %v1033_v39 = vadd.f32 %v1032_v61, %v1031_v45 }
 0x1e1   :  { %v1034_v15 = vrot.slane %v1033_v39, 4 }
 0x1e3   :  { %v1035_v26 = vadd.f32 %v1034_v15, %v1033_v39  ;;  %v3091_v39 = vld [vmem:[#allocation4_spill] sm:$0xff] }
 0x1e5   :  { %v1036_v33 = vrot.slane %v1035_v26, 2 }
 0x1e7   :  { %v1037_v14 = vadd.f32 %v1036_v33, %v1035_v26  ;;  %v2146_v26 = vld [vmem:[%s2996_s3] sm:$0x1]  ;;  %v3092_v33 = vld [vmem:[#allocation5_spill] sm:$0xff] }
 0x1e9   :  { %v1038_v21 = vrot.slane %v1037_v14, 1 }
 0x1eb   :  { %v1039_v8 = vadd.f32 %v1038_v21, %v1037_v14 }
 0x1ed   :  { %v1040_v44 = vmul.f32 0.001953125, %v1039_v8 }
 0x1ef   :  { %v1042_v51 = vadd.f32 1e-05, %v1040_v44 }
 0x1f1   :  { %1526 = vrsqrt.f32 %v1042_v51 }
 0x1fe   :  { %v1527_v52 = vpop.eup %1526 }
 0x1ff   :  { %v1044_v45 = vmul.f32 %v1527_v52, %v1041_v9  ;;  %v3094_v9 = vld [vmem:[#allocation6_spill] sm:$0xff]  ;;  %v3095_v52 = vld [vmem:[#allocation11_spill] sm:$0xff] }
 0x201   :  { %v2149_v14 = vmul.f32 %v1044_v45, %v1943_v12  ;;  %v2153_v16 = vrot.slane %v1044_v45, %v3043_v55  ;;  %v3090_v12 = vld [vmem:[#allocation3_spill] sm:$0xff]  ;;  %v3107_v55 = vld [vmem:[#allocation20_spill] sm:$0xff] }
 0x203   :  { %v1047_v4 = vsub.f32 %v2146_v26, %v2149_v14  ;;  %v2159_v2 = vmul.f32 %v2153_v16, %v1689_v35  ;;  %v2163_v25 = vmul.f32 %v2153_v16, %v1693_v37  ;;  %v2167_v19 = vmul.f32 %v3089_v47, %v2153_v16  ;;  %v3096_v26 = vld [vmem:[#allocation10_spill] sm:$0xff]  ;;  %v3097_v47 = vld [vmem:[#allocation15_spill] sm:$0xff] }
 0x204   :  { %v2171_v61 = vmul.f32 %v3090_v12, %v2153_v16  ;;  %v2175_v15 = vmul.f32 %v2153_v16, %v3091_v39  ;;  %v2179_v35 = vmul.f32 %v2153_v16, %v3092_v33  ;;  %v2183_v37 = vmul.f32 %v1699_v41, %v2153_v16  ;;  %v3098_v39 = vld [vmem:[#allocation14_spill] sm:$0xff] }
 0x205   :  { %v2187_v21 = vmul.f32 %v1709_v48, %v2153_v16  ;;  %v2191_v8 = vmul.f32 %v2153_v16, %v1727_v60  ;;  %v2195_v44 = vmul.f32 %v2153_v16, %v1737_v3  ;;  %v2199_v51 = vmul.f32 %v1721_v56, %v2153_v16 }
 0x206   :  { %v2203_v41 = vmul.f32 %v1731_v63, %v2153_v16  ;;  %v2207_v48 = vmul.f32 %v2153_v16, %v1747_v10  ;;  %v2211_v60 = vmul.f32 %v2153_v16, %v1757_v17  ;;  %v2215_v3 = vmul.f32 %v1741_v6, %v2153_v16 }
 0x207   :  { %v2219_v56 = vmul.f32 %v1751_v13, %v2153_v16  ;;  %v2223_v63 = vmul.f32 %v2153_v16, %v1767_v24  ;;  %v2227_v10 = vmul.f32 %v2153_v16, %v1777_v31  ;;  %v2231_v17 = vmul.f32 %v1761_v20, %v2153_v16 }
 0x208   :  { %v2235_v6 = vmul.f32 %v1771_v27, %v2153_v16  ;;  %v2239_v13 = vmul.f32 %v2153_v16, %v1787_v43  ;;  %v2243_v24 = vmul.f32 %v2153_v16, %v1797_v57  ;;  %v2247_v31 = vmul.f32 %v1781_v38, %v2153_v16 }
 0x209   :  { %v2251_v20 = vmul.f32 %v1791_v49, %v2153_v16  ;;  %v2255_v27 = vmul.f32 %v2153_v16, %v1807_v5  ;;  %v2259_v43 = vmul.f32 %v2153_v16, %v1817_v18  ;;  %v2263_v57 = vmul.f32 %v1801_v62, %v2153_v16 }
 0x20a   :  { %v2267_v38 = vmul.f32 %v1811_v11, %v2153_v16  ;;  %v2271_v49 = vmul.f32 %v2153_v16, %v1827_v30  ;;  %v2275_v5 = vmul.f32 %v2153_v16, %v1837_v53  ;;  %v2279_v18 = vmul.f32 %v1821_v23, %v2153_v16 }
 0x20b   :  { %v2283_v62 = vmul.f32 %v1831_v40, %v2153_v16  ;;  %v2287_v11 = vmul.f32 %v2153_v16, %v1713_v50  ;;  %v2291_v30 = vmul.f32 %v2153_v16, %v1725_v58  ;;  %v2295_v53 = vmul.f32 %v1707_v46, %v2153_v16 }
 0x20c   :  { %v2299_v23 = vmul.f32 %v1719_v54, %v2153_v16  ;;  %v2303_v40 = vmul.f32 %v2153_v16, %v1743_v7  ;;  %v2307_v50 = vmul.f32 %v2153_v16, %v3093_v1  ;;  %v2311_v58 = vmul.f32 %v1733_v0, %v2153_v16  ;;  %v3099_v1 = vld [vmem:[#allocation19_spill] sm:$0xff] }
 0x20d   :  { %v2315_v46 = vmul.f32 %v3094_v9, %v2153_v16  ;;  %v2319_v54 = vmul.f32 %v2153_v16, %v3074_v22  ;;  %v2323_v7 = vmul.f32 %v2153_v16, %v3095_v52  ;;  %v2327_v45 = vmul.f32 %v3075_v34, %v2153_v16  ;;  %v3102_v52 = vld [vmem:[#allocation18_spill] sm:$0xff] }
 0x20e   :  { %v2331_v0 = vmul.f32 %v3096_v26, %v2153_v16  ;;  %v2335_v14 = vmul.f32 %v2153_v16, %v3076_v59  ;;  %v2339_v22 = vmul.f32 %v2153_v16, %v3097_v47  ;;  %v2343_v12 = vmul.f32 %v3077_v28, %v2153_v16  ;;  %v3104_v26 = vld [vmem:[#allocation21_spill] sm:$0xff] }
 0x20f   :  { %v2347_v34 = vmul.f32 %v3098_v39, %v2153_v16  ;;  %v2351_v33 = vmul.f32 %v2153_v16, %v3078_v32  ;;  %v2355_v59 = vmul.f32 %v2153_v16, %v3099_v1  ;;  %v2359_v9 = vmul.f32 %v3079_v36, %v2153_v16  ;;  %v3106_v39 = vld [vmem:[#allocation23_spill] sm:$0xff] }
 0x210   :  { %v2363_v28 = vmul.f32 %v3102_v52, %v2153_v16  ;;  %v2367_v47 = vmul.f32 %v2153_v16, %v3104_v26  ;;  %v2371_v32 = vmul.f32 %v2153_v16, %v3106_v39  ;;  %v2375_v1 = vmul.f32 %v3107_v55, %v2153_v16 }
 0x211   :  { %3100 = vst [vmem:[#allocation9_spill] sm:$0xff] %v2355_v59  ;;  %3101 = vst [vmem:[#allocation8_spill] sm:$0xff] %v2359_v9  ;;  %v3109_v59 = vld [vmem:[#allocation22_spill] sm:$0xff]  ;;  %v3111_v9 = vld [vmem:[#allocation25_spill] sm:$0xff]  ;;  %v2395_v55 = vmul.f32 %v3086_v42, %v2153_v16 }
 0x212   :  { %3103 = vst [vmem:[#allocation13_spill] sm:$0xff] %v2363_v28  ;;  %3105 = vst [vmem:[#allocation12_spill] sm:$0xff] %v2367_v47  ;;  %v2379_v36 = vmul.f32 %v3109_v59, %v2153_v16  ;;  %v2383_v52 = vmul.f32 %v2153_v16, %v3111_v9  ;;  %v3113_v28 = vld [vmem:[#allocation27_spill] sm:$0xff]  ;;  %v3115_v47 = vld [vmem:[#allocation24_spill] sm:$0xff] }
 0x213   :  { %3108 = vst [vmem:[#allocation17_spill] sm:$0xff] %v2375_v1  ;;  %v2387_v26 = vmul.f32 %v2153_v16, %v3113_v28  ;;  %v2391_v39 = vmul.f32 %v3115_v47, %v2153_v16  ;;  %v3117_v1 = vsub.s32 0, %v2137_v29 }
 0x214   :  { %3110 = vst [vmem:[#allocation16_spill] sm:$0xff] %v2379_v36  ;;  %3112 = vst [vmem:[#allocation26_spill] sm:$0xff] %v2383_v52  ;;  %v3118_v36 = vld [vmem:[#allocation29_spill] sm:$0xff]  ;;  %v3119_v52 = vld [vmem:[#allocation31_spill] sm:$0xff] }
 0x215   :  { %3114 = vst [vmem:[#allocation2_spill] sm:$0xff] %v2387_v26  ;;  %3116 = vst [vmem:[#allocation3_spill] sm:$0xff] %v2391_v39  ;;  %v2399_v59 = vrot.slane %v1047_v4, %v3117_v1  ;;  %v2403_v9 = vmul.f32 %v2153_v16, %v3118_v36  ;;  %v2407_v28 = vmul.f32 %v2153_v16, %v3119_v52  ;;  %v3120_v26 = vld [vmem:[#allocation28_spill] sm:$0xff]  ;;  %v3121_v39 = vld [vmem:[#allocation30_spill] sm:$0xff] }
 0x216   :  { %v2411_v47 = vmul.f32 %v3120_v26, %v2153_v16  ;;  %v2415_v42 = vmul.f32 %v3121_v39, %v2153_v16 }
 0x217   :  { %v2419_v29 = vadd.f32 %v2399_v59, %v2159_v2  ;;  %v2423_v4 = vadd.f32 %v2399_v59, %v2163_v25  ;;  %v2427_v1 = vadd.f32 %v2399_v59, %v2167_v19  ;;  %v2431_v36 = vadd.f32 %v2399_v59, %v2171_v61 }
 0x218   :  { %v2435_v16 = vadd.f32 %v2399_v59, %v2175_v15  ;;  %v2439_v2 = vadd.f32 %v2399_v59, %v2179_v35  ;;  %v2443_v25 = vadd.f32 %v2399_v59, %v2183_v37  ;;  %v2447_v19 = vadd.f32 %v2399_v59, %v2187_v21  ;;  %v3124_v52 = vld [vmem:[#allocation9_spill] sm:$0xff]  ;;  %v3126_v26 = vld [vmem:[#allocation8_spill] sm:$0xff] }
 0x219   :  { %v2451_v61 = vadd.f32 %v2399_v59, %v2191_v8  ;;  %v2455_v15 = vadd.f32 %v2399_v59, %v2195_v44  ;;  %v2459_v35 = vadd.f32 %v2399_v59, %v2199_v51  ;;  %v2463_v37 = vadd.f32 %v2399_v59, %v2203_v41  ;;  %v3128_v39 = vld [vmem:[#allocation13_spill] sm:$0xff] }
 0x21a   :  { %v2467_v21 = vadd.f32 %v2399_v59, %v2207_v48  ;;  %v2471_v8 = vadd.f32 %v2399_v59, %v2211_v60  ;;  %v2475_v44 = vadd.f32 %v2399_v59, %v2215_v3  ;;  %v2479_v51 = vadd.f32 %v2399_v59, %v2219_v56 }
 0x21b   :  { %v2483_v41 = vadd.f32 %v2399_v59, %v2223_v63  ;;  %v2487_v48 = vadd.f32 %v2399_v59, %v2227_v10  ;;  %v2491_v60 = vadd.f32 %v2399_v59, %v2231_v17  ;;  %v2495_v3 = vadd.f32 %v2399_v59, %v2235_v6 }
 0x21c   :  { %v2499_v56 = vadd.f32 %v2399_v59, %v2239_v13  ;;  %v2503_v63 = vadd.f32 %v2399_v59, %v2243_v24  ;;  %v2507_v10 = vadd.f32 %v2399_v59, %v2247_v31  ;;  %v2511_v17 = vadd.f32 %v2399_v59, %v2251_v20 }
 0x21d   :  { %v2515_v6 = vadd.f32 %v2399_v59, %v2255_v27  ;;  %v2519_v13 = vadd.f32 %v2399_v59, %v2259_v43  ;;  %v2523_v24 = vadd.f32 %v2399_v59, %v2263_v57  ;;  %v2527_v31 = vadd.f32 %v2399_v59, %v2267_v38 }
 0x21e   :  { %v2531_v20 = vadd.f32 %v2399_v59, %v2271_v49  ;;  %v2535_v27 = vadd.f32 %v2399_v59, %v2275_v5  ;;  %v2539_v43 = vadd.f32 %v2399_v59, %v2279_v18  ;;  %v2543_v57 = vadd.f32 %v2399_v59, %v2283_v62 }
 0x21f   :  { %v2547_v38 = vadd.f32 %v2399_v59, %v2287_v11  ;;  %v2551_v49 = vadd.f32 %v2399_v59, %v2291_v30  ;;  %v2555_v5 = vadd.f32 %v2399_v59, %v2295_v53  ;;  %v2559_v18 = vadd.f32 %v2399_v59, %v2299_v23 }
 0x220   :  { %v2563_v62 = vadd.f32 %v2399_v59, %v2303_v40  ;;  %v2567_v11 = vadd.f32 %v2399_v59, %v2307_v50  ;;  %v2571_v30 = vadd.f32 %v2399_v59, %v2311_v58  ;;  %v2575_v53 = vadd.f32 %v2399_v59, %v2315_v46 }
 0x221   :  { %v2579_v23 = vadd.f32 %v2399_v59, %v2319_v54  ;;  %v2583_v40 = vadd.f32 %v2399_v59, %v2323_v7  ;;  %v2587_v50 = vadd.f32 %v2399_v59, %v2327_v45  ;;  %v2591_v58 = vadd.f32 %v2399_v59, %v2331_v0 }
 0x222   :  { %v2595_v46 = vadd.f32 %v2399_v59, %v2335_v14  ;;  %v2599_v54 = vadd.f32 %v2399_v59, %v2339_v22  ;;  %v2603_v7 = vadd.f32 %v2399_v59, %v2343_v12  ;;  %v2607_v45 = vadd.f32 %v2399_v59, %v2347_v34 }
 0x223   :  { %v2611_v0 = vadd.f32 %v2399_v59, %v2351_v33  ;;  %v2615_v14 = vadd.f32 %v2399_v59, %v3124_v52  ;;  %v2619_v22 = vadd.f32 %v2399_v59, %v3126_v26  ;;  %v2623_v12 = vadd.f32 %v2399_v59, %v3128_v39 }
 0x224   :  { %3122 = vst [vmem:[#allocation4_spill] sm:$0xff] %v2603_v7  ;;  %v3130_v7 = vld [vmem:[#allocation12_spill] sm:$0xff]  ;;  %v2631_v33 = vadd.f32 %v2399_v59, %v2371_v32 }
 0x225   :  { %3123 = vst [vmem:[#allocation5_spill] sm:$0xff] %v2611_v0  ;;  %3125 = vst [vmem:[#allocation7_spill] sm:$0xff] %v2615_v14  ;;  %v2627_v34 = vadd.f32 %v2399_v59, %v3130_v7  ;;  %v3132_v0 = vld [vmem:[#allocation17_spill] sm:$0xff]  ;;  %v3133_v14 = vld [vmem:[#allocation16_spill] sm:$0xff] }
 0x226   :  { %3127 = vst [vmem:[#allocation6_spill] sm:$0xff] %v2619_v22  ;;  %3129 = vst [vmem:[#allocation11_spill] sm:$0xff] %v2623_v12  ;;  %v2635_v52 = vadd.f32 %v2399_v59, %v3132_v0  ;;  %v2639_v26 = vadd.f32 %v2399_v59, %v3133_v14  ;;  %v3134_v22 = vld [vmem:[#allocation26_spill] sm:$0xff]  ;;  %v2655_v0 = vadd.f32 %v2399_v59, %v2395_v55  ;;  %v1189_v55 = vmax.f32 %v2423_v4, 0.0 }
 0x227   :  { %3131 = vst [vmem:[#allocation10_spill] sm:$0xff] %v2627_v34  ;;  %v2643_v39 = vadd.f32 %v2399_v59, %v3134_v22  ;;  %v3135_v12 = vld [vmem:[#allocation2_spill] sm:$0xff]  ;;  %v3136_v34 = vld [vmem:[#allocation3_spill] sm:$0xff]  ;;  %v2659_v14 = vadd.f32 %v2399_v59, %v2403_v9  ;;  %v2663_v22 = vadd.f32 %v2399_v59, %v2407_v28  ;;  %v1191_v9 = vmax.f32 %v2431_v36, 0.0 }
 0x228   :  { %v2647_v7 = vadd.f32 %v2399_v59, %v3135_v12  ;;  %v2651_v32 = vadd.f32 %v2399_v59, %v3136_v34  ;;  %3138 = vst [vmem:[#allocation14_spill] sm:$0xff] %v2655_v0  ;;  %v2667_v12 = vadd.f32 %v2399_v59, %v2411_v47  ;;  %v2671_v34 = vadd.f32 %v2399_v59, %v2415_v42 }
 0x229   :  { %3139 = vst [vmem:[#allocation19_spill] sm:$0xff] %v2659_v14  ;;  %3140 = vst [vmem:[#allocation18_spill] sm:$0xff] %v2663_v22  ;;  %v1190_v0 = vmax.f32 %v2427_v1, 0.0  ;;  %v1192_v14 = vmax.f32 %v2435_v16, 0.0  ;;  %v1193_v28 = vmax.f32 %v2439_v2, 0.0  ;;  %v1194_v22 = vmax.f32 %v2443_v25, 0.0 }
 0x22a   :  { %3137 = vst [vmem:[#allocation15_spill] sm:$0xff] %v2651_v32  ;;  %3141 = vst [vmem:[#allocation21_spill] sm:$0xff] %v2667_v12  ;;  %v1188_v32 = vmax.f32 %v2419_v29, 0.0  ;;  %v1195_v47 = vmax.f32 %v2447_v19, 0.0  ;;  %v1196_v12 = vmax.f32 %v2451_v61, 0.0  ;;  %v1197_v59 = vmax.f32 %v2455_v15, 0.0 }
 0x22b   :  { %v1198_v42 = vmax.f32 %v2459_v35, 0.0  ;;  %v1199_v29 = vmax.f32 %v2463_v37, 0.0  ;;  %1253 = vst.msk [vmem:[%s2997_s4 + $0x8] sm:$0xff] %vm644_vm1, %v1189_v55  ;;  %1254 = vst.msk [vmem:[%s2997_s4 + $0x10] sm:$0xff] %vm644_vm1, %v1190_v0  ;;  %v1200_v4 = vmax.f32 %v2467_v21, 0.0  ;;  %v1201_v1 = vmax.f32 %v2471_v8, 0.0 }
 0x22c   :  { %1252 = vst.msk [vmem:[%s2997_s4] sm:$0xff] %vm644_vm1, %v1188_v32  ;;  %1255 = vst.msk [vmem:[%s2997_s4 + $0x18] sm:$0xff] %vm644_vm1, %v1191_v9  ;;  %v1202_v36 = vmax.f32 %v2475_v44, 0.0  ;;  %v1203_v16 = vmax.f32 %v2479_v51, 0.0  ;;  %v1204_v2 = vmax.f32 %v2483_v41, 0.0  ;;  %v1205_v25 = vmax.f32 %v2487_v48, 0.0 }
 0x22d   :  { %1256 = vst.msk [vmem:[%s2997_s4 + $0x20] sm:$0xff] %vm644_vm1, %v1192_v14  ;;  %1257 = vst.msk [vmem:[%s2997_s4 + $0x28] sm:$0xff] %vm644_vm1, %v1193_v28  ;;  %v1206_v19 = vmax.f32 %v2491_v60, 0.0  ;;  %v1207_v61 = vmax.f32 %v2495_v3, 0.0  ;;  %v1208_v15 = vmax.f32 %v2499_v56, 0.0  ;;  %v1209_v35 = vmax.f32 %v2503_v63, 0.0 }
 0x22e   :  { %1258 = vst.msk [vmem:[%s2997_s4 + $0x30] sm:$0xff] %vm644_vm1, %v1194_v22  ;;  %1259 = vst.msk [vmem:[%s2997_s4 + $0x38] sm:$0xff] %vm644_vm1, %v1195_v47  ;;  %v1210_v37 = vmax.f32 %v2507_v10, 0.0  ;;  %v1211_v21 = vmax.f32 %v2511_v17, 0.0  ;;  %v1212_v8 = vmax.f32 %v2515_v6, 0.0  ;;  %v1213_v44 = vmax.f32 %v2519_v13, 0.0 }
 0x22f   :  { %1260 = vst.msk [vmem:[%s2997_s4 + $0x40] sm:$0xff] %vm644_vm1, %v1196_v12  ;;  %1261 = vst.msk [vmem:[%s2997_s4 + $0x48] sm:$0xff] %vm644_vm1, %v1197_v59  ;;  %v1214_v51 = vmax.f32 %v2523_v24, 0.0  ;;  %v1215_v41 = vmax.f32 %v2527_v31, 0.0  ;;  %v1216_v48 = vmax.f32 %v2531_v20, 0.0  ;;  %v1217_v60 = vmax.f32 %v2535_v27, 0.0 }
 0x230   :  { %1262 = vst.msk [vmem:[%s2997_s4 + $0x50] sm:$0xff] %vm644_vm1, %v1198_v42  ;;  %1263 = vst.msk [vmem:[%s2997_s4 + $0x58] sm:$0xff] %vm644_vm1, %v1199_v29  ;;  %v1218_v3 = vmax.f32 %v2539_v43, 0.0  ;;  %v1219_v56 = vmax.f32 %v2543_v57, 0.0  ;;  %v1220_v63 = vmax.f32 %v2547_v38, 0.0  ;;  %v1221_v10 = vmax.f32 %v2551_v49, 0.0 }
 0x231   :  { %1264 = vst.msk [vmem:[%s2997_s4 + $0x60] sm:$0xff] %vm644_vm1, %v1200_v4  ;;  %1265 = vst.msk [vmem:[%s2997_s4 + $0x68] sm:$0xff] %vm644_vm1, %v1201_v1  ;;  %v1222_v17 = vmax.f32 %v2555_v5, 0.0  ;;  %v1223_v6 = vmax.f32 %v2559_v18, 0.0  ;;  %v1224_v13 = vmax.f32 %v2563_v62, 0.0  ;;  %v1225_v24 = vmax.f32 %v2567_v11, 0.0 }
 0x232   :  { %1266 = vst.msk [vmem:[%s2997_s4 + $0x70] sm:$0xff] %vm644_vm1, %v1202_v36  ;;  %1267 = vst.msk [vmem:[%s2997_s4 + $0x78] sm:$0xff] %vm644_vm1, %v1203_v16  ;;  %v1226_v31 = vmax.f32 %v2571_v30, 0.0  ;;  %v1227_v20 = vmax.f32 %v2575_v53, 0.0  ;;  %v1228_v27 = vmax.f32 %v2579_v23, 0.0  ;;  %v1229_v43 = vmax.f32 %v2583_v40, 0.0 }
 0x233   :  { %1268 = vst.msk [vmem:[%s2997_s4 + $0x80] sm:$0xff] %vm644_vm1, %v1204_v2  ;;  %1269 = vst.msk [vmem:[%s2997_s4 + $0x88] sm:$0xff] %vm644_vm1, %v1205_v25  ;;  %v1230_v57 = vmax.f32 %v2587_v50, 0.0  ;;  %v1231_v38 = vmax.f32 %v2591_v58, 0.0  ;;  %v1232_v49 = vmax.f32 %v2595_v46, 0.0  ;;  %v1233_v5 = vmax.f32 %v2599_v54, 0.0 }
 0x234   :  { %1270 = vst.msk [vmem:[%s2997_s4 + $0x90] sm:$0xff] %vm644_vm1, %v1206_v19  ;;  %1271 = vst.msk [vmem:[%s2997_s4 + $0x98] sm:$0xff] %vm644_vm1, %v1207_v61  ;;  %v3142_v18 = vld [vmem:[#allocation4_spill] sm:$0xff]  ;;  %v1235_v11 = vmax.f32 %v2607_v45, 0.0  ;;  %v3143_v30 = vld [vmem:[#allocation5_spill] sm:$0xff]  ;;  %v1241_v0 = vmax.f32 %v2631_v33, 0.0 }
 0x235   :  { %1272 = vst.msk [vmem:[%s2997_s4 + $0xa0] sm:$0xff] %vm644_vm1, %v1208_v15  ;;  %1273 = vst.msk [vmem:[%s2997_s4 + $0xa8] sm:$0xff] %vm644_vm1, %v1209_v35  ;;  %v1234_v62 = vmax.f32 %v3142_v18, 0.0  ;;  %v1236_v53 = vmax.f32 %v3143_v30, 0.0  ;;  %v3144_v23 = vld [vmem:[#allocation7_spill] sm:$0xff]  ;;  %v3145_v50 = vld [vmem:[#allocation6_spill] sm:$0xff] }
 0x236   :  { %1274 = vst.msk [vmem:[%s2997_s4 + $0xb0] sm:$0xff] %vm644_vm1, %v1210_v37  ;;  %1275 = vst.msk [vmem:[%s2997_s4 + $0xb8] sm:$0xff] %vm644_vm1, %v1211_v21  ;;  %v1237_v40 = vmax.f32 %v3144_v23, 0.0  ;;  %v1238_v58 = vmax.f32 %v3145_v50, 0.0  ;;  %v3146_v46 = vld [vmem:[#allocation11_spill] sm:$0xff]  ;;  %v3147_v45 = vld [vmem:[#allocation10_spill] sm:$0xff] }
 0x237   :  { %1276 = vst.msk [vmem:[%s2997_s4 + $0xc0] sm:$0xff] %vm644_vm1, %v1212_v8  ;;  %1277 = vst.msk [vmem:[%s2997_s4 + $0xc8] sm:$0xff] %vm644_vm1, %v1213_v44  ;;  %v1239_v54 = vmax.f32 %v3146_v46, 0.0  ;;  %v1240_v32 = vmax.f32 %v3147_v45, 0.0  ;;  %v1242_v14 = vmax.f32 %v2635_v52, 0.0  ;;  %v1243_v22 = vmax.f32 %v2639_v26, 0.0 }
 0x238   :  { %1278 = vst.msk [vmem:[%s2997_s4 + $0xd0] sm:$0xff] %vm644_vm1, %v1214_v51  ;;  %1279 = vst.msk [vmem:[%s2997_s4 + $0xd8] sm:$0xff] %vm644_vm1, %v1215_v41  ;;  %v1244_v33 = vmax.f32 %v2643_v39, 0.0  ;;  %v1245_v52 = vmax.f32 %v2647_v7, 0.0  ;;  %v3148_v26 = vld [vmem:[#allocation15_spill] sm:$0xff]  ;;  %v3149_v55 = vld [vmem:[#allocation14_spill] sm:$0xff] }
 0x239   :  { %1280 = vst.msk [vmem:[%s2997_s4 + $0xe0] sm:$0xff] %vm644_vm1, %v1216_v48  ;;  %1281 = vst.msk [vmem:[%s2997_s4 + $0xe8] sm:$0xff] %vm644_vm1, %v1217_v60  ;;  %v1246_v12 = vmax.f32 %v3148_v26, 0.0  ;;  %v1247_v9 = vmax.f32 %v3149_v55, 0.0  ;;  %v3150_v39 = vld [vmem:[#allocation19_spill] sm:$0xff]  ;;  %v3151_v28 = vld [vmem:[#allocation18_spill] sm:$0xff] }
 0x23a   :  { %1282 = vst.msk [vmem:[%s2997_s4 + $0xf0] sm:$0xff] %vm644_vm1, %v1218_v3  ;;  %1283 = vst.msk [vmem:[%s2997_s4 + $0xf8] sm:$0xff] %vm644_vm1, %v1219_v56  ;;  %v1248_v7 = vmax.f32 %v3150_v39, 0.0  ;;  %v1249_v47 = vmax.f32 %v3151_v28, 0.0  ;;  %v3152_v59 = vld [vmem:[#allocation21_spill] sm:$0xff]  ;;  %v1251_v29 = vmax.f32 %v2671_v34, 0.0 }
 0x23b   :  { %1284 = vst.msk [vmem:[%s2997_s4 + $0x100] sm:$0xff] %vm644_vm1, %v1220_v63  ;;  %1285 = vst.msk [vmem:[%s2997_s4 + $0x108] sm:$0xff] %vm644_vm1, %v1221_v10  ;;  %v1250_v42 = vmax.f32 %v3152_v59, 0.0 }
 0x23c   :  { %1286 = vst.msk [vmem:[%s2997_s4 + $0x110] sm:$0xff] %vm644_vm1, %v1222_v17  ;;  %1287 = vst.msk [vmem:[%s2997_s4 + $0x118] sm:$0xff] %vm644_vm1, %v1223_v6 }
 0x23d   :  { %1288 = vst.msk [vmem:[%s2997_s4 + $0x120] sm:$0xff] %vm644_vm1, %v1224_v13  ;;  %1289 = vst.msk [vmem:[%s2997_s4 + $0x128] sm:$0xff] %vm644_vm1, %v1225_v24 }
 0x23e   :  { %1290 = vst.msk [vmem:[%s2997_s4 + $0x130] sm:$0xff] %vm644_vm1, %v1226_v31  ;;  %1291 = vst.msk [vmem:[%s2997_s4 + $0x138] sm:$0xff] %vm644_vm1, %v1227_v20 }
 0x23f   :  { %1292 = vst.msk [vmem:[%s2997_s4 + $0x140] sm:$0xff] %vm644_vm1, %v1228_v27  ;;  %1293 = vst.msk [vmem:[%s2997_s4 + $0x148] sm:$0xff] %vm644_vm1, %v1229_v43 }
 0x240   :  { %1294 = vst.msk [vmem:[%s2997_s4 + $0x150] sm:$0xff] %vm644_vm1, %v1230_v57  ;;  %1295 = vst.msk [vmem:[%s2997_s4 + $0x158] sm:$0xff] %vm644_vm1, %v1231_v38 }
 0x241   :  { %1296 = vst.msk [vmem:[%s2997_s4 + $0x160] sm:$0xff] %vm644_vm1, %v1232_v49  ;;  %1297 = vst.msk [vmem:[%s2997_s4 + $0x168] sm:$0xff] %vm644_vm1, %v1233_v5 }
 0x242   :  { %1298 = vst.msk [vmem:[%s2997_s4 + $0x170] sm:$0xff] %vm644_vm1, %v1234_v62  ;;  %1299 = vst.msk [vmem:[%s2997_s4 + $0x178] sm:$0xff] %vm644_vm1, %v1235_v11 }
 0x243   :  { %1300 = vst.msk [vmem:[%s2997_s4 + $0x180] sm:$0xff] %vm644_vm1, %v1236_v53  ;;  %1301 = vst.msk [vmem:[%s2997_s4 + $0x188] sm:$0xff] %vm644_vm1, %v1237_v40 }
 0x244   :  { %1302 = vst.msk [vmem:[%s2997_s4 + $0x190] sm:$0xff] %vm644_vm1, %v1238_v58  ;;  %1303 = vst.msk [vmem:[%s2997_s4 + $0x198] sm:$0xff] %vm644_vm1, %v1239_v54 }
 0x245   :  { %1304 = vst.msk [vmem:[%s2997_s4 + $0x1a0] sm:$0xff] %vm644_vm1, %v1240_v32  ;;  %1305 = vst.msk [vmem:[%s2997_s4 + $0x1a8] sm:$0xff] %vm644_vm1, %v1241_v0 }
 0x246   :  { %1306 = vst.msk [vmem:[%s2997_s4 + $0x1b0] sm:$0xff] %vm644_vm1, %v1242_v14  ;;  %1307 = vst.msk [vmem:[%s2997_s4 + $0x1b8] sm:$0xff] %vm644_vm1, %v1243_v22 }
 0x247   :  { %1308 = vst.msk [vmem:[%s2997_s4 + $0x1c0] sm:$0xff] %vm644_vm1, %v1244_v33  ;;  %1309 = vst.msk [vmem:[%s2997_s4 + $0x1c8] sm:$0xff] %vm644_vm1, %v1245_v52 }
 0x248   :  { %1310 = vst.msk [vmem:[%s2997_s4 + $0x1d0] sm:$0xff] %vm644_vm1, %v1246_v12  ;;  %1311 = vst.msk [vmem:[%s2997_s4 + $0x1d8] sm:$0xff] %vm644_vm1, %v1247_v9 }
 0x249   :  { %1312 = vst.msk [vmem:[%s2997_s4 + $0x1e0] sm:$0xff] %vm644_vm1, %v1248_v7  ;;  %1313 = vst.msk [vmem:[%s2997_s4 + $0x1e8] sm:$0xff] %vm644_vm1, %v1249_v47 }
 0x24a   :  { %1314 = vst.msk [vmem:[%s2997_s4 + $0x1f0] sm:$0xff] %vm644_vm1, %v1250_v42  ;;  %1315 = vst.msk [vmem:[%s2997_s4 + $0x1f8] sm:$0xff] %vm644_vm1, %v1251_v29 }

// kernel: resnet_forward.10
= control target key start
LH: loop header
LB: loop body
LE: loop exit
PB: predicated region body
PF: predicated region fallthrough
CT: control target
= control target key end

     0   :  { %v1734_v0 = vmov 0   ;;  %vm442_vm0 = vcmask 130048   ;;  %s3317_s1 = inlined_call_operand.vmem [shape: bf16[144,16], index: 1, kind: input, shape index: {}]   ;;  %s3318_s0 = inlined_call_operand.vmem [shape: bf16[512,144], index: 0, kind: input, shape index: {}]   ;;  %s3319_s2 = inlined_call_operand.vmem [shape: f32[1,16], index: 2, kind: input, shape index: {}]   ;;  %s3320_s3 = inlined_call_operand.vmem [shape: f32[1,16], index: 3, kind: input, shape index: {}]   ;;  %s3321_s4 = inlined_call_operand.vmem [shape: f32[512,16], index: 4, kind: output, shape index: {}]  }
   0x1   :  { %539 = vmatprep.subr.bf16.mxu0 %v1734_v0  ;;  %v1627_v1 = vld [vmem:[%s3317_s1 + $0x38] sm:$0xff]   ;;  %1608 = vmatprep.subr.bf16.mxu1 %v1734_v0  ;;  %v1628_v2 = vld [vmem:[%s3317_s1 + $0x30] sm:$0xff]   ;;  %v1629_v3 = vld [vmem:[%s3317_s1 + $0x28] sm:$0xff]  }
   0x2   :  { %540 = vmatpush1.bf16.msra.mxu0 %v1627_v1  ;;  %1617 = vmatpush1.bf16.msra.mxu1 %v1627_v1  ;;  %v1630_v4 = vld [vmem:[%s3317_s1 + $0x20] sm:$0xff]   ;;  %v1631_v6 = vld [vmem:[%s3317_s1 + $0x18] sm:$0xff]   ;;  %v1632_v7 = vld [vmem:[%s3317_s1 + $0x10] sm:$0xff]  }
   0x3   :  { %541 = vmatprep.subr.bf16.mxu0 %v1734_v0  ;;  %1609 = vmatprep.subr.bf16.mxu1 %v1734_v0  ;;  %v1638_v5 = vld [vmem:[%s3318_s0 + $0x4] ss:$8 sps:$4 sm:$0xff]   ;;  %v1636_v12 = vld [vmem:[%s3318_s0] ss:$8 sps:$4 sm:$0xff]   ;;  %v1639_v13 = vld [vmem:[%s3318_s0 + $0x14] ss:$8 sps:$4 sm:$0xff]  }
   0x4   :  { %1576 = vmatprep.mubr.msk.bf16.mxu0 %vm442_vm0, %v1638_v5  ;;  %v1662_v8 = vld [vmem:[%s3318_s0 + $0x104] ss:$8 sps:$4 sm:$0xff]   ;;  %v1660_v14 = vld [vmem:[%s3318_s0 + $0x100] ss:$8 sps:$4 sm:$0xff]   ;;  %v1666_v15 = vld [vmem:[%s3318_s0 + $0x114] ss:$8 sps:$4 sm:$0xff]  }
   0x5   :  { %v1633_v9 = vld [vmem:[%s3317_s1 + $0x8] sm:$0xff]   ;;  %1592 = vmatprep.mubr.msk.bf16.mxu1 %vm442_vm0, %v1662_v8  ;;  %v1634_v10 = vld [vmem:[%s3317_s1] sm:$0xff]   ;;  %v1641_v16 = vld [vmem:[%s3318_s0 + $0x10] ss:$8 sps:$4 sm:$0xff]  }
   0x6   :  { %542 = vmatpush1.bf16.msra.mxu0 %v1628_v2  ;;  %1618 = vmatpush1.bf16.msra.mxu1 %v1628_v2  ;;  %v1635_v11 = vld [vmem:[%s3317_s1 + $0x40] sm:$0xff]   ;;  %v1668_v18 = vld [vmem:[%s3318_s0 + $0x110] ss:$8 sps:$4 sm:$0xff]   ;;  %v1645_v21 = vld [vmem:[%s3318_s0 + $0x34] ss:$8 sps:$4 sm:$0xff]  }
   0x7   :  { %543 = vmatprep.subr.bf16.mxu0 %v1734_v0  ;;  %1610 = vmatprep.subr.bf16.mxu1 %v1734_v0  ;;  %v1642_v17 = vld [vmem:[%s3318_s0 + $0x24] ss:$8 sps:$4 sm:$0xff]   ;;  %v1644_v20 = vld [vmem:[%s3318_s0 + $0x20] ss:$8 sps:$4 sm:$0xff]   ;;  %v1678_v23 = vld [vmem:[%s3318_s0 + $0x134] ss:$8 sps:$4 sm:$0xff]  }
   0x8   :  { %v1672_v19 = vld [vmem:[%s3318_s0 + $0x124] ss:$8 sps:$4 sm:$0xff]   ;;  %v1674_v22 = vld [vmem:[%s3318_s0 + $0x120] ss:$8 sps:$4 sm:$0xff]   ;;  %v1647_v24 = vld [vmem:[%s3318_s0 + $0x30] ss:$8 sps:$4 sm:$0xff]  }
   0x9   :  { %v1680_v25 = vld [vmem:[%s3318_s0 + $0x130] ss:$8 sps:$4 sm:$0xff]   ;;  %v1648_v26 = vld [vmem:[%s3318_s0 + $0x44] ss:$8 sps:$4 sm:$0xff]   ;;  %v1650_v28 = vld [vmem:[%s3318_s0 + $0x40] ss:$8 sps:$4 sm:$0xff]  }
   0xa   :  { %544 = vmatpush1.bf16.msra.mxu0 %v1629_v3  ;;  %1619 = vmatpush1.bf16.msra.mxu1 %v1629_v3  ;;  %v1684_v27 = vld [vmem:[%s3318_s0 + $0x144] ss:$8 sps:$4 sm:$0xff]   ;;  %v1686_v29 = vld [vmem:[%s3318_s0 + $0x140] ss:$8 sps:$4 sm:$0xff]   ;;  %v1651_v30 = vld [vmem:[%s3318_s0 + $0x54] ss:$8 sps:$4 sm:$0xff]  }
   0xb   :  { %545 = vmatprep.subr.bf16.mxu0 %v1734_v0  ;;  %1611 = vmatprep.subr.bf16.mxu1 %v1734_v0  ;;  %v1690_v31 = vld [vmem:[%s3318_s0 + $0x154] ss:$8 sps:$4 sm:$0xff]   ;;  %v1653_v32 = vld [vmem:[%s3318_s0 + $0x50] ss:$8 sps:$4 sm:$0xff]   ;;  %v1654_v34 = vld [vmem:[%s3318_s0 + $0x64] ss:$8 sps:$4 sm:$0xff]  }
   0xc   :  { %v1692_v33 = vld [vmem:[%s3318_s0 + $0x150] ss:$8 sps:$4 sm:$0xff]   ;;  %v1696_v35 = vld [vmem:[%s3318_s0 + $0x164] ss:$8 sps:$4 sm:$0xff]   ;;  %v1656_v36 = vld [vmem:[%s3318_s0 + $0x60] ss:$8 sps:$4 sm:$0xff]  }
   0xd   :  { %v1698_v37 = vld [vmem:[%s3318_s0 + $0x160] ss:$8 sps:$4 sm:$0xff]   ;;  %v1657_v38 = vld [vmem:[%s3318_s0 + $0x74] ss:$8 sps:$4 sm:$0xff]   ;;  %v1659_v40 = vld [vmem:[%s3318_s0 + $0x70] ss:$8 sps:$4 sm:$0xff]  }
   0xe   :  { %546 = vmatpush1.bf16.msra.mxu0 %v1630_v4  ;;  %1620 = vmatpush1.bf16.msra.mxu1 %v1630_v4  ;;  %v1702_v39 = vld [vmem:[%s3318_s0 + $0x174] ss:$8 sps:$4 sm:$0xff]   ;;  %v1704_v41 = vld [vmem:[%s3318_s0 + $0x170] ss:$8 sps:$4 sm:$0xff]   ;;  %v1663_v42 = vld [vmem:[%s3318_s0 + $0x84] ss:$8 sps:$4 sm:$0xff]  }
   0xf   :  { %547 = vmatprep.subr.bf16.mxu0 %v1734_v0  ;;  %1612 = vmatprep.subr.bf16.mxu1 %v1734_v0  ;;  %v1708_v43 = vld [vmem:[%s3318_s0 + $0x184] ss:$8 sps:$4 sm:$0xff]   ;;  %v1665_v44 = vld [vmem:[%s3318_s0 + $0x80] ss:$8 sps:$4 sm:$0xff]   ;;  %v1669_v46 = vld [vmem:[%s3318_s0 + $0x94] ss:$8 sps:$4 sm:$0xff]  }
  0x10   :  { %v1710_v45 = vld [vmem:[%s3318_s0 + $0x180] ss:$8 sps:$4 sm:$0xff]   ;;  %v1711_v47 = vld [vmem:[%s3318_s0 + $0x194] ss:$8 sps:$4 sm:$0xff]   ;;  %v1671_v48 = vld [vmem:[%s3318_s0 + $0x90] ss:$8 sps:$4 sm:$0xff]  }
  0x11   :  { %v1713_v49 = vld [vmem:[%s3318_s0 + $0x190] ss:$8 sps:$4 sm:$0xff]   ;;  %v1675_v50 = vld [vmem:[%s3318_s0 + $0xa4] ss:$8 sps:$4 sm:$0xff]   ;;  %v1677_v52 = vld [vmem:[%s3318_s0 + $0xa0] ss:$8 sps:$4 sm:$0xff]  }
  0x12   :  { %548 = vmatpush1.bf16.msra.mxu0 %v1631_v6  ;;  %1621 = vmatpush1.bf16.msra.mxu1 %v1631_v6  ;;  %v1714_v51 = vld [vmem:[%s3318_s0 + $0x1a4] ss:$8 sps:$4 sm:$0xff]   ;;  %v1716_v53 = vld [vmem:[%s3318_s0 + $0x1a0] ss:$8 sps:$4 sm:$0xff]   ;;  %v1681_v54 = vld [vmem:[%s3318_s0 + $0xb4] ss:$8 sps:$4 sm:$0xff]  }
  0x13   :  { %549 = vmatprep.subr.bf16.mxu0 %v1734_v0  ;;  %1613 = vmatprep.subr.bf16.mxu1 %v1734_v0  ;;  %v1717_v55 = vld [vmem:[%s3318_s0 + $0x1b4] ss:$8 sps:$4 sm:$0xff]   ;;  %v1683_v56 = vld [vmem:[%s3318_s0 + $0xb0] ss:$8 sps:$4 sm:$0xff]   ;;  %v1687_v58 = vld [vmem:[%s3318_s0 + $0xc4] ss:$8 sps:$4 sm:$0xff]  }
  0x14   :  { %v1719_v57 = vld [vmem:[%s3318_s0 + $0x1b0] ss:$8 sps:$4 sm:$0xff]   ;;  %v1720_v59 = vld [vmem:[%s3318_s0 + $0x1c4] ss:$8 sps:$4 sm:$0xff]   ;;  %v1689_v60 = vld [vmem:[%s3318_s0 + $0xc0] ss:$8 sps:$4 sm:$0xff]  }
  0x15   :  { %v1722_v61 = vld [vmem:[%s3318_s0 + $0x1c0] ss:$8 sps:$4 sm:$0xff]   ;;  %v1693_v62 = vld [vmem:[%s3318_s0 + $0xd4] ss:$8 sps:$4 sm:$0xff]   ;;  %v1725_v1 = vld [vmem:[%s3318_s0 + $0x1d0] ss:$8 sps:$4 sm:$0xff]  }
  0x16   :  { %550 = vmatpush1.bf16.msra.mxu0 %v1632_v7  ;;  %1622 = vmatpush1.bf16.msra.mxu1 %v1632_v7  ;;  %v1723_v63 = vld [vmem:[%s3318_s0 + $0x1d4] ss:$8 sps:$4 sm:$0xff]   ;;  %v1699_v2 = vld [vmem:[%s3318_s0 + $0xe4] ss:$8 sps:$4 sm:$0xff]   ;;  %v1701_v4 = vld [vmem:[%s3318_s0 + $0xe0] ss:$8 sps:$4 sm:$0xff]  }
  0x17   :  { %551 = vmatprep.subr.bf16.mxu0 %v1734_v0  ;;  %1614 = vmatprep.subr.bf16.mxu1 %v1734_v0  ;;  %v1726_v3 = vld [vmem:[%s3318_s0 + $0x1e4] ss:$8 sps:$4 sm:$0xff]   ;;  %v1728_v5 = vld [vmem:[%s3318_s0 + $0x1e0] ss:$8 sps:$4 sm:$0xff]   ;;  %v1705_v6 = vld [vmem:[%s3318_s0 + $0xf4] ss:$8 sps:$4 sm:$0xff]  }
  0x18   :  { %v1729_v7 = vld [vmem:[%s3318_s0 + $0x1f4] ss:$8 sps:$4 sm:$0xff]   ;;  %v1707_v8 = vld [vmem:[%s3318_s0 + $0xf0] ss:$8 sps:$4 sm:$0xff]  }
  0x1a   :  { %552 = vmatpush1.bf16.msra.mxu0 %v1633_v9  ;;  %1623 = vmatpush1.bf16.msra.mxu1 %v1633_v9  ;;  %v1731_v9 = vld [vmem:[%s3318_s0 + $0x1f0] ss:$8 sps:$4 sm:$0xff]  }
  0x1b   :  { %553 = vmatprep.subr.bf16.mxu0 %v1734_v0  ;;  %1615 = vmatprep.subr.bf16.mxu1 %v1734_v0 }
  0x1e   :  { %554 = vmatpush1.bf16.msra.mxu0 %v1634_v10  ;;  %1624 = vmatpush1.bf16.msra.mxu1 %v1634_v10 }
  0x1f   :  { %569 = vmatprep.subr.bf16.mxu0 %v1734_v0  ;;  %1616 = vmatprep.subr.bf16.mxu1 %v1734_v0  ;;  %v1695_v0 = vld [vmem:[%s3318_s0 + $0xd0] ss:$8 sps:$4 sm:$0xff]  }
  0x22   :  { %570 = vmatpush2.bf16.msra.mxu0 %v1635_v11  ;;  %1625 = vmatpush2.bf16.msra.mxu1 %v1635_v11 }
  0x25   :  { %572 = vmatmul.mubr.bf16.vlgmr.msra.gmra.mxu0 %v1636_v12  ;;  %700 = vmatmul.mubr.bf16.vlgmr.msra.gmra.mxu1 %v1660_v14 }
  0x26   :  { %1577 = vmatprep.mubr.msk.bf16.mxu0 %vm442_vm0, %v1639_v13  ;;  %1593 = vmatprep.mubr.msk.bf16.mxu1 %vm442_vm0, %v1666_v15 }
  0x2d   :  { %580 = vmatmul.mubr.bf16.gmra.mxu0 %v1641_v16  ;;  %708 = vmatmul.mubr.bf16.gmra.mxu1 %v1668_v18 }
  0x2e   :  { %1578 = vmatprep.mubr.msk.bf16.mxu0 %vm442_vm0, %v1642_v17  ;;  %1594 = vmatprep.mubr.msk.bf16.mxu1 %vm442_vm0, %v1672_v19 }
  0x35   :  { %588 = vmatmul.mubr.bf16.gmra.mxu0 %v1644_v20  ;;  %716 = vmatmul.mubr.bf16.gmra.mxu1 %v1674_v22 }
  0x36   :  { %1579 = vmatprep.mubr.msk.bf16.mxu0 %vm442_vm0, %v1645_v21  ;;  %1595 = vmatprep.mubr.msk.bf16.mxu1 %vm442_vm0, %v1678_v23 }
  0x3d   :  { %596 = vmatmul.mubr.bf16.gmra.mxu0 %v1647_v24  ;;  %724 = vmatmul.mubr.bf16.gmra.mxu1 %v1680_v25 }
  0x3e   :  { %1580 = vmatprep.mubr.msk.bf16.mxu0 %vm442_vm0, %v1648_v26  ;;  %1596 = vmatprep.mubr.msk.bf16.mxu1 %vm442_vm0, %v1684_v27 }
  0x45   :  { %604 = vmatmul.mubr.bf16.gmra.mxu0 %v1650_v28  ;;  %732 = vmatmul.mubr.bf16.gmra.mxu1 %v1686_v29 }
  0x46   :  { %1581 = vmatprep.mubr.msk.bf16.mxu0 %vm442_vm0, %v1651_v30  ;;  %1597 = vmatprep.mubr.msk.bf16.mxu1 %vm442_vm0, %v1690_v31 }
  0x4d   :  { %612 = vmatmul.mubr.bf16.gmra.mxu0 %v1653_v32  ;;  %740 = vmatmul.mubr.bf16.gmra.mxu1 %v1692_v33 }
  0x4e   :  { %1582 = vmatprep.mubr.msk.bf16.mxu0 %vm442_vm0, %v1654_v34  ;;  %1598 = vmatprep.mubr.msk.bf16.mxu1 %vm442_vm0, %v1696_v35 }
  0x55   :  { %620 = vmatmul.mubr.bf16.gmra.mxu0 %v1656_v36  ;;  %748 = vmatmul.mubr.bf16.gmra.mxu1 %v1698_v37 }
  0x56   :  { %1583 = vmatprep.mubr.msk.bf16.mxu0 %vm442_vm0, %v1657_v38  ;;  %1599 = vmatprep.mubr.msk.bf16.mxu1 %vm442_vm0, %v1702_v39 }
  0x5d   :  { %628 = vmatmul.mubr.bf16.gmra.mxu0 %v1659_v40  ;;  %756 = vmatmul.mubr.bf16.gmra.mxu1 %v1704_v41 }
  0x5e   :  { %1584 = vmatprep.mubr.msk.bf16.mxu0 %vm442_vm0, %v1663_v42  ;;  %1600 = vmatprep.mubr.msk.bf16.mxu1 %vm442_vm0, %v1708_v43 }
  0x65   :  { %636 = vmatmul.mubr.bf16.gmra.mxu0 %v1665_v44  ;;  %764 = vmatmul.mubr.bf16.gmra.mxu1 %v1710_v45 }
  0x66   :  { %1585 = vmatprep.mubr.msk.bf16.mxu0 %vm442_vm0, %v1669_v46  ;;  %1601 = vmatprep.mubr.msk.bf16.mxu1 %vm442_vm0, %v1711_v47 }
  0x6d   :  { %644 = vmatmul.mubr.bf16.gmra.mxu0 %v1671_v48  ;;  %772 = vmatmul.mubr.bf16.gmra.mxu1 %v1713_v49 }
  0x6e   :  { %1586 = vmatprep.mubr.msk.bf16.mxu0 %vm442_vm0, %v1675_v50  ;;  %1602 = vmatprep.mubr.msk.bf16.mxu1 %vm442_vm0, %v1714_v51 }
  0x75   :  { %652 = vmatmul.mubr.bf16.gmra.mxu0 %v1677_v52  ;;  %780 = vmatmul.mubr.bf16.gmra.mxu1 %v1716_v53 }
  0x76   :  { %1587 = vmatprep.mubr.msk.bf16.mxu0 %vm442_vm0, %v1681_v54  ;;  %1603 = vmatprep.mubr.msk.bf16.mxu1 %vm442_vm0, %v1717_v55 }
  0x7d   :  { %660 = vmatmul.mubr.bf16.gmra.mxu0 %v1683_v56  ;;  %788 = vmatmul.mubr.bf16.gmra.mxu1 %v1719_v57 }
  0x7e   :  { %1588 = vmatprep.mubr.msk.bf16.mxu0 %vm442_vm0, %v1687_v58  ;;  %1604 = vmatprep.mubr.msk.bf16.mxu1 %vm442_vm0, %v1720_v59 }
  0x85   :  { %668 = vmatmul.mubr.bf16.gmra.mxu0 %v1689_v60  ;;  %796 = vmatmul.mubr.bf16.gmra.mxu1 %v1722_v61 }
  0x86   :  { %1589 = vmatprep.mubr.msk.bf16.mxu0 %vm442_vm0, %v1693_v62  ;;  %1605 = vmatprep.mubr.msk.bf16.mxu1 %vm442_vm0, %v1723_v63 }
  0x8d   :  { %676 = vmatmul.mubr.bf16.gmra.mxu0 %v1695_v0  ;;  %804 = vmatmul.mubr.bf16.gmra.mxu1 %v1725_v1 }
  0x8e   :  { %1590 = vmatprep.mubr.msk.bf16.mxu0 %vm442_vm0, %v1699_v2  ;;  %1606 = vmatprep.mubr.msk.bf16.mxu1 %vm442_vm0, %v1726_v3 }
  0x95   :  { %684 = vmatmul.mubr.bf16.gmra.mxu0 %v1701_v4  ;;  %812 = vmatmul.mubr.bf16.gmra.mxu1 %v1728_v5 }
  0x96   :  { %1591 = vmatprep.mubr.msk.bf16.mxu0 %vm442_vm0, %v1705_v6  ;;  %1607 = vmatprep.mubr.msk.bf16.mxu1 %vm442_vm0, %v1729_v7 }
  0x9d   :  { %692 = vmatmul.mubr.bf16.gmra.mxu0 %v1707_v8  ;;  %820 = vmatmul.mubr.bf16.gmra.mxu1 %v1731_v9 }
  0xe5   :  { %v2011_v10 = vpop.f32.mrf.mxu0  ;;  %v2013_v11 = vpop.f32.mrf.mxu1 }
  0xe7   :  { %v575_v12 = vpop.f32.mrf.mxu0  ;;  %v703_v13 = vpop.f32.mrf.mxu1 }
  0xe9   :  { %v2015_v14 = vpop.f32.mrf.mxu0  ;;  %v2017_v15 = vpop.f32.mrf.mxu1 }
  0xea   :  { %v829_v12 = vsel %vm442_vm0, %v2015_v14, 0.0 }
  0xeb   :  { %v578_v16 = vpop.f32.mrf.mxu0  ;;  %v706_v17 = vpop.f32.mrf.mxu1 }
  0xec   :  { %v828_v17 = vsel %vm442_vm0, %v2011_v10, 0.0 }
  0xed   :  { %v2019_v18 = vpop.f32.mrf.mxu0  ;;  %v2021_v19 = vpop.f32.mrf.mxu1 }
  0xef   :  { %v583_v20 = vpop.f32.mrf.mxu0  ;;  %v711_v21 = vpop.f32.mrf.mxu1 }
  0xf0   :  { %v831_v20 = vsel %vm442_vm0, %v2019_v18, 0.0  ;;  %v830_v21 = vadd.f32 %v829_v12, %v828_v17 }
  0xf1   :  { %v2023_v22 = vpop.f32.mrf.mxu0  ;;  %v2025_v23 = vpop.f32.mrf.mxu1 }
  0xf2   :  { %3367 = vst [vmem:[#allocation2_spill] sm:$0xff] %v2023_v22 }
  0xf3   :  { %v586_v24 = vpop.f32.mrf.mxu0  ;;  %v714_v25 = vpop.f32.mrf.mxu1 }
  0xf5   :  { %v2027_v26 = vpop.f32.mrf.mxu0  ;;  %v2029_v27 = vpop.f32.mrf.mxu1 }
  0xf6   :  { %3368 = vst [vmem:[#allocation3_spill] sm:$0xff] %v2027_v26 }
  0xf7   :  { %v591_v28 = vpop.f32.mrf.mxu0  ;;  %v719_v29 = vpop.f32.mrf.mxu1 }
  0xf8   :  { %v833_v28 = vsel %vm442_vm0, %v2023_v22, 0.0  ;;  %v832_v29 = vadd.f32 %v831_v20, %v830_v21 }
  0xf9   :  { %v2031_v30 = vpop.f32.mrf.mxu0  ;;  %v2033_v31 = vpop.f32.mrf.mxu1 }
  0xfa   :  { %3369 = vst [vmem:[#allocation4_spill] sm:$0xff] %v2031_v30 }
  0xfb   :  { %v594_v32 = vpop.f32.mrf.mxu0  ;;  %v722_v33 = vpop.f32.mrf.mxu1 }
  0xfd   :  { %v2035_v34 = vpop.f32.mrf.mxu0  ;;  %v2037_v35 = vpop.f32.mrf.mxu1 }
  0xff   :  { %v599_v36 = vpop.f32.mrf.mxu0  ;;  %v727_v37 = vpop.f32.mrf.mxu1 }
 0x100   :  { %v835_v36 = vsel %vm442_vm0, %v2027_v26, 0.0  ;;  %v834_v37 = vadd.f32 %v833_v28, %v832_v29 }
 0x101   :  { %v2039_v38 = vpop.f32.mrf.mxu0  ;;  %v2041_v39 = vpop.f32.mrf.mxu1 }
 0x103   :  { %v602_v40 = vpop.f32.mrf.mxu0  ;;  %v730_v41 = vpop.f32.mrf.mxu1 }
 0x105   :  { %v2043_v42 = vpop.f32.mrf.mxu0  ;;  %v2045_v43 = vpop.f32.mrf.mxu1 }
 0x107   :  { %v607_v44 = vpop.f32.mrf.mxu0  ;;  %v735_v45 = vpop.f32.mrf.mxu1 }
 0x108   :  { %v837_v44 = vsel %vm442_vm0, %v2031_v30, 0.0  ;;  %v836_v45 = vadd.f32 %v835_v36, %v834_v37 }
 0x109   :  { %v2047_v46 = vpop.f32.mrf.mxu0  ;;  %v2049_v47 = vpop.f32.mrf.mxu1 }
 0x10a   :  { %v845_v12 = vsel %vm442_vm0, %v2047_v46, 0.0 }
 0x10b   :  { %v610_v48 = vpop.f32.mrf.mxu0  ;;  %v738_v49 = vpop.f32.mrf.mxu1 }
 0x10d   :  { %v2051_v50 = vpop.f32.mrf.mxu0  ;;  %v2053_v51 = vpop.f32.mrf.mxu1 }
 0x10f   :  { %v615_v52 = vpop.f32.mrf.mxu0  ;;  %v743_v53 = vpop.f32.mrf.mxu1 }
 0x110   :  { %v839_v52 = vsel %vm442_vm0, %v2035_v34, 0.0  ;;  %v838_v53 = vadd.f32 %v837_v44, %v836_v45 }
 0x111   :  { %v2055_v54 = vpop.f32.mrf.mxu0  ;;  %v2057_v55 = vpop.f32.mrf.mxu1 }
 0x112   :  { %v849_v36 = vsel %vm442_vm0, %v2055_v54, 0.0 }
 0x113   :  { %v618_v56 = vpop.f32.mrf.mxu0  ;;  %v746_v57 = vpop.f32.mrf.mxu1 }
 0x115   :  { %v2059_v58 = vpop.f32.mrf.mxu0  ;;  %v2061_v59 = vpop.f32.mrf.mxu1 }
 0x116   :  { %v851_v44 = vsel %vm442_vm0, %v2059_v58, 0.0 }
 0x117   :  { %v623_v60 = vpop.f32.mrf.mxu0  ;;  %v751_v61 = vpop.f32.mrf.mxu1 }
 0x118   :  { %v841_v60 = vsel %vm442_vm0, %v2039_v38, 0.0  ;;  %v840_v61 = vadd.f32 %v839_v52, %v838_v53 }
 0x119   :  { %v2063_v62 = vpop.f32.mrf.mxu0  ;;  %v2065_v63 = vpop.f32.mrf.mxu1 }
 0x11a   :  { %3370 = vst [vmem:[#allocation5_spill] sm:$0xff] %v2063_v62 }
 0x11b   :  { %v626_v0 = vpop.f32.mrf.mxu0  ;;  %v754_v1 = vpop.f32.mrf.mxu1 }
 0x11d   :  { %v2067_v2 = vpop.f32.mrf.mxu0  ;;  %v2069_v3 = vpop.f32.mrf.mxu1 }
 0x11e   :  { %3371 = vst [vmem:[#allocation6_spill] sm:$0xff] %v2067_v2 }
 0x11f   :  { %v631_v4 = vpop.f32.mrf.mxu0  ;;  %v759_v5 = vpop.f32.mrf.mxu1 }
 0x120   :  { %v843_v4 = vsel %vm442_vm0, %v2043_v42, 0.0  ;;  %v842_v5 = vadd.f32 %v841_v60, %v840_v61 }
 0x121   :  { %v2071_v6 = vpop.f32.mrf.mxu0  ;;  %v2073_v7 = vpop.f32.mrf.mxu1 }
 0x122   :  { %3372 = vst [vmem:[#allocation7_spill] sm:$0xff] %v2071_v6  ;;  %v844_v17 = vadd.f32 %v843_v4, %v842_v5  ;;  %v855_v4 = vsel %vm442_vm0, %v2067_v2, 0.0 }
 0x123   :  { %v634_v8 = vpop.f32.mrf.mxu0  ;;  %v762_v9 = vpop.f32.mrf.mxu1 }
 0x125   :  { %v2077_v13 = vpop.f32.mrf.mxu0  ;;  %v2079_v16 = vpop.f32.mrf.mxu1 }
 0x126   :  { %3373 = vst [vmem:[#allocation8_spill] sm:$0xff] %v2077_v13 }
 0x127   :  { %v639_v24 = vpop.f32.mrf.mxu0  ;;  %v767_v25 = vpop.f32.mrf.mxu1 }
 0x128   :  { %v847_v24 = vsel %vm442_vm0, %v2051_v50, 0.0  ;;  %v846_v25 = vadd.f32 %v845_v12, %v844_v17  ;;  %v857_v12 = vsel %vm442_vm0, %v2071_v6, 0.0 }
 0x129   :  { %v2087_v32 = vpop.f32.mrf.mxu0  ;;  %v2089_v33 = vpop.f32.mrf.mxu1 }
 0x12a   :  { %3374 = vst [vmem:[#allocation9_spill] sm:$0xff] %v2087_v32  ;;  %v848_v37 = vadd.f32 %v847_v24, %v846_v25 }
 0x12b   :  { %v642_v40 = vpop.f32.mrf.mxu0  ;;  %v770_v41 = vpop.f32.mrf.mxu1 }
 0x12c   :  { %v850_v45 = vadd.f32 %v849_v36, %v848_v37 }
 0x12d   :  { %v2095_v48 = vpop.f32.mrf.mxu0  ;;  %v2097_v49 = vpop.f32.mrf.mxu1 }
 0x12e   :  { %3375 = vst [vmem:[#allocation10_spill] sm:$0xff] %v2095_v48 }
 0x12f   :  { %v647_v56 = vpop.f32.mrf.mxu0  ;;  %v775_v57 = vpop.f32.mrf.mxu1 }
 0x130   :  { %v853_v56 = vsel %vm442_vm0, %v2063_v62, 0.0  ;;  %v852_v57 = vadd.f32 %v851_v44, %v850_v45  ;;  %v861_v44 = vsel %vm442_vm0, %v2087_v32, 0.0 }
 0x131   :  { %v2103_v0 = vpop.f32.mrf.mxu0  ;;  %v2105_v1 = vpop.f32.mrf.mxu1 }
 0x132   :  { %3376 = vst [vmem:[#allocation11_spill] sm:$0xff] %v2103_v0  ;;  %v854_v5 = vadd.f32 %v853_v56, %v852_v57  ;;  %v863_v56 = vsel %vm442_vm0, %v2095_v48, 0.0 }
 0x133   :  { %v650_v8 = vpop.f32.mrf.mxu0  ;;  %v778_v9 = vpop.f32.mrf.mxu1 }
 0x134   :  { %v856_v17 = vadd.f32 %v855_v4, %v854_v5 }
 0x135   :  { %v2111_v20 = vpop.f32.mrf.mxu0  ;;  %v2113_v21 = vpop.f32.mrf.mxu1 }
 0x136   :  { %3377 = vst [vmem:[#allocation12_spill] sm:$0xff] %v2111_v20 }
 0x137   :  { %v655_v28 = vpop.f32.mrf.mxu0  ;;  %v783_v29 = vpop.f32.mrf.mxu1 }
 0x138   :  { %v859_v28 = vsel %vm442_vm0, %v2077_v13, 0.0  ;;  %v858_v29 = vadd.f32 %v857_v12, %v856_v17 }
 0x139   :  { %v2119_v40 = vpop.f32.mrf.mxu0  ;;  %v2121_v41 = vpop.f32.mrf.mxu1 }
 0x13a   :  { %3378 = vst [vmem:[#allocation13_spill] sm:$0xff] %v2119_v40  ;;  %v860_v45 = vadd.f32 %v859_v28, %v858_v29  ;;  %v867_v28 = vsel %vm442_vm0, %v2111_v20, 0.0  ;;  %v869_v48 = vsel %vm442_vm0, %v2119_v40, 0.0 }
 0x13b   :  { %v658_v52 = vpop.f32.mrf.mxu0  ;;  %v786_v53 = vpop.f32.mrf.mxu1 }
 0x13c   :  { %v862_v57 = vadd.f32 %v861_v44, %v860_v45 }
 0x13d   :  { %v2127_v60 = vpop.f32.mrf.mxu0  ;;  %v2129_v61 = vpop.f32.mrf.mxu1 }
 0x13e   :  { %3379 = vst [vmem:[#allocation14_spill] sm:$0xff] %v2127_v60 }
 0x13f   :  { %v663_v8 = vpop.f32.mrf.mxu0  ;;  %v791_v9 = vpop.f32.mrf.mxu1 }
 0x140   :  { %v865_v8 = vsel %vm442_vm0, %v2103_v0, 0.0  ;;  %v864_v9 = vadd.f32 %v863_v56, %v862_v57  ;;  %v871_v56 = vsel %vm442_vm0, %v2127_v60, 0.0 }
 0x141   :  { %v2135_v24 = vpop.f32.mrf.mxu0  ;;  %v2137_v25 = vpop.f32.mrf.mxu1 }
 0x142   :  { %3380 = vst [vmem:[#allocation15_spill] sm:$0xff] %v2135_v24  ;;  %3381 = vst [vmem:[#allocation16_spill] sm:$0xff] %v2137_v25  ;;  %v866_v29 = vadd.f32 %v865_v8, %v864_v9  ;;  %v873_v20 = vsel %vm442_vm0, %v2135_v24, 0.0 }
 0x143   :  { %v666_v36 = vpop.f32.mrf.mxu0  ;;  %v794_v37 = vpop.f32.mrf.mxu1 }
 0x144   :  { %v868_v44 = vadd.f32 %v867_v28, %v866_v29 }
 0x145   :  { %v2143_v52 = vpop.f32.mrf.mxu0  ;;  %v2145_v53 = vpop.f32.mrf.mxu1 }
 0x146   :  { %3382 = vst [vmem:[#allocation17_spill] sm:$0xff] %v2143_v52  ;;  %3383 = vst [vmem:[#allocation18_spill] sm:$0xff] %v2145_v53  ;;  %v870_v57 = vadd.f32 %v869_v48, %v868_v44  ;;  %v875_v28 = vsel %vm442_vm0, %v2143_v52, 0.0 }
 0x147   :  { %v671_v4 = vpop.f32.mrf.mxu0  ;;  %v799_v5 = vpop.f32.mrf.mxu1 }
 0x148   :  { %v872_v8 = vadd.f32 %v871_v56, %v870_v57 }
 0x149   :  { %v2151_v12 = vpop.f32.mrf.mxu0  ;;  %v2153_v17 = vpop.f32.mrf.mxu1 }
 0x14a   :  { %3384 = vst [vmem:[#allocation19_spill] sm:$0xff] %v2151_v12  ;;  %3385 = vst [vmem:[#allocation20_spill] sm:$0xff] %v2153_v17  ;;  %v874_v29 = vadd.f32 %v873_v20, %v872_v8  ;;  %v877_v60 = vsel %vm442_vm0, %v2151_v12, 0.0 }
 0x14b   :  { %v674_v36 = vpop.f32.mrf.mxu0  ;;  %v802_v37 = vpop.f32.mrf.mxu1 }
 0x14c   :  { %v876_v48 = vadd.f32 %v875_v28, %v874_v29 }
 0x14d   :  { %v2159_v45 = vpop.f32.mrf.mxu0  ;;  %v2161_v4 = vpop.f32.mrf.mxu1 }
 0x14e   :  { %3386 = vst [vmem:[#allocation21_spill] sm:$0xff] %v2159_v45  ;;  %3387 = vst [vmem:[#allocation22_spill] sm:$0xff] %v2161_v4  ;;  %v879_v56 = vsel %vm442_vm0, %v2159_v45, 0.0  ;;  %v878_v57 = vadd.f32 %v877_v60, %v876_v48 }
 0x14f   :  { %v679_v5 = vpop.f32.mrf.mxu0  ;;  %v807_v0 = vpop.f32.mrf.mxu1 }
 0x150   :  { %v880_v20 = vadd.f32 %v879_v56, %v878_v57 }
 0x151   :  { %v2167_v9 = vpop.f32.mrf.mxu0  ;;  %v2169_v36 = vpop.f32.mrf.mxu1 }
 0x152   :  { %3388 = vst [vmem:[#allocation23_spill] sm:$0xff] %v2167_v9  ;;  %3389 = vst [vmem:[#allocation24_spill] sm:$0xff] %v2169_v36  ;;  %v881_v52 = vsel %vm442_vm0, %v2167_v9, 0.0 }
 0x153   :  { %v682_v37 = vpop.f32.mrf.mxu0  ;;  %v810_v40 = vpop.f32.mrf.mxu1  ;;  %v882_v29 = vadd.f32 %v881_v52, %v880_v20 }
 0x155   :  { %v2175_v44 = vpop.f32.mrf.mxu0  ;;  %v2177_v0 = vpop.f32.mrf.mxu1 }
 0x156   :  { %3390 = vst [vmem:[#allocation25_spill] sm:$0xff] %v2177_v0  ;;  %v883_v28 = vsel %vm442_vm0, %v2175_v44, 0.0 }
 0x157   :  { %v687_v5 = vpop.f32.mrf.mxu0  ;;  %v815_v24 = vpop.f32.mrf.mxu1  ;;  %v884_v60 = vadd.f32 %v883_v28, %v882_v29 }
 0x159   :  { %v2183_v8 = vpop.f32.mrf.mxu0  ;;  %v2185_v40 = vpop.f32.mrf.mxu1 }
 0x15a   :  { %3391 = vst [vmem:[#allocation26_spill] sm:$0xff] %v2183_v8  ;;  %3392 = vst [vmem:[#allocation27_spill] sm:$0xff] %v2185_v40  ;;  %v885_v45 = vsel %vm442_vm0, %v2183_v8, 0.0 }
 0x15b   :  { %v690_v37 = vpop.f32.mrf.mxu0  ;;  %v818_v12 = vpop.f32.mrf.mxu1  ;;  %v886_v57 = vadd.f32 %v885_v45, %v884_v60  ;;  %v893_v45 = vsel %vm442_vm0, %v2017_v15, 0.0 }
 0x15c   :  { %v891_v37 = vsel %vm442_vm0, %v2013_v11, 0.0 }
 0x15d   :  { %v2191_v48 = vpop.f32.mrf.mxu0  ;;  %v2193_v24 = vpop.f32.mrf.mxu1 }
 0x15e   :  { %3393 = vst [vmem:[#allocation28_spill] sm:$0xff] %v2193_v24  ;;  %v887_v56 = vsel %vm442_vm0, %v2191_v48, 0.0 }
 0x15f   :  { %v695_v5 = vpop.f32.mrf.mxu0  ;;  %v823_v9 = vpop.f32.mrf.mxu1  ;;  %v888_v32 = vadd.f32 %v887_v56, %v886_v57  ;;  %v897_v57 = vsel %vm442_vm0, %v2025_v23, 0.0 }
 0x160   :  { %v895_v9 = vsel %vm442_vm0, %v2021_v19, 0.0 }
 0x161   :  { %v2197_v13 = vpop.f32.mrf.mxu0  ;;  %v2199_v52 = vpop.f32.mrf.mxu1 }
 0x162   :  { %3394 = vst [vmem:[#allocation29_spill] sm:$0xff] %v2199_v52  ;;  %v889_v12 = vsel %vm442_vm0, %v2197_v13, 0.0 }
 0x163   :  { %v890_v20 = vadd.f32 %v889_v12, %v888_v32  ;;  %v698_v28 = vpop.f32.mrf.mxu0  ;;  %v826_v29 = vpop.f32.mrf.mxu1  ;;  %v899_v32 = vsel %vm442_vm0, %v2029_v27, 0.0 }
 0x164   :  { %v901_v28 = vsel %vm442_vm0, %v2033_v31, 0.0  ;;  %v903_v29 = vsel %vm442_vm0, %v2037_v35, 0.0 }
 0x165   :  { %v892_v8 = vadd.f32 %v891_v37, %v890_v20  ;;  %v905_v37 = vsel %vm442_vm0, %v2041_v39, 0.0 }
 0x167   :  { %v894_v60 = vadd.f32 %v893_v45, %v892_v8 }
 0x169   :  { %v896_v56 = vadd.f32 %v895_v9, %v894_v60  ;;  %v907_v60 = vsel %vm442_vm0, %v2045_v43, 0.0 }
 0x16b   :  { %v898_v5 = vadd.f32 %v897_v57, %v896_v56  ;;  %v909_v56 = vsel %vm442_vm0, %v2049_v47, 0.0 }
 0x16d   :  { %v900_v12 = vadd.f32 %v899_v32, %v898_v5  ;;  %v911_v5 = vsel %vm442_vm0, %v2053_v51, 0.0 }
 0x16f   :  { %v902_v20 = vadd.f32 %v901_v28, %v900_v12  ;;  %v913_v12 = vsel %vm442_vm0, %v2057_v55, 0.0 }
 0x171   :  { %v904_v8 = vadd.f32 %v903_v29, %v902_v20  ;;  %v915_v20 = vsel %vm442_vm0, %v2061_v59, 0.0 }
 0x173   :  { %v906_v45 = vadd.f32 %v905_v37, %v904_v8  ;;  %v917_v8 = vsel %vm442_vm0, %v2065_v63, 0.0 }
 0x175   :  { %v908_v9 = vadd.f32 %v907_v60, %v906_v45  ;;  %v919_v45 = vsel %vm442_vm0, %v2069_v3, 0.0 }
 0x177   :  { %v910_v57 = vadd.f32 %v909_v56, %v908_v9  ;;  %v921_v9 = vsel %vm442_vm0, %v2073_v7, 0.0 }
 0x179   :  { %v912_v32 = vadd.f32 %v911_v5, %v910_v57  ;;  %v923_v57 = vsel %vm442_vm0, %v2079_v16, 0.0 }
 0x17b   :  { %v914_v28 = vadd.f32 %v913_v12, %v912_v32  ;;  %v925_v32 = vsel %vm442_vm0, %v2089_v33, 0.0 }
 0x17d   :  { %v916_v29 = vadd.f32 %v915_v20, %v914_v28  ;;  %v927_v28 = vsel %vm442_vm0, %v2097_v49, 0.0 }
 0x17f   :  { %v918_v37 = vadd.f32 %v917_v8, %v916_v29  ;;  %v929_v29 = vsel %vm442_vm0, %v2105_v1, 0.0 }
 0x181   :  { %v920_v60 = vadd.f32 %v919_v45, %v918_v37  ;;  %v931_v37 = vsel %vm442_vm0, %v2113_v21, 0.0 }
 0x183   :  { %v922_v56 = vadd.f32 %v921_v9, %v920_v60  ;;  %v933_v60 = vsel %vm442_vm0, %v2121_v41, 0.0 }
 0x185   :  { %v924_v5 = vadd.f32 %v923_v57, %v922_v56  ;;  %v935_v56 = vsel %vm442_vm0, %v2129_v61, 0.0 }
 0x187   :  { %v926_v12 = vadd.f32 %v925_v32, %v924_v5  ;;  %v937_v5 = vsel %vm442_vm0, %v2137_v25, 0.0 }
 0x189   :  { %v928_v20 = vadd.f32 %v927_v28, %v926_v12  ;;  %v939_v12 = vsel %vm442_vm0, %v2145_v53, 0.0 }
 0x18b   :  { %v930_v8 = vadd.f32 %v929_v29, %v928_v20  ;;  %v941_v20 = vsel %vm442_vm0, %v2153_v17, 0.0 }
 0x18d   :  { %v932_v45 = vadd.f32 %v931_v37, %v930_v8  ;;  %v943_v8 = vsel %vm442_vm0, %v2161_v4, 0.0 }
 0x18f   :  { %v934_v9 = vadd.f32 %v933_v60, %v932_v45  ;;  %v945_v45 = vsel %vm442_vm0, %v2169_v36, 0.0 }
 0x191   :  { %v936_v57 = vadd.f32 %v935_v56, %v934_v9  ;;  %v947_v9 = vsel %vm442_vm0, %v2177_v0, 0.0 }
 0x193   :  { %v938_v32 = vadd.f32 %v937_v5, %v936_v57  ;;  %v949_v57 = vsel %vm442_vm0, %v2185_v40, 0.0 }
 0x195   :  { %v940_v28 = vadd.f32 %v939_v12, %v938_v32  ;;  %v951_v32 = vsel %vm442_vm0, %v2193_v24, 0.0 }
 0x197   :  { %v942_v29 = vadd.f32 %v941_v20, %v940_v28  ;;  %v953_v28 = vsel %vm442_vm0, %v2199_v52, 0.0 }
 0x199   :  { %v944_v37 = vadd.f32 %v943_v8, %v942_v29 }
 0x19b   :  { %v946_v60 = vadd.f32 %v945_v45, %v944_v37 }
 0x19d   :  { %v948_v56 = vadd.f32 %v947_v9, %v946_v60 }
 0x19f   :  { %v950_v5 = vadd.f32 %v949_v57, %v948_v56 }
 0x1a1   :  { %v952_v12 = vadd.f32 %v951_v32, %v950_v5 }
 0x1a3   :  { %v954_v20 = vadd.f32 %v953_v28, %v952_v12 }
 0x1a5   :  { %v955_v29 = vrot.slane %v954_v20, 4 }
 0x1a7   :  { %v956_v8 = vadd.f32 %v955_v29, %v954_v20 }
 0x1a9   :  { %v957_v36 = vrot.slane %v956_v8, 2 }
 0x1ab   :  { %v958_v37 = vadd.f32 %v957_v36, %v956_v8 }
 0x1ad   :  { %v959_v45 = vrot.slane %v958_v37, 1 }
 0x1af   :  { %v960_v4 = vadd.f32 %v959_v45, %v958_v37 }
 0x1b1   :  { %v2267_v0 = vmul.f32 0.001953125, %v960_v4 }
 0x1b3   :  { %v962_v60 = vsub.f32 %v2011_v10, %v2267_v0  ;;  %v963_v9 = vsub.f32 %v2015_v14, %v2267_v0  ;;  %v964_v56 = vsub.f32 %v2019_v18, %v2267_v0  ;;  %v965_v57 = vsub.f32 %v2023_v22, %v2267_v0 }
 0x1b4   :  { %v966_v36 = vsub.f32 %v2027_v26, %v2267_v0  ;;  %v967_v4 = vsub.f32 %v2031_v30, %v2267_v0  ;;  %v968_v37 = vsub.f32 %v2035_v34, %v2267_v0  ;;  %v969_v26 = vsub.f32 %v2039_v38, %v2267_v0 }
 0x1b5   :  { %v1026_v5 = vmul.f32 %v962_v60, %v962_v60  ;;  %v1027_v32 = vmul.f32 %v963_v9, %v963_v9  ;;  %v1028_v12 = vmul.f32 %v964_v56, %v964_v56  ;;  %v1029_v28 = vmul.f32 %v965_v57, %v965_v57 }
 0x1b6   :  { %v1030_v45 = vmul.f32 %v966_v36, %v966_v36  ;;  %v1031_v56 = vmul.f32 %v967_v4, %v967_v4  ;;  %v970_v57 = vsub.f32 %v2043_v42, %v2267_v0  ;;  %v971_v36 = vsub.f32 %v2047_v46, %v2267_v0 }
 0x1b7   :  { %v1090_v20 = vsel %vm442_vm0, %v1026_v5, 0.0  ;;  %v1091_v29 = vsel %vm442_vm0, %v1027_v32, 0.0  ;;  %v1093_v60 = vsel %vm442_vm0, %v1028_v12, 0.0  ;;  %v1095_v22 = vsel %vm442_vm0, %v1029_v28, 0.0 }
 0x1b8   :  { %v1092_v8 = vadd.f32 %v1091_v29, %v1090_v20  ;;  %v1032_v5 = vmul.f32 %v968_v37, %v968_v37  ;;  %v1097_v32 = vsel %vm442_vm0, %v1030_v45, 0.0  ;;  %v1033_v29 = vmul.f32 %v969_v26, %v969_v26 }
 0x1b9   :  { %v1099_v12 = vsel %vm442_vm0, %v1031_v56, 0.0  ;;  %v972_v4 = vsub.f32 %v2051_v50, %v2267_v0  ;;  %v973_v37 = vsub.f32 %v2055_v54, %v2267_v0  ;;  %v974_v26 = vsub.f32 %v2059_v58, %v2267_v0 }
 0x1ba   :  { %v1094_v9 = vadd.f32 %v1093_v60, %v1092_v8  ;;  %v1034_v60 = vmul.f32 %v970_v57, %v970_v57  ;;  %v975_v57 = vsub.f32 %v2063_v62, %v2267_v0 }
 0x1bc   :  { %v1096_v30 = vadd.f32 %v1095_v22, %v1094_v9  ;;  %v1101_v22 = vsel %vm442_vm0, %v1032_v5, 0.0  ;;  %v1035_v9 = vmul.f32 %v971_v36, %v971_v36  ;;  %v1105_v56 = vsel %vm442_vm0, %v1034_v60, 0.0 }
 0x1bd   :  { %v976_v36 = vsub.f32 %v2067_v2, %v2267_v0 }
 0x1be   :  { %v1098_v20 = vadd.f32 %v1097_v32, %v1096_v30  ;;  %v1103_v30 = vsel %vm442_vm0, %v1033_v29, 0.0  ;;  %v1036_v32 = vmul.f32 %v972_v4, %v972_v4  ;;  %v1107_v5 = vsel %vm442_vm0, %v1035_v9, 0.0 }
 0x1bf   :  { %v977_v4 = vsub.f32 %v2071_v6, %v2267_v0  ;;  %v1040_v62 = vmul.f32 %v976_v36, %v976_v36 }
 0x1c0   :  { %v1100_v8 = vadd.f32 %v1099_v12, %v1098_v20  ;;  %v1037_v12 = vmul.f32 %v973_v37, %v973_v37  ;;  %v1109_v29 = vsel %vm442_vm0, %v1036_v32, 0.0 }
 0x1c1   :  { %v1041_v2 = vmul.f32 %v977_v4, %v977_v4 }
 0x1c2   :  { %v1102_v28 = vadd.f32 %v1101_v22, %v1100_v8  ;;  %v1038_v22 = vmul.f32 %v974_v26, %v974_v26  ;;  %v1111_v60 = vsel %vm442_vm0, %v1037_v12, 0.0  ;;  %v1117_v12 = vsel %vm442_vm0, %v1040_v62, 0.0 }
 0x1c4   :  { %v1104_v45 = vadd.f32 %v1103_v30, %v1102_v28  ;;  %v1039_v30 = vmul.f32 %v975_v57, %v975_v57  ;;  %v1113_v9 = vsel %vm442_vm0, %v1038_v22, 0.0  ;;  %v1119_v22 = vsel %vm442_vm0, %v1041_v2, 0.0 }
 0x1c6   :  { %v1106_v20 = vadd.f32 %v1105_v56, %v1104_v45  ;;  %v3395_v56 = vld [vmem:[#allocation8_spill] sm:$0xff]  ;;  %v1115_v32 = vsel %vm442_vm0, %v1039_v30, 0.0 }
 0x1c7   :  { %v978_v37 = vsub.f32 %v3395_v56, %v2267_v0 }
 0x1c8   :  { %v1108_v8 = vadd.f32 %v1107_v5, %v1106_v20  ;;  %v3396_v5 = vld [vmem:[#allocation9_spill] sm:$0xff] }
 0x1c9   :  { %v979_v26 = vsub.f32 %v3396_v5, %v2267_v0  ;;  %v1042_v6 = vmul.f32 %v978_v37, %v978_v37 }
 0x1ca   :  { %v1110_v28 = vadd.f32 %v1109_v29, %v1108_v8  ;;  %v3397_v29 = vld [vmem:[#allocation10_spill] sm:$0xff] }
 0x1cb   :  { %v980_v57 = vsub.f32 %v3397_v29, %v2267_v0  ;;  %v1043_v56 = vmul.f32 %v979_v26, %v979_v26  ;;  %v1121_v30 = vsel %vm442_vm0, %v1042_v6, 0.0 }
 0x1cc   :  { %v1112_v45 = vadd.f32 %v1111_v60, %v1110_v28  ;;  %v3398_v60 = vld [vmem:[#allocation11_spill] sm:$0xff] }
 0x1cd   :  { %v981_v36 = vsub.f32 %v3398_v60, %v2267_v0  ;;  %v1044_v5 = vmul.f32 %v980_v57, %v980_v57  ;;  %v1123_v62 = vsel %vm442_vm0, %v1043_v56, 0.0 }
 0x1ce   :  { %v1114_v20 = vadd.f32 %v1113_v9, %v1112_v45  ;;  %v3399_v9 = vld [vmem:[#allocation12_spill] sm:$0xff] }
 0x1cf   :  { %v982_v4 = vsub.f32 %v3399_v9, %v2267_v0  ;;  %v1045_v29 = vmul.f32 %v981_v36, %v981_v36  ;;  %v1125_v2 = vsel %vm442_vm0, %v1044_v5, 0.0 }
 0x1d0   :  { %v1116_v8 = vadd.f32 %v1115_v32, %v1114_v20  ;;  %v3400_v32 = vld [vmem:[#allocation13_spill] sm:$0xff] }
 0x1d1   :  { %v983_v37 = vsub.f32 %v3400_v32, %v2267_v0  ;;  %v1046_v60 = vmul.f32 %v982_v4, %v982_v4  ;;  %v1127_v6 = vsel %vm442_vm0, %v1045_v29, 0.0 }
 0x1d2   :  { %v1118_v28 = vadd.f32 %v1117_v12, %v1116_v8  ;;  %v3401_v12 = vld [vmem:[#allocation14_spill] sm:$0xff] }
 0x1d3   :  { %v984_v26 = vsub.f32 %v3401_v12, %v2267_v0  ;;  %v1047_v9 = vmul.f32 %v983_v37, %v983_v37  ;;  %v1129_v56 = vsel %vm442_vm0, %v1046_v60, 0.0 }
 0x1d4   :  { %v1120_v45 = vadd.f32 %v1119_v22, %v1118_v28  ;;  %v3402_v22 = vld [vmem:[#allocation15_spill] sm:$0xff] }
 0x1d5   :  { %v985_v57 = vsub.f32 %v3402_v22, %v2267_v0  ;;  %v1048_v32 = vmul.f32 %v984_v26, %v984_v26  ;;  %v1131_v5 = vsel %vm442_vm0, %v1047_v9, 0.0 }
 0x1d6   :  { %v1122_v20 = vadd.f32 %v1121_v30, %v1120_v45  ;;  %v3403_v30 = vld [vmem:[#allocation17_spill] sm:$0xff] }
 0x1d7   :  { %v986_v36 = vsub.f32 %v3403_v30, %v2267_v0  ;;  %v1049_v12 = vmul.f32 %v985_v57, %v985_v57  ;;  %v1133_v29 = vsel %vm442_vm0, %v1048_v32, 0.0  ;;  %v990_v57 = vsub.f32 %v2175_v44, %v2267_v0 }
 0x1d8   :  { %v1124_v8 = vadd.f32 %v1123_v62, %v1122_v20  ;;  %v3404_v62 = vld [vmem:[#allocation19_spill] sm:$0xff] }
 0x1d9   :  { %v987_v4 = vsub.f32 %v3404_v62, %v2267_v0  ;;  %v1050_v22 = vmul.f32 %v986_v36, %v986_v36  ;;  %v1135_v60 = vsel %vm442_vm0, %v1049_v12, 0.0 }
 0x1da   :  { %v1126_v28 = vadd.f32 %v1125_v2, %v1124_v8  ;;  %v3405_v2 = vld [vmem:[#allocation21_spill] sm:$0xff] }
 0x1db   :  { %v988_v37 = vsub.f32 %v3405_v2, %v2267_v0  ;;  %v1051_v30 = vmul.f32 %v987_v4, %v987_v4  ;;  %v1137_v9 = vsel %vm442_vm0, %v1050_v22, 0.0  ;;  %v992_v4 = vsub.f32 %v2191_v48, %v2267_v0 }
 0x1dc   :  { %v1128_v45 = vadd.f32 %v1127_v6, %v1126_v28  ;;  %v3406_v6 = vld [vmem:[#allocation23_spill] sm:$0xff] }
 0x1dd   :  { %v989_v26 = vsub.f32 %v3406_v6, %v2267_v0  ;;  %v1139_v32 = vsel %vm442_vm0, %v1051_v30, 0.0 }
 0x1de   :  { %v1130_v20 = vadd.f32 %v1129_v56, %v1128_v45  ;;  %v1052_v56 = vmul.f32 %v988_v37, %v988_v37  ;;  %v993_v37 = vsub.f32 %v2197_v13, %v2267_v0 }
 0x1df   :  { %v1053_v2 = vmul.f32 %v989_v26, %v989_v26  ;;  %v994_v26 = vsub.f32 %v2013_v11, %v2267_v0 }
 0x1e0   :  { %v1132_v8 = vadd.f32 %v1131_v5, %v1130_v20  ;;  %v3407_v5 = vld [vmem:[#allocation26_spill] sm:$0xff]  ;;  %v1141_v12 = vsel %vm442_vm0, %v1052_v56, 0.0 }
 0x1e1   :  { %v991_v36 = vsub.f32 %v3407_v5, %v2267_v0  ;;  %v1143_v22 = vsel %vm442_vm0, %v1053_v2, 0.0 }
 0x1e2   :  { %v1134_v28 = vadd.f32 %v1133_v29, %v1132_v8  ;;  %v1054_v29 = vmul.f32 %v990_v57, %v990_v57  ;;  %v995_v57 = vsub.f32 %v2017_v15, %v2267_v0 }
 0x1e4   :  { %v1136_v45 = vadd.f32 %v1135_v60, %v1134_v28  ;;  %v1055_v60 = vmul.f32 %v991_v36, %v991_v36  ;;  %v1145_v30 = vsel %vm442_vm0, %v1054_v29, 0.0  ;;  %v996_v36 = vsub.f32 %v2021_v19, %v2267_v0 }
 0x1e6   :  { %v1138_v20 = vadd.f32 %v1137_v9, %v1136_v45  ;;  %v1056_v9 = vmul.f32 %v992_v4, %v992_v4  ;;  %v1147_v56 = vsel %vm442_vm0, %v1055_v60, 0.0  ;;  %v997_v4 = vsub.f32 %v2025_v23, %v2267_v0 }
 0x1e8   :  { %v1140_v8 = vadd.f32 %v1139_v32, %v1138_v20  ;;  %v1057_v32 = vmul.f32 %v993_v37, %v993_v37  ;;  %v1149_v2 = vsel %vm442_vm0, %v1056_v9, 0.0  ;;  %v998_v37 = vsub.f32 %v2029_v27, %v2267_v0 }
 0x1ea   :  { %v1142_v28 = vadd.f32 %v1141_v12, %v1140_v8  ;;  %v1058_v12 = vmul.f32 %v994_v26, %v994_v26  ;;  %v1151_v29 = vsel %vm442_vm0, %v1057_v32, 0.0  ;;  %v999_v26 = vsub.f32 %v2033_v31, %v2267_v0 }
 0x1ec   :  { %v1144_v45 = vadd.f32 %v1143_v22, %v1142_v28  ;;  %v1059_v22 = vmul.f32 %v995_v57, %v995_v57  ;;  %v1153_v60 = vsel %vm442_vm0, %v1058_v12, 0.0  ;;  %v1000_v57 = vsub.f32 %v2037_v35, %v2267_v0 }
 0x1ee   :  { %v1146_v20 = vadd.f32 %v1145_v30, %v1144_v45  ;;  %v1060_v30 = vmul.f32 %v996_v36, %v996_v36  ;;  %v1155_v9 = vsel %vm442_vm0, %v1059_v22, 0.0  ;;  %v1001_v36 = vsub.f32 %v2041_v39, %v2267_v0 }
 0x1f0   :  { %v1148_v8 = vadd.f32 %v1147_v56, %v1146_v20  ;;  %v1061_v56 = vmul.f32 %v997_v4, %v997_v4  ;;  %v1157_v32 = vsel %vm442_vm0, %v1060_v30, 0.0  ;;  %v1002_v4 = vsub.f32 %v2045_v43, %v2267_v0 }
 0x1f2   :  { %v1150_v28 = vadd.f32 %v1149_v2, %v1148_v8  ;;  %v1062_v2 = vmul.f32 %v998_v37, %v998_v37  ;;  %v1159_v12 = vsel %vm442_vm0, %v1061_v56, 0.0  ;;  %v1003_v37 = vsub.f32 %v2049_v47, %v2267_v0 }
 0x1f4   :  { %v1152_v45 = vadd.f32 %v1151_v29, %v1150_v28  ;;  %v1063_v29 = vmul.f32 %v999_v26, %v999_v26  ;;  %v1161_v22 = vsel %vm442_vm0, %v1062_v2, 0.0  ;;  %v1004_v26 = vsub.f32 %v2053_v51, %v2267_v0 }
 0x1f6   :  { %v1154_v20 = vadd.f32 %v1153_v60, %v1152_v45  ;;  %v1064_v60 = vmul.f32 %v1000_v57, %v1000_v57  ;;  %v1163_v30 = vsel %vm442_vm0, %v1063_v29, 0.0  ;;  %v1005_v57 = vsub.f32 %v2057_v55, %v2267_v0 }
 0x1f8   :  { %v1156_v8 = vadd.f32 %v1155_v9, %v1154_v20  ;;  %v1065_v9 = vmul.f32 %v1001_v36, %v1001_v36  ;;  %v1165_v56 = vsel %vm442_vm0, %v1064_v60, 0.0  ;;  %v1006_v36 = vsub.f32 %v2061_v59, %v2267_v0 }
 0x1fa   :  { %v1158_v28 = vadd.f32 %v1157_v32, %v1156_v8  ;;  %v1066_v32 = vmul.f32 %v1002_v4, %v1002_v4  ;;  %v1167_v2 = vsel %vm442_vm0, %v1065_v9, 0.0  ;;  %v1007_v4 = vsub.f32 %v2065_v63, %v2267_v0 }
 0x1fc   :  { %v1160_v45 = vadd.f32 %v1159_v12, %v1158_v28  ;;  %v1067_v12 = vmul.f32 %v1003_v37, %v1003_v37  ;;  %v1169_v29 = vsel %vm442_vm0, %v1066_v32, 0.0  ;;  %v1008_v37 = vsub.f32 %v2069_v3, %v2267_v0 }
 0x1fe   :  { %v1162_v20 = vadd.f32 %v1161_v22, %v1160_v45  ;;  %v1068_v22 = vmul.f32 %v1004_v26, %v1004_v26  ;;  %v1171_v60 = vsel %vm442_vm0, %v1067_v12, 0.0  ;;  %v1009_v26 = vsub.f32 %v2073_v7, %v2267_v0 }
 0x200   :  { %v1164_v8 = vadd.f32 %v1163_v30, %v1162_v20  ;;  %v1069_v30 = vmul.f32 %v1005_v57, %v1005_v57  ;;  %v1173_v9 = vsel %vm442_vm0, %v1068_v22, 0.0  ;;  %v1010_v57 = vsub.f32 %v2079_v16, %v2267_v0 }
 0x202   :  { %v1166_v28 = vadd.f32 %v1165_v56, %v1164_v8  ;;  %v1070_v56 = vmul.f32 %v1006_v36, %v1006_v36  ;;  %v1175_v32 = vsel %vm442_vm0, %v1069_v30, 0.0  ;;  %v1011_v36 = vsub.f32 %v2089_v33, %v2267_v0 }
 0x204   :  { %v1168_v45 = vadd.f32 %v1167_v2, %v1166_v28  ;;  %v1071_v2 = vmul.f32 %v1007_v4, %v1007_v4  ;;  %v1177_v12 = vsel %vm442_vm0, %v1070_v56, 0.0  ;;  %v1012_v4 = vsub.f32 %v2097_v49, %v2267_v0 }
 0x206   :  { %v1170_v20 = vadd.f32 %v1169_v29, %v1168_v45  ;;  %v1072_v29 = vmul.f32 %v1008_v37, %v1008_v37  ;;  %v1179_v22 = vsel %vm442_vm0, %v1071_v2, 0.0  ;;  %v1013_v37 = vsub.f32 %v2105_v1, %v2267_v0 }
 0x208   :  { %v1172_v8 = vadd.f32 %v1171_v60, %v1170_v20  ;;  %v1073_v60 = vmul.f32 %v1009_v26, %v1009_v26  ;;  %v1181_v30 = vsel %vm442_vm0, %v1072_v29, 0.0  ;;  %v1014_v26 = vsub.f32 %v2113_v21, %v2267_v0 }
 0x20a   :  { %v1174_v28 = vadd.f32 %v1173_v9, %v1172_v8  ;;  %v1074_v9 = vmul.f32 %v1010_v57, %v1010_v57  ;;  %v1183_v56 = vsel %vm442_vm0, %v1073_v60, 0.0  ;;  %v1015_v57 = vsub.f32 %v2121_v41, %v2267_v0 }
 0x20c   :  { %v1176_v45 = vadd.f32 %v1175_v32, %v1174_v28  ;;  %v1075_v32 = vmul.f32 %v1011_v36, %v1011_v36  ;;  %v1185_v2 = vsel %vm442_vm0, %v1074_v9, 0.0  ;;  %v1016_v36 = vsub.f32 %v2129_v61, %v2267_v0 }
 0x20e   :  { %v1178_v20 = vadd.f32 %v1177_v12, %v1176_v45  ;;  %v1076_v12 = vmul.f32 %v1012_v4, %v1012_v4  ;;  %v1187_v29 = vsel %vm442_vm0, %v1075_v32, 0.0  ;;  %v1017_v4 = vsub.f32 %v2137_v25, %v2267_v0 }
 0x210   :  { %v1180_v8 = vadd.f32 %v1179_v22, %v1178_v20  ;;  %v1077_v22 = vmul.f32 %v1013_v37, %v1013_v37  ;;  %v1189_v60 = vsel %vm442_vm0, %v1076_v12, 0.0  ;;  %v1018_v37 = vsub.f32 %v2145_v53, %v2267_v0 }
 0x212   :  { %v1182_v28 = vadd.f32 %v1181_v30, %v1180_v8  ;;  %v1078_v30 = vmul.f32 %v1014_v26, %v1014_v26  ;;  %v1191_v9 = vsel %vm442_vm0, %v1077_v22, 0.0  ;;  %v1019_v26 = vsub.f32 %v2153_v17, %v2267_v0 }
 0x213   :  { %v1082_v25 = vmul.f32 %v1018_v37, %v1018_v37  ;;  %v1023_v37 = vsub.f32 %v2185_v40, %v2267_v0 }
 0x214   :  { %v1184_v45 = vadd.f32 %v1183_v56, %v1182_v28  ;;  %v1079_v56 = vmul.f32 %v1015_v57, %v1015_v57  ;;  %v1193_v32 = vsel %vm442_vm0, %v1078_v30, 0.0  ;;  %v1083_v53 = vmul.f32 %v1019_v26, %v1019_v26 }
 0x215   :  { %v1024_v26 = vsub.f32 %v2193_v24, %v2267_v0 }
 0x216   :  { %v1186_v20 = vadd.f32 %v1185_v2, %v1184_v45  ;;  %v1080_v2 = vmul.f32 %v1016_v36, %v1016_v36  ;;  %v1195_v12 = vsel %vm442_vm0, %v1079_v56, 0.0  ;;  %v1201_v56 = vsel %vm442_vm0, %v1082_v25, 0.0 }
 0x218   :  { %v1188_v8 = vadd.f32 %v1187_v29, %v1186_v20  ;;  %v1081_v29 = vmul.f32 %v1017_v4, %v1017_v4  ;;  %v1197_v22 = vsel %vm442_vm0, %v1080_v2, 0.0  ;;  %v1203_v2 = vsel %vm442_vm0, %v1083_v53, 0.0 }
 0x21a   :  { %v1190_v28 = vadd.f32 %v1189_v60, %v1188_v8  ;;  %v3408_v60 = vld [vmem:[#allocation22_spill] sm:$0xff]  ;;  %v1199_v30 = vsel %vm442_vm0, %v1081_v29, 0.0 }
 0x21b   :  { %v1020_v57 = vsub.f32 %v3408_v60, %v2267_v0 }
 0x21c   :  { %v1192_v45 = vadd.f32 %v1191_v9, %v1190_v28  ;;  %v3409_v9 = vld [vmem:[#allocation24_spill] sm:$0xff] }
 0x21d   :  { %v1021_v36 = vsub.f32 %v3409_v9, %v2267_v0  ;;  %v1084_v17 = vmul.f32 %v1020_v57, %v1020_v57  ;;  %v1025_v57 = vsub.f32 %v2199_v52, %v2267_v0 }
 0x21e   :  { %v1194_v20 = vadd.f32 %v1193_v32, %v1192_v45  ;;  %v3410_v32 = vld [vmem:[#allocation25_spill] sm:$0xff] }
 0x21f   :  { %v1022_v4 = vsub.f32 %v3410_v32, %v2267_v0  ;;  %v1205_v29 = vsel %vm442_vm0, %v1084_v17, 0.0  ;;  %v1089_v53 = vmul.f32 %v1025_v57, %v1025_v57 }
 0x220   :  { %v1196_v8 = vadd.f32 %v1195_v12, %v1194_v20  ;;  %v1085_v12 = vmul.f32 %v1021_v36, %v1021_v36 }
 0x221   :  { %v1215_v17 = vsel %vm442_vm0, %v1089_v53, 0.0 }
 0x222   :  { %v1198_v28 = vadd.f32 %v1197_v22, %v1196_v8  ;;  %v1086_v22 = vmul.f32 %v1022_v4, %v1022_v4  ;;  %v1207_v25 = vsel %vm442_vm0, %v1085_v12, 0.0 }
 0x224   :  { %v1200_v45 = vadd.f32 %v1199_v30, %v1198_v28  ;;  %v1087_v30 = vmul.f32 %v1023_v37, %v1023_v37  ;;  %v1209_v36 = vsel %vm442_vm0, %v1086_v22, 0.0  ;;  %v1232_v22 = vlaneseq }
 0x226   :  { %v1202_v20 = vadd.f32 %v1201_v56, %v1200_v45  ;;  %v1088_v56 = vmul.f32 %v1024_v26, %v1024_v26  ;;  %v2461_v57 = vshrl.u32 %v1232_v22, 7  ;;  %v3416_v22 = vld [vmem:[#allocation7_spill] sm:$0xff] }
 0x228   :  { %v1204_v8 = vadd.f32 %v1203_v2, %v1202_v20  ;;  %v1211_v20 = vsel %vm442_vm0, %v1087_v30, 0.0  ;;  %v1213_v4 = vsel %vm442_vm0, %v1088_v56, 0.0  ;;  %v3366_v30 = vsub.s32 0, %v2461_v57 }
 0x22a   :  { %v1206_v28 = vadd.f32 %v1205_v29, %v1204_v8 }
 0x22c   :  { %v1208_v45 = vadd.f32 %v1207_v25, %v1206_v28 }
 0x22e   :  { %v1210_v40 = vadd.f32 %v1209_v36, %v1208_v45 }
 0x230   :  { %v1212_v2 = vadd.f32 %v1211_v20, %v1210_v40  ;;  %v1224_v40 = vld [vmem:[%s3319_s2] sm:$0x1] }
 0x232   :  { %v1214_v24 = vadd.f32 %v1213_v4, %v1212_v2 }
 0x234   :  { %v1216_v8 = vadd.f32 %v1215_v17, %v1214_v24  ;;  %v3412_v17 = vld [vmem:[#allocation3_spill] sm:$0xff] }
 0x236   :  { %v1217_v29 = vrot.slane %v1216_v8, 4 }
 0x238   :  { %v1218_v52 = vadd.f32 %v1217_v29, %v1216_v8  ;;  %v3413_v29 = vld [vmem:[#allocation4_spill] sm:$0xff] }
 0x23a   :  { %v1219_v37 = vrot.slane %v1218_v52, 2 }
 0x23c   :  { %v1220_v32 = vadd.f32 %v1219_v37, %v1218_v52  ;;  %v2470_v52 = vld [vmem:[%s3320_s3] sm:$0x1] }
 0x23e   :  { %v1221_v12 = vrot.slane %v1220_v32, 1 }
 0x240   :  { %v1222_v28 = vadd.f32 %v1221_v12, %v1220_v32 }
 0x242   :  { %v1223_v26 = vmul.f32 0.001953125, %v1222_v28 }
 0x244   :  { %v1225_v25 = vadd.f32 1e-05, %v1223_v26  ;;  %v3414_v26 = vld [vmem:[#allocation5_spill] sm:$0xff] }
 0x246   :  { %1732 = vrsqrt.f32 %v1225_v25  ;;  %v3415_v25 = vld [vmem:[#allocation6_spill] sm:$0xff] }
 0x253   :  { %v1733_v45 = vpop.eup %1732 }
 0x254   :  { %v1227_v24 = vmul.f32 %v1733_v45, %v1224_v40  ;;  %v3417_v40 = vld [vmem:[#allocation8_spill] sm:$0xff]  ;;  %v3418_v45 = vld [vmem:[#allocation9_spill] sm:$0xff] }
 0x256   :  { %v2473_v32 = vmul.f32 %v1227_v24, %v2267_v0  ;;  %v2477_v56 = vrot.slane %v1227_v24, %v3366_v30  ;;  %v3411_v0 = vld [vmem:[#allocation2_spill] sm:$0xff]  ;;  %v3426_v30 = vld [vmem:[#allocation17_spill] sm:$0xff] }
 0x257   :  { %v3419_v24 = vld [vmem:[#allocation10_spill] sm:$0xff] }
 0x258   :  { %v1230_v36 = vsub.f32 %v2470_v52, %v2473_v32  ;;  %v2483_v53 = vmul.f32 %v2477_v56, %v2011_v10  ;;  %v2487_v20 = vmul.f32 %v2477_v56, %v2015_v14  ;;  %v2491_v2 = vmul.f32 %v2477_v56, %v2019_v18  ;;  %v3420_v32 = vld [vmem:[#allocation11_spill] sm:$0xff] }
 0x259   :  { %v2495_v4 = vmul.f32 %v2477_v56, %v3411_v0  ;;  %v2499_v8 = vmul.f32 %v2477_v56, %v3412_v17  ;;  %v2503_v10 = vmul.f32 %v2477_v56, %v3413_v29  ;;  %v2507_v14 = vmul.f32 %v2477_v56, %v2035_v34  ;;  %v3421_v17 = vld [vmem:[#allocation12_spill] sm:$0xff] }
 0x25a   :  { %v2511_v18 = vmul.f32 %v2477_v56, %v2039_v38  ;;  %v2515_v37 = vmul.f32 %v2477_v56, %v2043_v42  ;;  %v2519_v12 = vmul.f32 %v2477_v56, %v2047_v46  ;;  %v2523_v28 = vmul.f32 %v2477_v56, %v2051_v50 }
 0x25b   :  { %v2527_v34 = vmul.f32 %v2477_v56, %v2055_v54  ;;  %v2531_v38 = vmul.f32 %v2477_v56, %v2059_v58  ;;  %v2535_v42 = vmul.f32 %v2477_v56, %v3414_v26  ;;  %v2539_v46 = vmul.f32 %v2477_v56, %v3415_v25  ;;  %v3423_v26 = vld [vmem:[#allocation13_spill] sm:$0xff] }
 0x25c   :  { %v2543_v50 = vmul.f32 %v2477_v56, %v3416_v22  ;;  %v2547_v54 = vmul.f32 %v2477_v56, %v3417_v40  ;;  %v2551_v58 = vmul.f32 %v2477_v56, %v3418_v45  ;;  %v2555_v52 = vmul.f32 %v2477_v56, %v3419_v24  ;;  %v3424_v22 = vld [vmem:[#allocation14_spill] sm:$0xff]  ;;  %v3425_v45 = vld [vmem:[#allocation15_spill] sm:$0xff] }
 0x25d   :  { %v2559_v0 = vmul.f32 %v2477_v56, %v3420_v32  ;;  %v2563_v29 = vmul.f32 %v2477_v56, %v3421_v17  ;;  %v2567_v25 = vmul.f32 %v2477_v56, %v3423_v26  ;;  %v2571_v40 = vmul.f32 %v2477_v56, %v3424_v22 }
 0x25e   :  { %v2575_v24 = vmul.f32 %v2477_v56, %v3425_v45  ;;  %v2579_v32 = vmul.f32 %v2477_v56, %v3426_v30  ;;  %v2583_v17 = vmul.f32 %v2477_v56, %v3404_v62  ;;  %v2591_v22 = vmul.f32 %v2477_v56, %v3406_v6 }
 0x25f   :  { %3422 = vst [vmem:[#allocation19_spill] sm:$0xff] %v2563_v29  ;;  %v3427_v29 = vld [vmem:[#allocation21_spill] sm:$0xff]  ;;  %v2595_v45 = vmul.f32 %v2477_v56, %v2175_v44  ;;  %v2599_v30 = vmul.f32 %v2477_v56, %v3407_v5  ;;  %v2603_v62 = vmul.f32 %v2477_v56, %v2191_v48  ;;  %v2611_v6 = vmul.f32 %v2477_v56, %v2013_v11 }
 0x260   :  { %v2587_v26 = vmul.f32 %v2477_v56, %v3427_v29  ;;  %v2607_v29 = vmul.f32 %v2477_v56, %v2197_v13  ;;  %v2615_v44 = vmul.f32 %v2477_v56, %v2017_v15  ;;  %v2619_v5 = vmul.f32 %v2477_v56, %v2021_v19 }
 0x261   :  { %v2623_v48 = vmul.f32 %v2477_v56, %v2025_v23  ;;  %v2627_v13 = vmul.f32 %v2477_v56, %v2029_v27  ;;  %v2631_v11 = vmul.f32 %v2477_v56, %v2033_v31  ;;  %v2635_v15 = vmul.f32 %v2477_v56, %v2037_v35 }
 0x262   :  { %v2639_v19 = vmul.f32 %v2477_v56, %v2041_v39  ;;  %v2643_v23 = vmul.f32 %v2477_v56, %v2045_v43  ;;  %v2647_v27 = vmul.f32 %v2477_v56, %v2049_v47  ;;  %v2651_v31 = vmul.f32 %v2477_v56, %v2053_v51 }
 0x263   :  { %v2655_v35 = vmul.f32 %v2477_v56, %v2057_v55  ;;  %v2659_v39 = vmul.f32 %v2477_v56, %v2061_v59  ;;  %v2663_v43 = vmul.f32 %v2477_v56, %v2065_v63  ;;  %v2667_v47 = vmul.f32 %v2477_v56, %v2069_v3 }
 0x264   :  { %v2671_v51 = vmul.f32 %v2477_v56, %v2073_v7  ;;  %v2675_v55 = vmul.f32 %v2477_v56, %v2079_v16  ;;  %v2679_v59 = vmul.f32 %v2477_v56, %v2089_v33  ;;  %v2683_v63 = vmul.f32 %v2477_v56, %v2097_v49 }
 0x265   :  { %v2687_v3 = vmul.f32 %v2477_v56, %v2105_v1  ;;  %v2691_v7 = vmul.f32 %v2477_v56, %v2113_v21  ;;  %v2695_v16 = vmul.f32 %v2477_v56, %v2121_v41  ;;  %v2699_v33 = vmul.f32 %v2477_v56, %v2129_v61 }
 0x266   :  { %3428 = vst [vmem:[#allocation23_spill] sm:$0xff] %v2679_v59  ;;  %3429 = vst [vmem:[#allocation26_spill] sm:$0xff] %v2683_v63  ;;  %v3432_v59 = vld [vmem:[#allocation16_spill] sm:$0xff]  ;;  %v3434_v63 = vld [vmem:[#allocation18_spill] sm:$0xff]  ;;  %v2715_v41 = vmul.f32 %v2477_v56, %v3408_v60  ;;  %v2719_v61 = vmul.f32 %v2477_v56, %v3409_v9 }
 0x267   :  { %3430 = vst [vmem:[#allocation22_spill] sm:$0xff] %v2687_v3  ;;  %3431 = vst [vmem:[#allocation24_spill] sm:$0xff] %v2699_v33  ;;  %v2703_v49 = vmul.f32 %v2477_v56, %v3432_v59  ;;  %v2707_v1 = vmul.f32 %v2477_v56, %v3434_v63  ;;  %v3436_v3 = vld [vmem:[#allocation20_spill] sm:$0xff]  ;;  %v3439_v33 = vsub.s32 0, %v2461_v57 }
 0x268   :  { %v2711_v21 = vmul.f32 %v2477_v56, %v3436_v3  ;;  %3438 = vst [vmem:[#allocation5_spill] sm:$0xff] %v2715_v41  ;;  %v3443_v41 = vld [vmem:[#allocation29_spill] sm:$0xff] }
 0x269   :  { %3433 = vst [vmem:[#allocation2_spill] sm:$0xff] %v2703_v49  ;;  %3435 = vst [vmem:[#allocation3_spill] sm:$0xff] %v2707_v1  ;;  %v2723_v59 = vrot.slane %v1230_v36, %v3439_v33  ;;  %v3440_v49 = vld [vmem:[#allocation25_spill] sm:$0xff]  ;;  %v3441_v1 = vld [vmem:[#allocation27_spill] sm:$0xff]  ;;  %v2739_v9 = vmul.f32 %v2477_v56, %v3443_v41 }
 0x26a   :  { %3437 = vst [vmem:[#allocation4_spill] sm:$0xff] %v2711_v21  ;;  %v2727_v63 = vmul.f32 %v2477_v56, %v3440_v49  ;;  %v2731_v3 = vmul.f32 %v2477_v56, %v3441_v1  ;;  %v3442_v21 = vld [vmem:[#allocation28_spill] sm:$0xff]  ;;  %v3444_v1 = vld [vmem:[#allocation19_spill] sm:$0xff] }
 0x26b   :  { %v2735_v60 = vmul.f32 %v2477_v56, %v3442_v21  ;;  %v2743_v57 = vadd.f32 %v2723_v59, %v2483_v53  ;;  %v2747_v36 = vadd.f32 %v2723_v59, %v2487_v20  ;;  %v2751_v33 = vadd.f32 %v2723_v59, %v2491_v2 }
 0x26c   :  { %v2755_v49 = vadd.f32 %v2723_v59, %v2495_v4  ;;  %v2759_v56 = vadd.f32 %v2723_v59, %v2499_v8  ;;  %v2763_v53 = vadd.f32 %v2723_v59, %v2503_v10  ;;  %v2767_v20 = vadd.f32 %v2723_v59, %v2507_v14 }
 0x26d   :  { %v2771_v2 = vadd.f32 %v2723_v59, %v2511_v18  ;;  %v2775_v4 = vadd.f32 %v2723_v59, %v2515_v37  ;;  %v2779_v8 = vadd.f32 %v2723_v59, %v2519_v12  ;;  %v2783_v10 = vadd.f32 %v2723_v59, %v2523_v28  ;;  %v3447_v41 = vld [vmem:[#allocation23_spill] sm:$0xff] }
 0x26e   :  { %v2787_v14 = vadd.f32 %v2723_v59, %v2527_v34  ;;  %v2791_v18 = vadd.f32 %v2723_v59, %v2531_v38  ;;  %v2795_v37 = vadd.f32 %v2723_v59, %v2535_v42  ;;  %v2799_v12 = vadd.f32 %v2723_v59, %v2539_v46 }
 0x26f   :  { %v2803_v28 = vadd.f32 %v2723_v59, %v2543_v50  ;;  %v2807_v34 = vadd.f32 %v2723_v59, %v2547_v54  ;;  %v2811_v38 = vadd.f32 %v2723_v59, %v2551_v58  ;;  %v2815_v42 = vadd.f32 %v2723_v59, %v2555_v52 }
 0x270   :  { %v2819_v46 = vadd.f32 %v2723_v59, %v2559_v0  ;;  %v2823_v50 = vadd.f32 %v2723_v59, %v3444_v1  ;;  %v2827_v54 = vadd.f32 %v2723_v59, %v2567_v25  ;;  %v2831_v58 = vadd.f32 %v2723_v59, %v2571_v40  ;;  %v3449_v1 = vld [vmem:[#allocation26_spill] sm:$0xff] }
 0x271   :  { %v2835_v52 = vadd.f32 %v2723_v59, %v2575_v24  ;;  %v2839_v0 = vadd.f32 %v2723_v59, %v2579_v32  ;;  %v2843_v21 = vadd.f32 %v2723_v59, %v2583_v17  ;;  %v2847_v25 = vadd.f32 %v2723_v59, %v2587_v26 }
 0x272   :  { %v2851_v40 = vadd.f32 %v2723_v59, %v2591_v22  ;;  %v2855_v24 = vadd.f32 %v2723_v59, %v2595_v45  ;;  %v2859_v32 = vadd.f32 %v2723_v59, %v2599_v30  ;;  %v2863_v17 = vadd.f32 %v2723_v59, %v2603_v62 }
 0x273   :  { %v2867_v26 = vadd.f32 %v2723_v59, %v2607_v29  ;;  %v2871_v22 = vadd.f32 %v2723_v59, %v2611_v6  ;;  %v2875_v45 = vadd.f32 %v2723_v59, %v2615_v44  ;;  %v2879_v30 = vadd.f32 %v2723_v59, %v2619_v5 }
 0x274   :  { %v2883_v62 = vadd.f32 %v2723_v59, %v2623_v48  ;;  %v2887_v29 = vadd.f32 %v2723_v59, %v2627_v13  ;;  %v2891_v6 = vadd.f32 %v2723_v59, %v2631_v11  ;;  %v2895_v44 = vadd.f32 %v2723_v59, %v2635_v15 }
 0x275   :  { %v2899_v5 = vadd.f32 %v2723_v59, %v2639_v19  ;;  %v2903_v48 = vadd.f32 %v2723_v59, %v2643_v23  ;;  %v2907_v13 = vadd.f32 %v2723_v59, %v2647_v27  ;;  %v2911_v11 = vadd.f32 %v2723_v59, %v2651_v31 }
 0x276   :  { %v2915_v15 = vadd.f32 %v2723_v59, %v2655_v35  ;;  %v2919_v19 = vadd.f32 %v2723_v59, %v2659_v39  ;;  %v2923_v23 = vadd.f32 %v2723_v59, %v2663_v43  ;;  %v2927_v27 = vadd.f32 %v2723_v59, %v2667_v47 }
 0x277   :  { %v2931_v31 = vadd.f32 %v2723_v59, %v2671_v51  ;;  %v2935_v35 = vadd.f32 %v2723_v59, %v2675_v55  ;;  %v2939_v39 = vadd.f32 %v2723_v59, %v3447_v41  ;;  %v2943_v43 = vadd.f32 %v2723_v59, %v3449_v1 }
 0x278   :  { %3445 = vst [vmem:[#allocation6_spill] sm:$0xff] %v2923_v23  ;;  %v3451_v23 = vld [vmem:[#allocation22_spill] sm:$0xff]  ;;  %v2951_v51 = vadd.f32 %v2723_v59, %v2691_v7  ;;  %v2955_v55 = vadd.f32 %v2723_v59, %v2695_v16 }
 0x279   :  { %3446 = vst [vmem:[#allocation7_spill] sm:$0xff] %v2935_v35  ;;  %3448 = vst [vmem:[#allocation8_spill] sm:$0xff] %v2939_v39  ;;  %v2947_v47 = vadd.f32 %v2723_v59, %v3451_v23  ;;  %v3454_v35 = vld [vmem:[#allocation24_spill] sm:$0xff]  ;;  %v3455_v39 = vld [vmem:[#allocation2_spill] sm:$0xff] }
 0x27a   :  { %3450 = vst [vmem:[#allocation9_spill] sm:$0xff] %v2943_v43  ;;  %3453 = vst [vmem:[#allocation11_spill] sm:$0xff] %v2951_v51  ;;  %v2959_v41 = vadd.f32 %v2723_v59, %v3454_v35  ;;  %v2963_v1 = vadd.f32 %v2723_v59, %v3455_v39  ;;  %v3456_v43 = vld [vmem:[#allocation3_spill] sm:$0xff]  ;;  %v3458_v51 = vld [vmem:[#allocation5_spill] sm:$0xff]  ;;  %v2979_v35 = vadd.f32 %v2723_v59, %v2719_v61  ;;  %v1372_v61 = vmax.f32 %v2747_v36, 0.0 }
 0x27b   :  { %3452 = vst [vmem:[#allocation10_spill] sm:$0xff] %v2947_v47  ;;  %v2967_v23 = vadd.f32 %v2723_v59, %v3456_v43  ;;  %v3457_v47 = vld [vmem:[#allocation4_spill] sm:$0xff]  ;;  %v2975_v16 = vadd.f32 %v2723_v59, %v3458_v51  ;;  %v2983_v39 = vadd.f32 %v2723_v59, %v2727_v63  ;;  %v2987_v43 = vadd.f32 %v2723_v59, %v2731_v3 }
 0x27c   :  { %v2971_v7 = vadd.f32 %v2723_v59, %v3457_v47  ;;  %3460 = vst [vmem:[#allocation13_spill] sm:$0xff] %v2979_v35  ;;  %v2991_v47 = vadd.f32 %v2723_v59, %v2735_v60  ;;  %v2995_v51 = vadd.f32 %v2723_v59, %v2739_v9  ;;  %v1373_v35 = vmax.f32 %v2751_v33, 0.0  ;;  %1436 = vst.msk [vmem:[%s3321_s4 + $0x8] sm:$0xff] %vm442_vm0, %v1372_v61 }
 0x27d   :  { %3459 = vst [vmem:[#allocation12_spill] sm:$0xff] %v2975_v16  ;;  %3461 = vst [vmem:[#allocation14_spill] sm:$0xff] %v2983_v39  ;;  %v1371_v16 = vmax.f32 %v2743_v57, 0.0  ;;  %v1374_v63 = vmax.f32 %v2755_v49, 0.0  ;;  %v1375_v39 = vmax.f32 %v2759_v56, 0.0  ;;  %v1376_v3 = vmax.f32 %v2763_v53, 0.0 }
 0x27e   :  { %3462 = vst [vmem:[#allocation15_spill] sm:$0xff] %v2987_v43  ;;  %3463 = vst [vmem:[#allocation17_spill] sm:$0xff] %v2991_v47  ;;  %v1377_v43 = vmax.f32 %v2767_v20, 0.0  ;;  %v1378_v60 = vmax.f32 %v2771_v2, 0.0  ;;  %v1379_v47 = vmax.f32 %v2775_v4, 0.0  ;;  %v1380_v59 = vmax.f32 %v2779_v8, 0.0 }
 0x27f   :  { %v1381_v9 = vmax.f32 %v2783_v10, 0.0  ;;  %v1382_v57 = vmax.f32 %v2787_v14, 0.0  ;;  %1435 = vst.msk [vmem:[%s3321_s4] sm:$0xff] %vm442_vm0, %v1371_v16  ;;  %1437 = vst.msk [vmem:[%s3321_s4 + $0x10] sm:$0xff] %vm442_vm0, %v1373_v35  ;;  %v1383_v36 = vmax.f32 %v2791_v18, 0.0  ;;  %v1384_v33 = vmax.f32 %v2795_v37, 0.0 }
 0x280   :  { %1438 = vst.msk [vmem:[%s3321_s4 + $0x18] sm:$0xff] %vm442_vm0, %v1374_v63  ;;  %v1385_v49 = vmax.f32 %v2799_v12, 0.0  ;;  %v1386_v56 = vmax.f32 %v2803_v28, 0.0  ;;  %1439 = vst.msk [vmem:[%s3321_s4 + $0x20] sm:$0xff] %vm442_vm0, %v1375_v39  ;;  %v1387_v53 = vmax.f32 %v2807_v34, 0.0  ;;  %v1388_v20 = vmax.f32 %v2811_v38, 0.0 }
 0x281   :  { %1440 = vst.msk [vmem:[%s3321_s4 + $0x28] sm:$0xff] %vm442_vm0, %v1376_v3  ;;  %1441 = vst.msk [vmem:[%s3321_s4 + $0x30] sm:$0xff] %vm442_vm0, %v1377_v43  ;;  %v1389_v2 = vmax.f32 %v2815_v42, 0.0  ;;  %v1390_v4 = vmax.f32 %v2819_v46, 0.0  ;;  %v1391_v8 = vmax.f32 %v2823_v50, 0.0  ;;  %v1392_v10 = vmax.f32 %v2827_v54, 0.0 }
 0x282   :  { %1442 = vst.msk [vmem:[%s3321_s4 + $0x38] sm:$0xff] %vm442_vm0, %v1378_v60  ;;  %1443 = vst.msk [vmem:[%s3321_s4 + $0x40] sm:$0xff] %vm442_vm0, %v1379_v47  ;;  %v1393_v14 = vmax.f32 %v2831_v58, 0.0  ;;  %v1394_v18 = vmax.f32 %v2835_v52, 0.0  ;;  %v1395_v37 = vmax.f32 %v2839_v0, 0.0  ;;  %v1396_v12 = vmax.f32 %v2843_v21, 0.0 }
 0x283   :  { %1444 = vst.msk [vmem:[%s3321_s4 + $0x48] sm:$0xff] %vm442_vm0, %v1380_v59  ;;  %1445 = vst.msk [vmem:[%s3321_s4 + $0x50] sm:$0xff] %vm442_vm0, %v1381_v9  ;;  %v1397_v28 = vmax.f32 %v2847_v25, 0.0  ;;  %v1398_v34 = vmax.f32 %v2851_v40, 0.0  ;;  %v1399_v38 = vmax.f32 %v2855_v24, 0.0  ;;  %v1400_v42 = vmax.f32 %v2859_v32, 0.0 }
 0x284   :  { %1446 = vst.msk [vmem:[%s3321_s4 + $0x58] sm:$0xff] %vm442_vm0, %v1382_v57  ;;  %1447 = vst.msk [vmem:[%s3321_s4 + $0x60] sm:$0xff] %vm442_vm0, %v1383_v36  ;;  %v1401_v46 = vmax.f32 %v2863_v17, 0.0  ;;  %v1402_v50 = vmax.f32 %v2867_v26, 0.0  ;;  %v1403_v54 = vmax.f32 %v2871_v22, 0.0  ;;  %v1404_v58 = vmax.f32 %v2875_v45, 0.0 }
 0x285   :  { %1448 = vst.msk [vmem:[%s3321_s4 + $0x68] sm:$0xff] %vm442_vm0, %v1384_v33  ;;  %1449 = vst.msk [vmem:[%s3321_s4 + $0x70] sm:$0xff] %vm442_vm0, %v1385_v49  ;;  %v1405_v52 = vmax.f32 %v2879_v30, 0.0  ;;  %v1406_v0 = vmax.f32 %v2883_v62, 0.0  ;;  %v1407_v21 = vmax.f32 %v2887_v29, 0.0  ;;  %v1408_v25 = vmax.f32 %v2891_v6, 0.0 }
 0x286   :  { %1450 = vst.msk [vmem:[%s3321_s4 + $0x78] sm:$0xff] %vm442_vm0, %v1386_v56  ;;  %1451 = vst.msk [vmem:[%s3321_s4 + $0x80] sm:$0xff] %vm442_vm0, %v1387_v53  ;;  %v1409_v40 = vmax.f32 %v2895_v44, 0.0  ;;  %v1410_v24 = vmax.f32 %v2899_v5, 0.0  ;;  %v1411_v32 = vmax.f32 %v2903_v48, 0.0  ;;  %v1412_v17 = vmax.f32 %v2907_v13, 0.0 }
 0x287   :  { %1452 = vst.msk [vmem:[%s3321_s4 + $0x88] sm:$0xff] %vm442_vm0, %v1388_v20  ;;  %1453 = vst.msk [vmem:[%s3321_s4 + $0x90] sm:$0xff] %vm442_vm0, %v1389_v2  ;;  %v1413_v26 = vmax.f32 %v2911_v11, 0.0  ;;  %v1414_v22 = vmax.f32 %v2915_v15, 0.0  ;;  %v1415_v45 = vmax.f32 %v2919_v19, 0.0  ;;  %v3464_v30 = vld [vmem:[#allocation6_spill] sm:$0xff] }
 0x288   :  { %1454 = vst.msk [vmem:[%s3321_s4 + $0x98] sm:$0xff] %vm442_vm0, %v1390_v4  ;;  %1455 = vst.msk [vmem:[%s3321_s4 + $0xa0] sm:$0xff] %vm442_vm0, %v1391_v8  ;;  %v1416_v62 = vmax.f32 %v3464_v30, 0.0  ;;  %v1417_v29 = vmax.f32 %v2927_v27, 0.0  ;;  %v1418_v6 = vmax.f32 %v2931_v31, 0.0  ;;  %v3465_v44 = vld [vmem:[#allocation7_spill] sm:$0xff] }
 0x289   :  { %1456 = vst.msk [vmem:[%s3321_s4 + $0xa8] sm:$0xff] %vm442_vm0, %v1392_v10  ;;  %1457 = vst.msk [vmem:[%s3321_s4 + $0xb0] sm:$0xff] %vm442_vm0, %v1393_v14  ;;  %v1419_v5 = vmax.f32 %v3465_v44, 0.0  ;;  %v3466_v48 = vld [vmem:[#allocation8_spill] sm:$0xff]  ;;  %v3467_v11 = vld [vmem:[#allocation9_spill] sm:$0xff]  ;;  %v1424_v35 = vmax.f32 %v2955_v55, 0.0 }
 0x28a   :  { %1458 = vst.msk [vmem:[%s3321_s4 + $0xb8] sm:$0xff] %vm442_vm0, %v1394_v18  ;;  %1459 = vst.msk [vmem:[%s3321_s4 + $0xc0] sm:$0xff] %vm442_vm0, %v1395_v37  ;;  %v1420_v13 = vmax.f32 %v3466_v48, 0.0  ;;  %v1421_v15 = vmax.f32 %v3467_v11, 0.0  ;;  %v3468_v19 = vld [vmem:[#allocation10_spill] sm:$0xff]  ;;  %v3469_v31 = vld [vmem:[#allocation11_spill] sm:$0xff] }
 0x28b   :  { %1460 = vst.msk [vmem:[%s3321_s4 + $0xc8] sm:$0xff] %vm442_vm0, %v1396_v12  ;;  %1461 = vst.msk [vmem:[%s3321_s4 + $0xd0] sm:$0xff] %vm442_vm0, %v1397_v28  ;;  %v1422_v27 = vmax.f32 %v3468_v19, 0.0  ;;  %v1423_v16 = vmax.f32 %v3469_v31, 0.0  ;;  %v1425_v39 = vmax.f32 %v2959_v41, 0.0  ;;  %v1426_v43 = vmax.f32 %v2963_v1, 0.0 }
 0x28c   :  { %1462 = vst.msk [vmem:[%s3321_s4 + $0xd8] sm:$0xff] %vm442_vm0, %v1398_v34  ;;  %1463 = vst.msk [vmem:[%s3321_s4 + $0xe0] sm:$0xff] %vm442_vm0, %v1399_v38  ;;  %v1427_v55 = vmax.f32 %v2967_v23, 0.0  ;;  %v1428_v41 = vmax.f32 %v2971_v7, 0.0  ;;  %v3470_v1 = vld [vmem:[#allocation12_spill] sm:$0xff]  ;;  %v3471_v61 = vld [vmem:[#allocation13_spill] sm:$0xff] }
 0x28d   :  { %1464 = vst.msk [vmem:[%s3321_s4 + $0xe8] sm:$0xff] %vm442_vm0, %v1400_v42  ;;  %1465 = vst.msk [vmem:[%s3321_s4 + $0xf0] sm:$0xff] %vm442_vm0, %v1401_v46  ;;  %v1429_v47 = vmax.f32 %v3470_v1, 0.0  ;;  %v1430_v63 = vmax.f32 %v3471_v61, 0.0  ;;  %v3472_v23 = vld [vmem:[#allocation14_spill] sm:$0xff]  ;;  %v3473_v3 = vld [vmem:[#allocation15_spill] sm:$0xff] }
 0x28e   :  { %1466 = vst.msk [vmem:[%s3321_s4 + $0xf8] sm:$0xff] %vm442_vm0, %v1402_v50  ;;  %1467 = vst.msk [vmem:[%s3321_s4 + $0x100] sm:$0xff] %vm442_vm0, %v1403_v54  ;;  %v1431_v7 = vmax.f32 %v3472_v23, 0.0  ;;  %v1432_v60 = vmax.f32 %v3473_v3, 0.0  ;;  %v3474_v59 = vld [vmem:[#allocation17_spill] sm:$0xff]  ;;  %v1434_v57 = vmax.f32 %v2995_v51, 0.0 }
 0x28f   :  { %1468 = vst.msk [vmem:[%s3321_s4 + $0x108] sm:$0xff] %vm442_vm0, %v1404_v58  ;;  %1469 = vst.msk [vmem:[%s3321_s4 + $0x110] sm:$0xff] %vm442_vm0, %v1405_v52  ;;  %v1433_v9 = vmax.f32 %v3474_v59, 0.0 }
 0x290   :  { %1470 = vst.msk [vmem:[%s3321_s4 + $0x118] sm:$0xff] %vm442_vm0, %v1406_v0  ;;  %1471 = vst.msk [vmem:[%s3321_s4 + $0x120] sm:$0xff] %vm442_vm0, %v1407_v21 }
 0x291   :  { %1472 = vst.msk [vmem:[%s3321_s4 + $0x128] sm:$0xff] %vm442_vm0, %v1408_v25  ;;  %1473 = vst.msk [vmem:[%s3321_s4 + $0x130] sm:$0xff] %vm442_vm0, %v1409_v40 }
 0x292   :  { %1474 = vst.msk [vmem:[%s3321_s4 + $0x138] sm:$0xff] %vm442_vm0, %v1410_v24  ;;  %1475 = vst.msk [vmem:[%s3321_s4 + $0x140] sm:$0xff] %vm442_vm0, %v1411_v32 }
 0x293   :  { %1476 = vst.msk [vmem:[%s3321_s4 + $0x148] sm:$0xff] %vm442_vm0, %v1412_v17  ;;  %1477 = vst.msk [vmem:[%s3321_s4 + $0x150] sm:$0xff] %vm442_vm0, %v1413_v26 }
 0x294   :  { %1478 = vst.msk [vmem:[%s3321_s4 + $0x158] sm:$0xff] %vm442_vm0, %v1414_v22  ;;  %1479 = vst.msk [vmem:[%s3321_s4 + $0x160] sm:$0xff] %vm442_vm0, %v1415_v45 }
 0x295   :  { %1480 = vst.msk [vmem:[%s3321_s4 + $0x168] sm:$0xff] %vm442_vm0, %v1416_v62  ;;  %1481 = vst.msk [vmem:[%s3321_s4 + $0x170] sm:$0xff] %vm442_vm0, %v1417_v29 }
 0x296   :  { %1482 = vst.msk [vmem:[%s3321_s4 + $0x178] sm:$0xff] %vm442_vm0, %v1418_v6  ;;  %1483 = vst.msk [vmem:[%s3321_s4 + $0x180] sm:$0xff] %vm442_vm0, %v1419_v5 }
 0x297   :  { %1484 = vst.msk [vmem:[%s3321_s4 + $0x188] sm:$0xff] %vm442_vm0, %v1420_v13  ;;  %1485 = vst.msk [vmem:[%s3321_s4 + $0x190] sm:$0xff] %vm442_vm0, %v1421_v15 }
 0x298   :  { %1486 = vst.msk [vmem:[%s3321_s4 + $0x198] sm:$0xff] %vm442_vm0, %v1422_v27  ;;  %1487 = vst.msk [vmem:[%s3321_s4 + $0x1a0] sm:$0xff] %vm442_vm0, %v1423_v16 }
 0x299   :  { %1488 = vst.msk [vmem:[%s3321_s4 + $0x1a8] sm:$0xff] %vm442_vm0, %v1424_v35  ;;  %1489 = vst.msk [vmem:[%s3321_s4 + $0x1b0] sm:$0xff] %vm442_vm0, %v1425_v39 }
 0x29a   :  { %1490 = vst.msk [vmem:[%s3321_s4 + $0x1b8] sm:$0xff] %vm442_vm0, %v1426_v43  ;;  %1491 = vst.msk [vmem:[%s3321_s4 + $0x1c0] sm:$0xff] %vm442_vm0, %v1427_v55 }
 0x29b   :  { %1492 = vst.msk [vmem:[%s3321_s4 + $0x1c8] sm:$0xff] %vm442_vm0, %v1428_v41  ;;  %1493 = vst.msk [vmem:[%s3321_s4 + $0x1d0] sm:$0xff] %vm442_vm0, %v1429_v47 }
 0x29c   :  { %1494 = vst.msk [vmem:[%s3321_s4 + $0x1d8] sm:$0xff] %vm442_vm0, %v1430_v63  ;;  %1495 = vst.msk [vmem:[%s3321_s4 + $0x1e0] sm:$0xff] %vm442_vm0, %v1431_v7 }
 0x29d   :  { %1496 = vst.msk [vmem:[%s3321_s4 + $0x1e8] sm:$0xff] %vm442_vm0, %v1432_v60  ;;  %1497 = vst.msk [vmem:[%s3321_s4 + $0x1f0] sm:$0xff] %vm442_vm0, %v1433_v9 }
 0x29e   :  { %1498 = vst.msk [vmem:[%s3321_s4 + $0x1f8] sm:$0xff] %vm442_vm0, %v1434_v57 }

// kernel: resnet_forward.11
= control target key start
LH: loop header
LB: loop body
LE: loop exit
PB: predicated region body
PF: predicated region fallthrough
CT: control target
= control target key end

     0   :  { %v1865_v0 = vmov 0   ;;  %vm445_vm0 = vcmask 130048   ;;  %s3837_s1 = inlined_call_operand.vmem [shape: bf16[144,16], index: 1, kind: input, shape index: {}]   ;;  %s3838_s0 = inlined_call_operand.vmem [shape: bf16[512,144], index: 0, kind: input, shape index: {}]   ;;  %s3839_s2 = inlined_call_operand.vmem [shape: f32[1,16], index: 2, kind: input, shape index: {}]   ;;  %s3840_s3 = inlined_call_operand.vmem [shape: f32[1,16], index: 3, kind: input, shape index: {}]   ;;  %s3841_s4 = inlined_call_operand.vmem [shape: f32[512,16], index: 4, kind: input, shape index: {}]   ;;  %s3842_s5 = inlined_call_operand.vmem [shape: f32[512,16], index: 5, kind: output, shape index: {}]  }
   0x1   :  { %542 = vmatprep.subr.bf16.mxu0 %v1865_v0  ;;  %v1758_v1 = vld [vmem:[%s3837_s1 + $0x38] sm:$0xff]   ;;  %1739 = vmatprep.subr.bf16.mxu1 %v1865_v0  ;;  %v1759_v2 = vld [vmem:[%s3837_s1 + $0x30] sm:$0xff]   ;;  %v1760_v3 = vld [vmem:[%s3837_s1 + $0x28] sm:$0xff]  }
   0x2   :  { %543 = vmatpush1.bf16.msra.mxu0 %v1758_v1  ;;  %1748 = vmatpush1.bf16.msra.mxu1 %v1758_v1  ;;  %v1761_v4 = vld [vmem:[%s3837_s1 + $0x20] sm:$0xff]   ;;  %v1762_v6 = vld [vmem:[%s3837_s1 + $0x18] sm:$0xff]   ;;  %v1763_v7 = vld [vmem:[%s3837_s1 + $0x10] sm:$0xff]  }
   0x3   :  { %544 = vmatprep.subr.bf16.mxu0 %v1865_v0  ;;  %1740 = vmatprep.subr.bf16.mxu1 %v1865_v0  ;;  %v1769_v5 = vld [vmem:[%s3838_s0 + $0x4] ss:$8 sps:$4 sm:$0xff]   ;;  %v1767_v12 = vld [vmem:[%s3838_s0] ss:$8 sps:$4 sm:$0xff]   ;;  %v1770_v13 = vld [vmem:[%s3838_s0 + $0x14] ss:$8 sps:$4 sm:$0xff]  }
   0x4   :  { %1707 = vmatprep.mubr.msk.bf16.mxu0 %vm445_vm0, %v1769_v5  ;;  %v1793_v8 = vld [vmem:[%s3838_s0 + $0x104] ss:$8 sps:$4 sm:$0xff]   ;;  %v1791_v14 = vld [vmem:[%s3838_s0 + $0x100] ss:$8 sps:$4 sm:$0xff]   ;;  %v1797_v15 = vld [vmem:[%s3838_s0 + $0x114] ss:$8 sps:$4 sm:$0xff]  }
   0x5   :  { %v1764_v9 = vld [vmem:[%s3837_s1 + $0x8] sm:$0xff]   ;;  %1723 = vmatprep.mubr.msk.bf16.mxu1 %vm445_vm0, %v1793_v8  ;;  %v1765_v10 = vld [vmem:[%s3837_s1] sm:$0xff]   ;;  %v1772_v16 = vld [vmem:[%s3838_s0 + $0x10] ss:$8 sps:$4 sm:$0xff]  }
   0x6   :  { %545 = vmatpush1.bf16.msra.mxu0 %v1759_v2  ;;  %1749 = vmatpush1.bf16.msra.mxu1 %v1759_v2  ;;  %v1766_v11 = vld [vmem:[%s3837_s1 + $0x40] sm:$0xff]   ;;  %v1799_v18 = vld [vmem:[%s3838_s0 + $0x110] ss:$8 sps:$4 sm:$0xff]   ;;  %v1776_v21 = vld [vmem:[%s3838_s0 + $0x34] ss:$8 sps:$4 sm:$0xff]  }
   0x7   :  { %546 = vmatprep.subr.bf16.mxu0 %v1865_v0  ;;  %1741 = vmatprep.subr.bf16.mxu1 %v1865_v0  ;;  %v1773_v17 = vld [vmem:[%s3838_s0 + $0x24] ss:$8 sps:$4 sm:$0xff]   ;;  %v1775_v20 = vld [vmem:[%s3838_s0 + $0x20] ss:$8 sps:$4 sm:$0xff]   ;;  %v1809_v23 = vld [vmem:[%s3838_s0 + $0x134] ss:$8 sps:$4 sm:$0xff]  }
   0x8   :  { %v1803_v19 = vld [vmem:[%s3838_s0 + $0x124] ss:$8 sps:$4 sm:$0xff]   ;;  %v1805_v22 = vld [vmem:[%s3838_s0 + $0x120] ss:$8 sps:$4 sm:$0xff]   ;;  %v1778_v24 = vld [vmem:[%s3838_s0 + $0x30] ss:$8 sps:$4 sm:$0xff]  }
   0x9   :  { %v1811_v25 = vld [vmem:[%s3838_s0 + $0x130] ss:$8 sps:$4 sm:$0xff]   ;;  %v1779_v26 = vld [vmem:[%s3838_s0 + $0x44] ss:$8 sps:$4 sm:$0xff]   ;;  %v1781_v28 = vld [vmem:[%s3838_s0 + $0x40] ss:$8 sps:$4 sm:$0xff]  }
   0xa   :  { %547 = vmatpush1.bf16.msra.mxu0 %v1760_v3  ;;  %1750 = vmatpush1.bf16.msra.mxu1 %v1760_v3  ;;  %v1815_v27 = vld [vmem:[%s3838_s0 + $0x144] ss:$8 sps:$4 sm:$0xff]   ;;  %v1817_v29 = vld [vmem:[%s3838_s0 + $0x140] ss:$8 sps:$4 sm:$0xff]   ;;  %v1782_v30 = vld [vmem:[%s3838_s0 + $0x54] ss:$8 sps:$4 sm:$0xff]  }
   0xb   :  { %548 = vmatprep.subr.bf16.mxu0 %v1865_v0  ;;  %1742 = vmatprep.subr.bf16.mxu1 %v1865_v0  ;;  %v1821_v31 = vld [vmem:[%s3838_s0 + $0x154] ss:$8 sps:$4 sm:$0xff]   ;;  %v1784_v32 = vld [vmem:[%s3838_s0 + $0x50] ss:$8 sps:$4 sm:$0xff]   ;;  %v1785_v34 = vld [vmem:[%s3838_s0 + $0x64] ss:$8 sps:$4 sm:$0xff]  }
   0xc   :  { %v1823_v33 = vld [vmem:[%s3838_s0 + $0x150] ss:$8 sps:$4 sm:$0xff]   ;;  %v1827_v35 = vld [vmem:[%s3838_s0 + $0x164] ss:$8 sps:$4 sm:$0xff]   ;;  %v1787_v36 = vld [vmem:[%s3838_s0 + $0x60] ss:$8 sps:$4 sm:$0xff]  }
   0xd   :  { %v1829_v37 = vld [vmem:[%s3838_s0 + $0x160] ss:$8 sps:$4 sm:$0xff]   ;;  %v1788_v38 = vld [vmem:[%s3838_s0 + $0x74] ss:$8 sps:$4 sm:$0xff]   ;;  %v1790_v40 = vld [vmem:[%s3838_s0 + $0x70] ss:$8 sps:$4 sm:$0xff]  }
   0xe   :  { %549 = vmatpush1.bf16.msra.mxu0 %v1761_v4  ;;  %1751 = vmatpush1.bf16.msra.mxu1 %v1761_v4  ;;  %v1833_v39 = vld [vmem:[%s3838_s0 + $0x174] ss:$8 sps:$4 sm:$0xff]   ;;  %v1835_v41 = vld [vmem:[%s3838_s0 + $0x170] ss:$8 sps:$4 sm:$0xff]   ;;  %v1794_v42 = vld [vmem:[%s3838_s0 + $0x84] ss:$8 sps:$4 sm:$0xff]  }
   0xf   :  { %550 = vmatprep.subr.bf16.mxu0 %v1865_v0  ;;  %1743 = vmatprep.subr.bf16.mxu1 %v1865_v0  ;;  %v1839_v43 = vld [vmem:[%s3838_s0 + $0x184] ss:$8 sps:$4 sm:$0xff]   ;;  %v1796_v44 = vld [vmem:[%s3838_s0 + $0x80] ss:$8 sps:$4 sm:$0xff]   ;;  %v1800_v46 = vld [vmem:[%s3838_s0 + $0x94] ss:$8 sps:$4 sm:$0xff]  }
  0x10   :  { %v1841_v45 = vld [vmem:[%s3838_s0 + $0x180] ss:$8 sps:$4 sm:$0xff]   ;;  %v1842_v47 = vld [vmem:[%s3838_s0 + $0x194] ss:$8 sps:$4 sm:$0xff]   ;;  %v1802_v48 = vld [vmem:[%s3838_s0 + $0x90] ss:$8 sps:$4 sm:$0xff]  }
  0x11   :  { %v1844_v49 = vld [vmem:[%s3838_s0 + $0x190] ss:$8 sps:$4 sm:$0xff]   ;;  %v1806_v50 = vld [vmem:[%s3838_s0 + $0xa4] ss:$8 sps:$4 sm:$0xff]   ;;  %v1808_v52 = vld [vmem:[%s3838_s0 + $0xa0] ss:$8 sps:$4 sm:$0xff]  }
  0x12   :  { %551 = vmatpush1.bf16.msra.mxu0 %v1762_v6  ;;  %1752 = vmatpush1.bf16.msra.mxu1 %v1762_v6  ;;  %v1845_v51 = vld [vmem:[%s3838_s0 + $0x1a4] ss:$8 sps:$4 sm:$0xff]   ;;  %v1847_v53 = vld [vmem:[%s3838_s0 + $0x1a0] ss:$8 sps:$4 sm:$0xff]   ;;  %v1812_v54 = vld [vmem:[%s3838_s0 + $0xb4] ss:$8 sps:$4 sm:$0xff]  }
  0x13   :  { %552 = vmatprep.subr.bf16.mxu0 %v1865_v0  ;;  %1744 = vmatprep.subr.bf16.mxu1 %v1865_v0  ;;  %v1848_v55 = vld [vmem:[%s3838_s0 + $0x1b4] ss:$8 sps:$4 sm:$0xff]   ;;  %v1814_v56 = vld [vmem:[%s3838_s0 + $0xb0] ss:$8 sps:$4 sm:$0xff]   ;;  %v1818_v58 = vld [vmem:[%s3838_s0 + $0xc4] ss:$8 sps:$4 sm:$0xff]  }
  0x14   :  { %v1850_v57 = vld [vmem:[%s3838_s0 + $0x1b0] ss:$8 sps:$4 sm:$0xff]   ;;  %v1851_v59 = vld [vmem:[%s3838_s0 + $0x1c4] ss:$8 sps:$4 sm:$0xff]   ;;  %v1820_v60 = vld [vmem:[%s3838_s0 + $0xc0] ss:$8 sps:$4 sm:$0xff]  }
  0x15   :  { %v1853_v61 = vld [vmem:[%s3838_s0 + $0x1c0] ss:$8 sps:$4 sm:$0xff]   ;;  %v1824_v62 = vld [vmem:[%s3838_s0 + $0xd4] ss:$8 sps:$4 sm:$0xff]   ;;  %v1856_v1 = vld [vmem:[%s3838_s0 + $0x1d0] ss:$8 sps:$4 sm:$0xff]  }
  0x16   :  { %553 = vmatpush1.bf16.msra.mxu0 %v1763_v7  ;;  %1753 = vmatpush1.bf16.msra.mxu1 %v1763_v7  ;;  %v1854_v63 = vld [vmem:[%s3838_s0 + $0x1d4] ss:$8 sps:$4 sm:$0xff]   ;;  %v1830_v2 = vld [vmem:[%s3838_s0 + $0xe4] ss:$8 sps:$4 sm:$0xff]   ;;  %v1832_v4 = vld [vmem:[%s3838_s0 + $0xe0] ss:$8 sps:$4 sm:$0xff]  }
  0x17   :  { %554 = vmatprep.subr.bf16.mxu0 %v1865_v0  ;;  %1745 = vmatprep.subr.bf16.mxu1 %v1865_v0  ;;  %v1857_v3 = vld [vmem:[%s3838_s0 + $0x1e4] ss:$8 sps:$4 sm:$0xff]   ;;  %v1859_v5 = vld [vmem:[%s3838_s0 + $0x1e0] ss:$8 sps:$4 sm:$0xff]   ;;  %v1836_v6 = vld [vmem:[%s3838_s0 + $0xf4] ss:$8 sps:$4 sm:$0xff]  }
  0x18   :  { %v1860_v7 = vld [vmem:[%s3838_s0 + $0x1f4] ss:$8 sps:$4 sm:$0xff]   ;;  %v1838_v8 = vld [vmem:[%s3838_s0 + $0xf0] ss:$8 sps:$4 sm:$0xff]  }
  0x1a   :  { %555 = vmatpush1.bf16.msra.mxu0 %v1764_v9  ;;  %1754 = vmatpush1.bf16.msra.mxu1 %v1764_v9  ;;  %v1862_v9 = vld [vmem:[%s3838_s0 + $0x1f0] ss:$8 sps:$4 sm:$0xff]  }
  0x1b   :  { %556 = vmatprep.subr.bf16.mxu0 %v1865_v0  ;;  %1746 = vmatprep.subr.bf16.mxu1 %v1865_v0 }
  0x1e   :  { %557 = vmatpush1.bf16.msra.mxu0 %v1765_v10  ;;  %1755 = vmatpush1.bf16.msra.mxu1 %v1765_v10 }
  0x1f   :  { %572 = vmatprep.subr.bf16.mxu0 %v1865_v0  ;;  %1747 = vmatprep.subr.bf16.mxu1 %v1865_v0  ;;  %v1826_v0 = vld [vmem:[%s3838_s0 + $0xd0] ss:$8 sps:$4 sm:$0xff]  }
  0x22   :  { %573 = vmatpush2.bf16.msra.mxu0 %v1766_v11  ;;  %1756 = vmatpush2.bf16.msra.mxu1 %v1766_v11 }
  0x25   :  { %575 = vmatmul.mubr.bf16.vlgmr.msra.gmra.mxu0 %v1767_v12  ;;  %703 = vmatmul.mubr.bf16.vlgmr.msra.gmra.mxu1 %v1791_v14 }
  0x26   :  { %1708 = vmatprep.mubr.msk.bf16.mxu0 %vm445_vm0, %v1770_v13  ;;  %1724 = vmatprep.mubr.msk.bf16.mxu1 %vm445_vm0, %v1797_v15 }
  0x2d   :  { %583 = vmatmul.mubr.bf16.gmra.mxu0 %v1772_v16  ;;  %711 = vmatmul.mubr.bf16.gmra.mxu1 %v1799_v18 }
  0x2e   :  { %1709 = vmatprep.mubr.msk.bf16.mxu0 %vm445_vm0, %v1773_v17  ;;  %1725 = vmatprep.mubr.msk.bf16.mxu1 %vm445_vm0, %v1803_v19 }
  0x35   :  { %591 = vmatmul.mubr.bf16.gmra.mxu0 %v1775_v20  ;;  %719 = vmatmul.mubr.bf16.gmra.mxu1 %v1805_v22 }
  0x36   :  { %1710 = vmatprep.mubr.msk.bf16.mxu0 %vm445_vm0, %v1776_v21  ;;  %1726 = vmatprep.mubr.msk.bf16.mxu1 %vm445_vm0, %v1809_v23 }
  0x3d   :  { %599 = vmatmul.mubr.bf16.gmra.mxu0 %v1778_v24  ;;  %727 = vmatmul.mubr.bf16.gmra.mxu1 %v1811_v25 }
  0x3e   :  { %1711 = vmatprep.mubr.msk.bf16.mxu0 %vm445_vm0, %v1779_v26  ;;  %1727 = vmatprep.mubr.msk.bf16.mxu1 %vm445_vm0, %v1815_v27 }
  0x45   :  { %607 = vmatmul.mubr.bf16.gmra.mxu0 %v1781_v28  ;;  %735 = vmatmul.mubr.bf16.gmra.mxu1 %v1817_v29 }
  0x46   :  { %1712 = vmatprep.mubr.msk.bf16.mxu0 %vm445_vm0, %v1782_v30  ;;  %1728 = vmatprep.mubr.msk.bf16.mxu1 %vm445_vm0, %v1821_v31 }
  0x4d   :  { %615 = vmatmul.mubr.bf16.gmra.mxu0 %v1784_v32  ;;  %743 = vmatmul.mubr.bf16.gmra.mxu1 %v1823_v33 }
  0x4e   :  { %1713 = vmatprep.mubr.msk.bf16.mxu0 %vm445_vm0, %v1785_v34  ;;  %1729 = vmatprep.mubr.msk.bf16.mxu1 %vm445_vm0, %v1827_v35 }
  0x55   :  { %623 = vmatmul.mubr.bf16.gmra.mxu0 %v1787_v36  ;;  %751 = vmatmul.mubr.bf16.gmra.mxu1 %v1829_v37 }
  0x56   :  { %1714 = vmatprep.mubr.msk.bf16.mxu0 %vm445_vm0, %v1788_v38  ;;  %1730 = vmatprep.mubr.msk.bf16.mxu1 %vm445_vm0, %v1833_v39 }
  0x5d   :  { %631 = vmatmul.mubr.bf16.gmra.mxu0 %v1790_v40  ;;  %759 = vmatmul.mubr.bf16.gmra.mxu1 %v1835_v41 }
  0x5e   :  { %1715 = vmatprep.mubr.msk.bf16.mxu0 %vm445_vm0, %v1794_v42  ;;  %1731 = vmatprep.mubr.msk.bf16.mxu1 %vm445_vm0, %v1839_v43 }
  0x65   :  { %639 = vmatmul.mubr.bf16.gmra.mxu0 %v1796_v44  ;;  %767 = vmatmul.mubr.bf16.gmra.mxu1 %v1841_v45 }
  0x66   :  { %1716 = vmatprep.mubr.msk.bf16.mxu0 %vm445_vm0, %v1800_v46  ;;  %1732 = vmatprep.mubr.msk.bf16.mxu1 %vm445_vm0, %v1842_v47 }
  0x6d   :  { %647 = vmatmul.mubr.bf16.gmra.mxu0 %v1802_v48  ;;  %775 = vmatmul.mubr.bf16.gmra.mxu1 %v1844_v49 }
  0x6e   :  { %1717 = vmatprep.mubr.msk.bf16.mxu0 %vm445_vm0, %v1806_v50  ;;  %1733 = vmatprep.mubr.msk.bf16.mxu1 %vm445_vm0, %v1845_v51 }
  0x75   :  { %655 = vmatmul.mubr.bf16.gmra.mxu0 %v1808_v52  ;;  %783 = vmatmul.mubr.bf16.gmra.mxu1 %v1847_v53 }
  0x76   :  { %1718 = vmatprep.mubr.msk.bf16.mxu0 %vm445_vm0, %v1812_v54  ;;  %1734 = vmatprep.mubr.msk.bf16.mxu1 %vm445_vm0, %v1848_v55 }
  0x7d   :  { %663 = vmatmul.mubr.bf16.gmra.mxu0 %v1814_v56  ;;  %791 = vmatmul.mubr.bf16.gmra.mxu1 %v1850_v57 }
  0x7e   :  { %1719 = vmatprep.mubr.msk.bf16.mxu0 %vm445_vm0, %v1818_v58  ;;  %1735 = vmatprep.mubr.msk.bf16.mxu1 %vm445_vm0, %v1851_v59 }
  0x85   :  { %671 = vmatmul.mubr.bf16.gmra.mxu0 %v1820_v60  ;;  %799 = vmatmul.mubr.bf16.gmra.mxu1 %v1853_v61 }
  0x86   :  { %1720 = vmatprep.mubr.msk.bf16.mxu0 %vm445_vm0, %v1824_v62  ;;  %1736 = vmatprep.mubr.msk.bf16.mxu1 %vm445_vm0, %v1854_v63 }
  0x8d   :  { %679 = vmatmul.mubr.bf16.gmra.mxu0 %v1826_v0  ;;  %807 = vmatmul.mubr.bf16.gmra.mxu1 %v1856_v1 }
  0x8e   :  { %1721 = vmatprep.mubr.msk.bf16.mxu0 %vm445_vm0, %v1830_v2  ;;  %1737 = vmatprep.mubr.msk.bf16.mxu1 %vm445_vm0, %v1857_v3 }
  0x95   :  { %687 = vmatmul.mubr.bf16.gmra.mxu0 %v1832_v4  ;;  %815 = vmatmul.mubr.bf16.gmra.mxu1 %v1859_v5 }
  0x96   :  { %1722 = vmatprep.mubr.msk.bf16.mxu0 %vm445_vm0, %v1836_v6  ;;  %1738 = vmatprep.mubr.msk.bf16.mxu1 %vm445_vm0, %v1860_v7 }
  0x9d   :  { %695 = vmatmul.mubr.bf16.gmra.mxu0 %v1838_v8  ;;  %823 = vmatmul.mubr.bf16.gmra.mxu1 %v1862_v9 }
  0xe5   :  { %v2147_v10 = vpop.f32.mrf.mxu0  ;;  %v2149_v11 = vpop.f32.mrf.mxu1 }
  0xe7   :  { %v578_v12 = vpop.f32.mrf.mxu0  ;;  %v706_v13 = vpop.f32.mrf.mxu1 }
  0xe9   :  { %v2151_v14 = vpop.f32.mrf.mxu0  ;;  %v2153_v15 = vpop.f32.mrf.mxu1 }
  0xea   :  { %v832_v12 = vsel %vm445_vm0, %v2151_v14, 0.0 }
  0xeb   :  { %v581_v16 = vpop.f32.mrf.mxu0  ;;  %v709_v17 = vpop.f32.mrf.mxu1 }
  0xec   :  { %v831_v17 = vsel %vm445_vm0, %v2147_v10, 0.0 }
  0xed   :  { %v2155_v18 = vpop.f32.mrf.mxu0  ;;  %v2157_v19 = vpop.f32.mrf.mxu1 }
  0xef   :  { %v586_v20 = vpop.f32.mrf.mxu0  ;;  %v714_v21 = vpop.f32.mrf.mxu1 }
  0xf0   :  { %v834_v20 = vsel %vm445_vm0, %v2155_v18, 0.0  ;;  %v833_v21 = vadd.f32 %v832_v12, %v831_v17 }
  0xf1   :  { %v2159_v22 = vpop.f32.mrf.mxu0  ;;  %v2161_v23 = vpop.f32.mrf.mxu1 }
  0xf2   :  { %3888 = vst [vmem:[#allocation2_spill] sm:$0xff] %v2159_v22 }
  0xf3   :  { %v589_v24 = vpop.f32.mrf.mxu0  ;;  %v717_v25 = vpop.f32.mrf.mxu1 }
  0xf5   :  { %v2163_v26 = vpop.f32.mrf.mxu0  ;;  %v2165_v27 = vpop.f32.mrf.mxu1 }
  0xf6   :  { %3889 = vst [vmem:[#allocation3_spill] sm:$0xff] %v2163_v26 }
  0xf7   :  { %v594_v28 = vpop.f32.mrf.mxu0  ;;  %v722_v29 = vpop.f32.mrf.mxu1 }
  0xf8   :  { %v836_v28 = vsel %vm445_vm0, %v2159_v22, 0.0  ;;  %v835_v29 = vadd.f32 %v834_v20, %v833_v21 }
  0xf9   :  { %v2167_v30 = vpop.f32.mrf.mxu0  ;;  %v2169_v31 = vpop.f32.mrf.mxu1 }
  0xfa   :  { %3890 = vst [vmem:[#allocation4_spill] sm:$0xff] %v2167_v30 }
  0xfb   :  { %v597_v32 = vpop.f32.mrf.mxu0  ;;  %v725_v33 = vpop.f32.mrf.mxu1 }
  0xfd   :  { %v2171_v34 = vpop.f32.mrf.mxu0  ;;  %v2173_v35 = vpop.f32.mrf.mxu1 }
  0xff   :  { %v602_v36 = vpop.f32.mrf.mxu0  ;;  %v730_v37 = vpop.f32.mrf.mxu1 }
 0x100   :  { %v838_v36 = vsel %vm445_vm0, %v2163_v26, 0.0  ;;  %v837_v37 = vadd.f32 %v836_v28, %v835_v29 }
 0x101   :  { %v2175_v38 = vpop.f32.mrf.mxu0  ;;  %v2177_v39 = vpop.f32.mrf.mxu1 }
 0x103   :  { %v605_v40 = vpop.f32.mrf.mxu0  ;;  %v733_v41 = vpop.f32.mrf.mxu1 }
 0x105   :  { %v2179_v42 = vpop.f32.mrf.mxu0  ;;  %v2181_v43 = vpop.f32.mrf.mxu1 }
 0x107   :  { %v610_v44 = vpop.f32.mrf.mxu0  ;;  %v738_v45 = vpop.f32.mrf.mxu1 }
 0x108   :  { %v840_v44 = vsel %vm445_vm0, %v2167_v30, 0.0  ;;  %v839_v45 = vadd.f32 %v838_v36, %v837_v37 }
 0x109   :  { %v2183_v46 = vpop.f32.mrf.mxu0  ;;  %v2185_v47 = vpop.f32.mrf.mxu1 }
 0x10a   :  { %v848_v12 = vsel %vm445_vm0, %v2183_v46, 0.0 }
 0x10b   :  { %v613_v48 = vpop.f32.mrf.mxu0  ;;  %v741_v49 = vpop.f32.mrf.mxu1 }
 0x10d   :  { %v2187_v50 = vpop.f32.mrf.mxu0  ;;  %v2189_v51 = vpop.f32.mrf.mxu1 }
 0x10f   :  { %v618_v52 = vpop.f32.mrf.mxu0  ;;  %v746_v53 = vpop.f32.mrf.mxu1 }
 0x110   :  { %v842_v52 = vsel %vm445_vm0, %v2171_v34, 0.0  ;;  %v841_v53 = vadd.f32 %v840_v44, %v839_v45 }
 0x111   :  { %v2191_v54 = vpop.f32.mrf.mxu0  ;;  %v2193_v55 = vpop.f32.mrf.mxu1 }
 0x112   :  { %v852_v36 = vsel %vm445_vm0, %v2191_v54, 0.0 }
 0x113   :  { %v621_v56 = vpop.f32.mrf.mxu0  ;;  %v749_v57 = vpop.f32.mrf.mxu1 }
 0x115   :  { %v2195_v58 = vpop.f32.mrf.mxu0  ;;  %v2197_v59 = vpop.f32.mrf.mxu1 }
 0x116   :  { %v854_v44 = vsel %vm445_vm0, %v2195_v58, 0.0 }
 0x117   :  { %v626_v60 = vpop.f32.mrf.mxu0  ;;  %v754_v61 = vpop.f32.mrf.mxu1 }
 0x118   :  { %v844_v60 = vsel %vm445_vm0, %v2175_v38, 0.0  ;;  %v843_v61 = vadd.f32 %v842_v52, %v841_v53 }
 0x119   :  { %v2199_v62 = vpop.f32.mrf.mxu0  ;;  %v2201_v63 = vpop.f32.mrf.mxu1 }
 0x11a   :  { %3891 = vst [vmem:[#allocation5_spill] sm:$0xff] %v2199_v62 }
 0x11b   :  { %v629_v0 = vpop.f32.mrf.mxu0  ;;  %v757_v1 = vpop.f32.mrf.mxu1 }
 0x11d   :  { %v2203_v2 = vpop.f32.mrf.mxu0  ;;  %v2205_v3 = vpop.f32.mrf.mxu1 }
 0x11e   :  { %3892 = vst [vmem:[#allocation6_spill] sm:$0xff] %v2203_v2 }
 0x11f   :  { %v634_v4 = vpop.f32.mrf.mxu0  ;;  %v762_v5 = vpop.f32.mrf.mxu1 }
 0x120   :  { %v846_v4 = vsel %vm445_vm0, %v2179_v42, 0.0  ;;  %v845_v5 = vadd.f32 %v844_v60, %v843_v61 }
 0x121   :  { %v2207_v6 = vpop.f32.mrf.mxu0  ;;  %v2209_v7 = vpop.f32.mrf.mxu1 }
 0x122   :  { %3893 = vst [vmem:[#allocation7_spill] sm:$0xff] %v2207_v6  ;;  %v847_v17 = vadd.f32 %v846_v4, %v845_v5  ;;  %v858_v4 = vsel %vm445_vm0, %v2203_v2, 0.0 }
 0x123   :  { %v637_v8 = vpop.f32.mrf.mxu0  ;;  %v765_v9 = vpop.f32.mrf.mxu1 }
 0x125   :  { %v2213_v13 = vpop.f32.mrf.mxu0  ;;  %v2215_v16 = vpop.f32.mrf.mxu1 }
 0x126   :  { %3894 = vst [vmem:[#allocation8_spill] sm:$0xff] %v2213_v13 }
 0x127   :  { %v642_v24 = vpop.f32.mrf.mxu0  ;;  %v770_v25 = vpop.f32.mrf.mxu1 }
 0x128   :  { %v850_v24 = vsel %vm445_vm0, %v2187_v50, 0.0  ;;  %v849_v25 = vadd.f32 %v848_v12, %v847_v17  ;;  %v860_v12 = vsel %vm445_vm0, %v2207_v6, 0.0 }
 0x129   :  { %v2223_v32 = vpop.f32.mrf.mxu0  ;;  %v2225_v33 = vpop.f32.mrf.mxu1 }
 0x12a   :  { %3895 = vst [vmem:[#allocation9_spill] sm:$0xff] %v2223_v32  ;;  %v851_v37 = vadd.f32 %v850_v24, %v849_v25 }
 0x12b   :  { %v645_v40 = vpop.f32.mrf.mxu0  ;;  %v773_v41 = vpop.f32.mrf.mxu1 }
 0x12c   :  { %v853_v45 = vadd.f32 %v852_v36, %v851_v37 }
 0x12d   :  { %v2231_v48 = vpop.f32.mrf.mxu0  ;;  %v2233_v49 = vpop.f32.mrf.mxu1 }
 0x12e   :  { %3896 = vst [vmem:[#allocation10_spill] sm:$0xff] %v2231_v48 }
 0x12f   :  { %v650_v56 = vpop.f32.mrf.mxu0  ;;  %v778_v57 = vpop.f32.mrf.mxu1 }
 0x130   :  { %v856_v56 = vsel %vm445_vm0, %v2199_v62, 0.0  ;;  %v855_v57 = vadd.f32 %v854_v44, %v853_v45  ;;  %v864_v44 = vsel %vm445_vm0, %v2223_v32, 0.0 }
 0x131   :  { %v2239_v0 = vpop.f32.mrf.mxu0  ;;  %v2241_v1 = vpop.f32.mrf.mxu1 }
 0x132   :  { %3897 = vst [vmem:[#allocation11_spill] sm:$0xff] %v2239_v0  ;;  %v857_v5 = vadd.f32 %v856_v56, %v855_v57  ;;  %v866_v56 = vsel %vm445_vm0, %v2231_v48, 0.0 }
 0x133   :  { %v653_v8 = vpop.f32.mrf.mxu0  ;;  %v781_v9 = vpop.f32.mrf.mxu1 }
 0x134   :  { %v859_v17 = vadd.f32 %v858_v4, %v857_v5 }
 0x135   :  { %v2247_v20 = vpop.f32.mrf.mxu0  ;;  %v2249_v21 = vpop.f32.mrf.mxu1 }
 0x136   :  { %3898 = vst [vmem:[#allocation12_spill] sm:$0xff] %v2247_v20 }
 0x137   :  { %v658_v28 = vpop.f32.mrf.mxu0  ;;  %v786_v29 = vpop.f32.mrf.mxu1 }
 0x138   :  { %v862_v28 = vsel %vm445_vm0, %v2213_v13, 0.0  ;;  %v861_v29 = vadd.f32 %v860_v12, %v859_v17 }
 0x139   :  { %v2255_v40 = vpop.f32.mrf.mxu0  ;;  %v2257_v41 = vpop.f32.mrf.mxu1 }
 0x13a   :  { %3899 = vst [vmem:[#allocation13_spill] sm:$0xff] %v2255_v40  ;;  %v863_v45 = vadd.f32 %v862_v28, %v861_v29  ;;  %v870_v28 = vsel %vm445_vm0, %v2247_v20, 0.0  ;;  %v872_v48 = vsel %vm445_vm0, %v2255_v40, 0.0 }
 0x13b   :  { %v661_v52 = vpop.f32.mrf.mxu0  ;;  %v789_v53 = vpop.f32.mrf.mxu1 }
 0x13c   :  { %v865_v57 = vadd.f32 %v864_v44, %v863_v45 }
 0x13d   :  { %v2263_v60 = vpop.f32.mrf.mxu0  ;;  %v2265_v61 = vpop.f32.mrf.mxu1 }
 0x13e   :  { %3900 = vst [vmem:[#allocation14_spill] sm:$0xff] %v2263_v60 }
 0x13f   :  { %v666_v8 = vpop.f32.mrf.mxu0  ;;  %v794_v9 = vpop.f32.mrf.mxu1 }
 0x140   :  { %v868_v8 = vsel %vm445_vm0, %v2239_v0, 0.0  ;;  %v867_v9 = vadd.f32 %v866_v56, %v865_v57  ;;  %v874_v56 = vsel %vm445_vm0, %v2263_v60, 0.0 }
 0x141   :  { %v2271_v24 = vpop.f32.mrf.mxu0  ;;  %v2273_v25 = vpop.f32.mrf.mxu1 }
 0x142   :  { %3901 = vst [vmem:[#allocation15_spill] sm:$0xff] %v2271_v24  ;;  %3902 = vst [vmem:[#allocation16_spill] sm:$0xff] %v2273_v25  ;;  %v869_v29 = vadd.f32 %v868_v8, %v867_v9  ;;  %v876_v20 = vsel %vm445_vm0, %v2271_v24, 0.0 }
 0x143   :  { %v669_v36 = vpop.f32.mrf.mxu0  ;;  %v797_v37 = vpop.f32.mrf.mxu1 }
 0x144   :  { %v871_v44 = vadd.f32 %v870_v28, %v869_v29 }
 0x145   :  { %v2279_v52 = vpop.f32.mrf.mxu0  ;;  %v2281_v53 = vpop.f32.mrf.mxu1 }
 0x146   :  { %3903 = vst [vmem:[#allocation17_spill] sm:$0xff] %v2279_v52  ;;  %3904 = vst [vmem:[#allocation18_spill] sm:$0xff] %v2281_v53  ;;  %v873_v57 = vadd.f32 %v872_v48, %v871_v44  ;;  %v878_v28 = vsel %vm445_vm0, %v2279_v52, 0.0 }
 0x147   :  { %v674_v4 = vpop.f32.mrf.mxu0  ;;  %v802_v5 = vpop.f32.mrf.mxu1 }
 0x148   :  { %v875_v8 = vadd.f32 %v874_v56, %v873_v57 }
 0x149   :  { %v2287_v12 = vpop.f32.mrf.mxu0  ;;  %v2289_v17 = vpop.f32.mrf.mxu1 }
 0x14a   :  { %3905 = vst [vmem:[#allocation19_spill] sm:$0xff] %v2287_v12  ;;  %3906 = vst [vmem:[#allocation20_spill] sm:$0xff] %v2289_v17  ;;  %v877_v29 = vadd.f32 %v876_v20, %v875_v8  ;;  %v880_v60 = vsel %vm445_vm0, %v2287_v12, 0.0 }
 0x14b   :  { %v677_v36 = vpop.f32.mrf.mxu0  ;;  %v805_v37 = vpop.f32.mrf.mxu1 }
 0x14c   :  { %v879_v48 = vadd.f32 %v878_v28, %v877_v29 }
 0x14d   :  { %v2295_v45 = vpop.f32.mrf.mxu0  ;;  %v2297_v4 = vpop.f32.mrf.mxu1 }
 0x14e   :  { %3907 = vst [vmem:[#allocation21_spill] sm:$0xff] %v2295_v45  ;;  %3908 = vst [vmem:[#allocation22_spill] sm:$0xff] %v2297_v4  ;;  %v882_v56 = vsel %vm445_vm0, %v2295_v45, 0.0  ;;  %v881_v57 = vadd.f32 %v880_v60, %v879_v48 }
 0x14f   :  { %v682_v5 = vpop.f32.mrf.mxu0  ;;  %v810_v0 = vpop.f32.mrf.mxu1 }
 0x150   :  { %v883_v20 = vadd.f32 %v882_v56, %v881_v57 }
 0x151   :  { %v2303_v9 = vpop.f32.mrf.mxu0  ;;  %v2305_v36 = vpop.f32.mrf.mxu1 }
 0x152   :  { %3909 = vst [vmem:[#allocation23_spill] sm:$0xff] %v2303_v9  ;;  %3910 = vst [vmem:[#allocation24_spill] sm:$0xff] %v2305_v36  ;;  %v884_v52 = vsel %vm445_vm0, %v2303_v9, 0.0 }
 0x153   :  { %v685_v37 = vpop.f32.mrf.mxu0  ;;  %v813_v40 = vpop.f32.mrf.mxu1  ;;  %v885_v29 = vadd.f32 %v884_v52, %v883_v20 }
 0x155   :  { %v2311_v44 = vpop.f32.mrf.mxu0  ;;  %v2313_v0 = vpop.f32.mrf.mxu1 }
 0x156   :  { %3911 = vst [vmem:[#allocation25_spill] sm:$0xff] %v2313_v0  ;;  %v886_v28 = vsel %vm445_vm0, %v2311_v44, 0.0 }
 0x157   :  { %v690_v5 = vpop.f32.mrf.mxu0  ;;  %v818_v24 = vpop.f32.mrf.mxu1  ;;  %v887_v60 = vadd.f32 %v886_v28, %v885_v29 }
 0x159   :  { %v2319_v8 = vpop.f32.mrf.mxu0  ;;  %v2321_v40 = vpop.f32.mrf.mxu1 }
 0x15a   :  { %3912 = vst [vmem:[#allocation26_spill] sm:$0xff] %v2319_v8  ;;  %3913 = vst [vmem:[#allocation27_spill] sm:$0xff] %v2321_v40  ;;  %v888_v45 = vsel %vm445_vm0, %v2319_v8, 0.0 }
 0x15b   :  { %v693_v37 = vpop.f32.mrf.mxu0  ;;  %v821_v12 = vpop.f32.mrf.mxu1  ;;  %v889_v57 = vadd.f32 %v888_v45, %v887_v60  ;;  %v896_v45 = vsel %vm445_vm0, %v2153_v15, 0.0 }
 0x15c   :  { %v894_v37 = vsel %vm445_vm0, %v2149_v11, 0.0 }
 0x15d   :  { %v2327_v48 = vpop.f32.mrf.mxu0  ;;  %v2329_v24 = vpop.f32.mrf.mxu1 }
 0x15e   :  { %3914 = vst [vmem:[#allocation28_spill] sm:$0xff] %v2329_v24  ;;  %v890_v56 = vsel %vm445_vm0, %v2327_v48, 0.0 }
 0x15f   :  { %v698_v5 = vpop.f32.mrf.mxu0  ;;  %v826_v9 = vpop.f32.mrf.mxu1  ;;  %v891_v32 = vadd.f32 %v890_v56, %v889_v57  ;;  %v900_v57 = vsel %vm445_vm0, %v2161_v23, 0.0 }
 0x160   :  { %v898_v9 = vsel %vm445_vm0, %v2157_v19, 0.0 }
 0x161   :  { %v2333_v13 = vpop.f32.mrf.mxu0  ;;  %v2335_v52 = vpop.f32.mrf.mxu1 }
 0x162   :  { %3915 = vst [vmem:[#allocation29_spill] sm:$0xff] %v2335_v52  ;;  %v892_v12 = vsel %vm445_vm0, %v2333_v13, 0.0 }
 0x163   :  { %v893_v20 = vadd.f32 %v892_v12, %v891_v32  ;;  %v701_v28 = vpop.f32.mrf.mxu0  ;;  %v829_v29 = vpop.f32.mrf.mxu1  ;;  %v902_v32 = vsel %vm445_vm0, %v2165_v27, 0.0 }
 0x164   :  { %v904_v28 = vsel %vm445_vm0, %v2169_v31, 0.0  ;;  %v906_v29 = vsel %vm445_vm0, %v2173_v35, 0.0 }
 0x165   :  { %v895_v8 = vadd.f32 %v894_v37, %v893_v20  ;;  %v908_v37 = vsel %vm445_vm0, %v2177_v39, 0.0 }
 0x167   :  { %v897_v60 = vadd.f32 %v896_v45, %v895_v8 }
 0x169   :  { %v899_v56 = vadd.f32 %v898_v9, %v897_v60  ;;  %v910_v60 = vsel %vm445_vm0, %v2181_v43, 0.0 }
 0x16b   :  { %v901_v5 = vadd.f32 %v900_v57, %v899_v56  ;;  %v912_v56 = vsel %vm445_vm0, %v2185_v47, 0.0 }
 0x16d   :  { %v903_v12 = vadd.f32 %v902_v32, %v901_v5  ;;  %v914_v5 = vsel %vm445_vm0, %v2189_v51, 0.0 }
 0x16f   :  { %v905_v20 = vadd.f32 %v904_v28, %v903_v12  ;;  %v916_v12 = vsel %vm445_vm0, %v2193_v55, 0.0 }
 0x171   :  { %v907_v8 = vadd.f32 %v906_v29, %v905_v20  ;;  %v918_v20 = vsel %vm445_vm0, %v2197_v59, 0.0 }
 0x173   :  { %v909_v45 = vadd.f32 %v908_v37, %v907_v8  ;;  %v920_v8 = vsel %vm445_vm0, %v2201_v63, 0.0 }
 0x175   :  { %v911_v9 = vadd.f32 %v910_v60, %v909_v45  ;;  %v922_v45 = vsel %vm445_vm0, %v2205_v3, 0.0 }
 0x177   :  { %v913_v57 = vadd.f32 %v912_v56, %v911_v9  ;;  %v924_v9 = vsel %vm445_vm0, %v2209_v7, 0.0 }
 0x179   :  { %v915_v32 = vadd.f32 %v914_v5, %v913_v57  ;;  %v926_v57 = vsel %vm445_vm0, %v2215_v16, 0.0 }
 0x17b   :  { %v917_v28 = vadd.f32 %v916_v12, %v915_v32  ;;  %v928_v32 = vsel %vm445_vm0, %v2225_v33, 0.0 }
 0x17d   :  { %v919_v29 = vadd.f32 %v918_v20, %v917_v28  ;;  %v930_v28 = vsel %vm445_vm0, %v2233_v49, 0.0 }
 0x17f   :  { %v921_v37 = vadd.f32 %v920_v8, %v919_v29  ;;  %v932_v29 = vsel %vm445_vm0, %v2241_v1, 0.0 }
 0x181   :  { %v923_v60 = vadd.f32 %v922_v45, %v921_v37  ;;  %v934_v37 = vsel %vm445_vm0, %v2249_v21, 0.0 }
 0x183   :  { %v925_v56 = vadd.f32 %v924_v9, %v923_v60  ;;  %v936_v60 = vsel %vm445_vm0, %v2257_v41, 0.0 }
 0x185   :  { %v927_v5 = vadd.f32 %v926_v57, %v925_v56  ;;  %v938_v56 = vsel %vm445_vm0, %v2265_v61, 0.0 }
 0x187   :  { %v929_v12 = vadd.f32 %v928_v32, %v927_v5  ;;  %v940_v5 = vsel %vm445_vm0, %v2273_v25, 0.0 }
 0x189   :  { %v931_v20 = vadd.f32 %v930_v28, %v929_v12  ;;  %v942_v12 = vsel %vm445_vm0, %v2281_v53, 0.0 }
 0x18b   :  { %v933_v8 = vadd.f32 %v932_v29, %v931_v20  ;;  %v944_v20 = vsel %vm445_vm0, %v2289_v17, 0.0 }
 0x18d   :  { %v935_v45 = vadd.f32 %v934_v37, %v933_v8  ;;  %v946_v8 = vsel %vm445_vm0, %v2297_v4, 0.0 }
 0x18f   :  { %v937_v9 = vadd.f32 %v936_v60, %v935_v45  ;;  %v948_v45 = vsel %vm445_vm0, %v2305_v36, 0.0 }
 0x191   :  { %v939_v57 = vadd.f32 %v938_v56, %v937_v9  ;;  %v950_v9 = vsel %vm445_vm0, %v2313_v0, 0.0 }
 0x193   :  { %v941_v32 = vadd.f32 %v940_v5, %v939_v57  ;;  %v952_v57 = vsel %vm445_vm0, %v2321_v40, 0.0 }
 0x195   :  { %v943_v28 = vadd.f32 %v942_v12, %v941_v32  ;;  %v954_v32 = vsel %vm445_vm0, %v2329_v24, 0.0 }
 0x197   :  { %v945_v29 = vadd.f32 %v944_v20, %v943_v28  ;;  %v956_v28 = vsel %vm445_vm0, %v2335_v52, 0.0 }
 0x199   :  { %v947_v37 = vadd.f32 %v946_v8, %v945_v29 }
 0x19b   :  { %v949_v60 = vadd.f32 %v948_v45, %v947_v37 }
 0x19d   :  { %v951_v56 = vadd.f32 %v950_v9, %v949_v60 }
 0x19f   :  { %v953_v5 = vadd.f32 %v952_v57, %v951_v56 }
 0x1a1   :  { %v955_v12 = vadd.f32 %v954_v32, %v953_v5 }
 0x1a3   :  { %v957_v20 = vadd.f32 %v956_v28, %v955_v12 }
 0x1a5   :  { %v958_v29 = vrot.slane %v957_v20, 4 }
 0x1a7   :  { %v959_v8 = vadd.f32 %v958_v29, %v957_v20 }
 0x1a9   :  { %v960_v36 = vrot.slane %v959_v8, 2 }
 0x1ab   :  { %v961_v37 = vadd.f32 %v960_v36, %v959_v8 }
 0x1ad   :  { %v962_v45 = vrot.slane %v961_v37, 1 }
 0x1af   :  { %v963_v4 = vadd.f32 %v962_v45, %v961_v37 }
 0x1b1   :  { %v2403_v0 = vmul.f32 0.001953125, %v963_v4 }
 0x1b3   :  { %v965_v60 = vsub.f32 %v2147_v10, %v2403_v0  ;;  %v966_v9 = vsub.f32 %v2151_v14, %v2403_v0  ;;  %v967_v56 = vsub.f32 %v2155_v18, %v2403_v0  ;;  %v968_v57 = vsub.f32 %v2159_v22, %v2403_v0 }
 0x1b4   :  { %v969_v36 = vsub.f32 %v2163_v26, %v2403_v0  ;;  %v970_v4 = vsub.f32 %v2167_v30, %v2403_v0  ;;  %v971_v37 = vsub.f32 %v2171_v34, %v2403_v0  ;;  %v972_v26 = vsub.f32 %v2175_v38, %v2403_v0 }
 0x1b5   :  { %v1029_v5 = vmul.f32 %v965_v60, %v965_v60  ;;  %v1030_v32 = vmul.f32 %v966_v9, %v966_v9  ;;  %v1031_v12 = vmul.f32 %v967_v56, %v967_v56  ;;  %v1032_v28 = vmul.f32 %v968_v57, %v968_v57 }
 0x1b6   :  { %v1033_v45 = vmul.f32 %v969_v36, %v969_v36  ;;  %v1034_v56 = vmul.f32 %v970_v4, %v970_v4  ;;  %v973_v57 = vsub.f32 %v2179_v42, %v2403_v0  ;;  %v974_v36 = vsub.f32 %v2183_v46, %v2403_v0 }
 0x1b7   :  { %v1093_v20 = vsel %vm445_vm0, %v1029_v5, 0.0  ;;  %v1094_v29 = vsel %vm445_vm0, %v1030_v32, 0.0  ;;  %v1096_v60 = vsel %vm445_vm0, %v1031_v12, 0.0  ;;  %v1098_v22 = vsel %vm445_vm0, %v1032_v28, 0.0 }
 0x1b8   :  { %v1095_v8 = vadd.f32 %v1094_v29, %v1093_v20  ;;  %v1035_v5 = vmul.f32 %v971_v37, %v971_v37  ;;  %v1100_v32 = vsel %vm445_vm0, %v1033_v45, 0.0  ;;  %v1036_v29 = vmul.f32 %v972_v26, %v972_v26 }
 0x1b9   :  { %v1102_v12 = vsel %vm445_vm0, %v1034_v56, 0.0  ;;  %v975_v4 = vsub.f32 %v2187_v50, %v2403_v0  ;;  %v976_v37 = vsub.f32 %v2191_v54, %v2403_v0  ;;  %v977_v26 = vsub.f32 %v2195_v58, %v2403_v0 }
 0x1ba   :  { %v1097_v9 = vadd.f32 %v1096_v60, %v1095_v8  ;;  %v1037_v60 = vmul.f32 %v973_v57, %v973_v57  ;;  %v978_v57 = vsub.f32 %v2199_v62, %v2403_v0 }
 0x1bc   :  { %v1099_v30 = vadd.f32 %v1098_v22, %v1097_v9  ;;  %v1104_v22 = vsel %vm445_vm0, %v1035_v5, 0.0  ;;  %v1038_v9 = vmul.f32 %v974_v36, %v974_v36  ;;  %v1108_v56 = vsel %vm445_vm0, %v1037_v60, 0.0 }
 0x1bd   :  { %v979_v36 = vsub.f32 %v2203_v2, %v2403_v0 }
 0x1be   :  { %v1101_v20 = vadd.f32 %v1100_v32, %v1099_v30  ;;  %v1106_v30 = vsel %vm445_vm0, %v1036_v29, 0.0  ;;  %v1039_v32 = vmul.f32 %v975_v4, %v975_v4  ;;  %v1110_v5 = vsel %vm445_vm0, %v1038_v9, 0.0 }
 0x1bf   :  { %v980_v4 = vsub.f32 %v2207_v6, %v2403_v0  ;;  %v1043_v62 = vmul.f32 %v979_v36, %v979_v36 }
 0x1c0   :  { %v1103_v8 = vadd.f32 %v1102_v12, %v1101_v20  ;;  %v1040_v12 = vmul.f32 %v976_v37, %v976_v37  ;;  %v1112_v29 = vsel %vm445_vm0, %v1039_v32, 0.0 }
 0x1c1   :  { %v1044_v2 = vmul.f32 %v980_v4, %v980_v4 }
 0x1c2   :  { %v1105_v28 = vadd.f32 %v1104_v22, %v1103_v8  ;;  %v1041_v22 = vmul.f32 %v977_v26, %v977_v26  ;;  %v1114_v60 = vsel %vm445_vm0, %v1040_v12, 0.0  ;;  %v1120_v12 = vsel %vm445_vm0, %v1043_v62, 0.0 }
 0x1c4   :  { %v1107_v45 = vadd.f32 %v1106_v30, %v1105_v28  ;;  %v1042_v30 = vmul.f32 %v978_v57, %v978_v57  ;;  %v1116_v9 = vsel %vm445_vm0, %v1041_v22, 0.0  ;;  %v1122_v22 = vsel %vm445_vm0, %v1044_v2, 0.0 }
 0x1c6   :  { %v1109_v20 = vadd.f32 %v1108_v56, %v1107_v45  ;;  %v3916_v56 = vld [vmem:[#allocation8_spill] sm:$0xff]  ;;  %v1118_v32 = vsel %vm445_vm0, %v1042_v30, 0.0 }
 0x1c7   :  { %v981_v37 = vsub.f32 %v3916_v56, %v2403_v0 }
 0x1c8   :  { %v1111_v8 = vadd.f32 %v1110_v5, %v1109_v20  ;;  %v3917_v5 = vld [vmem:[#allocation9_spill] sm:$0xff] }
 0x1c9   :  { %v982_v26 = vsub.f32 %v3917_v5, %v2403_v0  ;;  %v1045_v6 = vmul.f32 %v981_v37, %v981_v37 }
 0x1ca   :  { %v1113_v28 = vadd.f32 %v1112_v29, %v1111_v8  ;;  %v3918_v29 = vld [vmem:[#allocation10_spill] sm:$0xff] }
 0x1cb   :  { %v983_v57 = vsub.f32 %v3918_v29, %v2403_v0  ;;  %v1046_v56 = vmul.f32 %v982_v26, %v982_v26  ;;  %v1124_v30 = vsel %vm445_vm0, %v1045_v6, 0.0 }
 0x1cc   :  { %v1115_v45 = vadd.f32 %v1114_v60, %v1113_v28  ;;  %v3919_v60 = vld [vmem:[#allocation11_spill] sm:$0xff] }
 0x1cd   :  { %v984_v36 = vsub.f32 %v3919_v60, %v2403_v0  ;;  %v1047_v5 = vmul.f32 %v983_v57, %v983_v57  ;;  %v1126_v62 = vsel %vm445_vm0, %v1046_v56, 0.0 }
 0x1ce   :  { %v1117_v20 = vadd.f32 %v1116_v9, %v1115_v45  ;;  %v3920_v9 = vld [vmem:[#allocation12_spill] sm:$0xff] }
 0x1cf   :  { %v985_v4 = vsub.f32 %v3920_v9, %v2403_v0  ;;  %v1048_v29 = vmul.f32 %v984_v36, %v984_v36  ;;  %v1128_v2 = vsel %vm445_vm0, %v1047_v5, 0.0 }
 0x1d0   :  { %v1119_v8 = vadd.f32 %v1118_v32, %v1117_v20  ;;  %v3921_v32 = vld [vmem:[#allocation13_spill] sm:$0xff] }
 0x1d1   :  { %v986_v37 = vsub.f32 %v3921_v32, %v2403_v0  ;;  %v1049_v60 = vmul.f32 %v985_v4, %v985_v4  ;;  %v1130_v6 = vsel %vm445_vm0, %v1048_v29, 0.0 }
 0x1d2   :  { %v1121_v28 = vadd.f32 %v1120_v12, %v1119_v8  ;;  %v3922_v12 = vld [vmem:[#allocation14_spill] sm:$0xff] }
 0x1d3   :  { %v987_v26 = vsub.f32 %v3922_v12, %v2403_v0  ;;  %v1050_v9 = vmul.f32 %v986_v37, %v986_v37  ;;  %v1132_v56 = vsel %vm445_vm0, %v1049_v60, 0.0 }
 0x1d4   :  { %v1123_v45 = vadd.f32 %v1122_v22, %v1121_v28  ;;  %v3923_v22 = vld [vmem:[#allocation15_spill] sm:$0xff] }
 0x1d5   :  { %v988_v57 = vsub.f32 %v3923_v22, %v2403_v0  ;;  %v1051_v32 = vmul.f32 %v987_v26, %v987_v26  ;;  %v1134_v5 = vsel %vm445_vm0, %v1050_v9, 0.0 }
 0x1d6   :  { %v1125_v20 = vadd.f32 %v1124_v30, %v1123_v45  ;;  %v3924_v30 = vld [vmem:[#allocation17_spill] sm:$0xff] }
 0x1d7   :  { %v989_v36 = vsub.f32 %v3924_v30, %v2403_v0  ;;  %v1052_v12 = vmul.f32 %v988_v57, %v988_v57  ;;  %v1136_v29 = vsel %vm445_vm0, %v1051_v32, 0.0  ;;  %v993_v57 = vsub.f32 %v2311_v44, %v2403_v0 }
 0x1d8   :  { %v1127_v8 = vadd.f32 %v1126_v62, %v1125_v20  ;;  %v3925_v62 = vld [vmem:[#allocation19_spill] sm:$0xff] }
 0x1d9   :  { %v990_v4 = vsub.f32 %v3925_v62, %v2403_v0  ;;  %v1053_v22 = vmul.f32 %v989_v36, %v989_v36  ;;  %v1138_v60 = vsel %vm445_vm0, %v1052_v12, 0.0 }
 0x1da   :  { %v1129_v28 = vadd.f32 %v1128_v2, %v1127_v8  ;;  %v3926_v2 = vld [vmem:[#allocation21_spill] sm:$0xff] }
 0x1db   :  { %v991_v37 = vsub.f32 %v3926_v2, %v2403_v0  ;;  %v1054_v30 = vmul.f32 %v990_v4, %v990_v4  ;;  %v1140_v9 = vsel %vm445_vm0, %v1053_v22, 0.0  ;;  %v995_v4 = vsub.f32 %v2327_v48, %v2403_v0 }
 0x1dc   :  { %v1131_v45 = vadd.f32 %v1130_v6, %v1129_v28  ;;  %v3927_v6 = vld [vmem:[#allocation23_spill] sm:$0xff] }
 0x1dd   :  { %v992_v26 = vsub.f32 %v3927_v6, %v2403_v0  ;;  %v1142_v32 = vsel %vm445_vm0, %v1054_v30, 0.0 }
 0x1de   :  { %v1133_v20 = vadd.f32 %v1132_v56, %v1131_v45  ;;  %v1055_v56 = vmul.f32 %v991_v37, %v991_v37  ;;  %v996_v37 = vsub.f32 %v2333_v13, %v2403_v0 }
 0x1df   :  { %v1056_v2 = vmul.f32 %v992_v26, %v992_v26  ;;  %v997_v26 = vsub.f32 %v2149_v11, %v2403_v0 }
 0x1e0   :  { %v1135_v8 = vadd.f32 %v1134_v5, %v1133_v20  ;;  %v3928_v5 = vld [vmem:[#allocation26_spill] sm:$0xff]  ;;  %v1144_v12 = vsel %vm445_vm0, %v1055_v56, 0.0 }
 0x1e1   :  { %v994_v36 = vsub.f32 %v3928_v5, %v2403_v0  ;;  %v1146_v22 = vsel %vm445_vm0, %v1056_v2, 0.0 }
 0x1e2   :  { %v1137_v28 = vadd.f32 %v1136_v29, %v1135_v8  ;;  %v1057_v29 = vmul.f32 %v993_v57, %v993_v57  ;;  %v998_v57 = vsub.f32 %v2153_v15, %v2403_v0 }
 0x1e4   :  { %v1139_v45 = vadd.f32 %v1138_v60, %v1137_v28  ;;  %v1058_v60 = vmul.f32 %v994_v36, %v994_v36  ;;  %v1148_v30 = vsel %vm445_vm0, %v1057_v29, 0.0  ;;  %v999_v36 = vsub.f32 %v2157_v19, %v2403_v0 }
 0x1e6   :  { %v1141_v20 = vadd.f32 %v1140_v9, %v1139_v45  ;;  %v1059_v9 = vmul.f32 %v995_v4, %v995_v4  ;;  %v1150_v56 = vsel %vm445_vm0, %v1058_v60, 0.0  ;;  %v1000_v4 = vsub.f32 %v2161_v23, %v2403_v0 }
 0x1e8   :  { %v1143_v8 = vadd.f32 %v1142_v32, %v1141_v20  ;;  %v1060_v32 = vmul.f32 %v996_v37, %v996_v37  ;;  %v1152_v2 = vsel %vm445_vm0, %v1059_v9, 0.0  ;;  %v1001_v37 = vsub.f32 %v2165_v27, %v2403_v0 }
 0x1ea   :  { %v1145_v28 = vadd.f32 %v1144_v12, %v1143_v8  ;;  %v1061_v12 = vmul.f32 %v997_v26, %v997_v26  ;;  %v1154_v29 = vsel %vm445_vm0, %v1060_v32, 0.0  ;;  %v1002_v26 = vsub.f32 %v2169_v31, %v2403_v0 }
 0x1ec   :  { %v1147_v45 = vadd.f32 %v1146_v22, %v1145_v28  ;;  %v1062_v22 = vmul.f32 %v998_v57, %v998_v57  ;;  %v1156_v60 = vsel %vm445_vm0, %v1061_v12, 0.0  ;;  %v1003_v57 = vsub.f32 %v2173_v35, %v2403_v0 }
 0x1ee   :  { %v1149_v20 = vadd.f32 %v1148_v30, %v1147_v45  ;;  %v1063_v30 = vmul.f32 %v999_v36, %v999_v36  ;;  %v1158_v9 = vsel %vm445_vm0, %v1062_v22, 0.0  ;;  %v1004_v36 = vsub.f32 %v2177_v39, %v2403_v0 }
 0x1f0   :  { %v1151_v8 = vadd.f32 %v1150_v56, %v1149_v20  ;;  %v1064_v56 = vmul.f32 %v1000_v4, %v1000_v4  ;;  %v1160_v32 = vsel %vm445_vm0, %v1063_v30, 0.0  ;;  %v1005_v4 = vsub.f32 %v2181_v43, %v2403_v0 }
 0x1f2   :  { %v1153_v28 = vadd.f32 %v1152_v2, %v1151_v8  ;;  %v1065_v2 = vmul.f32 %v1001_v37, %v1001_v37  ;;  %v1162_v12 = vsel %vm445_vm0, %v1064_v56, 0.0  ;;  %v1006_v37 = vsub.f32 %v2185_v47, %v2403_v0 }
 0x1f4   :  { %v1155_v45 = vadd.f32 %v1154_v29, %v1153_v28  ;;  %v1066_v29 = vmul.f32 %v1002_v26, %v1002_v26  ;;  %v1164_v22 = vsel %vm445_vm0, %v1065_v2, 0.0  ;;  %v1007_v26 = vsub.f32 %v2189_v51, %v2403_v0 }
 0x1f6   :  { %v1157_v20 = vadd.f32 %v1156_v60, %v1155_v45  ;;  %v1067_v60 = vmul.f32 %v1003_v57, %v1003_v57  ;;  %v1166_v30 = vsel %vm445_vm0, %v1066_v29, 0.0  ;;  %v1008_v57 = vsub.f32 %v2193_v55, %v2403_v0 }
 0x1f8   :  { %v1159_v8 = vadd.f32 %v1158_v9, %v1157_v20  ;;  %v1068_v9 = vmul.f32 %v1004_v36, %v1004_v36  ;;  %v1168_v56 = vsel %vm445_vm0, %v1067_v60, 0.0  ;;  %v1009_v36 = vsub.f32 %v2197_v59, %v2403_v0 }
 0x1fa   :  { %v1161_v28 = vadd.f32 %v1160_v32, %v1159_v8  ;;  %v1069_v32 = vmul.f32 %v1005_v4, %v1005_v4  ;;  %v1170_v2 = vsel %vm445_vm0, %v1068_v9, 0.0  ;;  %v1010_v4 = vsub.f32 %v2201_v63, %v2403_v0 }
 0x1fc   :  { %v1163_v45 = vadd.f32 %v1162_v12, %v1161_v28  ;;  %v1070_v12 = vmul.f32 %v1006_v37, %v1006_v37  ;;  %v1172_v29 = vsel %vm445_vm0, %v1069_v32, 0.0  ;;  %v1011_v37 = vsub.f32 %v2205_v3, %v2403_v0 }
 0x1fe   :  { %v1165_v20 = vadd.f32 %v1164_v22, %v1163_v45  ;;  %v1071_v22 = vmul.f32 %v1007_v26, %v1007_v26  ;;  %v1174_v60 = vsel %vm445_vm0, %v1070_v12, 0.0  ;;  %v1012_v26 = vsub.f32 %v2209_v7, %v2403_v0 }
 0x200   :  { %v1167_v8 = vadd.f32 %v1166_v30, %v1165_v20  ;;  %v1072_v30 = vmul.f32 %v1008_v57, %v1008_v57  ;;  %v1176_v9 = vsel %vm445_vm0, %v1071_v22, 0.0  ;;  %v1013_v57 = vsub.f32 %v2215_v16, %v2403_v0 }
 0x202   :  { %v1169_v28 = vadd.f32 %v1168_v56, %v1167_v8  ;;  %v1073_v56 = vmul.f32 %v1009_v36, %v1009_v36  ;;  %v1178_v32 = vsel %vm445_vm0, %v1072_v30, 0.0  ;;  %v1014_v36 = vsub.f32 %v2225_v33, %v2403_v0 }
 0x204   :  { %v1171_v45 = vadd.f32 %v1170_v2, %v1169_v28  ;;  %v1074_v2 = vmul.f32 %v1010_v4, %v1010_v4  ;;  %v1180_v12 = vsel %vm445_vm0, %v1073_v56, 0.0  ;;  %v1015_v4 = vsub.f32 %v2233_v49, %v2403_v0 }
 0x206   :  { %v1173_v20 = vadd.f32 %v1172_v29, %v1171_v45  ;;  %v1075_v29 = vmul.f32 %v1011_v37, %v1011_v37  ;;  %v1182_v22 = vsel %vm445_vm0, %v1074_v2, 0.0  ;;  %v1016_v37 = vsub.f32 %v2241_v1, %v2403_v0 }
 0x208   :  { %v1175_v8 = vadd.f32 %v1174_v60, %v1173_v20  ;;  %v1076_v60 = vmul.f32 %v1012_v26, %v1012_v26  ;;  %v1184_v30 = vsel %vm445_vm0, %v1075_v29, 0.0  ;;  %v1017_v26 = vsub.f32 %v2249_v21, %v2403_v0 }
 0x20a   :  { %v1177_v28 = vadd.f32 %v1176_v9, %v1175_v8  ;;  %v1077_v9 = vmul.f32 %v1013_v57, %v1013_v57  ;;  %v1186_v56 = vsel %vm445_vm0, %v1076_v60, 0.0  ;;  %v1018_v57 = vsub.f32 %v2257_v41, %v2403_v0 }
 0x20c   :  { %v1179_v45 = vadd.f32 %v1178_v32, %v1177_v28  ;;  %v1078_v32 = vmul.f32 %v1014_v36, %v1014_v36  ;;  %v1188_v2 = vsel %vm445_vm0, %v1077_v9, 0.0  ;;  %v1019_v36 = vsub.f32 %v2265_v61, %v2403_v0 }
 0x20e   :  { %v1181_v20 = vadd.f32 %v1180_v12, %v1179_v45  ;;  %v1079_v12 = vmul.f32 %v1015_v4, %v1015_v4  ;;  %v1190_v29 = vsel %vm445_vm0, %v1078_v32, 0.0  ;;  %v1020_v4 = vsub.f32 %v2273_v25, %v2403_v0 }
 0x210   :  { %v1183_v8 = vadd.f32 %v1182_v22, %v1181_v20  ;;  %v1080_v22 = vmul.f32 %v1016_v37, %v1016_v37  ;;  %v1192_v60 = vsel %vm445_vm0, %v1079_v12, 0.0  ;;  %v1021_v37 = vsub.f32 %v2281_v53, %v2403_v0 }
 0x212   :  { %v1185_v28 = vadd.f32 %v1184_v30, %v1183_v8  ;;  %v1081_v30 = vmul.f32 %v1017_v26, %v1017_v26  ;;  %v1194_v9 = vsel %vm445_vm0, %v1080_v22, 0.0  ;;  %v1022_v26 = vsub.f32 %v2289_v17, %v2403_v0 }
 0x213   :  { %v1085_v25 = vmul.f32 %v1021_v37, %v1021_v37  ;;  %v1026_v37 = vsub.f32 %v2321_v40, %v2403_v0 }
 0x214   :  { %v1187_v45 = vadd.f32 %v1186_v56, %v1185_v28  ;;  %v1082_v56 = vmul.f32 %v1018_v57, %v1018_v57  ;;  %v1196_v32 = vsel %vm445_vm0, %v1081_v30, 0.0  ;;  %v1086_v53 = vmul.f32 %v1022_v26, %v1022_v26 }
 0x215   :  { %v1027_v26 = vsub.f32 %v2329_v24, %v2403_v0 }
 0x216   :  { %v1189_v20 = vadd.f32 %v1188_v2, %v1187_v45  ;;  %v1083_v2 = vmul.f32 %v1019_v36, %v1019_v36  ;;  %v1198_v12 = vsel %vm445_vm0, %v1082_v56, 0.0  ;;  %v1204_v56 = vsel %vm445_vm0, %v1085_v25, 0.0 }
 0x218   :  { %v1191_v8 = vadd.f32 %v1190_v29, %v1189_v20  ;;  %v1084_v29 = vmul.f32 %v1020_v4, %v1020_v4  ;;  %v1200_v22 = vsel %vm445_vm0, %v1083_v2, 0.0  ;;  %v1206_v2 = vsel %vm445_vm0, %v1086_v53, 0.0 }
 0x21a   :  { %v1193_v28 = vadd.f32 %v1192_v60, %v1191_v8  ;;  %v3929_v60 = vld [vmem:[#allocation22_spill] sm:$0xff]  ;;  %v1202_v30 = vsel %vm445_vm0, %v1084_v29, 0.0 }
 0x21b   :  { %v1023_v57 = vsub.f32 %v3929_v60, %v2403_v0 }
 0x21c   :  { %v1195_v45 = vadd.f32 %v1194_v9, %v1193_v28  ;;  %v3930_v9 = vld [vmem:[#allocation24_spill] sm:$0xff] }
 0x21d   :  { %v1024_v36 = vsub.f32 %v3930_v9, %v2403_v0  ;;  %v1087_v17 = vmul.f32 %v1023_v57, %v1023_v57  ;;  %v1028_v57 = vsub.f32 %v2335_v52, %v2403_v0 }
 0x21e   :  { %v1197_v20 = vadd.f32 %v1196_v32, %v1195_v45  ;;  %v3931_v32 = vld [vmem:[#allocation25_spill] sm:$0xff] }
 0x21f   :  { %v1025_v4 = vsub.f32 %v3931_v32, %v2403_v0  ;;  %v1208_v29 = vsel %vm445_vm0, %v1087_v17, 0.0  ;;  %v1092_v53 = vmul.f32 %v1028_v57, %v1028_v57 }
 0x220   :  { %v1199_v8 = vadd.f32 %v1198_v12, %v1197_v20  ;;  %v1088_v12 = vmul.f32 %v1024_v36, %v1024_v36 }
 0x221   :  { %v1218_v17 = vsel %vm445_vm0, %v1092_v53, 0.0 }
 0x222   :  { %v1201_v28 = vadd.f32 %v1200_v22, %v1199_v8  ;;  %v1089_v22 = vmul.f32 %v1025_v4, %v1025_v4  ;;  %v1210_v25 = vsel %vm445_vm0, %v1088_v12, 0.0 }
 0x224   :  { %v1203_v45 = vadd.f32 %v1202_v30, %v1201_v28  ;;  %v1090_v30 = vmul.f32 %v1026_v37, %v1026_v37  ;;  %v1212_v36 = vsel %vm445_vm0, %v1089_v22, 0.0  ;;  %v1235_v22 = vlaneseq }
 0x226   :  { %v1205_v20 = vadd.f32 %v1204_v56, %v1203_v45  ;;  %v1091_v56 = vmul.f32 %v1027_v26, %v1027_v26  ;;  %v2597_v57 = vshrl.u32 %v1235_v22, 7  ;;  %v3937_v22 = vld [vmem:[#allocation7_spill] sm:$0xff] }
 0x228   :  { %v1207_v8 = vadd.f32 %v1206_v2, %v1205_v20  ;;  %v1214_v20 = vsel %vm445_vm0, %v1090_v30, 0.0  ;;  %v1216_v4 = vsel %vm445_vm0, %v1091_v56, 0.0  ;;  %v3887_v30 = vsub.s32 0, %v2597_v57 }
 0x22a   :  { %v1209_v28 = vadd.f32 %v1208_v29, %v1207_v8 }
 0x22c   :  { %v1211_v45 = vadd.f32 %v1210_v25, %v1209_v28 }
 0x22e   :  { %v1213_v40 = vadd.f32 %v1212_v36, %v1211_v45 }
 0x230   :  { %v1215_v2 = vadd.f32 %v1214_v20, %v1213_v40  ;;  %v1227_v40 = vld [vmem:[%s3839_s2] sm:$0x1] }
 0x232   :  { %v1217_v24 = vadd.f32 %v1216_v4, %v1215_v2 }
 0x234   :  { %v1219_v8 = vadd.f32 %v1218_v17, %v1217_v24  ;;  %v3933_v17 = vld [vmem:[#allocation3_spill] sm:$0xff] }
 0x236   :  { %v1220_v29 = vrot.slane %v1219_v8, 4 }
 0x238   :  { %v1221_v52 = vadd.f32 %v1220_v29, %v1219_v8  ;;  %v3934_v29 = vld [vmem:[#allocation4_spill] sm:$0xff] }
 0x23a   :  { %v1222_v37 = vrot.slane %v1221_v52, 2 }
 0x23c   :  { %v1223_v32 = vadd.f32 %v1222_v37, %v1221_v52  ;;  %v2606_v52 = vld [vmem:[%s3840_s3] sm:$0x1] }
 0x23e   :  { %v1224_v12 = vrot.slane %v1223_v32, 1 }
 0x240   :  { %v1225_v28 = vadd.f32 %v1224_v12, %v1223_v32 }
 0x242   :  { %v1226_v26 = vmul.f32 0.001953125, %v1225_v28 }
 0x244   :  { %v1228_v25 = vadd.f32 1e-05, %v1226_v26  ;;  %v3935_v26 = vld [vmem:[#allocation5_spill] sm:$0xff] }
 0x246   :  { %1863 = vrsqrt.f32 %v1228_v25  ;;  %v3936_v25 = vld [vmem:[#allocation6_spill] sm:$0xff] }
 0x253   :  { %v1864_v45 = vpop.eup %1863 }
 0x254   :  { %v1230_v24 = vmul.f32 %v1864_v45, %v1227_v40  ;;  %v3938_v40 = vld [vmem:[#allocation8_spill] sm:$0xff]  ;;  %v3939_v45 = vld [vmem:[#allocation9_spill] sm:$0xff] }
 0x256   :  { %v2609_v32 = vmul.f32 %v1230_v24, %v2403_v0  ;;  %v2613_v56 = vrot.slane %v1230_v24, %v3887_v30  ;;  %v3932_v0 = vld [vmem:[#allocation2_spill] sm:$0xff]  ;;  %v3947_v30 = vld [vmem:[#allocation17_spill] sm:$0xff] }
 0x257   :  { %v3940_v24 = vld [vmem:[#allocation10_spill] sm:$0xff] }
 0x258   :  { %v1233_v36 = vsub.f32 %v2606_v52, %v2609_v32  ;;  %v2619_v53 = vmul.f32 %v2613_v56, %v2147_v10  ;;  %v2623_v20 = vmul.f32 %v2613_v56, %v2151_v14  ;;  %v2627_v2 = vmul.f32 %v2613_v56, %v2155_v18  ;;  %v3941_v32 = vld [vmem:[#allocation11_spill] sm:$0xff] }
 0x259   :  { %v2631_v4 = vmul.f32 %v2613_v56, %v3932_v0  ;;  %v2635_v8 = vmul.f32 %v2613_v56, %v3933_v17  ;;  %v2639_v10 = vmul.f32 %v2613_v56, %v3934_v29  ;;  %v2643_v14 = vmul.f32 %v2613_v56, %v2171_v34  ;;  %v3942_v17 = vld [vmem:[#allocation12_spill] sm:$0xff] }
 0x25a   :  { %v2647_v18 = vmul.f32 %v2613_v56, %v2175_v38  ;;  %v2651_v37 = vmul.f32 %v2613_v56, %v2179_v42  ;;  %v2655_v12 = vmul.f32 %v2613_v56, %v2183_v46  ;;  %v2659_v28 = vmul.f32 %v2613_v56, %v2187_v50 }
 0x25b   :  { %v2663_v34 = vmul.f32 %v2613_v56, %v2191_v54  ;;  %v2667_v38 = vmul.f32 %v2613_v56, %v2195_v58  ;;  %v2671_v42 = vmul.f32 %v2613_v56, %v3935_v26  ;;  %v2675_v46 = vmul.f32 %v2613_v56, %v3936_v25  ;;  %v3944_v26 = vld [vmem:[#allocation13_spill] sm:$0xff] }
 0x25c   :  { %v2679_v50 = vmul.f32 %v2613_v56, %v3937_v22  ;;  %v2683_v54 = vmul.f32 %v2613_v56, %v3938_v40  ;;  %v2687_v58 = vmul.f32 %v2613_v56, %v3939_v45  ;;  %v2691_v52 = vmul.f32 %v2613_v56, %v3940_v24  ;;  %v3945_v22 = vld [vmem:[#allocation14_spill] sm:$0xff]  ;;  %v3946_v45 = vld [vmem:[#allocation15_spill] sm:$0xff] }
 0x25d   :  { %v2695_v0 = vmul.f32 %v2613_v56, %v3941_v32  ;;  %v2699_v29 = vmul.f32 %v2613_v56, %v3942_v17  ;;  %v2703_v25 = vmul.f32 %v2613_v56, %v3944_v26  ;;  %v2707_v40 = vmul.f32 %v2613_v56, %v3945_v22 }
 0x25e   :  { %v2711_v24 = vmul.f32 %v2613_v56, %v3946_v45  ;;  %v2715_v32 = vmul.f32 %v2613_v56, %v3947_v30  ;;  %v2719_v17 = vmul.f32 %v2613_v56, %v3925_v62  ;;  %v2727_v22 = vmul.f32 %v2613_v56, %v3927_v6 }
 0x25f   :  { %3943 = vst [vmem:[#allocation19_spill] sm:$0xff] %v2699_v29  ;;  %v3948_v29 = vld [vmem:[#allocation21_spill] sm:$0xff]  ;;  %v2731_v45 = vmul.f32 %v2613_v56, %v2311_v44  ;;  %v2735_v30 = vmul.f32 %v2613_v56, %v3928_v5  ;;  %v2739_v62 = vmul.f32 %v2613_v56, %v2327_v48  ;;  %v2747_v6 = vmul.f32 %v2613_v56, %v2149_v11 }
 0x260   :  { %v2723_v26 = vmul.f32 %v2613_v56, %v3948_v29  ;;  %v2743_v29 = vmul.f32 %v2613_v56, %v2333_v13  ;;  %v2751_v44 = vmul.f32 %v2613_v56, %v2153_v15  ;;  %v2755_v5 = vmul.f32 %v2613_v56, %v2157_v19 }
 0x261   :  { %v2759_v48 = vmul.f32 %v2613_v56, %v2161_v23  ;;  %v2763_v13 = vmul.f32 %v2613_v56, %v2165_v27  ;;  %v2767_v11 = vmul.f32 %v2613_v56, %v2169_v31  ;;  %v2771_v15 = vmul.f32 %v2613_v56, %v2173_v35 }
 0x262   :  { %v2775_v19 = vmul.f32 %v2613_v56, %v2177_v39  ;;  %v2779_v23 = vmul.f32 %v2613_v56, %v2181_v43  ;;  %v2783_v27 = vmul.f32 %v2613_v56, %v2185_v47  ;;  %v2787_v31 = vmul.f32 %v2613_v56, %v2189_v51 }
 0x263   :  { %v2791_v35 = vmul.f32 %v2613_v56, %v2193_v55  ;;  %v2795_v39 = vmul.f32 %v2613_v56, %v2197_v59  ;;  %v2799_v43 = vmul.f32 %v2613_v56, %v2201_v63  ;;  %v2803_v47 = vmul.f32 %v2613_v56, %v2205_v3 }
 0x264   :  { %v2807_v51 = vmul.f32 %v2613_v56, %v2209_v7  ;;  %v2811_v55 = vmul.f32 %v2613_v56, %v2215_v16  ;;  %v2815_v59 = vmul.f32 %v2613_v56, %v2225_v33  ;;  %v2819_v63 = vmul.f32 %v2613_v56, %v2233_v49 }
 0x265   :  { %v2823_v3 = vmul.f32 %v2613_v56, %v2241_v1  ;;  %v2827_v7 = vmul.f32 %v2613_v56, %v2249_v21  ;;  %v2831_v16 = vmul.f32 %v2613_v56, %v2257_v41  ;;  %v2835_v33 = vmul.f32 %v2613_v56, %v2265_v61 }
 0x266   :  { %3949 = vst [vmem:[#allocation23_spill] sm:$0xff] %v2815_v59  ;;  %3950 = vst [vmem:[#allocation26_spill] sm:$0xff] %v2819_v63  ;;  %v3953_v59 = vld [vmem:[#allocation16_spill] sm:$0xff]  ;;  %v3955_v63 = vld [vmem:[#allocation18_spill] sm:$0xff]  ;;  %v2851_v41 = vmul.f32 %v2613_v56, %v3929_v60  ;;  %v2855_v61 = vmul.f32 %v2613_v56, %v3930_v9 }
 0x267   :  { %3951 = vst [vmem:[#allocation22_spill] sm:$0xff] %v2823_v3  ;;  %3952 = vst [vmem:[#allocation24_spill] sm:$0xff] %v2835_v33  ;;  %v2839_v49 = vmul.f32 %v2613_v56, %v3953_v59  ;;  %v2843_v1 = vmul.f32 %v2613_v56, %v3955_v63  ;;  %v3957_v3 = vld [vmem:[#allocation20_spill] sm:$0xff]  ;;  %v3960_v33 = vsub.s32 0, %v2597_v57 }
 0x268   :  { %v2847_v21 = vmul.f32 %v2613_v56, %v3957_v3  ;;  %3959 = vst [vmem:[#allocation5_spill] sm:$0xff] %v2851_v41  ;;  %v3964_v41 = vld [vmem:[#allocation29_spill] sm:$0xff] }
 0x269   :  { %3954 = vst [vmem:[#allocation2_spill] sm:$0xff] %v2839_v49  ;;  %3956 = vst [vmem:[#allocation3_spill] sm:$0xff] %v2843_v1  ;;  %v2859_v59 = vrot.slane %v1233_v36, %v3960_v33  ;;  %v3961_v49 = vld [vmem:[#allocation25_spill] sm:$0xff]  ;;  %v3962_v1 = vld [vmem:[#allocation27_spill] sm:$0xff]  ;;  %v2875_v9 = vmul.f32 %v2613_v56, %v3964_v41 }
 0x26a   :  { %3958 = vst [vmem:[#allocation4_spill] sm:$0xff] %v2847_v21  ;;  %v2863_v63 = vmul.f32 %v2613_v56, %v3961_v49  ;;  %v2867_v3 = vmul.f32 %v2613_v56, %v3962_v1  ;;  %v3963_v21 = vld [vmem:[#allocation28_spill] sm:$0xff]  ;;  %v3965_v1 = vld [vmem:[#allocation19_spill] sm:$0xff] }
 0x26b   :  { %v2871_v60 = vmul.f32 %v2613_v56, %v3963_v21  ;;  %v2879_v57 = vadd.f32 %v2859_v59, %v2619_v53  ;;  %v2883_v36 = vadd.f32 %v2859_v59, %v2623_v20  ;;  %v2887_v33 = vadd.f32 %v2859_v59, %v2627_v2 }
 0x26c   :  { %v2891_v49 = vadd.f32 %v2859_v59, %v2631_v4  ;;  %v2895_v56 = vadd.f32 %v2859_v59, %v2635_v8  ;;  %v2899_v53 = vadd.f32 %v2859_v59, %v2639_v10  ;;  %v2903_v20 = vadd.f32 %v2859_v59, %v2643_v14 }
 0x26d   :  { %v2907_v2 = vadd.f32 %v2859_v59, %v2647_v18  ;;  %v2911_v4 = vadd.f32 %v2859_v59, %v2651_v37  ;;  %v2915_v8 = vadd.f32 %v2859_v59, %v2655_v12  ;;  %v2919_v10 = vadd.f32 %v2859_v59, %v2659_v28  ;;  %v3981_v41 = vld [vmem:[#allocation23_spill] sm:$0xff] }
 0x26e   :  { %v2923_v14 = vadd.f32 %v2859_v59, %v2663_v34  ;;  %v2927_v18 = vadd.f32 %v2859_v59, %v2667_v38  ;;  %v2931_v37 = vadd.f32 %v2859_v59, %v2671_v42  ;;  %v2935_v12 = vadd.f32 %v2859_v59, %v2675_v46 }
 0x26f   :  { %v2939_v28 = vadd.f32 %v2859_v59, %v2679_v50  ;;  %v2943_v34 = vadd.f32 %v2859_v59, %v2683_v54  ;;  %v2947_v38 = vadd.f32 %v2859_v59, %v2687_v58  ;;  %v2951_v42 = vadd.f32 %v2859_v59, %v2691_v52 }
 0x270   :  { %v2955_v46 = vadd.f32 %v2859_v59, %v2695_v0  ;;  %v2959_v50 = vadd.f32 %v2859_v59, %v3965_v1  ;;  %v2963_v54 = vadd.f32 %v2859_v59, %v2703_v25  ;;  %v2967_v58 = vadd.f32 %v2859_v59, %v2707_v40 }
 0x271   :  { %v2971_v52 = vadd.f32 %v2859_v59, %v2711_v24  ;;  %v2975_v0 = vadd.f32 %v2859_v59, %v2715_v32  ;;  %v2979_v21 = vadd.f32 %v2859_v59, %v2719_v17  ;;  %v2983_v25 = vadd.f32 %v2859_v59, %v2723_v26 }
 0x272   :  { %v2987_v40 = vadd.f32 %v2859_v59, %v2727_v22  ;;  %v2991_v24 = vadd.f32 %v2859_v59, %v2731_v45  ;;  %v2995_v32 = vadd.f32 %v2859_v59, %v2735_v30  ;;  %v2999_v17 = vadd.f32 %v2859_v59, %v2739_v62 }
 0x273   :  { %v3003_v26 = vadd.f32 %v2859_v59, %v2743_v29  ;;  %v3007_v22 = vadd.f32 %v2859_v59, %v2747_v6  ;;  %v3011_v45 = vadd.f32 %v2859_v59, %v2751_v44  ;;  %v3015_v30 = vadd.f32 %v2859_v59, %v2755_v5 }
 0x274   :  { %v3019_v62 = vadd.f32 %v2859_v59, %v2759_v48  ;;  %v3023_v29 = vadd.f32 %v2859_v59, %v2763_v13  ;;  %v3027_v6 = vadd.f32 %v2859_v59, %v2767_v11  ;;  %v3031_v44 = vadd.f32 %v2859_v59, %v2771_v15 }
 0x275   :  { %3966 = vst [vmem:[#allocation6_spill] sm:$0xff] %v3015_v30  ;;  %v3035_v5 = vadd.f32 %v2859_v59, %v2775_v19  ;;  %v3039_v48 = vadd.f32 %v2859_v59, %v2779_v23  ;;  %v3043_v13 = vadd.f32 %v2859_v59, %v2783_v27  ;;  %v3047_v11 = vadd.f32 %v2859_v59, %v2787_v31  ;;  %v1399_v30 = vld [vmem:[%s3841_s4 + $0xc8] sm:$0xff] }
 0x276   :  { %3967 = vst [vmem:[#allocation7_spill] sm:$0xff] %v3019_v62  ;;  %3968 = vst [vmem:[#allocation8_spill] sm:$0xff] %v3023_v29  ;;  %v3051_v15 = vadd.f32 %v2859_v59, %v2791_v35  ;;  %v3055_v19 = vadd.f32 %v2859_v59, %v2795_v39  ;;  %v3059_v23 = vadd.f32 %v2859_v59, %v2799_v43  ;;  %v1374_v35 = vld [vmem:[%s3841_s4] sm:$0xff]  ;;  %v1375_v39 = vld [vmem:[%s3841_s4 + $0x8] sm:$0xff] }
 0x277   :  { %3969 = vst [vmem:[#allocation9_spill] sm:$0xff] %v3027_v6  ;;  %3970 = vst [vmem:[#allocation10_spill] sm:$0xff] %v3031_v44  ;;  %v3063_v27 = vadd.f32 %v2859_v59, %v2803_v47  ;;  %v3067_v31 = vadd.f32 %v2859_v59, %v2807_v51  ;;  %v1376_v43 = vld [vmem:[%s3841_s4 + $0x10] sm:$0xff]  ;;  %v1377_v47 = vld [vmem:[%s3841_s4 + $0x18] sm:$0xff]  ;;  %v3083_v51 = vadd.f32 %v2859_v59, %v2811_v55 }
 0x278   :  { %3971 = vst [vmem:[#allocation11_spill] sm:$0xff] %v3035_v5  ;;  %3972 = vst [vmem:[#allocation12_spill] sm:$0xff] %v3039_v48  ;;  %v3087_v1 = vadd.f32 %v2859_v59, %v3981_v41  ;;  %v1379_v55 = vld [vmem:[%s3841_s4 + $0x28] sm:$0xff]  ;;  %v1380_v41 = vld [vmem:[%s3841_s4 + $0x30] sm:$0xff]  ;;  %v3151_v5 = vadd.f32 %v2859_v59, %v2855_v61  ;;  %v3167_v61 = vadd.f32 %v2859_v59, %v2863_v63 }
 0x279   :  { %3973 = vst [vmem:[#allocation13_spill] sm:$0xff] %v3043_v13  ;;  %3974 = vst [vmem:[#allocation14_spill] sm:$0xff] %v3047_v11  ;;  %v1382_v13 = vld [vmem:[%s3841_s4 + $0x40] sm:$0xff]  ;;  %v1391_v63 = vld [vmem:[%s3841_s4 + $0x88] sm:$0xff]  ;;  %v3212_v6 = vadd.f32 %v1376_v43, %v2887_v33  ;;  %v3215_v29 = vadd.f32 %v1377_v47, %v2891_v49  ;;  %v3233_v49 = vadd.f32 %v1379_v55, %v2899_v53 }
 0x27a   :  { %3975 = vst [vmem:[#allocation15_spill] sm:$0xff] %v3051_v15  ;;  %3976 = vst [vmem:[#allocation17_spill] sm:$0xff] %v3055_v19  ;;  %v1378_v15 = vld [vmem:[%s3841_s4 + $0x20] sm:$0xff]  ;;  %v1403_v47 = vld [vmem:[%s3841_s4 + $0xe8] sm:$0xff] }
 0x27b   :  { %3977 = vst [vmem:[#allocation21_spill] sm:$0xff] %v3059_v23  ;;  %3978 = vst [vmem:[#allocation16_spill] sm:$0xff] %v3063_v27  ;;  %v3985_v23 = vld [vmem:[#allocation22_spill] sm:$0xff]  ;;  %v3230_v33 = vadd.f32 %v1378_v15, %v2895_v56  ;;  %v1404_v56 = vld [vmem:[%s3841_s4 + $0xf0] sm:$0xff] }
 0x27c   :  { %3979 = vst [vmem:[#allocation18_spill] sm:$0xff] %v3067_v31  ;;  %3980 = vst [vmem:[#allocation20_spill] sm:$0xff] %v3083_v51  ;;  %v3983_v31 = vld [vmem:[#allocation26_spill] sm:$0xff]  ;;  %v3095_v19 = vadd.f32 %v2859_v59, %v3985_v23  ;;  %v3111_v23 = vadd.f32 %v2859_v59, %v2827_v7  ;;  %v1383_v7 = vld [vmem:[%s3841_s4 + $0x48] sm:$0xff] }
 0x27d   :  { %3982 = vst [vmem:[#allocation25_spill] sm:$0xff] %v3087_v1  ;;  %v3091_v27 = vadd.f32 %v2859_v59, %v3983_v31  ;;  %v1381_v31 = vld [vmem:[%s3841_s4 + $0x38] sm:$0xff]  ;;  %v3991_v51 = vld [vmem:[#allocation2_spill] sm:$0xff] }
 0x27e   :  { %3986 = vst [vmem:[#allocation28_spill] sm:$0xff] %v3095_v19  ;;  %3987 = vst [vmem:[#allocation29_spill] sm:$0xff] %v3111_v23  ;;  %v3115_v19 = vadd.f32 %v2859_v59, %v2831_v16  ;;  %v3123_v11 = vadd.f32 %v2859_v59, %v3991_v51  ;;  %v1384_v16 = vld [vmem:[%s3841_s4 + $0x50] sm:$0xff]  ;;  %v3997_v23 = vld [vmem:[#allocation5_spill] sm:$0xff] }
 0x27f   :  { %3984 = vst [vmem:[#allocation27_spill] sm:$0xff] %v3091_v27  ;;  %v3989_v27 = vld [vmem:[#allocation24_spill] sm:$0xff]  ;;  %v3147_v48 = vadd.f32 %v2859_v59, %v3997_v23  ;;  %v1386_v44 = vld [vmem:[%s3841_s4 + $0x60] sm:$0xff]  ;;  %v1389_v23 = vld [vmem:[%s3841_s4 + $0x78] sm:$0xff]  ;;  %v3260_v15 = vadd.f32 %v1384_v16, %v2919_v10 }
 0x280   :  { %3988 = vst [vmem:[#allocation19_spill] sm:$0xff] %v3115_v19  ;;  %v3119_v1 = vadd.f32 %v2859_v59, %v3989_v27  ;;  %3992 = vst [vmem:[#allocation26_spill] sm:$0xff] %v3123_v11  ;;  %v1385_v27 = vld [vmem:[%s3841_s4 + $0x58] sm:$0xff]  ;;  %v3995_v11 = vld [vmem:[#allocation4_spill] sm:$0xff]  ;;  %v3278_v10 = vadd.f32 %v1386_v44, %v2927_v18 }
 0x281   :  { %v3143_v19 = vadd.f32 %v2859_v59, %v3995_v11  ;;  %3998 = vst [vmem:[#allocation2_spill] sm:$0xff] %v3147_v48  ;;  %v1388_v11 = vld [vmem:[%s3841_s4 + $0x70] sm:$0xff]  ;;  %4000 = vst [vmem:[#allocation4_spill] sm:$0xff] %v3167_v61  ;;  %v3175_v48 = vadd.f32 %v2859_v59, %v2871_v60  ;;  %v1393_v60 = vld [vmem:[%s3841_s4 + $0x98] sm:$0xff]  ;;  %v3209_v61 = vadd.f32 %v1375_v39, %v2883_v36 }
 0x282   :  { %3990 = vst [vmem:[#allocation23_spill] sm:$0xff] %v3119_v1  ;;  %v3993_v1 = vld [vmem:[#allocation3_spill] sm:$0xff]  ;;  %v1398_v62 = vld [vmem:[%s3841_s4 + $0xc0] sm:$0xff]  ;;  %v1401_v36 = vld [vmem:[%s3841_s4 + $0xd8] sm:$0xff]  ;;  %v3239_v39 = vadd.f32 %v1381_v31, %v2907_v2  ;;  %v3257_v2 = vadd.f32 %v1383_v7, %v2915_v8  ;;  %v3263_v55 = vadd.f32 %v1385_v27, %v2923_v14  ;;  %v3287_v7 = vadd.f32 %v1389_v23, %v2939_v28 }
 0x283   :  { %v3139_v51 = vadd.f32 %v2859_v59, %v3993_v1  ;;  %3996 = vst [vmem:[#allocation24_spill] sm:$0xff] %v3143_v19  ;;  %3999 = vst [vmem:[#allocation3_spill] sm:$0xff] %v3151_v5  ;;  %v1387_v1 = vld [vmem:[%s3841_s4 + $0x68] sm:$0xff]  ;;  %v3171_v5 = vadd.f32 %v2859_v59, %v2867_v3  ;;  %v3179_v19 = vadd.f32 %v2859_v59, %v2875_v9  ;;  %v1392_v3 = vld [vmem:[%s3841_s4 + $0x90] sm:$0xff] }
 0x284   :  { %4002 = vst [vmem:[#allocation30_spill] sm:$0xff] %v3175_v48  ;;  %v1394_v59 = vld [vmem:[%s3841_s4 + $0xa0] sm:$0xff]  ;;  %v1395_v9 = vld [vmem:[%s3841_s4 + $0xa8] sm:$0xff]  ;;  %v1397_v48 = vld [vmem:[%s3841_s4 + $0xb8] sm:$0xff]  ;;  %v3281_v14 = vadd.f32 %v1387_v1, %v2931_v37  ;;  %v3305_v28 = vadd.f32 %v1391_v63, %v2947_v38  ;;  %v3308_v44 = vadd.f32 %v1392_v3, %v2951_v42  ;;  %v3311_v1 = vadd.f32 %v1393_v60, %v2955_v46 }
 0x285   :  { %3994 = vst [vmem:[#allocation22_spill] sm:$0xff] %v3139_v51  ;;  %4001 = vst [vmem:[#allocation5_spill] sm:$0xff] %v3171_v5  ;;  %v1390_v51 = vld [vmem:[%s3841_s4 + $0x80] sm:$0xff]  ;;  %v3206_v5 = vadd.f32 %v1374_v35, %v2879_v57  ;;  %v1400_v57 = vld [vmem:[%s3841_s4 + $0xd0] sm:$0xff]  ;;  %v3236_v35 = vadd.f32 %v1380_v41, %v2903_v20  ;;  %v3254_v20 = vadd.f32 %v1382_v13, %v2911_v4 }
 0x286   :  { %4003 = vst [vmem:[#allocation31_spill] sm:$0xff] %v3179_v19  ;;  %v1396_v19 = vld [vmem:[%s3841_s4 + $0xb0] sm:$0xff]  ;;  %v1402_v43 = vld [vmem:[%s3841_s4 + $0xe0] sm:$0xff]  ;;  %v1405_v53 = vld [vmem:[%s3841_s4 + $0xf8] sm:$0xff]  ;;  %v3284_v13 = vadd.f32 %v1388_v11, %v2935_v12  ;;  %v3302_v12 = vadd.f32 %v1390_v51, %v2943_v34  ;;  %v3323_v38 = vadd.f32 %v1394_v59, %v2959_v50  ;;  %v3326_v42 = vadd.f32 %v1395_v9, %v2963_v54 }
 0x287   :  { %v1406_v41 = vld [vmem:[%s3841_s4 + $0x100] sm:$0xff]  ;;  %v1407_v31 = vld [vmem:[%s3841_s4 + $0x108] sm:$0xff]  ;;  %v1408_v4 = vld [vmem:[%s3841_s4 + $0x110] sm:$0xff]  ;;  %v3329_v46 = vadd.f32 %v1396_v19, %v2967_v58  ;;  %v3332_v51 = vadd.f32 %v1397_v48, %v2971_v52  ;;  %v3344_v54 = vadd.f32 %v1398_v62, %v2975_v0  ;;  %v3347_v58 = vadd.f32 %v1399_v30, %v2979_v21 }
 0x288   :  { %v1409_v8 = vld [vmem:[%s3841_s4 + $0x118] sm:$0xff]  ;;  %v1410_v16 = vld [vmem:[%s3841_s4 + $0x120] sm:$0xff]  ;;  %v1411_v27 = vld [vmem:[%s3841_s4 + $0x128] sm:$0xff]  ;;  %v3350_v52 = vadd.f32 %v1400_v57, %v2983_v25  ;;  %v3353_v48 = vadd.f32 %v1401_v36, %v2987_v40  ;;  %v3365_v21 = vadd.f32 %v1402_v43, %v2991_v24  ;;  %v3368_v25 = vadd.f32 %v1403_v47, %v2995_v32 }
 0x289   :  { %v1412_v18 = vld [vmem:[%s3841_s4 + $0x130] sm:$0xff]  ;;  %v1413_v37 = vld [vmem:[%s3841_s4 + $0x138] sm:$0xff]  ;;  %v1414_v11 = vld [vmem:[%s3841_s4 + $0x140] sm:$0xff]  ;;  %v3371_v40 = vadd.f32 %v1404_v56, %v2999_v17  ;;  %v3374_v30 = vadd.f32 %v1405_v53, %v3003_v26  ;;  %v3386_v32 = vadd.f32 %v1406_v41, %v3007_v22  ;;  %v3389_v17 = vadd.f32 %v1407_v31, %v3011_v45 }
 0x28a   :  { %v1415_v23 = vld [vmem:[%s3841_s4 + $0x148] sm:$0xff]  ;;  %v1416_v34 = vld [vmem:[%s3841_s4 + $0x150] sm:$0xff]  ;;  %v1417_v63 = vld [vmem:[%s3841_s4 + $0x158] sm:$0xff] }
 0x28b   :  { %v1418_v3 = vld [vmem:[%s3841_s4 + $0x160] sm:$0xff]  ;;  %v1419_v50 = vld [vmem:[%s3841_s4 + $0x168] sm:$0xff]  ;;  %v1420_v19 = vld [vmem:[%s3841_s4 + $0x170] sm:$0xff] }
 0x28c   :  { %v1421_v60 = vld [vmem:[%s3841_s4 + $0x178] sm:$0xff]  ;;  %v1422_v0 = vld [vmem:[%s3841_s4 + $0x180] sm:$0xff]  ;;  %v1423_v62 = vld [vmem:[%s3841_s4 + $0x188] sm:$0xff] }
 0x28d   :  { %v1424_v59 = vld [vmem:[%s3841_s4 + $0x190] sm:$0xff]  ;;  %v1425_v24 = vld [vmem:[%s3841_s4 + $0x198] sm:$0xff]  ;;  %v4004_v26 = vld [vmem:[#allocation6_spill] sm:$0xff] }
 0x28e   :  { %v3392_v9 = vadd.f32 %v1408_v4, %v4004_v26  ;;  %v4006_v57 = vld [vmem:[#allocation7_spill] sm:$0xff]  ;;  %v1426_v43 = vld [vmem:[%s3841_s4 + $0x1a0] sm:$0xff]  ;;  %v1428_v22 = vld [vmem:[%s3841_s4 + $0x1b0] sm:$0xff] }
 0x28f   :  { %v3395_v36 = vadd.f32 %v1409_v8, %v4006_v57  ;;  %v1427_v47 = vld [vmem:[%s3841_s4 + $0x1a8] sm:$0xff]  ;;  %v4008_v45 = vld [vmem:[#allocation8_spill] sm:$0xff]  ;;  %v4010_v53 = vld [vmem:[#allocation9_spill] sm:$0xff] }
 0x290   :  { %4005 = vst [vmem:[#allocation6_spill] sm:$0xff] %v3392_v9  ;;  %v3407_v56 = vadd.f32 %v1410_v16, %v4008_v45  ;;  %v3410_v41 = vadd.f32 %v1411_v27, %v4010_v53  ;;  %v4012_v31 = vld [vmem:[#allocation10_spill] sm:$0xff]  ;;  %v4014_v8 = vld [vmem:[#allocation11_spill] sm:$0xff]  ;;  %v1429_v57 = vld [vmem:[%s3841_s4 + $0x1b8] sm:$0xff] }
 0x291   :  { %4007 = vst [vmem:[#allocation7_spill] sm:$0xff] %v3395_v36  ;;  %v3413_v4 = vadd.f32 %v1412_v18, %v4012_v31  ;;  %v3416_v26 = vadd.f32 %v1413_v37, %v4014_v8  ;;  %v1430_v36 = vld [vmem:[%s3841_s4 + $0x1c0] sm:$0xff]  ;;  %v1431_v16 = vld [vmem:[%s3841_s4 + $0x1c8] sm:$0xff]  ;;  %v4016_v27 = vld [vmem:[#allocation12_spill] sm:$0xff] }
 0x292   :  { %4009 = vst [vmem:[#allocation8_spill] sm:$0xff] %v3407_v56  ;;  %4011 = vst [vmem:[#allocation9_spill] sm:$0xff] %v3410_v41  ;;  %v3428_v45 = vadd.f32 %v1414_v11, %v4016_v27  ;;  %v4018_v18 = vld [vmem:[#allocation13_spill] sm:$0xff]  ;;  %v4020_v37 = vld [vmem:[#allocation14_spill] sm:$0xff] }
 0x293   :  { %4013 = vst [vmem:[#allocation10_spill] sm:$0xff] %v3413_v4  ;;  %4015 = vst [vmem:[#allocation11_spill] sm:$0xff] %v3416_v26  ;;  %v3431_v53 = vadd.f32 %v1415_v23, %v4018_v18  ;;  %v3434_v31 = vadd.f32 %v1416_v34, %v4020_v37  ;;  %v4022_v8 = vld [vmem:[#allocation15_spill] sm:$0xff]  ;;  %v1432_v4 = vld [vmem:[%s3841_s4 + $0x1d0] sm:$0xff] }
 0x294   :  { %4017 = vst [vmem:[#allocation12_spill] sm:$0xff] %v3428_v45  ;;  %v3437_v26 = vadd.f32 %v1417_v63, %v4022_v8  ;;  %v1433_v41 = vld [vmem:[%s3841_s4 + $0x1d8] sm:$0xff]  ;;  %v1434_v11 = vld [vmem:[%s3841_s4 + $0x1e0] sm:$0xff]  ;;  %v4028_v63 = vld [vmem:[#allocation16_spill] sm:$0xff] }
 0x295   :  { %4019 = vst [vmem:[#allocation13_spill] sm:$0xff] %v3431_v53  ;;  %4021 = vst [vmem:[#allocation14_spill] sm:$0xff] %v3434_v31  ;;  %v4024_v23 = vld [vmem:[#allocation17_spill] sm:$0xff]  ;;  %v3455_v37 = vadd.f32 %v1420_v19, %v4028_v63  ;;  %v4030_v8 = vld [vmem:[#allocation18_spill] sm:$0xff] }
 0x296   :  { %4023 = vst [vmem:[#allocation15_spill] sm:$0xff] %v3437_v26  ;;  %v3449_v27 = vadd.f32 %v1418_v3, %v4024_v23  ;;  %v4026_v34 = vld [vmem:[#allocation21_spill] sm:$0xff]  ;;  %v3458_v26 = vadd.f32 %v1421_v60, %v4030_v8  ;;  %v1435_v31 = vld [vmem:[%s3841_s4 + $0x1e8] sm:$0xff]  ;;  %v1436_v53 = vld [vmem:[%s3841_s4 + $0x1f0] sm:$0xff] }
 0x297   :  { %v3452_v18 = vadd.f32 %v1419_v50, %v4026_v34  ;;  %4029 = vst [vmem:[#allocation16_spill] sm:$0xff] %v3455_v37  ;;  %v1437_v3 = vld [vmem:[%s3841_s4 + $0x1f8] sm:$0xff]  ;;  %v4032_v50 = vld [vmem:[#allocation20_spill] sm:$0xff]  ;;  %v4034_v60 = vld [vmem:[#allocation27_spill] sm:$0xff] }
 0x298   :  { %4025 = vst [vmem:[#allocation17_spill] sm:$0xff] %v3449_v27  ;;  %4031 = vst [vmem:[#allocation18_spill] sm:$0xff] %v3458_v26  ;;  %v3470_v23 = vadd.f32 %v1422_v0, %v4032_v50  ;;  %v4033_v19 = vld [vmem:[#allocation25_spill] sm:$0xff]  ;;  %v3476_v63 = vadd.f32 %v1424_v59, %v4034_v60  ;;  %v4035_v8 = vld [vmem:[#allocation28_spill] sm:$0xff] }
 0x299   :  { %4027 = vst [vmem:[#allocation21_spill] sm:$0xff] %v3452_v18  ;;  %v3473_v34 = vadd.f32 %v1423_v62, %v4033_v19  ;;  %v3479_v26 = vadd.f32 %v1425_v24, %v4035_v8  ;;  %v4036_v37 = vld [vmem:[#allocation29_spill] sm:$0xff]  ;;  %v4037_v27 = vld [vmem:[#allocation19_spill] sm:$0xff]  ;;  %v4039_v0 = vld [vmem:[#allocation26_spill] sm:$0xff] }
 0x29a   :  { %v3482_v18 = vadd.f32 %v1426_v43, %v4036_v37  ;;  %v3485_v45 = vadd.f32 %v1427_v47, %v4037_v27  ;;  %v4038_v56 = vld [vmem:[#allocation23_spill] sm:$0xff]  ;;  %v3491_v50 = vadd.f32 %v1429_v57, %v4039_v0  ;;  %v4040_v62 = vld [vmem:[#allocation22_spill] sm:$0xff]  ;;  %v4041_v59 = vld [vmem:[#allocation24_spill] sm:$0xff] }
 0x29b   :  { %v3488_v9 = vadd.f32 %v1428_v22, %v4038_v56  ;;  %v3494_v19 = vadd.f32 %v1430_v36, %v4040_v62  ;;  %v3497_v60 = vadd.f32 %v1431_v16, %v4041_v59  ;;  %v4042_v24 = vld [vmem:[#allocation2_spill] sm:$0xff]  ;;  %v4043_v43 = vld [vmem:[#allocation3_spill] sm:$0xff]  ;;  %v4044_v47 = vld [vmem:[#allocation4_spill] sm:$0xff]  ;;  %v1502_v16 = vmax.f32 %v3206_v5, 0.0 }
 0x29c   :  { %v3500_v8 = vadd.f32 %v1432_v4, %v4042_v24  ;;  %v3503_v37 = vadd.f32 %v1433_v41, %v4043_v43  ;;  %v3506_v27 = vadd.f32 %v1434_v11, %v4044_v47  ;;  %v4045_v22 = vld [vmem:[#allocation5_spill] sm:$0xff]  ;;  %v4046_v57 = vld [vmem:[#allocation30_spill] sm:$0xff]  ;;  %v4047_v36 = vld [vmem:[#allocation31_spill] sm:$0xff]  ;;  %v1503_v4 = vmax.f32 %v3209_v61, 0.0 }
 0x29d   :  { %v3509_v56 = vadd.f32 %v1435_v31, %v4045_v22  ;;  %v3512_v0 = vadd.f32 %v1436_v53, %v4046_v57  ;;  %v3515_v62 = vadd.f32 %v1437_v3, %v4047_v36  ;;  %v1504_v59 = vmax.f32 %v3212_v6, 0.0  ;;  %1566 = vst.msk [vmem:[%s3842_s5] sm:$0xff] %vm445_vm0, %v1502_v16  ;;  %v4053_v47 = vld [vmem:[#allocation11_spill] sm:$0xff]  ;;  %v4054_v57 = vld [vmem:[#allocation12_spill] sm:$0xff]  ;;  %v4055_v16 = vld [vmem:[#allocation13_spill] sm:$0xff] }
 0x29e   :  { %v1505_v41 = vmax.f32 %v3215_v29, 0.0  ;;  %v1506_v11 = vmax.f32 %v3230_v33, 0.0  ;;  %v1507_v24 = vmax.f32 %v3233_v49, 0.0  ;;  %v1508_v31 = vmax.f32 %v3236_v35, 0.0  ;;  %1567 = vst.msk [vmem:[%s3842_s5 + $0x8] sm:$0xff] %vm445_vm0, %v1503_v4 }
 0x29f   :  { %v1509_v53 = vmax.f32 %v3239_v39, 0.0  ;;  %v1510_v43 = vmax.f32 %v3254_v20, 0.0  ;;  %v1511_v3 = vmax.f32 %v3257_v2, 0.0  ;;  %v1512_v5 = vmax.f32 %v3260_v15, 0.0  ;;  %1568 = vst.msk [vmem:[%s3842_s5 + $0x10] sm:$0xff] %vm445_vm0, %v1504_v59  ;;  %v4056_v59 = vld [vmem:[#allocation14_spill] sm:$0xff] }
 0x2a0   :  { %v1513_v61 = vmax.f32 %v3263_v55, 0.0  ;;  %1569 = vst.msk [vmem:[%s3842_s5 + $0x18] sm:$0xff] %vm445_vm0, %v1505_v41  ;;  %v1514_v29 = vmax.f32 %v3278_v10, 0.0  ;;  %v1515_v6 = vmax.f32 %v3281_v14, 0.0  ;;  %v1516_v33 = vmax.f32 %v3284_v13, 0.0  ;;  %1570 = vst.msk [vmem:[%s3842_s5 + $0x20] sm:$0xff] %vm445_vm0, %v1506_v11 }
 0x2a1   :  { %v1517_v49 = vmax.f32 %v3287_v7, 0.0  ;;  %1571 = vst.msk [vmem:[%s3842_s5 + $0x28] sm:$0xff] %vm445_vm0, %v1507_v24  ;;  %1572 = vst.msk [vmem:[%s3842_s5 + $0x30] sm:$0xff] %vm445_vm0, %v1508_v31  ;;  %v1518_v35 = vmax.f32 %v3302_v12, 0.0  ;;  %v1519_v39 = vmax.f32 %v3305_v28, 0.0  ;;  %v1520_v20 = vmax.f32 %v3308_v44, 0.0 }
 0x2a2   :  { %1573 = vst.msk [vmem:[%s3842_s5 + $0x38] sm:$0xff] %vm445_vm0, %v1509_v53  ;;  %v1521_v2 = vmax.f32 %v3311_v1, 0.0  ;;  %1574 = vst.msk [vmem:[%s3842_s5 + $0x40] sm:$0xff] %vm445_vm0, %v1510_v43  ;;  %v1522_v15 = vmax.f32 %v3323_v38, 0.0  ;;  %v1523_v55 = vmax.f32 %v3326_v42, 0.0  ;;  %v1524_v10 = vmax.f32 %v3329_v46, 0.0 }
 0x2a3   :  { %1575 = vst.msk [vmem:[%s3842_s5 + $0x48] sm:$0xff] %vm445_vm0, %v1511_v3  ;;  %1576 = vst.msk [vmem:[%s3842_s5 + $0x50] sm:$0xff] %vm445_vm0, %v1512_v5  ;;  %v1525_v14 = vmax.f32 %v3332_v51, 0.0  ;;  %v1526_v13 = vmax.f32 %v3344_v54, 0.0  ;;  %v1527_v7 = vmax.f32 %v3347_v58, 0.0  ;;  %v1528_v12 = vmax.f32 %v3350_v52, 0.0 }
 0x2a4   :  { %1577 = vst.msk [vmem:[%s3842_s5 + $0x58] sm:$0xff] %vm445_vm0, %v1513_v61  ;;  %1578 = vst.msk [vmem:[%s3842_s5 + $0x60] sm:$0xff] %vm445_vm0, %v1514_v29  ;;  %v1529_v28 = vmax.f32 %v3353_v48, 0.0  ;;  %v1530_v44 = vmax.f32 %v3365_v21, 0.0  ;;  %v1531_v1 = vmax.f32 %v3368_v25, 0.0  ;;  %v1532_v38 = vmax.f32 %v3371_v40, 0.0 }
 0x2a5   :  { %1579 = vst.msk [vmem:[%s3842_s5 + $0x68] sm:$0xff] %vm445_vm0, %v1515_v6  ;;  %1580 = vst.msk [vmem:[%s3842_s5 + $0x70] sm:$0xff] %vm445_vm0, %v1516_v33  ;;  %v1533_v42 = vmax.f32 %v3374_v30, 0.0  ;;  %v1534_v46 = vmax.f32 %v3386_v32, 0.0  ;;  %v1535_v51 = vmax.f32 %v3389_v17, 0.0  ;;  %v4048_v54 = vld [vmem:[#allocation6_spill] sm:$0xff] }
 0x2a6   :  { %1581 = vst.msk [vmem:[%s3842_s5 + $0x78] sm:$0xff] %vm445_vm0, %v1517_v49  ;;  %1582 = vst.msk [vmem:[%s3842_s5 + $0x80] sm:$0xff] %vm445_vm0, %v1518_v35  ;;  %v1536_v58 = vmax.f32 %v4048_v54, 0.0  ;;  %v4049_v52 = vld [vmem:[#allocation7_spill] sm:$0xff]  ;;  %v4050_v21 = vld [vmem:[#allocation8_spill] sm:$0xff]  ;;  %v1541_v22 = vmax.f32 %v4053_v47, 0.0 }
 0x2a7   :  { %1583 = vst.msk [vmem:[%s3842_s5 + $0x88] sm:$0xff] %vm445_vm0, %v1519_v39  ;;  %1584 = vst.msk [vmem:[%s3842_s5 + $0x90] sm:$0xff] %vm445_vm0, %v1520_v20  ;;  %v1537_v48 = vmax.f32 %v4049_v52, 0.0  ;;  %v1538_v25 = vmax.f32 %v4050_v21, 0.0  ;;  %v4051_v40 = vld [vmem:[#allocation9_spill] sm:$0xff]  ;;  %v4052_v32 = vld [vmem:[#allocation10_spill] sm:$0xff] }
 0x2a8   :  { %1585 = vst.msk [vmem:[%s3842_s5 + $0x98] sm:$0xff] %vm445_vm0, %v1521_v2  ;;  %1586 = vst.msk [vmem:[%s3842_s5 + $0xa0] sm:$0xff] %vm445_vm0, %v1522_v15  ;;  %v1539_v30 = vmax.f32 %v4051_v40, 0.0  ;;  %v1540_v17 = vmax.f32 %v4052_v32, 0.0  ;;  %v1542_v36 = vmax.f32 %v4054_v57, 0.0  ;;  %v1543_v4 = vmax.f32 %v4055_v16, 0.0 }
 0x2a9   :  { %1587 = vst.msk [vmem:[%s3842_s5 + $0xa8] sm:$0xff] %vm445_vm0, %v1523_v55  ;;  %1588 = vst.msk [vmem:[%s3842_s5 + $0xb0] sm:$0xff] %vm445_vm0, %v1524_v10  ;;  %v1544_v41 = vmax.f32 %v4056_v59, 0.0  ;;  %v4057_v11 = vld [vmem:[#allocation15_spill] sm:$0xff]  ;;  %v4058_v31 = vld [vmem:[#allocation17_spill] sm:$0xff]  ;;  %v1550_v33 = vmax.f32 %v3470_v23, 0.0 }
 0x2aa   :  { %1589 = vst.msk [vmem:[%s3842_s5 + $0xb8] sm:$0xff] %vm445_vm0, %v1525_v14  ;;  %1590 = vst.msk [vmem:[%s3842_s5 + $0xc0] sm:$0xff] %vm445_vm0, %v1526_v13  ;;  %v1545_v24 = vmax.f32 %v4057_v11, 0.0  ;;  %v1546_v53 = vmax.f32 %v4058_v31, 0.0  ;;  %v4059_v43 = vld [vmem:[#allocation21_spill] sm:$0xff]  ;;  %v4060_v5 = vld [vmem:[#allocation16_spill] sm:$0xff] }
 0x2ab   :  { %1591 = vst.msk [vmem:[%s3842_s5 + $0xc8] sm:$0xff] %vm445_vm0, %v1527_v7  ;;  %1592 = vst.msk [vmem:[%s3842_s5 + $0xd0] sm:$0xff] %vm445_vm0, %v1528_v12  ;;  %v1547_v3 = vmax.f32 %v4059_v43, 0.0  ;;  %v1548_v61 = vmax.f32 %v4060_v5, 0.0  ;;  %v4061_v29 = vld [vmem:[#allocation18_spill] sm:$0xff]  ;;  %v1551_v49 = vmax.f32 %v3473_v34, 0.0 }
 0x2ac   :  { %1593 = vst.msk [vmem:[%s3842_s5 + $0xd8] sm:$0xff] %vm445_vm0, %v1529_v28  ;;  %1594 = vst.msk [vmem:[%s3842_s5 + $0xe0] sm:$0xff] %vm445_vm0, %v1530_v44  ;;  %v1549_v6 = vmax.f32 %v4061_v29, 0.0  ;;  %v1552_v35 = vmax.f32 %v3476_v63, 0.0  ;;  %v1553_v39 = vmax.f32 %v3479_v26, 0.0  ;;  %v1554_v26 = vmax.f32 %v3482_v18, 0.0 }
 0x2ad   :  { %1595 = vst.msk [vmem:[%s3842_s5 + $0xe8] sm:$0xff] %vm445_vm0, %v1531_v1  ;;  %1596 = vst.msk [vmem:[%s3842_s5 + $0xf0] sm:$0xff] %vm445_vm0, %v1532_v38  ;;  %v1555_v23 = vmax.f32 %v3485_v45, 0.0  ;;  %v1556_v34 = vmax.f32 %v3488_v9, 0.0  ;;  %v1557_v63 = vmax.f32 %v3491_v50, 0.0  ;;  %v1558_v9 = vmax.f32 %v3494_v19, 0.0 }
 0x2ae   :  { %1597 = vst.msk [vmem:[%s3842_s5 + $0xf8] sm:$0xff] %vm445_vm0, %v1533_v42  ;;  %1598 = vst.msk [vmem:[%s3842_s5 + $0x100] sm:$0xff] %vm445_vm0, %v1534_v46  ;;  %v1559_v45 = vmax.f32 %v3497_v60, 0.0  ;;  %v1560_v18 = vmax.f32 %v3500_v8, 0.0  ;;  %v1561_v50 = vmax.f32 %v3503_v37, 0.0  ;;  %v1562_v19 = vmax.f32 %v3506_v27, 0.0 }
 0x2af   :  { %1599 = vst.msk [vmem:[%s3842_s5 + $0x108] sm:$0xff] %vm445_vm0, %v1535_v51  ;;  %1600 = vst.msk [vmem:[%s3842_s5 + $0x110] sm:$0xff] %vm445_vm0, %v1536_v58  ;;  %v1563_v60 = vmax.f32 %v3509_v56, 0.0  ;;  %v1564_v8 = vmax.f32 %v3512_v0, 0.0  ;;  %v1565_v37 = vmax.f32 %v3515_v62, 0.0 }
 0x2b0   :  { %1601 = vst.msk [vmem:[%s3842_s5 + $0x118] sm:$0xff] %vm445_vm0, %v1537_v48  ;;  %1602 = vst.msk [vmem:[%s3842_s5 + $0x120] sm:$0xff] %vm445_vm0, %v1538_v25 }
 0x2b1   :  { %1603 = vst.msk [vmem:[%s3842_s5 + $0x128] sm:$0xff] %vm445_vm0, %v1539_v30  ;;  %1604 = vst.msk [vmem:[%s3842_s5 + $0x130] sm:$0xff] %vm445_vm0, %v1540_v17 }
 0x2b2   :  { %1605 = vst.msk [vmem:[%s3842_s5 + $0x138] sm:$0xff] %vm445_vm0, %v1541_v22  ;;  %1606 = vst.msk [vmem:[%s3842_s5 + $0x140] sm:$0xff] %vm445_vm0, %v1542_v36 }
 0x2b3   :  { %1607 = vst.msk [vmem:[%s3842_s5 + $0x148] sm:$0xff] %vm445_vm0, %v1543_v4  ;;  %1608 = vst.msk [vmem:[%s3842_s5 + $0x150] sm:$0xff] %vm445_vm0, %v1544_v41 }
 0x2b4   :  { %1609 = vst.msk [vmem:[%s3842_s5 + $0x158] sm:$0xff] %vm445_vm0, %v1545_v24  ;;  %1610 = vst.msk [vmem:[%s3842_s5 + $0x160] sm:$0xff] %vm445_vm0, %v1546_v53 }
 0x2b5   :  { %1611 = vst.msk [vmem:[%s3842_s5 + $0x168] sm:$0xff] %vm445_vm0, %v1547_v3  ;;  %1612 = vst.msk [vmem:[%s3842_s5 + $0x170] sm:$0xff] %vm445_vm0, %v1548_v61 }
 0x2b6   :  { %1613 = vst.msk [vmem:[%s3842_s5 + $0x178] sm:$0xff] %vm445_vm0, %v1549_v6  ;;  %1614 = vst.msk [vmem:[%s3842_s5 + $0x180] sm:$0xff] %vm445_vm0, %v1550_v33 }
 0x2b7   :  { %1615 = vst.msk [vmem:[%s3842_s5 + $0x188] sm:$0xff] %vm445_vm0, %v1551_v49  ;;  %1616 = vst.msk [vmem:[%s3842_s5 + $0x190] sm:$0xff] %vm445_vm0, %v1552_v35 }
 0x2b8   :  { %1617 = vst.msk [vmem:[%s3842_s5 + $0x198] sm:$0xff] %vm445_vm0, %v1553_v39  ;;  %1618 = vst.msk [vmem:[%s3842_s5 + $0x1a0] sm:$0xff] %vm445_vm0, %v1554_v26 }
 0x2b9   :  { %1619 = vst.msk [vmem:[%s3842_s5 + $0x1a8] sm:$0xff] %vm445_vm0, %v1555_v23  ;;  %1620 = vst.msk [vmem:[%s3842_s5 + $0x1b0] sm:$0xff] %vm445_vm0, %v1556_v34 }
 0x2ba   :  { %1621 = vst.msk [vmem:[%s3842_s5 + $0x1b8] sm:$0xff] %vm445_vm0, %v1557_v63  ;;  %1622 = vst.msk [vmem:[%s3842_s5 + $0x1c0] sm:$0xff] %vm445_vm0, %v1558_v9 }
 0x2bb   :  { %1623 = vst.msk [vmem:[%s3842_s5 + $0x1c8] sm:$0xff] %vm445_vm0, %v1559_v45  ;;  %1624 = vst.msk [vmem:[%s3842_s5 + $0x1d0] sm:$0xff] %vm445_vm0, %v1560_v18 }
 0x2bc   :  { %1625 = vst.msk [vmem:[%s3842_s5 + $0x1d8] sm:$0xff] %vm445_vm0, %v1561_v50  ;;  %1626 = vst.msk [vmem:[%s3842_s5 + $0x1e0] sm:$0xff] %vm445_vm0, %v1562_v19 }
 0x2bd   :  { %1627 = vst.msk [vmem:[%s3842_s5 + $0x1e8] sm:$0xff] %vm445_vm0, %v1563_v60  ;;  %1628 = vst.msk [vmem:[%s3842_s5 + $0x1f0] sm:$0xff] %vm445_vm0, %v1564_v8 }
 0x2be   :  { %1629 = vst.msk [vmem:[%s3842_s5 + $0x1f8] sm:$0xff] %vm445_vm0, %v1565_v37 }

// kernel: resnet_forward.12
= control target key start
LH: loop header
LB: loop body
LE: loop exit
PB: predicated region body
PF: predicated region fallthrough
CT: control target
= control target key end

     0   :  { %v583_v0 = vmov 0   ;;  %vm178_vm0 = vcmask 130048   ;;  %vm300_vm1 = vcmask 261120   ;;  %s893_s1 = inlined_call_operand.vmem [shape: bf16[144,32], index: 1, kind: input, shape index: {}]   ;;  %s894_s0 = inlined_call_operand.vmem [shape: bf16[128,144], index: 0, kind: input, shape index: {}]   ;;  %s895_s2 = inlined_call_operand.vmem [shape: f32[1,32], index: 2, kind: input, shape index: {}]   ;;  %s896_s3 = inlined_call_operand.vmem [shape: f32[1,32], index: 3, kind: input, shape index: {}]   ;;  %s897_s4 = inlined_call_operand.vmem [shape: f32[128,32], index: 4, kind: output, shape index: {}]  }
   0x1   :  { %203 = vmatprep.subr.bf16.mxu0 %v583_v0  ;;  %v548_v1 = vld [vmem:[%s893_s1 + $0x38] sm:$0xff]   ;;  %529 = vmatprep.subr.bf16.mxu1 %v583_v0  ;;  %v549_v2 = vld [vmem:[%s893_s1 + $0x30] sm:$0xff]   ;;  %v550_v3 = vld [vmem:[%s893_s1 + $0x28] sm:$0xff]  }
   0x2   :  { %204 = vmatpush1.bf16.msra.mxu0 %v548_v1  ;;  %538 = vmatpush1.bf16.msra.mxu1 %v548_v1  ;;  %v551_v4 = vld [vmem:[%s893_s1 + $0x20] sm:$0xff]   ;;  %v552_v7 = vld [vmem:[%s893_s1 + $0x18] sm:$0xff]   ;;  %v553_v8 = vld [vmem:[%s893_s1 + $0x10] sm:$0xff]  }
   0x3   :  { %205 = vmatprep.subr.bf16.mxu0 %v583_v0  ;;  %530 = vmatprep.subr.bf16.mxu1 %v583_v0  ;;  %v559_v5 = vld [vmem:[%s894_s0 + $0x4] ss:$8 sps:$4 sm:$0xff]   ;;  %v557_v12 = vld [vmem:[%s894_s0] ss:$8 sps:$4 sm:$0xff]   ;;  %v560_v14 = vld [vmem:[%s894_s0 + $0x14] ss:$8 sps:$4 sm:$0xff]  }
   0x4   :  { %521 = vmatprep.mubr.msk.bf16.mxu0 %vm178_vm0, %v559_v5  ;;  %v565_v6 = vld [vmem:[%s894_s0 + $0x44] ss:$8 sps:$4 sm:$0xff]   ;;  %v563_v13 = vld [vmem:[%s894_s0 + $0x40] ss:$8 sps:$4 sm:$0xff]   ;;  %v569_v15 = vld [vmem:[%s894_s0 + $0x54] ss:$8 sps:$4 sm:$0xff]  }
   0x5   :  { %525 = vmatprep.mubr.msk.bf16.mxu1 %vm178_vm0, %v565_v6  ;;  %v554_v9 = vld [vmem:[%s893_s1 + $0x8] sm:$0xff]   ;;  %v555_v10 = vld [vmem:[%s893_s1] sm:$0xff]   ;;  %v562_v16 = vld [vmem:[%s894_s0 + $0x10] ss:$8 sps:$4 sm:$0xff]  }
   0x6   :  { %206 = vmatpush1.bf16.msra.mxu0 %v549_v2  ;;  %539 = vmatpush1.bf16.msra.mxu1 %v549_v2  ;;  %v556_v11 = vld [vmem:[%s893_s1 + $0x40] sm:$0xff]   ;;  %v571_v17 = vld [vmem:[%s894_s0 + $0x50] ss:$8 sps:$4 sm:$0xff]   ;;  %v572_v22 = vld [vmem:[%s894_s0 + $0x34] ss:$8 sps:$4 sm:$0xff]  }
   0x7   :  { %207 = vmatprep.subr.bf16.mxu0 %v583_v0  ;;  %531 = vmatprep.subr.bf16.mxu1 %v583_v0  ;;  %v566_v18 = vld [vmem:[%s894_s0 + $0x24] ss:$8 sps:$4 sm:$0xff]   ;;  %v568_v20 = vld [vmem:[%s894_s0 + $0x20] ss:$8 sps:$4 sm:$0xff]   ;;  %v578_v23 = vld [vmem:[%s894_s0 + $0x74] ss:$8 sps:$4 sm:$0xff]  }
   0x8   :  { %v575_v19 = vld [vmem:[%s894_s0 + $0x64] ss:$8 sps:$4 sm:$0xff]   ;;  %v577_v21 = vld [vmem:[%s894_s0 + $0x60] ss:$8 sps:$4 sm:$0xff]   ;;  %v574_v24 = vld [vmem:[%s894_s0 + $0x30] ss:$8 sps:$4 sm:$0xff]  }
   0x9   :  { %v580_v25 = vld [vmem:[%s894_s0 + $0x70] ss:$8 sps:$4 sm:$0xff]  }
   0xa   :  { %208 = vmatpush1.bf16.msra.mxu0 %v550_v3  ;;  %540 = vmatpush1.bf16.msra.mxu1 %v550_v3 }
   0xb   :  { %209 = vmatprep.subr.bf16.mxu0 %v583_v0  ;;  %532 = vmatprep.subr.bf16.mxu1 %v583_v0 }
   0xe   :  { %210 = vmatpush1.bf16.msra.mxu0 %v551_v4  ;;  %541 = vmatpush1.bf16.msra.mxu1 %v551_v4 }
   0xf   :  { %211 = vmatprep.subr.bf16.mxu0 %v583_v0  ;;  %533 = vmatprep.subr.bf16.mxu1 %v583_v0 }
  0x12   :  { %212 = vmatpush1.bf16.msra.mxu0 %v552_v7  ;;  %542 = vmatpush1.bf16.msra.mxu1 %v552_v7 }
  0x13   :  { %213 = vmatprep.subr.bf16.mxu0 %v583_v0  ;;  %534 = vmatprep.subr.bf16.mxu1 %v583_v0 }
  0x16   :  { %214 = vmatpush1.bf16.msra.mxu0 %v553_v8  ;;  %543 = vmatpush1.bf16.msra.mxu1 %v553_v8 }
  0x17   :  { %215 = vmatprep.subr.bf16.mxu0 %v583_v0  ;;  %535 = vmatprep.subr.bf16.mxu1 %v583_v0 }
  0x1a   :  { %216 = vmatpush1.bf16.msra.mxu0 %v554_v9  ;;  %544 = vmatpush1.bf16.msra.mxu1 %v554_v9 }
  0x1b   :  { %217 = vmatprep.subr.bf16.mxu0 %v583_v0  ;;  %536 = vmatprep.subr.bf16.mxu1 %v583_v0 }
  0x1e   :  { %218 = vmatpush1.bf16.msra.mxu0 %v555_v10  ;;  %545 = vmatpush1.bf16.msra.mxu1 %v555_v10 }
  0x1f   :  { %233 = vmatprep.subr.bf16.mxu0 %v583_v0  ;;  %537 = vmatprep.subr.bf16.mxu1 %v583_v0 }
  0x22   :  { %234 = vmatpush2.bf16.msra.mxu0 %v556_v11  ;;  %546 = vmatpush2.bf16.msra.mxu1 %v556_v11 }
  0x25   :  { %236 = vmatmul.mubr.bf16.vlgmr.msra.gmra.mxu0 %v557_v12  ;;  %268 = vmatmul.mubr.bf16.vlgmr.msra.gmra.mxu1 %v563_v13 }
  0x26   :  { %522 = vmatprep.mubr.msk.bf16.mxu0 %vm178_vm0, %v560_v14  ;;  %526 = vmatprep.mubr.msk.bf16.mxu1 %vm178_vm0, %v569_v15 }
  0x2d   :  { %244 = vmatmul.mubr.bf16.gmra.mxu0 %v562_v16  ;;  %276 = vmatmul.mubr.bf16.gmra.mxu1 %v571_v17 }
  0x2e   :  { %523 = vmatprep.mubr.msk.bf16.mxu0 %vm178_vm0, %v566_v18  ;;  %527 = vmatprep.mubr.msk.bf16.mxu1 %vm178_vm0, %v575_v19 }
  0x35   :  { %252 = vmatmul.mubr.bf16.gmra.mxu0 %v568_v20  ;;  %284 = vmatmul.mubr.bf16.gmra.mxu1 %v577_v21 }
  0x36   :  { %524 = vmatprep.mubr.msk.bf16.mxu0 %vm178_vm0, %v572_v22  ;;  %528 = vmatprep.mubr.msk.bf16.mxu1 %vm178_vm0, %v578_v23 }
  0x3d   :  { %260 = vmatmul.mubr.bf16.gmra.mxu0 %v574_v24  ;;  %292 = vmatmul.mubr.bf16.gmra.mxu1 %v580_v25 }
  0xe5   :  { %v692_v26 = vpop.f32.mrf.mxu0  ;;  %v694_v27 = vpop.f32.mrf.mxu1 }
  0xe6   :  { %v301_v45 = vsel %vm300_vm1, %v692_v26, 0.0  ;;  %v316_v9 = vsel %vm300_vm1, %v694_v27, 0.0 }
  0xe7   :  { %v239_v28 = vpop.f32.mrf.mxu0  ;;  %v271_v29 = vpop.f32.mrf.mxu1 }
  0xe9   :  { %v696_v30 = vpop.f32.mrf.mxu0  ;;  %v698_v31 = vpop.f32.mrf.mxu1 }
  0xea   :  { %v302_v42 = vsel %vm300_vm1, %v696_v30, 0.0  ;;  %v318_v11 = vsel %vm300_vm1, %v698_v31, 0.0 }
  0xeb   :  { %v242_v32 = vpop.f32.mrf.mxu0  ;;  %v274_v33 = vpop.f32.mrf.mxu1  ;;  %v303_v47 = vadd.f32 %v302_v42, %v301_v45 }
  0xed   :  { %v700_v34 = vpop.f32.mrf.mxu0  ;;  %v702_v35 = vpop.f32.mrf.mxu1 }
  0xee   :  { %v304_v46 = vsel %vm300_vm1, %v700_v34, 0.0  ;;  %v320_v13 = vsel %vm300_vm1, %v702_v35, 0.0 }
  0xef   :  { %v247_v36 = vpop.f32.mrf.mxu0  ;;  %v279_v37 = vpop.f32.mrf.mxu1  ;;  %v305_v51 = vadd.f32 %v304_v46, %v303_v47 }
  0xf1   :  { %v704_v38 = vpop.f32.mrf.mxu0  ;;  %v706_v39 = vpop.f32.mrf.mxu1 }
  0xf2   :  { %v306_v50 = vsel %vm300_vm1, %v704_v38, 0.0  ;;  %v322_v15 = vsel %vm300_vm1, %v706_v39, 0.0 }
  0xf3   :  { %v250_v40 = vpop.f32.mrf.mxu0  ;;  %v282_v41 = vpop.f32.mrf.mxu1  ;;  %v307_v55 = vadd.f32 %v306_v50, %v305_v51 }
  0xf5   :  { %v710_v43 = vpop.f32.mrf.mxu0  ;;  %v712_v44 = vpop.f32.mrf.mxu1 }
  0xf6   :  { %v308_v54 = vsel %vm300_vm1, %v710_v43, 0.0  ;;  %v324_v17 = vsel %vm300_vm1, %v712_v44, 0.0 }
  0xf7   :  { %v255_v48 = vpop.f32.mrf.mxu0  ;;  %v287_v49 = vpop.f32.mrf.mxu1  ;;  %v309_v59 = vadd.f32 %v308_v54, %v307_v55 }
  0xf9   :  { %v720_v52 = vpop.f32.mrf.mxu0  ;;  %v722_v53 = vpop.f32.mrf.mxu1 }
  0xfa   :  { %v310_v58 = vsel %vm300_vm1, %v720_v52, 0.0  ;;  %v326_v19 = vsel %vm300_vm1, %v722_v53, 0.0 }
  0xfb   :  { %v258_v56 = vpop.f32.mrf.mxu0  ;;  %v290_v57 = vpop.f32.mrf.mxu1  ;;  %v311_v63 = vadd.f32 %v310_v58, %v309_v59 }
  0xfd   :  { %v728_v60 = vpop.f32.mrf.mxu0  ;;  %v730_v61 = vpop.f32.mrf.mxu1 }
  0xfe   :  { %v312_v62 = vsel %vm300_vm1, %v728_v60, 0.0  ;;  %v328_v21 = vsel %vm300_vm1, %v730_v61, 0.0 }
  0xff   :  { %v263_v0 = vpop.f32.mrf.mxu0  ;;  %v295_v1 = vpop.f32.mrf.mxu1  ;;  %v313_v2 = vadd.f32 %v312_v62, %v311_v63 }
 0x101   :  { %v734_v3 = vpop.f32.mrf.mxu0  ;;  %v736_v4 = vpop.f32.mrf.mxu1 }
 0x102   :  { %v314_v5 = vsel %vm300_vm1, %v734_v3, 0.0  ;;  %v330_v23 = vsel %vm300_vm1, %v736_v4, 0.0 }
 0x103   :  { %v315_v6 = vadd.f32 %v314_v5, %v313_v2  ;;  %v266_v7 = vpop.f32.mrf.mxu0  ;;  %v298_v8 = vpop.f32.mrf.mxu1 }
 0x105   :  { %v317_v10 = vadd.f32 %v316_v9, %v315_v6 }
 0x107   :  { %v319_v12 = vadd.f32 %v318_v11, %v317_v10 }
 0x109   :  { %v321_v14 = vadd.f32 %v320_v13, %v319_v12 }
 0x10b   :  { %v323_v16 = vadd.f32 %v322_v15, %v321_v14 }
 0x10d   :  { %v325_v18 = vadd.f32 %v324_v17, %v323_v16 }
 0x10f   :  { %v327_v20 = vadd.f32 %v326_v19, %v325_v18 }
 0x111   :  { %v329_v22 = vadd.f32 %v328_v21, %v327_v20 }
 0x113   :  { %v331_v24 = vadd.f32 %v330_v23, %v329_v22 }
 0x115   :  { %v332_v25 = vrot.slane %v331_v24, 4 }
 0x117   :  { %v333_v28 = vadd.f32 %v332_v25, %v331_v24 }
 0x119   :  { %v334_v29 = vrot.slane %v333_v28, 2 }
 0x11b   :  { %v335_v32 = vadd.f32 %v334_v29, %v333_v28 }
 0x11d   :  { %v336_v33 = vrot.slane %v335_v32, 1 }
 0x11f   :  { %v337_v36 = vadd.f32 %v336_v33, %v335_v32 }
 0x121   :  { %v756_v37 = vmul.f32 0.0078125, %v337_v36 }
 0x123   :  { %v339_v40 = vsub.f32 %v692_v26, %v756_v37  ;;  %v340_v41 = vsub.f32 %v696_v30, %v756_v37  ;;  %v341_v42 = vsub.f32 %v700_v34, %v756_v37  ;;  %v342_v45 = vsub.f32 %v704_v38, %v756_v37 }
 0x124   :  { %v343_v48 = vsub.f32 %v710_v43, %v756_v37  ;;  %v344_v50 = vsub.f32 %v720_v52, %v756_v37  ;;  %v345_v57 = vsub.f32 %v728_v60, %v756_v37  ;;  %v346_v63 = vsub.f32 %v734_v3, %v756_v37 }
 0x125   :  { %v355_v46 = vmul.f32 %v339_v40, %v339_v40  ;;  %v356_v47 = vmul.f32 %v340_v41, %v340_v41  ;;  %v357_v49 = vmul.f32 %v341_v42, %v341_v42  ;;  %v358_v51 = vmul.f32 %v342_v45, %v342_v45 }
 0x126   :  { %v359_v58 = vmul.f32 %v343_v48, %v343_v48  ;;  %v360_v0 = vmul.f32 %v344_v50, %v344_v50  ;;  %v347_v5 = vsub.f32 %v694_v27, %v756_v37  ;;  %v361_v6 = vmul.f32 %v345_v57, %v345_v57 }
 0x127   :  { %v371_v54 = vsel %vm300_vm1, %v355_v46, 0.0  ;;  %v372_v55 = vsel %vm300_vm1, %v356_v47, 0.0  ;;  %v374_v59 = vsel %vm300_vm1, %v357_v49, 0.0  ;;  %v376_v1 = vsel %vm300_vm1, %v358_v51, 0.0 }
 0x128   :  { %v373_v56 = vadd.f32 %v372_v55, %v371_v54  ;;  %v378_v7 = vsel %vm300_vm1, %v359_v58, 0.0  ;;  %v348_v9 = vsub.f32 %v698_v31, %v756_v37  ;;  %v362_v10 = vmul.f32 %v346_v63, %v346_v63 }
 0x129   :  { %v380_v11 = vsel %vm300_vm1, %v360_v0, 0.0  ;;  %v349_v13 = vsub.f32 %v702_v35, %v756_v37  ;;  %v363_v14 = vmul.f32 %v347_v5, %v347_v5  ;;  %v382_v15 = vsel %vm300_vm1, %v361_v6, 0.0 }
 0x12a   :  { %v375_v62 = vadd.f32 %v374_v59, %v373_v56  ;;  %v350_v17 = vsub.f32 %v706_v39, %v756_v37  ;;  %v364_v18 = vmul.f32 %v348_v9, %v348_v9  ;;  %v384_v19 = vsel %vm300_vm1, %v362_v10, 0.0  ;;  %v409_v10 = vld [vmem:[%s895_s2] sm:$0x1] }
 0x12b   :  { %v351_v21 = vsub.f32 %v712_v44, %v756_v37  ;;  %v365_v22 = vmul.f32 %v349_v13, %v349_v13  ;;  %v386_v23 = vsel %vm300_vm1, %v363_v14, 0.0  ;;  %v352_v25 = vsub.f32 %v722_v53, %v756_v37  ;;  %v413_v14 = vld [vmem:[%s896_s3] sm:$0x1] }
 0x12c   :  { %v377_v2 = vadd.f32 %v376_v1, %v375_v62  ;;  %v366_v28 = vmul.f32 %v350_v17, %v350_v17  ;;  %v388_v29 = vsel %vm300_vm1, %v364_v18, 0.0  ;;  %v353_v33 = vsub.f32 %v730_v61, %v756_v37 }
 0x12d   :  { %v367_v36 = vmul.f32 %v351_v21, %v351_v21  ;;  %v390_v40 = vsel %vm300_vm1, %v365_v22, 0.0  ;;  %v354_v42 = vsub.f32 %v736_v4, %v756_v37  ;;  %v368_v45 = vmul.f32 %v352_v25, %v352_v25 }
 0x12e   :  { %v379_v8 = vadd.f32 %v378_v7, %v377_v2  ;;  %v392_v46 = vsel %vm300_vm1, %v366_v28, 0.0  ;;  %v369_v48 = vmul.f32 %v353_v33, %v353_v33 }
 0x12f   :  { %v394_v49 = vsel %vm300_vm1, %v367_v36, 0.0  ;;  %v370_v51 = vmul.f32 %v354_v42, %v354_v42  ;;  %v396_v54 = vsel %vm300_vm1, %v368_v45, 0.0 }
 0x130   :  { %v381_v12 = vadd.f32 %v380_v11, %v379_v8  ;;  %v398_v56 = vsel %vm300_vm1, %v369_v48, 0.0  ;;  %v417_v8 = vlaneseq }
 0x131   :  { %v400_v58 = vsel %vm300_vm1, %v370_v51, 0.0 }
 0x132   :  { %v383_v16 = vadd.f32 %v382_v15, %v381_v12  ;;  %v418_v9 = vshrl.u32 %v417_v8, 7 }
 0x134   :  { %v385_v20 = vadd.f32 %v384_v19, %v383_v16  ;;  %v419_v11 = vsub.s32 0, %v418_v9 }
 0x136   :  { %v387_v24 = vadd.f32 %v386_v23, %v385_v20 }
 0x138   :  { %v389_v32 = vadd.f32 %v388_v29, %v387_v24 }
 0x13a   :  { %v391_v41 = vadd.f32 %v390_v40, %v389_v32 }
 0x13c   :  { %v393_v47 = vadd.f32 %v392_v46, %v391_v41 }
 0x13e   :  { %v395_v50 = vadd.f32 %v394_v49, %v393_v47 }
 0x140   :  { %v397_v55 = vadd.f32 %v396_v54, %v395_v50 }
 0x142   :  { %v399_v57 = vadd.f32 %v398_v56, %v397_v55 }
 0x144   :  { %v401_v59 = vadd.f32 %v400_v58, %v399_v57 }
 0x146   :  { %v402_v62 = vrot.slane %v401_v59, 4 }
 0x148   :  { %v403_v63 = vadd.f32 %v402_v62, %v401_v59 }
 0x14a   :  { %v404_v0 = vrot.slane %v403_v63, 2 }
 0x14c   :  { %v405_v1 = vadd.f32 %v404_v0, %v403_v63 }
 0x14e   :  { %v406_v2 = vrot.slane %v405_v1, 1 }
 0x150   :  { %v407_v5 = vadd.f32 %v406_v2, %v405_v1 }
 0x152   :  { %v408_v6 = vmul.f32 0.0078125, %v407_v5 }
 0x154   :  { %v410_v7 = vadd.f32 1e-05, %v408_v6 }
 0x156   :  { %581 = vrsqrt.f32 %v410_v7 }
 0x163   :  { %v582_v12 = vpop.eup %581 }
 0x164   :  { %v412_v13 = vmul.f32 %v582_v12, %v409_v10 }
 0x166   :  { %v414_v15 = vmul.f32 %v412_v13, %v756_v37  ;;  %v420_v16 = vrot.slane %v412_v13, %v419_v11 }
 0x168   :  { %v415_v17 = vsub.f32 %v413_v14, %v414_v15  ;;  %v422_v18 = vmul.f32 %v420_v16, %v692_v26  ;;  %v423_v19 = vmul.f32 %v420_v16, %v696_v30  ;;  %v424_v20 = vmul.f32 %v420_v16, %v700_v34 }
 0x169   :  { %v425_v21 = vmul.f32 %v420_v16, %v704_v38  ;;  %v426_v22 = vmul.f32 %v420_v16, %v710_v43  ;;  %v427_v23 = vmul.f32 %v420_v16, %v720_v52  ;;  %v428_v24 = vmul.f32 %v420_v16, %v728_v60 }
 0x16a   :  { %v429_v25 = vmul.f32 %v420_v16, %v734_v3  ;;  %v430_v37 = vmul.f32 %v420_v16, %v694_v27  ;;  %v431_v28 = vmul.f32 %v420_v16, %v698_v31  ;;  %v432_v26 = vmul.f32 %v420_v16, %v702_v35 }
 0x16b   :  { %v433_v30 = vmul.f32 %v420_v16, %v706_v39  ;;  %v442_v29 = vrot.slane %v415_v17, %v419_v11  ;;  %v434_v34 = vmul.f32 %v420_v16, %v712_v44  ;;  %v435_v38 = vmul.f32 %v420_v16, %v722_v53 }
 0x16c   :  { %v436_v43 = vmul.f32 %v420_v16, %v730_v61  ;;  %v437_v52 = vmul.f32 %v420_v16, %v736_v4 }
 0x16d   :  { %v444_v60 = vadd.f32 %v442_v29, %v422_v18  ;;  %v445_v32 = vadd.f32 %v442_v29, %v423_v19  ;;  %v446_v3 = vadd.f32 %v442_v29, %v424_v20  ;;  %v447_v33 = vadd.f32 %v442_v29, %v425_v21 }
 0x16e   :  { %v448_v27 = vadd.f32 %v442_v29, %v426_v22  ;;  %v449_v36 = vadd.f32 %v442_v29, %v427_v23  ;;  %v450_v31 = vadd.f32 %v442_v29, %v428_v24  ;;  %v451_v40 = vadd.f32 %v442_v29, %v429_v25 }
 0x16f   :  { %v452_v35 = vadd.f32 %v442_v29, %v430_v37  ;;  %v453_v41 = vadd.f32 %v442_v29, %v431_v28  ;;  %v454_v39 = vadd.f32 %v442_v29, %v432_v26  ;;  %v455_v42 = vadd.f32 %v442_v29, %v433_v30 }
 0x170   :  { %v456_v45 = vadd.f32 %v442_v29, %v434_v34  ;;  %v457_v44 = vadd.f32 %v442_v29, %v435_v38  ;;  %v458_v46 = vadd.f32 %v442_v29, %v436_v43  ;;  %v459_v53 = vadd.f32 %v442_v29, %v437_v52 }
 0x171   :  { %v460_v47 = vmax.f32 %v444_v60, 0.0  ;;  %v461_v61 = vmax.f32 %v445_v32, 0.0  ;;  %v462_v48 = vmax.f32 %v446_v3, 0.0  ;;  %v463_v4 = vmax.f32 %v447_v33, 0.0 }
 0x172   :  { %v464_v49 = vmax.f32 %v448_v27, 0.0  ;;  %v465_v50 = vmax.f32 %v449_v36, 0.0  ;;  %v466_v51 = vmax.f32 %v450_v31, 0.0  ;;  %v467_v54 = vmax.f32 %v451_v40, 0.0 }
 0x173   :  { %v468_v55 = vmax.f32 %v452_v35, 0.0  ;;  %v469_v56 = vmax.f32 %v453_v41, 0.0  ;;  %v470_v57 = vmax.f32 %v454_v39, 0.0  ;;  %v471_v58 = vmax.f32 %v455_v42, 0.0  ;;  %476 = vst.msk [vmem:[%s897_s4] sm:$0xff] %vm300_vm1, %v460_v47  ;;  %477 = vst.msk [vmem:[%s897_s4 + $0x8] sm:$0xff] %vm300_vm1, %v461_v61 }
 0x174   :  { %478 = vst.msk [vmem:[%s897_s4 + $0x10] sm:$0xff] %vm300_vm1, %v462_v48  ;;  %479 = vst.msk [vmem:[%s897_s4 + $0x18] sm:$0xff] %vm300_vm1, %v463_v4  ;;  %v472_v59 = vmax.f32 %v456_v45, 0.0  ;;  %v473_v62 = vmax.f32 %v457_v44, 0.0  ;;  %v474_v63 = vmax.f32 %v458_v46, 0.0  ;;  %v475_v0 = vmax.f32 %v459_v53, 0.0 }
 0x175   :  { %480 = vst.msk [vmem:[%s897_s4 + $0x20] sm:$0xff] %vm300_vm1, %v464_v49  ;;  %481 = vst.msk [vmem:[%s897_s4 + $0x28] sm:$0xff] %vm300_vm1, %v465_v50 }
 0x176   :  { %482 = vst.msk [vmem:[%s897_s4 + $0x30] sm:$0xff] %vm300_vm1, %v466_v51  ;;  %483 = vst.msk [vmem:[%s897_s4 + $0x38] sm:$0xff] %vm300_vm1, %v467_v54 }
 0x177   :  { %484 = vst.msk [vmem:[%s897_s4 + $0x40] sm:$0xff] %vm300_vm1, %v468_v55  ;;  %485 = vst.msk [vmem:[%s897_s4 + $0x48] sm:$0xff] %vm300_vm1, %v469_v56 }
 0x178   :  { %486 = vst.msk [vmem:[%s897_s4 + $0x50] sm:$0xff] %vm300_vm1, %v470_v57  ;;  %487 = vst.msk [vmem:[%s897_s4 + $0x58] sm:$0xff] %vm300_vm1, %v471_v58 }
 0x179   :  { %488 = vst.msk [vmem:[%s897_s4 + $0x60] sm:$0xff] %vm300_vm1, %v472_v59  ;;  %489 = vst.msk [vmem:[%s897_s4 + $0x68] sm:$0xff] %vm300_vm1, %v473_v62 }
 0x17a   :  { %490 = vst.msk [vmem:[%s897_s4 + $0x70] sm:$0xff] %vm300_vm1, %v474_v63  ;;  %491 = vst.msk [vmem:[%s897_s4 + $0x78] sm:$0xff] %vm300_vm1, %v475_v0 }

// kernel: resnet_forward.13
= control target key start
LH: loop header
LB: loop body
LE: loop exit
PB: predicated region body
PF: predicated region fallthrough
CT: control target
= control target key end

     0   :  { %vm82_vm0 = vcmask 130048   ;;  %vm204_vm1 = vcmask 261120   ;;  %s702_s1 = inlined_call_operand.vmem [shape: bf16[16,32], index: 1, kind: input, shape index: {}]   ;;  %s703_s0 = inlined_call_operand.vmem [shape: bf16[128,16], index: 0, kind: input, shape index: {}]   ;;  %s704_s2 = inlined_call_operand.vmem [shape: f32[1,32], index: 2, kind: input, shape index: {}]   ;;  %s705_s3 = inlined_call_operand.vmem [shape: f32[1,32], index: 3, kind: input, shape index: {}]   ;;  %s706_s4 = inlined_call_operand.vmem [shape: f32[128,32], index: 4, kind: output, shape index: {}]  }
   0x1   :  { %v430_v0 = vld [vmem:[%s702_s1] sm:$0xff]   ;;  %v432_v2 = vld [vmem:[%s703_s0 + $0x8] sm:$0xff]   ;;  %v433_v3 = vld [vmem:[%s703_s0 + $0x10] sm:$0xff]  }
   0x2   :  { %v431_v1 = vld [vmem:[%s703_s0] sm:$0xff]   ;;  %410 = vmatprep.subr.bf16.mxu0 %v430_v0  ;;  %428 = vmatprep.subr.bf16.mxu1 %v430_v0  ;;  %v436_v5 = vld [vmem:[%s703_s0 + $0x28] sm:$0xff]   ;;  %v437_v6 = vld [vmem:[%s703_s0 + $0x30] sm:$0xff]  }
   0x3   :  { %411 = vmatpush3.bf16.msra.mxu0 %v430_v0  ;;  %412 = vmatprep.mubr.msk.bf16.mxu0 %vm82_vm0, %v431_v1  ;;  %v435_v4 = vld [vmem:[%s703_s0 + $0x20] sm:$0xff]   ;;  %v434_v7 = vld [vmem:[%s703_s0 + $0x18] sm:$0xff]  }
   0x4   :  { %429 = vmatpush3.bf16.msra.mxu1 %v430_v0  ;;  %420 = vmatprep.mubr.msk.bf16.mxu1 %vm82_vm0, %v435_v4  ;;  %v438_v8 = vld [vmem:[%s703_s0 + $0x38] sm:$0xff]  }
   0x6   :  { %413 = vmatmul.mubr.msk.bf16.vlgmr.msra.gmra.mxu0 %vm82_vm0, %v432_v2 }
   0x7   :  { %416 = vmatprep.mubr.msk.bf16.mxu0 %vm82_vm0, %v433_v3  ;;  %421 = vmatmul.mubr.msk.bf16.vlgmr.msra.gmra.mxu1 %vm82_vm0, %v436_v5 }
   0x8   :  { %424 = vmatprep.mubr.msk.bf16.mxu1 %vm82_vm0, %v437_v6 }
   0xe   :  { %417 = vmatmul.mubr.msk.bf16.gmra.mxu0 %vm82_vm0, %v434_v7 }
   0xf   :  { %425 = vmatmul.mubr.msk.bf16.gmra.mxu1 %vm82_vm0, %v438_v8 }
  0xc6   :  { %v501_v9 = vpop.f32.mrf.mxu0 }
  0xc7   :  { %v505_v11 = vpop.f32.mrf.mxu1  ;;  %v208_v20 = vsel %vm204_vm1, %v501_v9, 0.0 }
  0xc8   :  { %v503_v10 = vpop.f32.mrf.mxu0  ;;  %v224_v43 = vsel %vm204_vm1, %v505_v11, 0.0 }
  0xc9   :  { %v509_v13 = vpop.f32.mrf.mxu1  ;;  %v205_v15 = vsel %vm204_vm1, %v503_v10, 0.0 }
  0xca   :  { %v507_v12 = vpop.f32.mrf.mxu0  ;;  %v220_v38 = vsel %vm204_vm1, %v509_v13, 0.0 }
  0xcb   :  { %v519_v19 = vpop.f32.mrf.mxu1  ;;  %v210_v23 = vsel %vm204_vm1, %v507_v12, 0.0 }
  0xcc   :  { %v511_v14 = vpop.f32.mrf.mxu0  ;;  %v226_v45 = vsel %vm204_vm1, %v519_v19, 0.0 }
  0xcd   :  { %v206_v16 = vsel %vm204_vm1, %v511_v14, 0.0  ;;  %v529_v26 = vpop.f32.mrf.mxu1 }
  0xce   :  { %v207_v17 = vadd.f32 %v206_v16, %v205_v15  ;;  %v517_v18 = vpop.f32.mrf.mxu0  ;;  %v222_v40 = vsel %vm204_vm1, %v529_v26, 0.0 }
  0xcf   :  { %v537_v32 = vpop.f32.mrf.mxu1  ;;  %v216_v33 = vsel %vm204_vm1, %v517_v18, 0.0 }
  0xd0   :  { %v209_v21 = vadd.f32 %v208_v20, %v207_v17  ;;  %v523_v22 = vpop.f32.mrf.mxu0  ;;  %v232_v52 = vsel %vm204_vm1, %v537_v32, 0.0 }
  0xd1   :  { %v212_v27 = vsel %vm204_vm1, %v523_v22, 0.0  ;;  %v543_v37 = vpop.f32.mrf.mxu1 }
  0xd2   :  { %v211_v24 = vadd.f32 %v210_v23, %v209_v21  ;;  %v527_v25 = vpop.f32.mrf.mxu0  ;;  %v228_v48 = vsel %vm204_vm1, %v543_v37, 0.0 }
  0xd3   :  { %v218_v35 = vsel %vm204_vm1, %v527_v25, 0.0  ;;  %v549_v42 = vpop.f32.mrf.mxu1 }
  0xd4   :  { %v213_v28 = vadd.f32 %v212_v27, %v211_v24  ;;  %v533_v29 = vpop.f32.mrf.mxu0  ;;  %v234_v54 = vsel %vm204_vm1, %v549_v42, 0.0 }
  0xd5   :  { %v214_v30 = vsel %vm204_vm1, %v533_v29, 0.0  ;;  %v555_v47 = vpop.f32.mrf.mxu1 }
  0xd6   :  { %v215_v31 = vadd.f32 %v214_v30, %v213_v28  ;;  %v230_v50 = vsel %vm204_vm1, %v555_v47, 0.0 }
  0xd8   :  { %v217_v34 = vadd.f32 %v216_v33, %v215_v31 }
  0xda   :  { %v219_v36 = vadd.f32 %v218_v35, %v217_v34 }
  0xdc   :  { %v221_v39 = vadd.f32 %v220_v38, %v219_v36 }
  0xde   :  { %v223_v41 = vadd.f32 %v222_v40, %v221_v39 }
  0xe0   :  { %v225_v44 = vadd.f32 %v224_v43, %v223_v41 }
  0xe2   :  { %v227_v46 = vadd.f32 %v226_v45, %v225_v44 }
  0xe4   :  { %v229_v49 = vadd.f32 %v228_v48, %v227_v46 }
  0xe6   :  { %v231_v51 = vadd.f32 %v230_v50, %v229_v49 }
  0xe8   :  { %v233_v53 = vadd.f32 %v232_v52, %v231_v51 }
  0xea   :  { %v235_v55 = vadd.f32 %v234_v54, %v233_v53 }
  0xec   :  { %v236_v56 = vrot.slane %v235_v55, 4 }
  0xee   :  { %v237_v57 = vadd.f32 %v236_v56, %v235_v55 }
  0xf0   :  { %v238_v58 = vrot.slane %v237_v57, 2 }
  0xf2   :  { %v239_v59 = vadd.f32 %v238_v58, %v237_v57 }
  0xf4   :  { %v240_v60 = vrot.slane %v239_v59, 1 }
  0xf6   :  { %v241_v61 = vadd.f32 %v240_v60, %v239_v59 }
  0xf8   :  { %v565_v62 = vmul.f32 0.0078125, %v241_v61 }
  0xfa   :  { %v243_v63 = vsub.f32 %v503_v10, %v565_v62  ;;  %v244_v0 = vsub.f32 %v511_v14, %v565_v62  ;;  %v245_v1 = vsub.f32 %v501_v9, %v565_v62  ;;  %v246_v2 = vsub.f32 %v507_v12, %v565_v62 }
  0xfb   :  { %v247_v5 = vsub.f32 %v523_v22, %v565_v62  ;;  %v248_v7 = vsub.f32 %v533_v29, %v565_v62  ;;  %v249_v20 = vsub.f32 %v517_v18, %v565_v62  ;;  %v250_v27 = vsub.f32 %v527_v25, %v565_v62 }
  0xfc   :  { %v259_v3 = vmul.f32 %v243_v63, %v243_v63  ;;  %v260_v4 = vmul.f32 %v244_v0, %v244_v0  ;;  %v261_v6 = vmul.f32 %v245_v1, %v245_v1  ;;  %v262_v8 = vmul.f32 %v246_v2, %v246_v2 }
  0xfd   :  { %v263_v21 = vmul.f32 %v247_v5, %v247_v5  ;;  %v264_v28 = vmul.f32 %v248_v7, %v248_v7  ;;  %v251_v33 = vsub.f32 %v509_v13, %v565_v62  ;;  %v265_v34 = vmul.f32 %v249_v20, %v249_v20 }
  0xfe   :  { %v275_v15 = vsel %vm204_vm1, %v259_v3, 0.0  ;;  %v276_v16 = vsel %vm204_vm1, %v260_v4, 0.0  ;;  %v278_v23 = vsel %vm204_vm1, %v261_v6, 0.0  ;;  %v280_v30 = vsel %vm204_vm1, %v262_v8, 0.0 }
  0xff   :  { %v277_v17 = vadd.f32 %v276_v16, %v275_v15  ;;  %v282_v35 = vsel %vm204_vm1, %v263_v21, 0.0  ;;  %v252_v38 = vsub.f32 %v529_v26, %v565_v62  ;;  %v266_v39 = vmul.f32 %v250_v27, %v250_v27 }
 0x100   :  { %v284_v40 = vsel %vm204_vm1, %v264_v28, 0.0  ;;  %v253_v43 = vsub.f32 %v505_v11, %v565_v62  ;;  %v267_v44 = vmul.f32 %v251_v33, %v251_v33  ;;  %v286_v45 = vsel %vm204_vm1, %v265_v34, 0.0 }
 0x101   :  { %v279_v24 = vadd.f32 %v278_v23, %v277_v17  ;;  %v254_v48 = vsub.f32 %v519_v19, %v565_v62  ;;  %v268_v49 = vmul.f32 %v252_v38, %v252_v38  ;;  %v288_v50 = vsel %vm204_vm1, %v266_v39, 0.0  ;;  %v313_v39 = vld [vmem:[%s704_s2] sm:$0x1] }
 0x102   :  { %v255_v52 = vsub.f32 %v543_v37, %v565_v62  ;;  %v269_v53 = vmul.f32 %v253_v43, %v253_v43  ;;  %v290_v54 = vsel %vm204_vm1, %v267_v44, 0.0  ;;  %v256_v56 = vsub.f32 %v555_v47, %v565_v62  ;;  %v317_v44 = vld [vmem:[%s705_s3] sm:$0x1] }
 0x103   :  { %v281_v31 = vadd.f32 %v280_v30, %v279_v24  ;;  %v270_v57 = vmul.f32 %v254_v48, %v254_v48  ;;  %v292_v58 = vsel %vm204_vm1, %v268_v49, 0.0  ;;  %v257_v60 = vsub.f32 %v537_v32, %v565_v62 }
 0x104   :  { %v271_v61 = vmul.f32 %v255_v52, %v255_v52  ;;  %v294_v63 = vsel %vm204_vm1, %v269_v53, 0.0  ;;  %v258_v1 = vsub.f32 %v549_v42, %v565_v62  ;;  %v272_v2 = vmul.f32 %v256_v56, %v256_v56 }
 0x105   :  { %v283_v36 = vadd.f32 %v282_v35, %v281_v31  ;;  %v296_v3 = vsel %vm204_vm1, %v270_v57, 0.0  ;;  %v273_v5 = vmul.f32 %v257_v60, %v257_v60 }
 0x106   :  { %v298_v6 = vsel %vm204_vm1, %v271_v61, 0.0  ;;  %v274_v8 = vmul.f32 %v258_v1, %v258_v1  ;;  %v300_v15 = vsel %vm204_vm1, %v272_v2, 0.0 }
 0x107   :  { %v285_v41 = vadd.f32 %v284_v40, %v283_v36  ;;  %v302_v17 = vsel %vm204_vm1, %v273_v5, 0.0  ;;  %v321_v36 = vlaneseq }
 0x108   :  { %v304_v21 = vsel %vm204_vm1, %v274_v8, 0.0 }
 0x109   :  { %v287_v46 = vadd.f32 %v286_v45, %v285_v41  ;;  %v322_v38 = vshrl.u32 %v321_v36, 7 }
 0x10b   :  { %v289_v51 = vadd.f32 %v288_v50, %v287_v46  ;;  %v323_v40 = vsub.s32 0, %v322_v38 }
 0x10d   :  { %v291_v55 = vadd.f32 %v290_v54, %v289_v51 }
 0x10f   :  { %v293_v59 = vadd.f32 %v292_v58, %v291_v55 }
 0x111   :  { %v295_v0 = vadd.f32 %v294_v63, %v293_v59 }
 0x113   :  { %v297_v4 = vadd.f32 %v296_v3, %v295_v0 }
 0x115   :  { %v299_v7 = vadd.f32 %v298_v6, %v297_v4 }
 0x117   :  { %v301_v16 = vadd.f32 %v300_v15, %v299_v7 }
 0x119   :  { %v303_v20 = vadd.f32 %v302_v17, %v301_v16 }
 0x11b   :  { %v305_v23 = vadd.f32 %v304_v21, %v303_v20 }
 0x11d   :  { %v306_v24 = vrot.slane %v305_v23, 4 }
 0x11f   :  { %v307_v27 = vadd.f32 %v306_v24, %v305_v23 }
 0x121   :  { %v308_v28 = vrot.slane %v307_v27, 2 }
 0x123   :  { %v309_v30 = vadd.f32 %v308_v28, %v307_v27 }
 0x125   :  { %v310_v31 = vrot.slane %v309_v30, 1 }
 0x127   :  { %v311_v33 = vadd.f32 %v310_v31, %v309_v30 }
 0x129   :  { %v312_v34 = vmul.f32 0.0078125, %v311_v33 }
 0x12b   :  { %v314_v35 = vadd.f32 1e-05, %v312_v34 }
 0x12d   :  { %439 = vrsqrt.f32 %v314_v35 }
 0x13a   :  { %v440_v41 = vpop.eup %439 }
 0x13b   :  { %v316_v43 = vmul.f32 %v440_v41, %v313_v39 }
 0x13d   :  { %v318_v45 = vmul.f32 %v316_v43, %v565_v62  ;;  %v324_v46 = vrot.slane %v316_v43, %v323_v40 }
 0x13f   :  { %v319_v48 = vsub.f32 %v317_v44, %v318_v45  ;;  %v326_v49 = vmul.f32 %v324_v46, %v503_v10  ;;  %v327_v50 = vmul.f32 %v324_v46, %v511_v14  ;;  %v328_v51 = vmul.f32 %v501_v9, %v324_v46 }
 0x140   :  { %v329_v52 = vmul.f32 %v507_v12, %v324_v46  ;;  %v330_v53 = vmul.f32 %v324_v46, %v523_v22  ;;  %v331_v54 = vmul.f32 %v324_v46, %v533_v29  ;;  %v332_v55 = vmul.f32 %v517_v18, %v324_v46 }
 0x141   :  { %v333_v56 = vmul.f32 %v527_v25, %v324_v46  ;;  %v334_v62 = vmul.f32 %v324_v46, %v509_v13  ;;  %v335_v57 = vmul.f32 %v324_v46, %v529_v26  ;;  %v336_v10 = vmul.f32 %v505_v11, %v324_v46 }
 0x142   :  { %v337_v14 = vmul.f32 %v519_v19, %v324_v46  ;;  %v346_v58 = vrot.slane %v319_v48, %v323_v40  ;;  %v338_v9 = vmul.f32 %v324_v46, %v543_v37  ;;  %v339_v12 = vmul.f32 %v324_v46, %v555_v47 }
 0x143   :  { %v340_v22 = vmul.f32 %v537_v32, %v324_v46  ;;  %v341_v29 = vmul.f32 %v549_v42, %v324_v46 }
 0x144   :  { %v348_v18 = vadd.f32 %v346_v58, %v326_v49  ;;  %v349_v59 = vadd.f32 %v346_v58, %v327_v50  ;;  %v350_v25 = vadd.f32 %v346_v58, %v328_v51  ;;  %v351_v60 = vadd.f32 %v346_v58, %v329_v52 }
 0x145   :  { %v352_v13 = vadd.f32 %v346_v58, %v330_v53  ;;  %v353_v61 = vadd.f32 %v346_v58, %v331_v54  ;;  %v354_v26 = vadd.f32 %v346_v58, %v332_v55  ;;  %v355_v63 = vadd.f32 %v346_v58, %v333_v56 }
 0x146   :  { %v356_v11 = vadd.f32 %v346_v58, %v334_v62  ;;  %v357_v0 = vadd.f32 %v346_v58, %v335_v57  ;;  %v358_v19 = vadd.f32 %v346_v58, %v336_v10  ;;  %v359_v1 = vadd.f32 %v346_v58, %v337_v14  ;;  %364 = vst.msk [vmem:[%s706_s4] sm:$0xff] %vm204_vm1, %v348_v18 }
 0x147   :  { %365 = vst.msk [vmem:[%s706_s4 + $0x8] sm:$0xff] %vm204_vm1, %v349_v59  ;;  %366 = vst.msk [vmem:[%s706_s4 + $0x10] sm:$0xff] %vm204_vm1, %v350_v25  ;;  %v360_v32 = vadd.f32 %v346_v58, %v338_v9  ;;  %v361_v37 = vadd.f32 %v346_v58, %v339_v12  ;;  %v362_v42 = vadd.f32 %v346_v58, %v340_v22 }
 0x148   :  { %367 = vst.msk [vmem:[%s706_s4 + $0x18] sm:$0xff] %vm204_vm1, %v351_v60  ;;  %v363_v47 = vadd.f32 %v346_v58, %v341_v29  ;;  %368 = vst.msk [vmem:[%s706_s4 + $0x20] sm:$0xff] %vm204_vm1, %v352_v13 }
 0x149   :  { %369 = vst.msk [vmem:[%s706_s4 + $0x28] sm:$0xff] %vm204_vm1, %v353_v61  ;;  %370 = vst.msk [vmem:[%s706_s4 + $0x30] sm:$0xff] %vm204_vm1, %v354_v26 }
 0x14a   :  { %371 = vst.msk [vmem:[%s706_s4 + $0x38] sm:$0xff] %vm204_vm1, %v355_v63  ;;  %372 = vst.msk [vmem:[%s706_s4 + $0x40] sm:$0xff] %vm204_vm1, %v356_v11 }
 0x14b   :  { %373 = vst.msk [vmem:[%s706_s4 + $0x48] sm:$0xff] %vm204_vm1, %v357_v0  ;;  %374 = vst.msk [vmem:[%s706_s4 + $0x50] sm:$0xff] %vm204_vm1, %v358_v19 }
 0x14c   :  { %375 = vst.msk [vmem:[%s706_s4 + $0x58] sm:$0xff] %vm204_vm1, %v359_v1  ;;  %376 = vst.msk [vmem:[%s706_s4 + $0x60] sm:$0xff] %vm204_vm1, %v360_v32 }
 0x14d   :  { %377 = vst.msk [vmem:[%s706_s4 + $0x68] sm:$0xff] %vm204_vm1, %v361_v37  ;;  %378 = vst.msk [vmem:[%s706_s4 + $0x70] sm:$0xff] %vm204_vm1, %v362_v42 }
 0x14e   :  { %379 = vst.msk [vmem:[%s706_s4 + $0x78] sm:$0xff] %vm204_vm1, %v363_v47 }

// kernel: resnet_forward.14
= control target key start
LH: loop header
LB: loop body
LE: loop exit
PB: predicated region body
PF: predicated region fallthrough
CT: control target
= control target key end

     0   :  { %vm317_vm0 = vcmask 261120   ;;  %s1412_s1 = inlined_call_operand.vmem [shape: bf16[288,32], index: 1, kind: input, shape index: {}]   ;;  %s1413_s0 = inlined_call_operand.vmem [shape: bf16[128,288], index: 0, kind: input, shape index: {}]   ;;  %s1414_s2 = inlined_call_operand.vmem [shape: f32[1,32], index: 2, kind: input, shape index: {}]   ;;  %s1415_s3 = inlined_call_operand.vmem [shape: f32[1,32], index: 3, kind: input, shape index: {}]   ;;  %s1416_s4 = inlined_call_operand.vmem [shape: f32[128,32], index: 4, kind: input, shape index: {}]   ;;  %s1417_s5 = inlined_call_operand.vmem [shape: f32[128,32], index: 5, kind: output, shape index: {}]  }
   0x1   :  { %v923_v0 = vld [vmem:[%s1412_s1 + $0x78] sm:$0xff]   ;;  %v925_v2 = vld [vmem:[%s1412_s1 + $0x70] sm:$0xff]   ;;  %v927_v4 = vld [vmem:[%s1412_s1 + $0x68] sm:$0xff]  }
   0x2   :  { %v924_v1 = vld [vmem:[%s1412_s1 + $0x38] sm:$0xff]   ;;  %813 = vmatprep.subr.bf16.mxu0 %v923_v0  ;;  %907 = vmatprep.subr.bf16.mxu1 %v923_v0  ;;  %v926_v3 = vld [vmem:[%s1412_s1 + $0x30] sm:$0xff]   ;;  %v928_v5 = vld [vmem:[%s1412_s1 + $0x28] sm:$0xff]  }
   0x3   :  { %814 = vmatpush3.bf16.msra.mxu0 %v924_v1  ;;  %915 = vmatpush3.bf16.msra.mxu1 %v924_v1  ;;  %v929_v6 = vld [vmem:[%s1412_s1 + $0x60] sm:$0xff]   ;;  %v931_v8 = vld [vmem:[%s1412_s1 + $0x58] sm:$0xff]   ;;  %v933_v10 = vld [vmem:[%s1412_s1 + $0x50] sm:$0xff]  }
   0x4   :  { %815 = vmatprep.subr.bf16.mxu0 %v925_v2  ;;  %908 = vmatprep.subr.bf16.mxu1 %v925_v2  ;;  %v930_v7 = vld [vmem:[%s1412_s1 + $0x20] sm:$0xff]   ;;  %v932_v9 = vld [vmem:[%s1412_s1 + $0x18] sm:$0xff]   ;;  %v934_v13 = vld [vmem:[%s1412_s1 + $0x10] sm:$0xff]  }
   0x5   :  { %v941_v11 = vld [vmem:[%s1413_s0 + $0x4] ss:$12 sps:$4 sm:$0xff]   ;;  %v944_v12 = vld [vmem:[%s1413_s0 + $0x94] ss:$12 sps:$4 sm:$0xff]   ;;  %v935_v14 = vld [vmem:[%s1412_s1 + $0x48] sm:$0xff]  }
   0x6   :  { %374 = vmatprep.mubr.bf16.mxu0 %v941_v11  ;;  %422 = vmatprep.mubr.bf16.mxu1 %v944_v12  ;;  %v936_v15 = vld [vmem:[%s1412_s1 + $0x8] sm:$0xff]   ;;  %v937_v16 = vld [vmem:[%s1412_s1 + $0x40] sm:$0xff]   ;;  %v942_v20 = vld [vmem:[%s1413_s0 + $0x90] ss:$12 sps:$4 sm:$0xff]  }
   0x7   :  { %816 = vmatpush3.bf16.msra.mxu0 %v926_v3  ;;  %916 = vmatpush3.bf16.msra.mxu1 %v926_v3  ;;  %v938_v17 = vld [vmem:[%s1412_s1] sm:$0xff]   ;;  %v945_v19 = vld [vmem:[%s1412_s1 + $0x88] sm:$0xff]   ;;  %v956_v28 = vld [vmem:[%s1413_s0 + $0x30] ss:$12 sps:$4 sm:$0xff]  }
   0x8   :  { %817 = vmatprep.subr.bf16.mxu0 %v927_v4  ;;  %909 = vmatprep.subr.bf16.mxu1 %v927_v4  ;;  %v939_v18 = vld [vmem:[%s1413_s0] ss:$12 sps:$4 sm:$0xff]   ;;  %v946_v21 = vld [vmem:[%s1413_s0 + $0x1c] ss:$12 sps:$4 sm:$0xff]   ;;  %v950_v24 = vld [vmem:[%s1413_s0 + $0x18] ss:$12 sps:$4 sm:$0xff]  }
   0x9   :  { %v948_v22 = vld [vmem:[%s1413_s0 + $0xac] ss:$12 sps:$4 sm:$0xff]   ;;  %v952_v23 = vld [vmem:[%s1412_s1 + $0x80] sm:$0xff]   ;;  %v951_v25 = vld [vmem:[%s1413_s0 + $0xa8] ss:$12 sps:$4 sm:$0xff]  }
   0xa   :  { %v953_v26 = vld [vmem:[%s1413_s0 + $0x34] ss:$12 sps:$4 sm:$0xff]   ;;  %v958_v30 = vld [vmem:[%s1413_s0 + $0x4c] ss:$12 sps:$4 sm:$0xff]   ;;  %v962_v33 = vld [vmem:[%s1413_s0 + $0x50] ss:$12 sps:$4 sm:$0xff]  }
   0xb   :  { %818 = vmatpush3.bf16.msra.mxu0 %v928_v5  ;;  %917 = vmatpush3.bf16.msra.mxu1 %v928_v5  ;;  %v955_v27 = vld [vmem:[%s1413_s0 + $0x8] ss:$12 sps:$4 sm:$0xff]   ;;  %v957_v29 = vld [vmem:[%s1413_s0 + $0x20] ss:$12 sps:$4 sm:$0xff]   ;;  %v960_v31 = vld [vmem:[%s1413_s0 + $0x38] ss:$12 sps:$4 sm:$0xff]  }
   0xc   :  { %819 = vmatprep.subr.bf16.mxu0 %v929_v6  ;;  %910 = vmatprep.subr.bf16.mxu1 %v929_v6  ;;  %v961_v32 = vld [vmem:[%s1413_s0 + $0x48] ss:$12 sps:$4 sm:$0xff]   ;;  %v963_v34 = vld [vmem:[%s1413_s0 + $0x64] ss:$12 sps:$4 sm:$0xff]   ;;  %v966_v36 = vld [vmem:[%s1413_s0 + $0x60] ss:$12 sps:$4 sm:$0xff]  }
   0xd   :  { %v965_v35 = vld [vmem:[%s1413_s0 + $0x68] ss:$12 sps:$4 sm:$0xff]   ;;  %v967_v37 = vld [vmem:[%s1413_s0 + $0x80] ss:$12 sps:$4 sm:$0xff]   ;;  %v970_v39 = vld [vmem:[%s1413_s0 + $0x98] ss:$12 sps:$4 sm:$0xff]  }
   0xe   :  { %v968_v38 = vld [vmem:[%s1413_s0 + $0x7c] ss:$12 sps:$4 sm:$0xff]   ;;  %v971_v40 = vld [vmem:[%s1413_s0 + $0x78] ss:$12 sps:$4 sm:$0xff]  }
   0xf   :  { %820 = vmatpush3.bf16.msra.mxu0 %v930_v7  ;;  %918 = vmatpush3.bf16.msra.mxu1 %v930_v7  ;;  %v972_v41 = vld [vmem:[%s1413_s0 + $0xb0] ss:$12 sps:$4 sm:$0xff]  }
  0x10   :  { %821 = vmatprep.subr.bf16.mxu0 %v931_v8  ;;  %911 = vmatprep.subr.bf16.mxu1 %v931_v8 }
  0x13   :  { %822 = vmatpush3.bf16.msra.mxu0 %v932_v9  ;;  %919 = vmatpush3.bf16.msra.mxu1 %v932_v9 }
  0x14   :  { %823 = vmatprep.subr.bf16.mxu0 %v933_v10  ;;  %912 = vmatprep.subr.bf16.mxu1 %v933_v10 }
  0x17   :  { %824 = vmatpush3.bf16.msra.mxu0 %v934_v13  ;;  %920 = vmatpush3.bf16.msra.mxu1 %v934_v13 }
  0x18   :  { %825 = vmatprep.subr.bf16.mxu0 %v935_v14  ;;  %913 = vmatprep.subr.bf16.mxu1 %v935_v14 }
  0x1b   :  { %826 = vmatpush3.bf16.msra.mxu0 %v936_v15  ;;  %921 = vmatpush3.bf16.msra.mxu1 %v936_v15 }
  0x1c   :  { %827 = vmatprep.subr.bf16.mxu0 %v937_v16  ;;  %914 = vmatprep.subr.bf16.mxu1 %v937_v16 }
  0x1f   :  { %828 = vmatpush3.bf16.msra.mxu0 %v938_v17  ;;  %922 = vmatpush3.bf16.msra.mxu1 %v938_v17 }
  0x20   :  { %887 = vmatprep.subr.bf16.mxu1 %v945_v19 }
  0x22   :  { %375 = vmatmul.mubr.bf16.vlgmr.msra.gmra.mxu0 %v939_v18  ;;  %423 = vmatmul.mubr.bf16.vlgmr.msra.gmra.mxu1 %v942_v20 }
  0x23   :  { %888 = vmatpush3.bf16.msra.mxu1 %v945_v19  ;;  %382 = vmatprep.mubr.bf16.mxu0 %v946_v21 }
  0x24   :  { %430 = vmatprep.mubr.bf16.mxu1 %v948_v22  ;;  %889 = vmatprep.subr.bf16.mxu1 %v952_v23 }
  0x27   :  { %890 = vmatpush3.bf16.msra.mxu1 %v952_v23 }
  0x2a   :  { %383 = vmatmul.mubr.bf16.gmra.mxu0 %v950_v24  ;;  %431 = vmatmul.mubr.bf16.gmra.mxu1 %v951_v25 }
  0x2b   :  { %390 = vmatprep.mubr.bf16.mxu0 %v953_v26  ;;  %891 = vmatprep.mubr.msk.bf16.mxu1 %vm317_vm0, %v955_v27 }
  0x32   :  { %391 = vmatmul.mubr.bf16.gmra.mxu0 %v956_v28  ;;  %892 = vmatmul.mubr.msk.bf16.vlgmr.msra.gmra.mxu1 %vm317_vm0, %v957_v29 }
  0x33   :  { %398 = vmatprep.mubr.bf16.mxu0 %v958_v30  ;;  %895 = vmatprep.mubr.msk.bf16.mxu1 %vm317_vm0, %v960_v31 }
  0x3a   :  { %399 = vmatmul.mubr.bf16.gmra.mxu0 %v961_v32  ;;  %896 = vmatmul.mubr.msk.bf16.gmra.mxu1 %vm317_vm0, %v962_v33 }
  0x3b   :  { %406 = vmatprep.mubr.bf16.mxu0 %v963_v34  ;;  %899 = vmatprep.mubr.msk.bf16.mxu1 %vm317_vm0, %v965_v35 }
  0x42   :  { %407 = vmatmul.mubr.bf16.gmra.mxu0 %v966_v36  ;;  %900 = vmatmul.mubr.msk.bf16.gmra.mxu1 %vm317_vm0, %v967_v37 }
  0x43   :  { %414 = vmatprep.mubr.bf16.mxu0 %v968_v38  ;;  %903 = vmatprep.mubr.msk.bf16.mxu1 %vm317_vm0, %v970_v39 }
  0x4a   :  { %415 = vmatmul.mubr.bf16.gmra.mxu0 %v971_v40  ;;  %904 = vmatmul.mubr.msk.bf16.gmra.mxu1 %vm317_vm0, %v972_v41 }
  0xe2   :  { %v829_v42 = vpop.f32.mrf.mxu0  ;;  %v1139_v43 = vpop.f32.mrf.mxu1 }
  0xe4   :  { %v830_v44 = vpop.f32.mrf.mxu0  ;;  %v1141_v45 = vpop.f32.mrf.mxu1 }
  0xe5   :  { %v831_v62 = vadd.f32 %v830_v44, %v829_v42 }
  0xe6   :  { %v832_v46 = vpop.f32.mrf.mxu0  ;;  %v1143_v47 = vpop.f32.mrf.mxu1 }
  0xe8   :  { %v833_v48 = vpop.f32.mrf.mxu0  ;;  %v1145_v49 = vpop.f32.mrf.mxu1 }
  0xe9   :  { %v834_v1 = vadd.f32 %v833_v48, %v832_v46 }
  0xea   :  { %v835_v50 = vpop.f32.mrf.mxu0  ;;  %v1147_v51 = vpop.f32.mrf.mxu1 }
  0xec   :  { %v836_v52 = vpop.f32.mrf.mxu0  ;;  %v1149_v53 = vpop.f32.mrf.mxu1 }
  0xed   :  { %v837_v2 = vadd.f32 %v836_v52, %v835_v50 }
  0xee   :  { %v838_v54 = vpop.f32.mrf.mxu0  ;;  %v1151_v55 = vpop.f32.mrf.mxu1 }
  0xf0   :  { %v839_v56 = vpop.f32.mrf.mxu0  ;;  %v1153_v57 = vpop.f32.mrf.mxu1 }
  0xf1   :  { %v840_v6 = vadd.f32 %v839_v56, %v838_v54 }
  0xf2   :  { %v841_v58 = vpop.f32.mrf.mxu0  ;;  %v893_v59 = vpop.f32.mrf.mxu1 }
  0xf3   :  { %v1157_v7 = vadd.f32 %v893_v59, %v837_v2 }
  0xf4   :  { %v842_v60 = vpop.f32.mrf.mxu0  ;;  %v473_v61 = vpop.f32.mrf.mxu1 }
  0xf5   :  { %v1155_v3 = vadd.f32 %v831_v62, %v473_v61  ;;  %v843_v11 = vadd.f32 %v842_v60, %v841_v58  ;;  %v539_v18 = vsel %vm317_vm0, %v1157_v7, 0.0 }
  0xf6   :  { %v844_v63 = vpop.f32.mrf.mxu0  ;;  %v894_v0 = vpop.f32.mrf.mxu1 }
  0xf7   :  { %v536_v12 = vsel %vm317_vm0, %v1155_v3, 0.0  ;;  %v1163_v13 = vadd.f32 %v894_v0, %v840_v6 }
  0xf8   :  { %v845_v4 = vpop.f32.mrf.mxu0  ;;  %v476_v5 = vpop.f32.mrf.mxu1 }
  0xf9   :  { %v1159_v8 = vadd.f32 %v834_v1, %v476_v5  ;;  %v541_v23 = vsel %vm317_vm0, %v1163_v13, 0.0  ;;  %v846_v24 = vadd.f32 %v845_v4, %v844_v63 }
  0xfa   :  { %v847_v9 = vpop.f32.mrf.mxu0  ;;  %v897_v10 = vpop.f32.mrf.mxu1 }
  0xfb   :  { %v537_v14 = vsel %vm317_vm0, %v1159_v8, 0.0 }
  0xfc   :  { %v538_v15 = vadd.f32 %v537_v14, %v536_v12  ;;  %v848_v16 = vpop.f32.mrf.mxu0  ;;  %v489_v17 = vpop.f32.mrf.mxu1  ;;  %v867_v12 = vadd.f32 %v1141_v45, %v1139_v43 }
  0xfd   :  { %v1169_v19 = vadd.f32 %v843_v11, %v489_v17  ;;  %v849_v25 = vadd.f32 %v848_v16, %v847_v9 }
  0xfe   :  { %v540_v20 = vadd.f32 %v539_v18, %v538_v15  ;;  %v850_v21 = vpop.f32.mrf.mxu0  ;;  %v898_v22 = vpop.f32.mrf.mxu1  ;;  %v870_v18 = vadd.f32 %v1145_v49, %v1143_v47 }
  0xff   :  { %v543_v29 = vsel %vm317_vm0, %v1169_v19, 0.0  ;;  %v1177_v34 = vadd.f32 %v897_v10, %v849_v25  ;;  %v876_v25 = vadd.f32 %v1153_v57, %v1151_v55 }
 0x100   :  { %v542_v26 = vadd.f32 %v541_v23, %v540_v20  ;;  %v851_v27 = vpop.f32.mrf.mxu0  ;;  %v492_v28 = vpop.f32.mrf.mxu1  ;;  %v873_v23 = vadd.f32 %v1149_v53, %v1147_v51 }
 0x101   :  { %v1175_v30 = vadd.f32 %v846_v24, %v492_v28  ;;  %v852_v35 = vadd.f32 %v851_v27, %v850_v21  ;;  %v547_v44 = vsel %vm317_vm0, %v1177_v34, 0.0 }
 0x102   :  { %v544_v31 = vadd.f32 %v543_v29, %v542_v26  ;;  %v853_v32 = vpop.f32.mrf.mxu0  ;;  %v901_v33 = vpop.f32.mrf.mxu1 }
 0x103   :  { %v545_v36 = vsel %vm317_vm0, %v1175_v30, 0.0  ;;  %v1183_v46 = vadd.f32 %v898_v22, %v852_v35 }
 0x104   :  { %v546_v37 = vadd.f32 %v545_v36, %v544_v31  ;;  %v854_v38 = vpop.f32.mrf.mxu0  ;;  %v505_v39 = vpop.f32.mrf.mxu1 }
 0x105   :  { %v855_v40 = vadd.f32 %v854_v38, %v853_v32  ;;  %v549_v60 = vsel %vm317_vm0, %v1183_v46, 0.0 }
 0x106   :  { %v856_v41 = vpop.f32.mrf.mxu0  ;;  %v902_v42 = vpop.f32.mrf.mxu1  ;;  %v548_v48 = vadd.f32 %v547_v44, %v546_v37 }
 0x107   :  { %v1185_v54 = vadd.f32 %v855_v40, %v505_v39 }
 0x108   :  { %v857_v50 = vpop.f32.mrf.mxu0  ;;  %v508_v52 = vpop.f32.mrf.mxu1  ;;  %v550_v62 = vadd.f32 %v549_v60, %v548_v48 }
 0x109   :  { %v858_v56 = vadd.f32 %v857_v50, %v856_v41  ;;  %v551_v1 = vsel %vm317_vm0, %v1185_v54, 0.0 }
 0x10a   :  { %v859_v58 = vpop.f32.mrf.mxu0  ;;  %v905_v59 = vpop.f32.mrf.mxu1  ;;  %v552_v10 = vadd.f32 %v551_v1, %v550_v62 }
 0x10b   :  { %v1189_v61 = vadd.f32 %v858_v56, %v508_v52  ;;  %v1215_v26 = vadd.f32 %v905_v59, %v873_v23 }
 0x10c   :  { %v860_v63 = vpop.f32.mrf.mxu0  ;;  %v521_v0 = vpop.f32.mrf.mxu1 }
 0x10d   :  { %v861_v2 = vadd.f32 %v860_v63, %v859_v58  ;;  %v553_v6 = vsel %vm317_vm0, %v1189_v61, 0.0  ;;  %v1203_v20 = vadd.f32 %v867_v12, %v521_v0  ;;  %v563_v28 = vsel %vm317_vm0, %v1215_v26, 0.0 }
 0x10e   :  { %v862_v4 = vpop.f32.mrf.mxu0  ;;  %v906_v5 = vpop.f32.mrf.mxu1  ;;  %v554_v16 = vadd.f32 %v553_v6, %v552_v10 }
 0x10f   :  { %v1195_v9 = vadd.f32 %v901_v33, %v861_v2  ;;  %v559_v47 = vsel %vm317_vm0, %v1203_v20, 0.0  ;;  %v1219_v27 = vadd.f32 %v906_v5, %v876_v25 }
 0x110   :  { %v863_v11 = vpop.f32.mrf.mxu0  ;;  %v524_v17 = vpop.f32.mrf.mxu1 }
 0x111   :  { %v555_v14 = vsel %vm317_vm0, %v1195_v9, 0.0  ;;  %v864_v15 = vadd.f32 %v863_v11, %v862_v4  ;;  %v1211_v45 = vadd.f32 %v870_v18, %v524_v17  ;;  %v565_v31 = vsel %vm317_vm0, %v1219_v27, 0.0 }
 0x112   :  { %v556_v22 = vadd.f32 %v555_v14, %v554_v16 }
 0x113   :  { %v1205_v21 = vadd.f32 %v902_v42, %v864_v15  ;;  %v561_v51 = vsel %vm317_vm0, %v1211_v45, 0.0 }
 0x115   :  { %v557_v43 = vsel %vm317_vm0, %v1205_v21, 0.0 }
 0x116   :  { %v558_v24 = vadd.f32 %v557_v43, %v556_v22 }
 0x118   :  { %v560_v49 = vadd.f32 %v559_v47, %v558_v24 }
 0x11a   :  { %v562_v53 = vadd.f32 %v561_v51, %v560_v49 }
 0x11c   :  { %v564_v29 = vadd.f32 %v563_v28, %v562_v53 }
 0x11e   :  { %v566_v55 = vadd.f32 %v565_v31, %v564_v29 }
 0x120   :  { %v567_v57 = vrot.slane %v566_v55, 4 }
 0x122   :  { %v568_v32 = vadd.f32 %v567_v57, %v566_v55 }
 0x124   :  { %v569_v33 = vrot.slane %v568_v32, 2 }
 0x126   :  { %v570_v35 = vadd.f32 %v569_v33, %v568_v32 }
 0x128   :  { %v571_v36 = vrot.slane %v570_v35, 1 }
 0x12a   :  { %v572_v37 = vadd.f32 %v571_v36, %v570_v35 }
 0x12c   :  { %v1227_v38 = vmul.f32 0.0078125, %v572_v37 }
 0x12e   :  { %v574_v39 = vsub.f32 %v1155_v3, %v1227_v38  ;;  %v575_v40 = vsub.f32 %v1159_v8, %v1227_v38  ;;  %v576_v41 = vsub.f32 %v1157_v7, %v1227_v38  ;;  %v577_v42 = vsub.f32 %v1163_v13, %v1227_v38 }
 0x12f   :  { %v578_v50 = vsub.f32 %v1169_v19, %v1227_v38  ;;  %v579_v56 = vsub.f32 %v1175_v30, %v1227_v38  ;;  %v580_v63 = vsub.f32 %v1177_v34, %v1227_v38  ;;  %v581_v4 = vsub.f32 %v1183_v46, %v1227_v38 }
 0x130   :  { %v590_v44 = vmul.f32 %v574_v39, %v574_v39  ;;  %v591_v48 = vmul.f32 %v575_v40, %v575_v40  ;;  %v592_v52 = vmul.f32 %v576_v41, %v576_v41  ;;  %v593_v58 = vmul.f32 %v577_v42, %v577_v42 }
 0x131   :  { %v594_v0 = vmul.f32 %v578_v50, %v578_v50  ;;  %v595_v5 = vmul.f32 %v579_v56, %v579_v56  ;;  %v582_v11 = vsub.f32 %v1185_v54, %v1227_v38  ;;  %v596_v12 = vmul.f32 %v580_v63, %v580_v63 }
 0x132   :  { %v606_v59 = vsel %vm317_vm0, %v590_v44, 0.0  ;;  %v607_v60 = vsel %vm317_vm0, %v591_v48, 0.0  ;;  %v609_v1 = vsel %vm317_vm0, %v592_v52, 0.0  ;;  %v611_v6 = vsel %vm317_vm0, %v593_v58, 0.0 }
 0x133   :  { %v608_v62 = vadd.f32 %v607_v60, %v606_v59  ;;  %v613_v14 = vsel %vm317_vm0, %v594_v0, 0.0  ;;  %v583_v16 = vsub.f32 %v1189_v61, %v1227_v38  ;;  %v597_v17 = vmul.f32 %v581_v4, %v581_v4 }
 0x134   :  { %v615_v18 = vsel %vm317_vm0, %v595_v5, 0.0  ;;  %v584_v23 = vsub.f32 %v1195_v9, %v1227_v38  ;;  %v598_v43 = vmul.f32 %v582_v11, %v582_v11  ;;  %v617_v24 = vsel %vm317_vm0, %v596_v12, 0.0 }
 0x135   :  { %v610_v2 = vadd.f32 %v609_v1, %v608_v62  ;;  %v585_v47 = vsub.f32 %v1205_v21, %v1227_v38  ;;  %v599_v49 = vmul.f32 %v583_v16, %v583_v16  ;;  %v619_v51 = vsel %vm317_vm0, %v597_v17, 0.0  ;;  %v644_v17 = vld [vmem:[%s1414_s2] sm:$0x1] }
 0x136   :  { %v586_v28 = vsub.f32 %v1203_v20, %v1227_v38  ;;  %v600_v29 = vmul.f32 %v584_v23, %v584_v23  ;;  %v621_v31 = vsel %vm317_vm0, %v598_v43, 0.0  ;;  %v587_v57 = vsub.f32 %v1211_v45, %v1227_v38  ;;  %v648_v43 = vld [vmem:[%s1415_s3] sm:$0x1] }
 0x137   :  { %v612_v10 = vadd.f32 %v611_v6, %v610_v2  ;;  %v601_v32 = vmul.f32 %v585_v47, %v585_v47  ;;  %v623_v33 = vsel %vm317_vm0, %v599_v49, 0.0  ;;  %v588_v36 = vsub.f32 %v1215_v26, %v1227_v38 }
 0x138   :  { %v602_v37 = vmul.f32 %v586_v28, %v586_v28  ;;  %v625_v39 = vsel %vm317_vm0, %v600_v29, 0.0  ;;  %v589_v41 = vsub.f32 %v1219_v27, %v1227_v38  ;;  %v603_v42 = vmul.f32 %v587_v57, %v587_v57 }
 0x139   :  { %v614_v15 = vadd.f32 %v613_v14, %v612_v10  ;;  %v627_v44 = vsel %vm317_vm0, %v601_v32, 0.0  ;;  %v604_v50 = vmul.f32 %v588_v36, %v588_v36 }
 0x13a   :  { %v629_v52 = vsel %vm317_vm0, %v602_v37, 0.0  ;;  %v605_v58 = vmul.f32 %v589_v41, %v589_v41  ;;  %v631_v59 = vsel %vm317_vm0, %v603_v42, 0.0  ;;  %v699_v37 = vld [vmem:[%s1416_s4 + $0x20] sm:$0xff] }
 0x13b   :  { %v616_v22 = vadd.f32 %v615_v18, %v614_v15  ;;  %v633_v62 = vsel %vm317_vm0, %v604_v50, 0.0  ;;  %v652_v15 = vlaneseq  ;;  %v702_v50 = vld [vmem:[%s1416_s4 + $0x38] sm:$0xff] }
 0x13c   :  { %v635_v0 = vsel %vm317_vm0, %v605_v58, 0.0 }
 0x13d   :  { %v618_v25 = vadd.f32 %v617_v24, %v616_v22  ;;  %v653_v16 = vshrl.u32 %v652_v15, 7 }
 0x13f   :  { %v620_v53 = vadd.f32 %v619_v51, %v618_v25  ;;  %v654_v18 = vsub.s32 0, %v653_v16 }
 0x141   :  { %v622_v55 = vadd.f32 %v621_v31, %v620_v53 }
 0x143   :  { %v624_v35 = vadd.f32 %v623_v33, %v622_v55 }
 0x145   :  { %v626_v40 = vadd.f32 %v625_v39, %v624_v35  ;;  %v700_v39 = vld [vmem:[%s1416_s4 + $0x28] sm:$0xff] }
 0x147   :  { %v628_v48 = vadd.f32 %v627_v44, %v626_v40  ;;  %v701_v40 = vld [vmem:[%s1416_s4 + $0x30] sm:$0xff] }
 0x149   :  { %v630_v56 = vadd.f32 %v629_v52, %v628_v48  ;;  %v703_v52 = vld [vmem:[%s1416_s4 + $0x40] sm:$0xff] }
 0x14b   :  { %v632_v60 = vadd.f32 %v631_v59, %v630_v56  ;;  %v704_v56 = vld [vmem:[%s1416_s4 + $0x48] sm:$0xff] }
 0x14d   :  { %v634_v63 = vadd.f32 %v633_v62, %v632_v60 }
 0x14f   :  { %v636_v1 = vadd.f32 %v635_v0, %v634_v63  ;;  %v705_v63 = vld [vmem:[%s1416_s4 + $0x50] sm:$0xff]  ;;  %v706_v0 = vld [vmem:[%s1416_s4 + $0x58] sm:$0xff] }
 0x151   :  { %v637_v2 = vrot.slane %v636_v1, 4 }
 0x153   :  { %v638_v4 = vadd.f32 %v637_v2, %v636_v1  ;;  %v707_v1 = vld [vmem:[%s1416_s4 + $0x60] sm:$0xff]  ;;  %v708_v2 = vld [vmem:[%s1416_s4 + $0x68] sm:$0xff] }
 0x155   :  { %v639_v5 = vrot.slane %v638_v4, 2 }
 0x157   :  { %v640_v6 = vadd.f32 %v639_v5, %v638_v4  ;;  %v709_v4 = vld [vmem:[%s1416_s4 + $0x70] sm:$0xff]  ;;  %v710_v5 = vld [vmem:[%s1416_s4 + $0x78] sm:$0xff] }
 0x159   :  { %v641_v10 = vrot.slane %v640_v6, 1 }
 0x15b   :  { %v642_v11 = vadd.f32 %v641_v10, %v640_v6 }
 0x15d   :  { %v643_v12 = vmul.f32 0.0078125, %v642_v11 }
 0x15f   :  { %v645_v14 = vadd.f32 1e-05, %v643_v12 }
 0x161   :  { %973 = vrsqrt.f32 %v645_v14 }
 0x16e   :  { %v974_v22 = vpop.eup %973 }
 0x16f   :  { %v647_v23 = vmul.f32 %v974_v22, %v644_v17 }
 0x171   :  { %v649_v24 = vmul.f32 %v647_v23, %v1227_v38  ;;  %v655_v25 = vrot.slane %v647_v23, %v654_v18 }
 0x173   :  { %v650_v47 = vsub.f32 %v648_v43, %v649_v24  ;;  %v657_v49 = vmul.f32 %v655_v25, %v1155_v3  ;;  %v658_v51 = vmul.f32 %v655_v25, %v1159_v8  ;;  %v659_v53 = vmul.f32 %v655_v25, %v1157_v7 }
 0x174   :  { %v660_v28 = vmul.f32 %v655_v25, %v1163_v13  ;;  %v661_v29 = vmul.f32 %v655_v25, %v1169_v19  ;;  %v662_v31 = vmul.f32 %v655_v25, %v1175_v30  ;;  %v663_v55 = vmul.f32 %v655_v25, %v1177_v34  ;;  %v695_v34 = vld [vmem:[%s1416_s4] sm:$0xff] }
 0x175   :  { %v664_v57 = vmul.f32 %v655_v25, %v1183_v46  ;;  %v665_v38 = vmul.f32 %v655_v25, %v1185_v54  ;;  %v666_v32 = vmul.f32 %v655_v25, %v1189_v61  ;;  %v667_v3 = vmul.f32 %v655_v25, %v1195_v9  ;;  %v696_v9 = vld [vmem:[%s1416_s4 + $0x8] sm:$0xff] }
 0x176   :  { %v668_v8 = vmul.f32 %v655_v25, %v1205_v21  ;;  %v677_v33 = vrot.slane %v650_v47, %v654_v18  ;;  %v669_v7 = vmul.f32 %v655_v25, %v1203_v20  ;;  %v670_v13 = vmul.f32 %v655_v25, %v1211_v45  ;;  %v697_v20 = vld [vmem:[%s1416_s4 + $0x10] sm:$0xff]  ;;  %v698_v21 = vld [vmem:[%s1416_s4 + $0x18] sm:$0xff] }
 0x177   :  { %v671_v19 = vmul.f32 %v655_v25, %v1215_v26  ;;  %v672_v30 = vmul.f32 %v655_v25, %v1219_v27 }
 0x178   :  { %v679_v46 = vadd.f32 %v677_v33, %v657_v49  ;;  %v680_v54 = vadd.f32 %v677_v33, %v658_v51  ;;  %v681_v61 = vadd.f32 %v677_v33, %v659_v53  ;;  %v682_v35 = vadd.f32 %v677_v33, %v660_v28 }
 0x179   :  { %v683_v45 = vadd.f32 %v677_v33, %v661_v29  ;;  %v684_v26 = vadd.f32 %v677_v33, %v662_v31  ;;  %v685_v27 = vadd.f32 %v677_v33, %v663_v55  ;;  %v686_v36 = vadd.f32 %v677_v33, %v664_v57 }
 0x17a   :  { %v687_v41 = vadd.f32 %v677_v33, %v665_v38  ;;  %v688_v42 = vadd.f32 %v677_v33, %v666_v32  ;;  %v689_v44 = vadd.f32 %v677_v33, %v667_v3  ;;  %v690_v48 = vadd.f32 %v677_v33, %v668_v8 }
 0x17b   :  { %v691_v58 = vadd.f32 %v677_v33, %v669_v7  ;;  %v692_v59 = vadd.f32 %v677_v33, %v670_v13  ;;  %v693_v60 = vadd.f32 %v677_v33, %v671_v19  ;;  %v694_v62 = vadd.f32 %v677_v33, %v672_v30 }
 0x17c   :  { %v711_v6 = vadd.f32 %v695_v34, %v679_v46  ;;  %v712_v10 = vadd.f32 %v696_v9, %v680_v54  ;;  %v713_v11 = vadd.f32 %v697_v20, %v681_v61  ;;  %v714_v12 = vadd.f32 %v698_v21, %v682_v35 }
 0x17d   :  { %v715_v14 = vadd.f32 %v699_v37, %v683_v45  ;;  %v716_v15 = vadd.f32 %v700_v39, %v684_v26  ;;  %v717_v16 = vadd.f32 %v701_v40, %v685_v27  ;;  %v718_v17 = vadd.f32 %v702_v50, %v686_v36 }
 0x17e   :  { %v719_v18 = vadd.f32 %v703_v52, %v687_v41  ;;  %v720_v22 = vadd.f32 %v704_v56, %v688_v42  ;;  %v721_v23 = vadd.f32 %v705_v63, %v689_v44  ;;  %v722_v43 = vadd.f32 %v706_v0, %v690_v48 }
 0x17f   :  { %v723_v24 = vadd.f32 %v707_v1, %v691_v58  ;;  %v724_v25 = vadd.f32 %v708_v2, %v692_v59  ;;  %v725_v47 = vadd.f32 %v709_v4, %v693_v60  ;;  %v726_v49 = vadd.f32 %v710_v5, %v694_v62 }
 0x180   :  { %v727_v51 = vmax.f32 %v711_v6, 0.0  ;;  %v728_v53 = vmax.f32 %v712_v10, 0.0  ;;  %v729_v28 = vmax.f32 %v713_v11, 0.0  ;;  %v730_v29 = vmax.f32 %v714_v12, 0.0 }
 0x181   :  { %v731_v31 = vmax.f32 %v715_v14, 0.0  ;;  %v732_v55 = vmax.f32 %v716_v15, 0.0  ;;  %v733_v57 = vmax.f32 %v717_v16, 0.0  ;;  %v734_v38 = vmax.f32 %v718_v17, 0.0 }
 0x182   :  { %v735_v32 = vmax.f32 %v719_v18, 0.0  ;;  %v736_v3 = vmax.f32 %v720_v22, 0.0  ;;  %v737_v8 = vmax.f32 %v721_v23, 0.0  ;;  %v738_v33 = vmax.f32 %v722_v43, 0.0  ;;  %743 = vst.msk [vmem:[%s1417_s5] sm:$0xff] %vm317_vm0, %v727_v51  ;;  %744 = vst.msk [vmem:[%s1417_s5 + $0x8] sm:$0xff] %vm317_vm0, %v728_v53 }
 0x183   :  { %745 = vst.msk [vmem:[%s1417_s5 + $0x10] sm:$0xff] %vm317_vm0, %v729_v28  ;;  %746 = vst.msk [vmem:[%s1417_s5 + $0x18] sm:$0xff] %vm317_vm0, %v730_v29  ;;  %v739_v7 = vmax.f32 %v723_v24, 0.0  ;;  %v740_v13 = vmax.f32 %v724_v25, 0.0  ;;  %v741_v19 = vmax.f32 %v725_v47, 0.0  ;;  %v742_v30 = vmax.f32 %v726_v49, 0.0 }
 0x184   :  { %747 = vst.msk [vmem:[%s1417_s5 + $0x20] sm:$0xff] %vm317_vm0, %v731_v31  ;;  %748 = vst.msk [vmem:[%s1417_s5 + $0x28] sm:$0xff] %vm317_vm0, %v732_v55 }
 0x185   :  { %749 = vst.msk [vmem:[%s1417_s5 + $0x30] sm:$0xff] %vm317_vm0, %v733_v57  ;;  %750 = vst.msk [vmem:[%s1417_s5 + $0x38] sm:$0xff] %vm317_vm0, %v734_v38 }
 0x186   :  { %751 = vst.msk [vmem:[%s1417_s5 + $0x40] sm:$0xff] %vm317_vm0, %v735_v32  ;;  %752 = vst.msk [vmem:[%s1417_s5 + $0x48] sm:$0xff] %vm317_vm0, %v736_v3 }
 0x187   :  { %753 = vst.msk [vmem:[%s1417_s5 + $0x50] sm:$0xff] %vm317_vm0, %v737_v8  ;;  %754 = vst.msk [vmem:[%s1417_s5 + $0x58] sm:$0xff] %vm317_vm0, %v738_v33 }
 0x188   :  { %755 = vst.msk [vmem:[%s1417_s5 + $0x60] sm:$0xff] %vm317_vm0, %v739_v7  ;;  %756 = vst.msk [vmem:[%s1417_s5 + $0x68] sm:$0xff] %vm317_vm0, %v740_v13 }
 0x189   :  { %757 = vst.msk [vmem:[%s1417_s5 + $0x70] sm:$0xff] %vm317_vm0, %v741_v19  ;;  %758 = vst.msk [vmem:[%s1417_s5 + $0x78] sm:$0xff] %vm317_vm0, %v742_v30 }

// kernel: resnet_forward.15
= control target key start
LH: loop header
LB: loop body
LE: loop exit
PB: predicated region body
PF: predicated region fallthrough
CT: control target
= control target key end

     0   :  { %vm200_vm0 = vcmask 261120   ;;  %vm305_vm1 = vcmask 523264   ;;  %s602_s1 = inlined_call_operand.vmem [shape: bf16[288,64], index: 1, kind: input, shape index: {}]   ;;  %s603_s0 = inlined_call_operand.vmem [shape: bf16[32,288], index: 0, kind: input, shape index: {}]   ;;  %s604_s2 = inlined_call_operand.vmem [shape: f32[1,64], index: 2, kind: input, shape index: {}]   ;;  %s605_s3 = inlined_call_operand.vmem [shape: f32[1,64], index: 3, kind: input, shape index: {}]   ;;  %s606_s4 = inlined_call_operand.vmem [shape: f32[32,64], index: 4, kind: output, shape index: {}]  }
   0x1   :  { %v447_v0 = vld [vmem:[%s602_s1 + $0x78] sm:$0xff]   ;;  %v449_v2 = vld [vmem:[%s602_s1 + $0x70] sm:$0xff]   ;;  %v451_v4 = vld [vmem:[%s602_s1 + $0x68] sm:$0xff]  }
   0x2   :  { %v448_v1 = vld [vmem:[%s602_s1 + $0x38] sm:$0xff]   ;;  %407 = vmatprep.subr.bf16.mxu0 %v447_v0  ;;  %v450_v3 = vld [vmem:[%s602_s1 + $0x30] sm:$0xff]   ;;  %v452_v5 = vld [vmem:[%s602_s1 + $0x28] sm:$0xff]  }
   0x3   :  { %408 = vmatpush3.bf16.msra.mxu0 %v448_v1  ;;  %v453_v6 = vld [vmem:[%s602_s1 + $0x60] sm:$0xff]   ;;  %v455_v8 = vld [vmem:[%s602_s1 + $0x58] sm:$0xff]   ;;  %v460_v9 = vld [vmem:[%s602_s1 + $0x88] sm:$0xff]  }
   0x4   :  { %409 = vmatprep.subr.bf16.mxu0 %v449_v2  ;;  %v454_v7 = vld [vmem:[%s602_s1 + $0x20] sm:$0xff]   ;;  %v456_v10 = vld [vmem:[%s602_s1 + $0x18] sm:$0xff]   ;;  %v457_v11 = vld [vmem:[%s602_s1 + $0x50] sm:$0xff]   ;;  %439 = vmatprep.subr.bf16.mxu1 %v460_v9 }
   0x5   :  { %440 = vmatpush3.bf16.msra.mxu1 %v460_v9  ;;  %v463_v12 = vld [vmem:[%s602_s1 + $0x80] sm:$0xff]   ;;  %v458_v13 = vld [vmem:[%s602_s1 + $0x10] sm:$0xff]   ;;  %v459_v14 = vld [vmem:[%s602_s1 + $0x48] sm:$0xff]  }
   0x6   :  { %441 = vmatprep.subr.bf16.mxu1 %v463_v12  ;;  %v467_v15 = vld [vmem:[%s603_s0 + $0x4] ss:$12 sps:$4 sm:$0xff]   ;;  %v468_v16 = vld [vmem:[%s603_s0 + $0x8] ss:$12 sps:$4 sm:$0xff]   ;;  %v469_v17 = vld [vmem:[%s603_s0 + $0x20] ss:$12 sps:$4 sm:$0xff]  }
   0x7   :  { %410 = vmatpush3.bf16.msra.mxu0 %v450_v3  ;;  %239 = vmatprep.mubr.bf16.mxu0 %v467_v15  ;;  %v461_v18 = vld [vmem:[%s602_s1 + $0x8] sm:$0xff]   ;;  %v462_v19 = vld [vmem:[%s602_s1 + $0x40] sm:$0xff]  }
   0x8   :  { %411 = vmatprep.subr.bf16.mxu0 %v451_v4  ;;  %443 = vmatprep.mubr.msk.bf16.mxu1 %vm200_vm0, %v468_v16  ;;  %v464_v20 = vld [vmem:[%s602_s1] sm:$0xff]   ;;  %v470_v22 = vld [vmem:[%s603_s0 + $0x1c] ss:$12 sps:$4 sm:$0xff]  }
   0x9   :  { %442 = vmatpush3.bf16.msra.mxu1 %v463_v12  ;;  %v465_v21 = vld [vmem:[%s603_s0] ss:$12 sps:$4 sm:$0xff]   ;;  %v472_v23 = vld [vmem:[%s603_s0 + $0x18] ss:$12 sps:$4 sm:$0xff]  }
   0xb   :  { %412 = vmatpush3.bf16.msra.mxu0 %v452_v5 }
   0xc   :  { %413 = vmatprep.subr.bf16.mxu0 %v453_v6  ;;  %444 = vmatmul.mubr.msk.bf16.vlgmr.msra.gmra.mxu1 %vm200_vm0, %v469_v17  ;;  %v350_v17 = vlaneseq }
   0xf   :  { %414 = vmatpush3.bf16.msra.mxu0 %v454_v7 }
  0x10   :  { %415 = vmatprep.subr.bf16.mxu0 %v455_v8 }
  0x13   :  { %416 = vmatpush3.bf16.msra.mxu0 %v456_v10 }
  0x14   :  { %417 = vmatprep.subr.bf16.mxu0 %v457_v11 }
  0x17   :  { %418 = vmatpush3.bf16.msra.mxu0 %v458_v13 }
  0x18   :  { %419 = vmatprep.subr.bf16.mxu0 %v459_v14 }
  0x1b   :  { %420 = vmatpush3.bf16.msra.mxu0 %v461_v18  ;;  %v351_v18 = vshrl.u32 %v350_v17, 7 }
  0x1c   :  { %421 = vmatprep.subr.bf16.mxu0 %v462_v19  ;;  %v342_v19 = vld [vmem:[%s604_s2] sm:$0x1] }
  0x1f   :  { %422 = vmatpush3.bf16.msra.mxu0 %v464_v20  ;;  %v352_v20 = vsub.s32 0, %v351_v18 }
  0x22   :  { %240 = vmatmul.mubr.bf16.vlgmr.msra.gmra.mxu0 %v465_v21 }
  0x23   :  { %247 = vmatprep.mubr.bf16.mxu0 %v470_v22 }
  0x2a   :  { %248 = vmatmul.mubr.bf16.gmra.mxu0 %v472_v23  ;;  %v346_v23 = vld [vmem:[%s605_s3] sm:$0x1] }
  0xcc   :  { %v445_v24 = vpop.f32.mrf.mxu1 }
  0xce   :  { %v290_v26 = vpop.f32.mrf.mxu1 }
  0xd0   :  { %v446_v29 = vpop.f32.mrf.mxu1 }
  0xd2   :  { %v293_v33 = vpop.f32.mrf.mxu1 }
  0xe2   :  { %v423_v25 = vpop.f32.mrf.mxu0 }
  0xe4   :  { %v424_v27 = vpop.f32.mrf.mxu0 }
  0xe5   :  { %v425_v31 = vadd.f32 %v424_v27, %v423_v25 }
  0xe6   :  { %v426_v28 = vpop.f32.mrf.mxu0 }
  0xe7   :  { %v291_v37 = vadd.f32 %v425_v31, %v290_v26 }
  0xe8   :  { %v427_v30 = vpop.f32.mrf.mxu0 }
  0xe9   :  { %v428_v32 = vadd.f32 %v427_v30, %v426_v28  ;;  %v306_v43 = vsel %vm305_vm1, %v291_v37, 0.0 }
  0xea   :  { %v429_v34 = vpop.f32.mrf.mxu0 }
  0xeb   :  { %v294_v35 = vadd.f32 %v428_v32, %v293_v33 }
  0xec   :  { %v430_v36 = vpop.f32.mrf.mxu0 }
  0xed   :  { %v431_v38 = vadd.f32 %v430_v36, %v429_v34  ;;  %v307_v40 = vsel %vm305_vm1, %v294_v35, 0.0 }
  0xee   :  { %v432_v39 = vpop.f32.mrf.mxu0  ;;  %v308_v46 = vadd.f32 %v307_v40, %v306_v43 }
  0xef   :  { %v299_v41 = vadd.f32 %v445_v24, %v431_v38 }
  0xf0   :  { %v433_v42 = vpop.f32.mrf.mxu0 }
  0xf1   :  { %v309_v44 = vsel %vm305_vm1, %v299_v41, 0.0  ;;  %v434_v45 = vadd.f32 %v433_v42, %v432_v39 }
  0xf2   :  { %v310_v48 = vadd.f32 %v309_v44, %v308_v46 }
  0xf3   :  { %v302_v47 = vadd.f32 %v446_v29, %v434_v45 }
  0xf5   :  { %v311_v49 = vsel %vm305_vm1, %v302_v47, 0.0 }
  0xf6   :  { %v312_v50 = vadd.f32 %v311_v49, %v310_v48 }
  0xf8   :  { %v313_v51 = vrot.slane %v312_v50, 4 }
  0xfa   :  { %v314_v52 = vadd.f32 %v313_v51, %v312_v50 }
  0xfc   :  { %v315_v53 = vrot.slane %v314_v52, 2 }
  0xfe   :  { %v316_v54 = vadd.f32 %v315_v53, %v314_v52 }
 0x100   :  { %v317_v55 = vrot.slane %v316_v54, 1 }
 0x102   :  { %v318_v56 = vadd.f32 %v317_v55, %v316_v54 }
 0x104   :  { %v319_v57 = vmul.f32 0.03125, %v318_v56 }
 0x106   :  { %v320_v58 = vsub.f32 %v291_v37, %v319_v57  ;;  %v321_v59 = vsub.f32 %v294_v35, %v319_v57  ;;  %v322_v60 = vsub.f32 %v299_v41, %v319_v57  ;;  %v323_v61 = vsub.f32 %v302_v47, %v319_v57 }
 0x108   :  { %v324_v62 = vmul.f32 %v320_v58, %v320_v58  ;;  %v325_v63 = vmul.f32 %v321_v59, %v321_v59  ;;  %v326_v0 = vmul.f32 %v322_v60, %v322_v60  ;;  %v327_v1 = vmul.f32 %v323_v61, %v323_v61 }
 0x10a   :  { %v328_v2 = vsel %vm305_vm1, %v324_v62, 0.0  ;;  %v329_v3 = vsel %vm305_vm1, %v325_v63, 0.0  ;;  %v331_v5 = vsel %vm305_vm1, %v326_v0, 0.0  ;;  %v333_v7 = vsel %vm305_vm1, %v327_v1, 0.0 }
 0x10b   :  { %v330_v4 = vadd.f32 %v329_v3, %v328_v2 }
 0x10d   :  { %v332_v6 = vadd.f32 %v331_v5, %v330_v4 }
 0x10f   :  { %v334_v8 = vadd.f32 %v333_v7, %v332_v6 }
 0x111   :  { %v335_v9 = vrot.slane %v334_v8, 4 }
 0x113   :  { %v336_v10 = vadd.f32 %v335_v9, %v334_v8 }
 0x115   :  { %v337_v11 = vrot.slane %v336_v10, 2 }
 0x117   :  { %v338_v12 = vadd.f32 %v337_v11, %v336_v10 }
 0x119   :  { %v339_v13 = vrot.slane %v338_v12, 1 }
 0x11b   :  { %v340_v14 = vadd.f32 %v339_v13, %v338_v12 }
 0x11d   :  { %v341_v15 = vmul.f32 0.03125, %v340_v14 }
 0x11f   :  { %v343_v16 = vadd.f32 1e-05, %v341_v15 }
 0x121   :  { %473 = vrsqrt.f32 %v343_v16 }
 0x12e   :  { %v474_v21 = vpop.eup %473 }
 0x12f   :  { %v345_v22 = vmul.f32 %v474_v21, %v342_v19 }
 0x131   :  { %v347_v24 = vmul.f32 %v345_v22, %v319_v57  ;;  %v353_v25 = vrot.slane %v345_v22, %v352_v20 }
 0x133   :  { %v348_v26 = vsub.f32 %v346_v23, %v347_v24  ;;  %v355_v27 = vmul.f32 %v353_v25, %v291_v37  ;;  %v356_v28 = vmul.f32 %v353_v25, %v294_v35  ;;  %v357_v29 = vmul.f32 %v353_v25, %v299_v41 }
 0x134   :  { %v358_v30 = vmul.f32 %v353_v25, %v302_v47 }
 0x135   :  { %v363_v31 = vrot.slane %v348_v26, %v352_v20 }
 0x137   :  { %v365_v32 = vadd.f32 %v363_v31, %v355_v27  ;;  %v366_v33 = vadd.f32 %v363_v31, %v356_v28  ;;  %v367_v34 = vadd.f32 %v363_v31, %v357_v29  ;;  %v368_v36 = vadd.f32 %v363_v31, %v358_v30 }
 0x139   :  { %v369_v38 = vmax.f32 %v365_v32, 0.0  ;;  %v370_v39 = vmax.f32 %v366_v33, 0.0  ;;  %v371_v40 = vmax.f32 %v367_v34, 0.0  ;;  %v372_v42 = vmax.f32 %v368_v36, 0.0 }
 0x13b   :  { %373 = vst.msk [vmem:[%s606_s4] sm:$0xff] %vm305_vm1, %v369_v38  ;;  %374 = vst.msk [vmem:[%s606_s4 + $0x8] sm:$0xff] %vm305_vm1, %v370_v39 }
 0x13c   :  { %375 = vst.msk [vmem:[%s606_s4 + $0x10] sm:$0xff] %vm305_vm1, %v371_v40  ;;  %376 = vst.msk [vmem:[%s606_s4 + $0x18] sm:$0xff] %vm305_vm1, %v372_v42 }

// kernel: resnet_forward.16
= control target key start
LH: loop header
LB: loop body
LE: loop exit
PB: predicated region body
PF: predicated region fallthrough
CT: control target
= control target key end

     0   :  { %vm48_vm0 = vcmask 261120   ;;  %vm104_vm1 = vcmask 523264   ;;  %v149_v45 = vlaneseq  ;;  %s267_s1 = inlined_call_operand.vmem [shape: bf16[32,64], index: 1, kind: input, shape index: {}]   ;;  %s268_s0 = inlined_call_operand.vmem [shape: bf16[32,32], index: 0, kind: input, shape index: {}]   ;;  %s269_s2 = inlined_call_operand.vmem [shape: f32[1,64], index: 2, kind: input, shape index: {}]   ;;  %s270_s3 = inlined_call_operand.vmem [shape: f32[1,64], index: 3, kind: input, shape index: {}]   ;;  %s271_s4 = inlined_call_operand.vmem [shape: f32[32,64], index: 4, kind: output, shape index: {}]  }
   0x1   :  { %v194_v0 = vld [vmem:[%s267_s1 + $0x8] sm:$0xff]   ;;  %v195_v1 = vld [vmem:[%s267_s1] sm:$0xff]  }
   0x2   :  { %186 = vmatprep.subr.bf16.mxu0 %v194_v0  ;;  %v196_v2 = vld [vmem:[%s268_s0] sm:$0xff]   ;;  %v197_v3 = vld [vmem:[%s268_s0 + $0x8] sm:$0xff]   ;;  %v150_v46 = vshrl.u32 %v149_v45, 7 }
   0x3   :  { %187 = vmatpush3.bf16.msra.mxu0 %v194_v0  ;;  %190 = vmatprep.mubr.msk.bf16.mxu0 %vm48_vm0, %v196_v2  ;;  %v141_v47 = vld [vmem:[%s269_s2] sm:$0x1] }
   0x4   :  { %188 = vmatprep.subr.bf16.mxu0 %v195_v1  ;;  %v151_v48 = vsub.s32 0, %v150_v46  ;;  %v145_v51 = vld [vmem:[%s270_s3] sm:$0x1] }
   0x7   :  { %189 = vmatpush3.bf16.msra.mxu0 %v195_v1 }
   0xa   :  { %191 = vmatmul.mubr.msk.bf16.vlgmr.msra.gmra.mxu0 %vm48_vm0, %v197_v3 }
  0xca   :  { %v192_v4 = vpop.f32.mrf.mxu0 }
  0xcb   :  { %v108_v11 = vsel %vm104_vm1, %v192_v4, 0.0 }
  0xcc   :  { %v89_v5 = vpop.f32.mrf.mxu0 }
  0xcd   :  { %v105_v8 = vsel %vm104_vm1, %v89_v5, 0.0 }
  0xce   :  { %v193_v6 = vpop.f32.mrf.mxu0 }
  0xcf   :  { %v110_v13 = vsel %vm104_vm1, %v193_v6, 0.0 }
  0xd0   :  { %v92_v7 = vpop.f32.mrf.mxu0 }
  0xd1   :  { %v106_v9 = vsel %vm104_vm1, %v92_v7, 0.0 }
  0xd2   :  { %v107_v10 = vadd.f32 %v106_v9, %v105_v8 }
  0xd4   :  { %v109_v12 = vadd.f32 %v108_v11, %v107_v10 }
  0xd6   :  { %v111_v14 = vadd.f32 %v110_v13, %v109_v12 }
  0xd8   :  { %v112_v15 = vrot.slane %v111_v14, 4 }
  0xda   :  { %v113_v16 = vadd.f32 %v112_v15, %v111_v14 }
  0xdc   :  { %v114_v17 = vrot.slane %v113_v16, 2 }
  0xde   :  { %v115_v18 = vadd.f32 %v114_v17, %v113_v16 }
  0xe0   :  { %v116_v19 = vrot.slane %v115_v18, 1 }
  0xe2   :  { %v117_v20 = vadd.f32 %v116_v19, %v115_v18 }
  0xe4   :  { %v118_v21 = vmul.f32 0.03125, %v117_v20 }
  0xe6   :  { %v119_v22 = vsub.f32 %v89_v5, %v118_v21  ;;  %v120_v23 = vsub.f32 %v92_v7, %v118_v21  ;;  %v121_v24 = vsub.f32 %v192_v4, %v118_v21  ;;  %v122_v25 = vsub.f32 %v193_v6, %v118_v21 }
  0xe8   :  { %v123_v26 = vmul.f32 %v119_v22, %v119_v22  ;;  %v124_v27 = vmul.f32 %v120_v23, %v120_v23  ;;  %v125_v28 = vmul.f32 %v121_v24, %v121_v24  ;;  %v126_v29 = vmul.f32 %v122_v25, %v122_v25 }
  0xea   :  { %v127_v30 = vsel %vm104_vm1, %v123_v26, 0.0  ;;  %v128_v31 = vsel %vm104_vm1, %v124_v27, 0.0  ;;  %v130_v33 = vsel %vm104_vm1, %v125_v28, 0.0  ;;  %v132_v35 = vsel %vm104_vm1, %v126_v29, 0.0 }
  0xeb   :  { %v129_v32 = vadd.f32 %v128_v31, %v127_v30 }
  0xed   :  { %v131_v34 = vadd.f32 %v130_v33, %v129_v32 }
  0xef   :  { %v133_v36 = vadd.f32 %v132_v35, %v131_v34 }
  0xf1   :  { %v134_v37 = vrot.slane %v133_v36, 4 }
  0xf3   :  { %v135_v38 = vadd.f32 %v134_v37, %v133_v36 }
  0xf5   :  { %v136_v39 = vrot.slane %v135_v38, 2 }
  0xf7   :  { %v137_v40 = vadd.f32 %v136_v39, %v135_v38 }
  0xf9   :  { %v138_v41 = vrot.slane %v137_v40, 1 }
  0xfb   :  { %v139_v42 = vadd.f32 %v138_v41, %v137_v40 }
  0xfd   :  { %v140_v43 = vmul.f32 0.03125, %v139_v42 }
  0xff   :  { %v142_v44 = vadd.f32 1e-05, %v140_v43 }
 0x101   :  { %198 = vrsqrt.f32 %v142_v44 }
 0x10e   :  { %v199_v49 = vpop.eup %198 }
 0x10f   :  { %v144_v50 = vmul.f32 %v199_v49, %v141_v47 }
 0x111   :  { %v146_v52 = vmul.f32 %v144_v50, %v118_v21  ;;  %v152_v53 = vrot.slane %v144_v50, %v151_v48 }
 0x113   :  { %v147_v54 = vsub.f32 %v145_v51, %v146_v52  ;;  %v154_v55 = vmul.f32 %v152_v53, %v89_v5  ;;  %v155_v56 = vmul.f32 %v152_v53, %v92_v7  ;;  %v156_v57 = vmul.f32 %v192_v4, %v152_v53 }
 0x114   :  { %v157_v58 = vmul.f32 %v193_v6, %v152_v53 }
 0x115   :  { %v162_v59 = vrot.slane %v147_v54, %v151_v48 }
 0x117   :  { %v164_v60 = vadd.f32 %v162_v59, %v154_v55  ;;  %v165_v61 = vadd.f32 %v162_v59, %v155_v56  ;;  %v166_v62 = vadd.f32 %v162_v59, %v156_v57  ;;  %v167_v63 = vadd.f32 %v162_v59, %v157_v58 }
 0x119   :  { %168 = vst.msk [vmem:[%s271_s4] sm:$0xff] %vm104_vm1, %v164_v60  ;;  %169 = vst.msk [vmem:[%s271_s4 + $0x8] sm:$0xff] %vm104_vm1, %v165_v61 }
 0x11a   :  { %170 = vst.msk [vmem:[%s271_s4 + $0x10] sm:$0xff] %vm104_vm1, %v166_v62  ;;  %171 = vst.msk [vmem:[%s271_s4 + $0x18] sm:$0xff] %vm104_vm1, %v167_v63 }

// kernel: resnet_forward.17
= control target key start
LH: loop header
LB: loop body
LE: loop exit
PB: predicated region body
PF: predicated region fallthrough
CT: control target
= control target key end

     0   :  { %vm381_vm0 = vcmask 523264   ;;  %s1302_s0 = inlined_call_operand.vmem [shape: bf16[32,576], index: 0, kind: input, shape index: {}]   ;;  %s1303_s1 = inlined_call_operand.vmem [shape: bf16[576,64], index: 1, kind: input, shape index: {}]   ;;  %s1304_s2 = inlined_call_operand.vmem [shape: f32[1,64], index: 2, kind: input, shape index: {}]   ;;  %s1305_s3 = inlined_call_operand.vmem [shape: f32[1,64], index: 3, kind: input, shape index: {}]   ;;  %s1306_s4 = inlined_call_operand.vmem [shape: f32[32,64], index: 4, kind: input, shape index: {}]   ;;  %s1307_s5 = inlined_call_operand.vmem [shape: f32[2,32], index: 5, kind: input, shape index: {}]   ;;  %s1308_s6 = inlined_call_operand.vmem [shape: f32[64,10], index: 6, kind: input, shape index: {}]   ;;  %s1309_s7 = inlined_call_operand.vmem [shape: f32[1,10], index: 7, kind: input, shape index: {}]   ;;  %s1310_s8 = inlined_call_operand.hbm [shape: f32[2,10], index: 8, kind: output, shape index: {}]  }
   0x1   :  { %v961_v0 = vld [vmem:[%s1303_s1 + $0x78] sm:$0xff]   ;;  %v965_v4 = vld [vmem:[%s1303_s1 + $0x70] sm:$0xff]   ;;  %v969_v8 = vld [vmem:[%s1303_s1 + $0x68] sm:$0xff]  }
   0x2   :  { %v962_v1 = vld [vmem:[%s1303_s1 + $0xf8] sm:$0xff]   ;;  %840 = vmatprep.subr.bf16.mxu0 %v961_v0  ;;  %v966_v5 = vld [vmem:[%s1303_s1 + $0xf0] sm:$0xff]   ;;  %v970_v9 = vld [vmem:[%s1303_s1 + $0xe8] sm:$0xff]  }
   0x3   :  { %v963_v2 = vld [vmem:[%s1303_s1 + $0x38] sm:$0xff]   ;;  %868 = vmatprep.subr.bf16.mxu1 %v962_v1  ;;  %v967_v6 = vld [vmem:[%s1303_s1 + $0x30] sm:$0xff]   ;;  %v971_v10 = vld [vmem:[%s1303_s1 + $0x28] sm:$0xff]  }
   0x4   :  { %v964_v3 = vld [vmem:[%s1303_s1 + $0xb8] sm:$0xff]   ;;  %841 = vmatpush3.bf16.msra.mxu0 %v963_v2  ;;  %v968_v7 = vld [vmem:[%s1303_s1 + $0xb0] sm:$0xff]   ;;  %v972_v11 = vld [vmem:[%s1303_s1 + $0xa8] sm:$0xff]  }
   0x5   :  { %869 = vmatpush3.bf16.msra.mxu1 %v964_v3  ;;  %842 = vmatprep.subr.bf16.mxu0 %v965_v4  ;;  %v973_v12 = vld [vmem:[%s1303_s1 + $0x60] sm:$0xff]   ;;  %v977_v16 = vld [vmem:[%s1303_s1 + $0x58] sm:$0xff]   ;;  %v981_v20 = vld [vmem:[%s1303_s1 + $0x50] sm:$0xff]  }
   0x6   :  { %870 = vmatprep.subr.bf16.mxu1 %v966_v5  ;;  %v974_v13 = vld [vmem:[%s1303_s1 + $0xe0] sm:$0xff]   ;;  %v978_v17 = vld [vmem:[%s1303_s1 + $0xd8] sm:$0xff]   ;;  %v982_v21 = vld [vmem:[%s1303_s1 + $0xd0] sm:$0xff]  }
   0x7   :  { %v975_v14 = vld [vmem:[%s1303_s1 + $0x20] sm:$0xff]   ;;  %v979_v18 = vld [vmem:[%s1303_s1 + $0x18] sm:$0xff]   ;;  %v983_v22 = vld [vmem:[%s1303_s1 + $0x10] sm:$0xff]  }
   0x8   :  { %843 = vmatpush3.bf16.msra.mxu0 %v967_v6  ;;  %v976_v15 = vld [vmem:[%s1303_s1 + $0xa0] sm:$0xff]   ;;  %v980_v19 = vld [vmem:[%s1303_s1 + $0x98] sm:$0xff]   ;;  %v984_v23 = vld [vmem:[%s1303_s1 + $0x90] sm:$0xff]  }
   0x9   :  { %871 = vmatpush3.bf16.msra.mxu1 %v968_v7  ;;  %844 = vmatprep.subr.bf16.mxu0 %v969_v8  ;;  %v985_v24 = vld [vmem:[%s1303_s1 + $0x48] sm:$0xff]   ;;  %v989_v28 = vld [vmem:[%s1303_s1 + $0x40] sm:$0xff]   ;;  %v999_v36 = vld [vmem:[%s1303_s1 + $0x118] sm:$0xff]  }
   0xa   :  { %872 = vmatprep.subr.bf16.mxu1 %v970_v9  ;;  %v986_v25 = vld [vmem:[%s1303_s1 + $0xc8] sm:$0xff]   ;;  %v990_v29 = vld [vmem:[%s1303_s1 + $0xc0] sm:$0xff]   ;;  %v1000_v37 = vld [vmem:[%s1303_s1 + $0x110] sm:$0xff]  }
   0xb   :  { %v987_v26 = vld [vmem:[%s1303_s1 + $0x8] sm:$0xff]   ;;  %v991_v30 = vld [vmem:[%s1303_s1] sm:$0xff]  }
   0xc   :  { %845 = vmatpush3.bf16.msra.mxu0 %v971_v10  ;;  %v988_v27 = vld [vmem:[%s1303_s1 + $0x88] sm:$0xff]   ;;  %v992_v31 = vld [vmem:[%s1303_s1 + $0x80] sm:$0xff]  }
   0xd   :  { %873 = vmatpush3.bf16.msra.mxu1 %v972_v11  ;;  %846 = vmatprep.subr.bf16.mxu0 %v973_v12  ;;  %v993_v32 = vld [vmem:[%s1302_s0] ss:$20 sps:$4 sm:$0xff]   ;;  %v995_v33 = vld [vmem:[%s1302_s0 + $0x4] ss:$20 sps:$4 sm:$0xff]   ;;  %v996_v34 = vld [vmem:[%s1302_s0 + $0x8] ss:$20 sps:$4 sm:$0xff]  }
   0xe   :  { %874 = vmatprep.subr.bf16.mxu1 %v974_v13  ;;  %v998_v35 = vld [vmem:[%s1302_s0 + $0xc] ss:$20 sps:$4 sm:$0xff]   ;;  %420 = vmatprep.mubr.bf16.mxu0 %v995_v33  ;;  %v1003_v39 = vld [vmem:[%s1302_s0 + $0x34] ss:$20 sps:$4 sm:$0xff]   ;;  %v1006_v42 = vld [vmem:[%s1302_s0 + $0x30] ss:$20 sps:$4 sm:$0xff]  }
   0xf   :  { %469 = vmatprep.mubr.bf16.mxu1 %v998_v35  ;;  %v1001_v38 = vld [vmem:[%s1302_s0 + $0x2c] ss:$20 sps:$4 sm:$0xff]   ;;  %v1005_v40 = vld [vmem:[%s1302_s0 + $0x28] ss:$20 sps:$4 sm:$0xff]   ;;  %v1009_v43 = vld [vmem:[%s1302_s0 + $0x10] ss:$20 sps:$4 sm:$0xff]  }
  0x10   :  { %847 = vmatpush3.bf16.msra.mxu0 %v975_v14  ;;  %v1007_v41 = vld [vmem:[%s1303_s1 + $0x108] sm:$0xff]   ;;  %v1008_v44 = vld [vmem:[%s1303_s1 + $0x100] sm:$0xff]  }
  0x11   :  { %875 = vmatpush3.bf16.msra.mxu1 %v976_v15  ;;  %848 = vmatprep.subr.bf16.mxu0 %v977_v16 }
  0x12   :  { %876 = vmatprep.subr.bf16.mxu1 %v978_v17 }
  0x14   :  { %849 = vmatpush3.bf16.msra.mxu0 %v979_v18 }
  0x15   :  { %877 = vmatpush3.bf16.msra.mxu1 %v980_v19  ;;  %850 = vmatprep.subr.bf16.mxu0 %v981_v20 }
  0x16   :  { %878 = vmatprep.subr.bf16.mxu1 %v982_v21 }
  0x18   :  { %851 = vmatpush3.bf16.msra.mxu0 %v983_v22 }
  0x19   :  { %879 = vmatpush3.bf16.msra.mxu1 %v984_v23  ;;  %852 = vmatprep.subr.bf16.mxu0 %v985_v24 }
  0x1a   :  { %880 = vmatprep.subr.bf16.mxu1 %v986_v25 }
  0x1c   :  { %853 = vmatpush3.bf16.msra.mxu0 %v987_v26 }
  0x1d   :  { %881 = vmatpush3.bf16.msra.mxu1 %v988_v27  ;;  %854 = vmatprep.subr.bf16.mxu0 %v989_v28 }
  0x1e   :  { %882 = vmatprep.subr.bf16.mxu1 %v990_v29 }
  0x20   :  { %855 = vmatpush3.bf16.msra.mxu0 %v991_v30 }
  0x21   :  { %883 = vmatpush3.bf16.msra.mxu1 %v992_v31 }
  0x22   :  { %916 = vmatprep.subr.bf16.mxu1 %v999_v36 }
  0x23   :  { %421 = vmatmul.mubr.bf16.vlgmr.msra.gmra.mxu0 %v993_v32 }
  0x24   :  { %470 = vmatmul.mubr.bf16.vlgmr.msra.gmra.mxu1 %v996_v34  ;;  %428 = vmatprep.mubr.bf16.mxu0 %v1001_v38 }
  0x25   :  { %917 = vmatpush3.bf16.msra.mxu1 %v999_v36  ;;  %477 = vmatprep.mubr.bf16.mxu1 %v1003_v39 }
  0x26   :  { %918 = vmatprep.subr.bf16.mxu1 %v1000_v37 }
  0x29   :  { %919 = vmatpush3.bf16.msra.mxu1 %v1000_v37 }
  0x2a   :  { %920 = vmatprep.subr.bf16.mxu1 %v1007_v41 }
  0x2b   :  { %13 = vsyncpa [#allocation3], 0  ;;  %429 = vmatmul.mubr.bf16.gmra.mxu0 %v1005_v40  ;;  %v1010_v45 = vld [vmem:[%s1302_s0 + $0x38] ss:$20 sps:$4 sm:$0xff]   ;;  %v1035_v46 = vmov 0.0   ;;  %vm1036_vm1 = vmmov 0  }
  0x2c   :  { %478 = vmatmul.mubr.bf16.gmra.mxu1 %v1006_v42  ;;  %939 = vmatprep.subr.mxu0 %v1035_v46  ;;  %v692_v47 = vld [vmem:[%s1308_s6 + $0x38] sm:$0xff]  ;;  %v691_v48 = vld [vmem:[%s1308_s6 + $0x30] sm:$0xff]  ;;  %v690_v49 = vld [vmem:[%s1308_s6 + $0x28] sm:$0xff]  ;;  %vm611_vm2 = vcmask 261120   ;;  %s1037_s12 = smov [#allocation2]   ;;  %vm773_vm3 = vcmask 74752  }
  0x2d   :  { %921 = vmatpush3.bf16.msra.mxu1 %v1007_v41  ;;  %924 = vmatprep.mubr.msk.bf16.mxu1 %vm381_vm0, %v1009_v43  ;;  %v689_v50 = vld [vmem:[%s1308_s6 + $0x20] sm:$0xff]  ;;  %v688_v51 = vld [vmem:[%s1308_s6 + $0x18] sm:$0xff]  ;;  %v687_v52 = vld [vmem:[%s1308_s6 + $0x10] sm:$0xff] }
  0x2e   :  { %922 = vmatprep.subr.bf16.mxu1 %v1008_v44  ;;  %955 = vmatprep.mubr.msk.f32.mxu0 %vm1036_vm1, %v1035_v46  ;;  %v686_v53 = vld [vmem:[%s1308_s6 + $0x8] sm:$0xff] }
  0x2f   :  { %940 = vmatpush3.msra.mxu0 %v692_v47 }
  0x30   :  { %941 = vmatprep.subr.mxu0 %v1035_v46 }
  0x31   :  { %923 = vmatpush3.bf16.msra.mxu1 %v1008_v44  ;;  %942 = vmatpush3.msra.mxu0 %v691_v48 }
  0x32   :  { %928 = vmatprep.subr.mxu1 %v1035_v46  ;;  %943 = vmatprep.subr.mxu0 %v1035_v46 }
  0x33   :  { %944 = vmatpush3.msra.mxu0 %v690_v49 }
  0x34   :  { %925 = vmatmul.mubr.msk.bf16.vlgmr.msra.gmra.mxu1 %vm381_vm0, %v1010_v45  ;;  %945 = vmatprep.subr.mxu0 %v1035_v46 }
  0x35   :  { %936 = vmatprep.mubr.msk.f32.mxu1 %vm1036_vm1, %v1035_v46  ;;  %946 = vmatpush3.msra.mxu0 %v689_v50 }
  0x36   :  { %947 = vmatprep.subr.mxu0 %v1035_v46 }
  0x37   :  { %948 = vmatpush3.msra.mxu0 %v688_v51 }
  0x38   :  { %949 = vmatprep.subr.mxu0 %v1035_v46 }
  0x39   :  { %950 = vmatpush3.msra.mxu0 %v687_v52 }
  0x3a   :  { %951 = vmatprep.subr.mxu0 %v1035_v46 }
  0x3b   :  { %952 = vmatpush3.msra.mxu0 %v686_v53 }
  0x3c   :  { %953 = vmatprep.subr.mxu0 %v1035_v46 }
  0xe3   :  { %v856_v54 = vpop.f32.mrf.mxu0 }
  0xe4   :  { %v884_v55 = vpop.f32.mrf.mxu1 }
  0xe5   :  { %v857_v56 = vpop.f32.mrf.mxu0 }
  0xe6   :  { %v885_v57 = vpop.f32.mrf.mxu1  ;;  %v858_v5 = vadd.f32 %v857_v56, %v856_v54 }
  0xe7   :  { %v859_v58 = vpop.f32.mrf.mxu0  ;;  %v886_v6 = vadd.f32 %v885_v57, %v884_v55 }
  0xe8   :  { %v887_v59 = vpop.f32.mrf.mxu1 }
  0xe9   :  { %v860_v60 = vpop.f32.mrf.mxu0  ;;  %v472_v16 = vadd.f32 %v886_v6, %v858_v5  ;;  %v575_v6 = vld [vmem:[%s1305_s3] sm:$0x1] }
  0xea   :  { %v888_v61 = vpop.f32.mrf.mxu1  ;;  %v861_v9 = vadd.f32 %v860_v60, %v859_v58 }
  0xeb   :  { %v862_v62 = vpop.f32.mrf.mxu0  ;;  %v889_v10 = vadd.f32 %v888_v61, %v887_v59 }
  0xec   :  { %v890_v63 = vpop.f32.mrf.mxu1 }
  0xed   :  { %v863_v0 = vpop.f32.mrf.mxu0  ;;  %v475_v20 = vadd.f32 %v889_v10, %v861_v9 }
  0xee   :  { %v891_v1 = vpop.f32.mrf.mxu1  ;;  %v864_v11 = vadd.f32 %v863_v0, %v862_v62  ;;  %v579_v0 = vlaneseq }
  0xef   :  { %v865_v2 = vpop.f32.mrf.mxu0  ;;  %v892_v12 = vadd.f32 %v891_v1, %v890_v63 }
  0xf0   :  { %v893_v3 = vpop.f32.mrf.mxu1  ;;  %v580_v1 = vshrl.u32 %v579_v0, 7 }
  0xf1   :  { %v866_v7 = vpop.f32.mrf.mxu0  ;;  %v480_v18 = vadd.f32 %v892_v12, %v864_v11 }
  0xf2   :  { %v894_v4 = vpop.f32.mrf.mxu1  ;;  %v867_v14 = vadd.f32 %v866_v7, %v865_v2  ;;  %v571_v2 = vld [vmem:[%s1304_s2] sm:$0x1] }
  0xf3   :  { %v895_v15 = vadd.f32 %v894_v4, %v893_v3  ;;  %v581_v3 = vsub.s32 0, %v580_v1 }
  0xf4   :  { %v926_v8 = vpop.f32.mrf.mxu1 }
  0xf5   :  { %v529_v22 = vadd.f32 %v926_v8, %v480_v18  ;;  %v483_v23 = vadd.f32 %v895_v15, %v867_v14  ;;  %v601_v14 = vld [vmem:[%s1306_s4 + $0x18] sm:$0xff]  ;;  %v600_v15 = vld [vmem:[%s1306_s4 + $0x10] sm:$0xff] }
  0xf6   :  { %v520_v13 = vpop.f32.mrf.mxu1 }
  0xf7   :  { %v1255_v19 = vadd.f32 %v520_v13, %v472_v16  ;;  %v538_v29 = vsel %vm381_vm0, %v529_v22, 0.0 }
  0xf8   :  { %v927_v17 = vpop.f32.mrf.mxu1 }
  0xf9   :  { %v535_v25 = vsel %vm381_vm0, %v1255_v19, 0.0  ;;  %v532_v26 = vadd.f32 %v927_v17, %v483_v23 }
  0xfa   :  { %v523_v21 = vpop.f32.mrf.mxu1 }
  0xfb   :  { %v524_v24 = vadd.f32 %v523_v21, %v475_v20  ;;  %v540_v31 = vsel %vm381_vm0, %v532_v26, 0.0  ;;  %v599_v21 = vld [vmem:[%s1306_s4 + $0x8] sm:$0xff] }
  0xfd   :  { %v536_v27 = vsel %vm381_vm0, %v524_v24, 0.0 }
  0xfe   :  { %v537_v28 = vadd.f32 %v536_v27, %v535_v25  ;;  %v598_v25 = vld [vmem:[%s1306_s4] sm:$0xff] }
 0x100   :  { %v539_v30 = vadd.f32 %v538_v29, %v537_v28 }
 0x102   :  { %v541_v32 = vadd.f32 %v540_v31, %v539_v30  ;;  %v610_v31 = vld [vmem:[%s1307_s5] sm:$0x3]  ;;  %s781_s5 = sshll.u32 %s1037_s12, 4  ;;  %s782_s5 = int_to_ptr.vmem [resolvable:$true] %s781_s5 }
 0x103   :  { %s1013_s13 = scalar_lea.vmem %s782_s5, 32  ;;  %p1018_p1 = scmp.lt.s32.totalorder %s782_s5, %s782_s5 }
 0x104   :  { %v542_v33 = vrot.slane %v541_v32, 4  ;;  %p1014_p0 = scmp.ne.s32.totalorder %s782_s5, %s1013_s13  ;;  %p1019_p2 = scmp.lt.s32.totalorder %s1013_s13, %s1013_s13 }
 0x106   :  { %v543_v34 = vadd.f32 %v542_v33, %v541_v32  ;;  %v685_v32 = vld [vmem:[%s1308_s6] sm:$0xff]  ;;  %p1020_p3 = por %p1019_p2, %p1018_p1 }
 0x107   :  { %954 = vmatpush3.msra.mxu0 %v685_v32 }
 0x108   :  { %v544_v35 = vrot.slane %v543_v34, 2  ;;  %p1021_p4 = pnand %p1020_p3, %p1014_p0 }
 0x10a   :  { %v545_v36 = vadd.f32 %v544_v35, %v543_v34  ;;  %v838_v35 = vld [vmem:[%s1309_s7] ss:$0 sm:$0xff] }
 0x10c   :  { %v546_v37 = vrot.slane %v545_v36, 1 }
 0x10e   :  { %v547_v38 = vadd.f32 %v546_v37, %v545_v36 }
 0x110   :  { %v548_v39 = vmul.f32 0.03125, %v547_v38 }
 0x112   :  { %v549_v40 = vsub.f32 %v1255_v19, %v548_v39  ;;  %v550_v41 = vsub.f32 %v524_v24, %v548_v39  ;;  %v551_v42 = vsub.f32 %v529_v22, %v548_v39  ;;  %v552_v43 = vsub.f32 %v532_v26, %v548_v39 }
 0x114   :  { %v553_v44 = vmul.f32 %v549_v40, %v549_v40  ;;  %v554_v45 = vmul.f32 %v550_v41, %v550_v41  ;;  %v555_v47 = vmul.f32 %v551_v42, %v551_v42  ;;  %v556_v48 = vmul.f32 %v552_v43, %v552_v43 }
 0x116   :  { %v557_v49 = vsel %vm381_vm0, %v553_v44, 0.0  ;;  %v558_v50 = vsel %vm381_vm0, %v554_v45, 0.0  ;;  %v560_v52 = vsel %vm381_vm0, %v555_v47, 0.0  ;;  %v562_v54 = vsel %vm381_vm0, %v556_v48, 0.0 }
 0x117   :  { %v559_v51 = vadd.f32 %v558_v50, %v557_v49 }
 0x119   :  { %v561_v53 = vadd.f32 %v560_v52, %v559_v51 }
 0x11b   :  { %v563_v55 = vadd.f32 %v562_v54, %v561_v53 }
 0x11d   :  { %v564_v56 = vrot.slane %v563_v55, 4 }
 0x11f   :  { %v565_v57 = vadd.f32 %v564_v56, %v563_v55 }
 0x121   :  { %v566_v58 = vrot.slane %v565_v57, 2 }
 0x123   :  { %v567_v59 = vadd.f32 %v566_v58, %v565_v57 }
 0x125   :  { %v568_v60 = vrot.slane %v567_v59, 1 }
 0x127   :  { %v569_v61 = vadd.f32 %v568_v60, %v567_v59 }
 0x129   :  { %v570_v62 = vmul.f32 0.03125, %v569_v61 }
 0x12b   :  { %v572_v63 = vadd.f32 1e-05, %v570_v62 }
 0x12d   :  { %1011 = vrsqrt.f32 %v572_v63 }
 0x13a   :  { %v1012_v4 = vpop.eup %1011 }
 0x13b   :  { %v574_v5 = vmul.f32 %v1012_v4, %v571_v2 }
 0x13d   :  { %v576_v7 = vmul.f32 %v574_v5, %v548_v39  ;;  %v582_v8 = vrot.slane %v574_v5, %v581_v3 }
 0x13f   :  { %v577_v9 = vsub.f32 %v575_v6, %v576_v7  ;;  %v585_v10 = vmul.f32 %v582_v8, %v524_v24  ;;  %v587_v12 = vmul.f32 %v582_v8, %v532_v26  ;;  %v586_v13 = vmul.f32 %v582_v8, %v529_v22 }
 0x140   :  { %v584_v20 = vmul.f32 %v582_v8, %v1255_v19 }
 0x141   :  { %v592_v11 = vrot.slane %v577_v9, %v581_v3 }
 0x143   :  { %v595_v16 = vadd.f32 %v592_v11, %v585_v10  ;;  %v597_v17 = vadd.f32 %v592_v11, %v587_v12  ;;  %v596_v18 = vadd.f32 %v592_v11, %v586_v13  ;;  %v594_v22 = vadd.f32 %v592_v11, %v584_v20 }
 0x145   :  { %v605_v23 = vadd.f32 %v601_v14, %v597_v17  ;;  %v604_v24 = vadd.f32 %v600_v15, %v596_v18  ;;  %v603_v27 = vadd.f32 %v599_v21, %v595_v16  ;;  %v602_v29 = vadd.f32 %v598_v25, %v594_v22 }
 0x147   :  { %v609_v26 = vmax.f32 %v605_v23, 0.0  ;;  %v608_v28 = vmax.f32 %v604_v24, 0.0  ;;  %v607_v19 = vmax.f32 %v603_v27, 0.0  ;;  %v606_v30 = vmax.f32 %v602_v29, 0.0 }
 0x149   :  { %929 = vmatpush3.msra.mxu1 %v609_v26 }
 0x14a   :  { %930 = vmatprep.subr.mxu1 %v1035_v46 }
 0x14b   :  { %931 = vmatpush3.msra.mxu1 %v608_v28 }
 0x14c   :  { %932 = vmatprep.subr.mxu1 %v1035_v46 }
 0x14d   :  { %933 = vmatpush3.msra.mxu1 %v607_v19 }
 0x14e   :  { %934 = vmatprep.subr.mxu1 %v1035_v46 }
 0x14f   :  { %935 = vmatpush3.msra.mxu1 %v606_v30 }
 0x150   :  { %937 = vmatmul.mubr.msk.f32.vlgmr.msra.gmra.mxu1 %vm611_vm2, %v610_v31 }
 0x210   :  { %v681_v33 = vpop.f32.mrf.mxu1 }
 0x211   :  { %956 = vmatmul.mubr.msk.f32.vlgmr.msra.gmra.mxu0 %vm381_vm0, %v681_v33 }
 0x212   :  { %v938_v34 = vpop.f32.mrf.mxu1 }
 0x2d1   :  { %v769_v36 = vpop.f32.mrf.mxu0 }
 0x2d2   :  { %v770_v46 = vadd.f32 %v838_v35, %v769_v36 }
 0x2d3   :  { %v957_v37 = vpop.f32.mrf.mxu0 }
 0x2d4   :  { %774 = vst.msk [vmem:[#allocation2] sm:$0x3] %vm773_vm3, %v770_v46 }
 0x2d5   :  { %1024 = shalt.err (!%p1021_p4)
}
 0x2d6   :  { %784 = dma.vmem_to_hbm [thread:$0]  %s782_s5, 32, %s1310_s8, [#allocation3]  }
 0x2d7   :  { %1033 = dma.done.wait [#allocation3], 32  }
 0x2d8   :  { %1034 = vsyncadd [#allocation3], 4294967264 }
 0x2d9   :  { %788 = vsyncpa [#allocation3], 1 }

</bundles_post_ra>
